<compile_context>
chip_gen: v5e
topology: v5e:2x2
jax: 0.10.0
libtpu: 0.0.40
codegen_flags: <defaults>
</compile_context>

<pallas_src>
import functools
import math

import jax
import jax.numpy as jnp
from jax.experimental import pallas as pl
from jax.experimental.pallas import tpu as pltpu

LN_EPS = 1e-5   # torch.nn.LayerNorm default eps
EPS = 1e-8      # CYK_CELL.eps


# ----------------------------------------------------------------------------
# helpers
# ----------------------------------------------------------------------------
def _round_up(x, m):
    return (x + m - 1) // m * m


def _tile_rows(n_rows, target):
    """Return (padded_rows, block_rows): block multiple of 8, padded % block == 0."""
    target = max(8, _round_up(target, 8))
    padded = _round_up(max(n_rows, 1), 8)
    if padded <= target:
        return padded, padded
    padded = _round_up(n_rows, target)
    return padded, target


def _layer_norm(x, gamma, beta):
    mu = jnp.mean(x, axis=-1, keepdims=True)
    var = jnp.mean((x - mu) ** 2, axis=-1, keepdims=True)
    return (x - mu) * jax.lax.rsqrt(var + LN_EPS) * gamma + beta


# ----------------------------------------------------------------------------
# Pallas kernels
# ----------------------------------------------------------------------------
def _initial_transform_kernel(x_ref, mask_ref, w_ref, b_ref, g_ref, beta_ref,
                              o_ref):
    # x: (bm, D), mask: (bm, 1), w: (D, D), b/g/beta: (1, D)
    x = x_ref[...] * mask_ref[...]                                   # mask #1
    y = jnp.dot(x, w_ref[...], preferred_element_type=jnp.float32) + b_ref[...]
    y = _layer_norm(y, g_ref[...], beta_ref[...])
    o_ref[...] = (y * mask_ref[...]).astype(o_ref.dtype)             # mask #2


def _cyk_row_kernel(l_ref, r_ref,
                    w1l_ref, w1r_ref, b1_ref,
                    w2f1_ref, w2f2_ref, w2i_ref, w2p_ref,
                    b2f1_ref, b2f2_ref, b2i_ref, b2p_ref,
                    g_ref, beta_ref, ws_ref, bs_ref,
                    o_ref,
                    m_sc, l_sc, acc_sc, *, activation):
    """Fused composer + scorer + softmax-over-splits + weighted sum.

    Grid = (col_tiles [parallel], splits j [arbitrary]).  Online softmax over
    the split axis accumulates in VMEM scratch; only the final weighted sum is
    stored to HBM.
    """
    j = pl.program_id(1)

    @pl.when(j == 0)
    def _():
        m_sc[...] = jnp.full_like(m_sc, -jnp.inf)
        l_sc[...] = jnp.zeros_like(l_sc)
        acc_sc[...] = jnp.zeros_like(acc_sc)

    c1 = l_ref[...]                                                  # (bm, D)
    c2 = r_ref[...]                                                  # (bm, D)

    # concat([c1, c2]) @ w1  ==  c1 @ w1[:D] + c2 @ w1[D:]  (w1 pre-split).
    h = (jnp.dot(c1, w1l_ref[...], preferred_element_type=jnp.float32)
         + jnp.dot(c2, w1r_ref[...], preferred_element_type=jnp.float32)
         + b1_ref[...])
    if activation == 'relu':
        h = jnp.maximum(h, 0.0)
    else:
        h = jax.nn.gelu(h, approximate=False)
    # hidden_dropout is identity at inference time.

    # wcell2 pre-split into four (H, D) gate pieces -> no 32-lane slicing.
    f1 = jax.nn.sigmoid(
        jnp.dot(h, w2f1_ref[...], preferred_element_type=jnp.float32) + b2f1_ref[...])
    f2 = jax.nn.sigmoid(
        jnp.dot(h, w2f2_ref[...], preferred_element_type=jnp.float32) + b2f2_ref[...])
    ig = jax.nn.sigmoid(
        jnp.dot(h, w2i_ref[...], preferred_element_type=jnp.float32) + b2i_ref[...])
    parent = jnp.dot(h, w2p_ref[...], preferred_element_type=jnp.float32) + b2p_ref[...]

    z = _layer_norm(f1 * c1 + f2 * c2 + ig * parent, g_ref[...], beta_ref[...])

    # combined_stack / (||combined_stack||_2 + eps)
    nrm = jnp.sqrt(jnp.sum(z * z, axis=-1, keepdims=True))
    z = z / (nrm + EPS)

    # scorer: Linear(D, 1); bias scalar comes from SMEM.
    s = jnp.sum(z * ws_ref[...], axis=-1, keepdims=True) + bs_ref[0, 0]  # (bm,1)

    # online softmax over the split axis j (matches F.softmax(dim=1) + sum).
    m_new = jnp.maximum(m_sc[...], s)
    alpha = jnp.exp(m_sc[...] - m_new)
    pj = jnp.exp(s - m_new)
    l_sc[...] = alpha * l_sc[...] + pj
    acc_sc[...] = alpha * acc_sc[...] + pj * z
    m_sc[...] = m_new

    @pl.when(j == pl.num_programs(1) - 1)
    def _():
        o_ref[...] = (acc_sc[...] / l_sc[...]).astype(o_ref.dtype)


# ----------------------------------------------------------------------------
# Wrappers around pallas_call
# ----------------------------------------------------------------------------
def initial_transform(x2d, mask2d, p, *, block_rows=1024):
    M, D = x2d.shape
    Mp, bm = _tile_rows(M, block_rows)
    if Mp != M:
        x2d = jnp.pad(x2d, ((0, Mp - M), (0, 0)))
        mask2d = jnp.pad(mask2d, ((0, Mp - M), (0, 0)))

    out = pl.pallas_call(
        _initial_transform_kernel,
        out_shape=jax.ShapeDtypeStruct((Mp, D), jnp.float32),
        grid=(Mp // bm,),
        in_specs=[
            pl.BlockSpec((bm, D), lambda i: (i, 0)),
            pl.BlockSpec((bm, 1), lambda i: (i, 0)),
            pl.BlockSpec((D, D), lambda i: (0, 0)),
            pl.BlockSpec((1, D), lambda i: (0, 0)),
            pl.BlockSpec((1, D), lambda i: (0, 0)),
            pl.BlockSpec((1, D), lambda i: (0, 0)),
        ],
        out_specs=pl.BlockSpec((bm, D), lambda i: (i, 0)),
        compiler_params=pltpu.CompilerParams(
            dimension_semantics=("parallel",),
            vmem_limit_bytes=32 * 1024 * 1024),
    )(x2d, mask2d, p['w_it'], p['b_it'], p['ln_g'], p['ln_b'])
    return out[:M]


def cyk_row_reduce(left_stack, right_stack, p, *, activation, block_rows=1024):
    """left/right_stack: (row, C, D) -> new chart row (C, D)."""
    row, C, D = left_stack.shape
    H = p['w1l'].shape[1]
    Cp, bm = _tile_rows(C, block_rows)
    if Cp != C:
        pad = ((0, 0), (0, Cp - C), (0, 0))
        left_stack = jnp.pad(left_stack, pad)
        right_stack = jnp.pad(right_stack, pad)

    def stk_spec():
        # first dim (split index j) squeezed out; rows tiled by bm.
        return pl.BlockSpec((None, bm, D), lambda i, j: (j, i, 0))

    def const_spec(shape):
        return pl.BlockSpec(shape, lambda i, j, _n=len(shape): (0,) * _n)

    out = pl.pallas_call(
        functools.partial(_cyk_row_kernel, activation=activation),
        out_shape=jax.ShapeDtypeStruct((Cp, D), jnp.float32),
        grid=(Cp // bm, row),
        in_specs=[
            stk_spec(), stk_spec(),
            const_spec((D, H)), const_spec((D, H)), const_spec((1, H)),
            const_spec((H, D)), const_spec((H, D)),
            const_spec((H, D)), const_spec((H, D)),
            const_spec((1, D)), const_spec((1, D)),
            const_spec((1, D)), const_spec((1, D)),
            const_spec((1, D)), const_spec((1, D)),
            const_spec((1, D)),                                   # scorer weight
            pl.BlockSpec(memory_space=pltpu.MemorySpace.SMEM),    # scorer bias
        ],
        out_specs=pl.BlockSpec((bm, D), lambda i, j: (i, 0)),
        scratch_shapes=[
            pltpu.VMEM((bm, 1), jnp.float32),   # running max
            pltpu.VMEM((bm, 1), jnp.float32),   # running denominator
            pltpu.VMEM((bm, D), jnp.float32),   # running weighted sum
        ],
        compiler_params=pltpu.CompilerParams(
            dimension_semantics=("parallel", "arbitrary"),
            vmem_limit_bytes=32 * 1024 * 1024),
    )(left_stack, right_stack,
      p['w1l'], p['w1r'], p['b1'],
      p['w2f1'], p['w2f2'], p['w2i'], p['w2p'],
      p['b2f1'], p['b2f2'], p['b2i'], p['b2p'],
      p['ln_g'], p['ln_b'], p['w_s'], p['b_s'])
    return out[:C]


# ----------------------------------------------------------------------------
# parameter prep (split packed torch-style weights into kernel layout)
# ----------------------------------------------------------------------------
def _prep_params(p):
    D = p['ln_g'].shape[-1]
    q = dict(p)
    q['w1l'] = p['w1'][:D, :]
    q['w1r'] = p['w1'][D:2 * D, :]
    q['w2f1'] = p['w2'][:, 0 * D:1 * D]
    q['w2f2'] = p['w2'][:, 1 * D:2 * D]
    q['w2i'] = p['w2'][:, 2 * D:3 * D]
    q['w2p'] = p['w2'][:, 3 * D:4 * D]
    q['b2f1'] = p['b2'][:, 0 * D:1 * D]
    q['b2f2'] = p['b2'][:, 1 * D:2 * D]
    q['b2i'] = p['b2'][:, 2 * D:3 * D]
    q['b2p'] = p['b2'][:, 3 * D:4 * D]
    return q


# ----------------------------------------------------------------------------
# CYK_CELL forward
# ----------------------------------------------------------------------------
def cyk_cell_forward(sequence, input_mask, params, *, activation='relu',
                     block_rows=1024):
    N, S, D = sequence.shape
    mask = input_mask[..., None].astype(jnp.float32)         # (N, S, 1)
    p = _prep_params(params)

    seq = initial_transform(sequence.reshape(N * S, D),
                            mask.reshape(N * S, 1), p,
                            block_rows=block_rows).reshape(N, S, D)

    chart = [seq]
    for row in range(1, S):
        C = N * (S - row)
        # TODO(synk): chart gather is still XLA glue (variable-length rows);
        # could be replaced by scalar-prefetched offsets into an HBM chart.
        lefts = [chart[j][:, :S - row, :] for j in range(row)]
        rights = [chart[row - j - 1][:, j + 1:, :] for j in range(row)]
        left_stack = jnp.stack(lefts, axis=0).reshape(row, C, D)
        right_stack = jnp.stack(rights, axis=0).reshape(row, C, D)

        new_row = cyk_row_reduce(left_stack, right_stack, p,
                                 activation=activation, block_rows=block_rows)
        chart.append(new_row.reshape(N, S - row, D))

    global_state = chart[-1][:, 0, :]                         # squeeze(1)
    sequence_out = seq * mask                                 # final masking
    return {'sequence': sequence_out, 'penalty': None,
            'global_state': global_state}


# ----------------------------------------------------------------------------
# Deterministic parameter initialization (synthetic, not a checkpoint load)
# ----------------------------------------------------------------------------
def init_params(key, hidden_size, cell_hidden_size):
    D, H = hidden_size, cell_hidden_size
    keys = jax.random.split(key, 8)

    def uni(k, shape, fan_in):
        b = 1.0 / math.sqrt(fan_in)
        return jax.random.uniform(k, shape, jnp.float32, -b, b)

    return {
        'w_it': uni(keys[0], (D, D), D),          # initial_transform_layer
        'b_it': uni(keys[1], (1, D), D),
        'w1':   uni(keys[2], (2 * D, H), 2 * D),  # wcell1
        'b1':   uni(keys[3], (1, H), 2 * D),
        'w2':   uni(keys[4], (H, 4 * D), H),      # wcell2
        'b2':   uni(keys[5], (1, 4 * D), H),
        'w_s':  uni(keys[6], (1, D), D),          # scorer (out_features=1)
        'b_s':  uni(keys[7], (1, 1), D),
        'ln_g': jnp.ones((1, D), jnp.float32),    # LayerNorm affine
        'ln_b': jnp.zeros((1, D), jnp.float32),
    }


if __name__ == "__main__":
    config = {
        'hidden_size': 32,
        'cell_hidden_size': 64,
        'in_dropout': 0.0,
        'hidden_dropout': 0.0,        # inference: dropout is identity
        'hidden_activation': 'relu',
    }
    N, S, D = 2, 8, config['hidden_size']

    key = jax.random.PRNGKey(0)
    k_param, k_seq = jax.random.split(key)
    params = init_params(k_param, config['hidden_size'],
                         config['cell_hidden_size'])

    sequence = jax.random.normal(k_seq, (N, S, D), jnp.float32)
    input_mask = jnp.ones((N, S), jnp.float32).at[1, 6:].set(0.0)

    fwd = jax.jit(functools.partial(cyk_cell_forward,
                                    activation=config['hidden_activation']))
    out = fwd(sequence, input_mask, params)

    jax.block_until_ready(out['sequence'])
    jax.block_until_ready(out['global_state'])
    assert out['sequence'].shape == (N, S, D)
    assert out['global_state'].shape == (N, D)
    assert bool(jnp.all(jnp.isfinite(out['sequence'])))
    assert bool(jnp.all(jnp.isfinite(out['global_state'])))
    print("KERNEL_OK")
</pallas_src>

<mosaic_0001>
module attributes {stable_mosaic.version = 11 : i64} {
  func.func @_initial_transform_kernel(%arg0: i32, %arg1: memref<16x32xf32, #tpu.memory_space<vmem>>, %arg2: memref<16x1xf32, #tpu.memory_space<vmem>>, %arg3: memref<32x32xf32, #tpu.memory_space<vmem>>, %arg4: memref<1x32xf32, #tpu.memory_space<vmem>>, %arg5: memref<1x32xf32, #tpu.memory_space<vmem>>, %arg6: memref<1x32xf32, #tpu.memory_space<vmem>>, %arg7: memref<16x32xf32, #tpu.memory_space<vmem>>) attributes {dimension_semantics = [#tpu.dimension_semantics<parallel>], iteration_bounds = array<i64: 1>, scalar_prefetch = 0 : i64, scratch_operands = 0 : i64, tpu.core_type = #tpu.core_type<tc>, window_params = [{transform_indices = @transform_0, window_bounds = array<i64: 16, 32>}, {transform_indices = @transform_1, window_bounds = array<i64: 16, 1>}, {pipeline_mode = #tpu.pipeline_mode<synchronous>, transform_indices = @transform_2, window_bounds = array<i64: 32, 32>}, {pipeline_mode = #tpu.pipeline_mode<synchronous>, transform_indices = @transform_3, window_bounds = array<i64: 1, 32>}, {pipeline_mode = #tpu.pipeline_mode<synchronous>, transform_indices = @transform_4, window_bounds = array<i64: 1, 32>}, {pipeline_mode = #tpu.pipeline_mode<synchronous>, transform_indices = @transform_5, window_bounds = array<i64: 1, 32>}, {transform_indices = @transform_6, window_bounds = array<i64: 16, 32>}]} {
    %c0 = arith.constant 0 : index
    %c0_0 = arith.constant 0 : index
    %0 = vector.load %arg1[%c0, %c0_0] : memref<16x32xf32, #tpu.memory_space<vmem>>, vector<16x32xf32>
    %c0_1 = arith.constant 0 : index
    %c0_2 = arith.constant 0 : index
    %1 = vector.load %arg2[%c0_1, %c0_2] : memref<16x1xf32, #tpu.memory_space<vmem>>, vector<16x1xf32>
    %2 = vector.broadcast %1 : vector<16x1xf32> to vector<16x32xf32>
    %3 = arith.mulf %0, %2 : vector<16x32xf32>
    %c0_3 = arith.constant 0 : index
    %c0_4 = arith.constant 0 : index
    %4 = vector.load %arg3[%c0_3, %c0_4] : memref<32x32xf32, #tpu.memory_space<vmem>>, vector<32x32xf32>
    %cst = arith.constant dense<0.000000e+00> : vector<16x32xf32>
    %5 = tpu.matmul %3, %4, %cst {dimension_numbers = #tpu.dot_dimension_numbers<[1], [0], [0], [1], [0, 0, 1, 1], [], []>} : vector<16x32xf32>, vector<32x32xf32>, vector<16x32xf32> -> vector<16x32xf32>
    %c0_5 = arith.constant 0 : index
    %c0_6 = arith.constant 0 : index
    %6 = vector.load %arg4[%c0_5, %c0_6] : memref<1x32xf32, #tpu.memory_space<vmem>>, vector<1x32xf32>
    %7 = vector.broadcast %6 : vector<1x32xf32> to vector<16x32xf32>
    %8 = arith.addf %5, %7 : vector<16x32xf32>
    %c0_7 = arith.constant 0 : index
    %c0_8 = arith.constant 0 : index
    %9 = vector.load %arg5[%c0_7, %c0_8] : memref<1x32xf32, #tpu.memory_space<vmem>>, vector<1x32xf32>
    %c0_9 = arith.constant 0 : index
    %c0_10 = arith.constant 0 : index
    %10 = vector.load %arg6[%c0_9, %c0_10] : memref<1x32xf32, #tpu.memory_space<vmem>>, vector<1x32xf32>
    %cst_11 = arith.constant dense<0.000000e+00> : vector<16xf32>
    %11 = vector.multi_reduction <add>, %8, %cst_11 [1] : vector<16x32xf32> to vector<16xf32>
    %12 = vector.shape_cast %11 : vector<16xf32> to vector<16x1xf32>
    %cst_12 = arith.constant 3.200000e+01 : f32
    %13 = vector.broadcast %cst_12 : f32 to vector<16x1xf32>
    %14 = arith.divf %12, %13 : vector<16x1xf32>
    %15 = vector.broadcast %14 : vector<16x1xf32> to vector<16x32xf32>
    %16 = arith.subf %8, %15 : vector<16x32xf32>
    %17 = arith.mulf %16, %16 : vector<16x32xf32>
    %cst_13 = arith.constant dense<0.000000e+00> : vector<16xf32>
    %18 = vector.multi_reduction <add>, %17, %cst_13 [1] : vector<16x32xf32> to vector<16xf32>
    %19 = vector.shape_cast %18 : vector<16xf32> to vector<16x1xf32>
    %cst_14 = arith.constant 3.200000e+01 : f32
    %20 = vector.broadcast %cst_14 : f32 to vector<16x1xf32>
    %21 = arith.divf %19, %20 : vector<16x1xf32>
    %22 = vector.broadcast %14 : vector<16x1xf32> to vector<16x32xf32>
    %23 = arith.subf %8, %22 : vector<16x32xf32>
    %cst_15 = arith.constant 9.99999974E-6 : f32
    %24 = vector.broadcast %cst_15 : f32 to vector<16x1xf32>
    %25 = arith.addf %21, %24 : vector<16x1xf32>
    %26 = math.rsqrt %25 : vector<16x1xf32>
    %27 = vector.broadcast %26 : vector<16x1xf32> to vector<16x32xf32>
    %28 = arith.mulf %23, %27 : vector<16x32xf32>
    %29 = vector.broadcast %9 : vector<1x32xf32> to vector<16x32xf32>
    %30 = arith.mulf %28, %29 : vector<16x32xf32>
    %31 = vector.broadcast %10 : vector<1x32xf32> to vector<16x32xf32>
    %32 = arith.addf %30, %31 : vector<16x32xf32>
    %c0_16 = arith.constant 0 : index
    %c0_17 = arith.constant 0 : index
    %33 = vector.load %arg2[%c0_16, %c0_17] : memref<16x1xf32, #tpu.memory_space<vmem>>, vector<16x1xf32>
    %34 = vector.broadcast %33 : vector<16x1xf32> to vector<16x32xf32>
    %35 = arith.mulf %32, %34 : vector<16x32xf32>
    %c0_18 = arith.constant 0 : index
    %c0_19 = arith.constant 0 : index
    %36 = vector.load %arg7[%c0_18, %c0_19] : memref<16x32xf32, #tpu.memory_space<vmem>>, vector<16x32xf32>
    tpu.vector_store %arg7[%c0_18, %c0_19], %35 {strides = array<i32>} : memref<16x32xf32, #tpu.memory_space<vmem>>, vector<16x32xf32>,
    return
  }
  func.func @transform_0(%arg0: i32) -> (i32, i32) {
    %c0_i32 = arith.constant 0 : i32
    %c0_i32_0 = arith.constant 0 : i32
    return %arg0, %c0_i32 : i32, i32
  }
  func.func @transform_1(%arg0: i32) -> (i32, i32) {
    %c0_i32 = arith.constant 0 : i32
    %c0_i32_0 = arith.constant 0 : i32
    return %arg0, %c0_i32 : i32, i32
  }
  func.func @transform_2(%arg0: i32) -> (i32, i32) {
    %c0_i32 = arith.constant 0 : i32
    %c0_i32_0 = arith.constant 0 : i32
    %c0_i32_1 = arith.constant 0 : i32
    return %c0_i32, %c0_i32_0 : i32, i32
  }
  func.func @transform_3(%arg0: i32) -> (i32, i32) {
    %c0_i32 = arith.constant 0 : i32
    %c0_i32_0 = arith.constant 0 : i32
    %c0_i32_1 = arith.constant 0 : i32
    return %c0_i32, %c0_i32_0 : i32, i32
  }
  func.func @transform_4(%arg0: i32) -> (i32, i32) {
    %c0_i32 = arith.constant 0 : i32
    %c0_i32_0 = arith.constant 0 : i32
    %c0_i32_1 = arith.constant 0 : i32
    return %c0_i32, %c0_i32_0 : i32, i32
  }
  func.func @transform_5(%arg0: i32) -> (i32, i32) {
    %c0_i32 = arith.constant 0 : i32
    %c0_i32_0 = arith.constant 0 : i32
    %c0_i32_1 = arith.constant 0 : i32
    return %c0_i32, %c0_i32_0 : i32, i32
  }
  func.func @transform_6(%arg0: i32) -> (i32, i32) {
    %c0_i32 = arith.constant 0 : i32
    %c0_i32_0 = arith.constant 0 : i32
    return %arg0, %c0_i32 : i32, i32
  }
}

module attributes {stable_mosaic.version = 11 : i64} {
  func.func @_cyk_row_kernel(%arg0: i32, %arg1: i32, %arg2: memref<1x16x32xf32, #tpu.memory_space<vmem>>, %arg3: memref<1x16x32xf32, #tpu.memory_space<vmem>>, %arg4: memref<32x64xf32, #tpu.memory_space<vmem>>, %arg5: memref<32x64xf32, #tpu.memory_space<vmem>>, %arg6: memref<1x64xf32, #tpu.memory_space<vmem>>, %arg7: memref<64x32xf32, #tpu.memory_space<vmem>>, %arg8: memref<64x32xf32, #tpu.memory_space<vmem>>, %arg9: memref<64x32xf32, #tpu.memory_space<vmem>>, %arg10: memref<64x32xf32, #tpu.memory_space<vmem>>, %arg11: memref<1x32xf32, #tpu.memory_space<vmem>>, %arg12: memref<1x32xf32, #tpu.memory_space<vmem>>, %arg13: memref<1x32xf32, #tpu.memory_space<vmem>>, %arg14: memref<1x32xf32, #tpu.memory_space<vmem>>, %arg15: memref<1x32xf32, #tpu.memory_space<vmem>>, %arg16: memref<1x32xf32, #tpu.memory_space<vmem>>, %arg17: memref<1x32xf32, #tpu.memory_space<vmem>>, %arg18: memref<1x1xf32, #tpu.memory_space<smem>>, %arg19: memref<16x32xf32, #tpu.memory_space<vmem>>, %arg20: memref<16x1xf32, #tpu.memory_space<vmem>>, %arg21: memref<16x1xf32, #tpu.memory_space<vmem>>, %arg22: memref<16x32xf32, #tpu.memory_space<vmem>>) attributes {dimension_semantics = [#tpu.dimension_semantics<parallel>, #tpu.dimension_semantics<arbitrary>], iteration_bounds = array<i64: 1, 1>, scalar_prefetch = 0 : i64, scratch_operands = 3 : i64, tpu.core_type = #tpu.core_type<tc>, window_params = [{transform_indices = @transform_0, window_bounds = array<i64: 1, 16, 32>}, {transform_indices = @transform_1, window_bounds = array<i64: 1, 16, 32>}, {pipeline_mode = #tpu.pipeline_mode<synchronous>, transform_indices = @transform_2, window_bounds = array<i64: 32, 64>}, {pipeline_mode = #tpu.pipeline_mode<synchronous>, transform_indices = @transform_3, window_bounds = array<i64: 32, 64>}, {pipeline_mode = #tpu.pipeline_mode<synchronous>, transform_indices = @transform_4, window_bounds = array<i64: 1, 64>}, {pipeline_mode = #tpu.pipeline_mode<synchronous>, transform_indices = @transform_5, window_bounds = array<i64: 64, 32>}, {pipeline_mode = #tpu.pipeline_mode<synchronous>, transform_indices = @transform_6, window_bounds = array<i64: 64, 32>}, {pipeline_mode = #tpu.pipeline_mode<synchronous>, transform_indices = @transform_7, window_bounds = array<i64: 64, 32>}, {pipeline_mode = #tpu.pipeline_mode<synchronous>, transform_indices = @transform_8, window_bounds = array<i64: 64, 32>}, {pipeline_mode = #tpu.pipeline_mode<synchronous>, transform_indices = @transform_9, window_bounds = array<i64: 1, 32>}, {pipeline_mode = #tpu.pipeline_mode<synchronous>, transform_indices = @transform_10, window_bounds = array<i64: 1, 32>}, {pipeline_mode = #tpu.pipeline_mode<synchronous>, transform_indices = @transform_11, window_bounds = array<i64: 1, 32>}, {pipeline_mode = #tpu.pipeline_mode<synchronous>, transform_indices = @transform_12, window_bounds = array<i64: 1, 32>}, {pipeline_mode = #tpu.pipeline_mode<synchronous>, transform_indices = @transform_13, window_bounds = array<i64: 1, 32>}, {pipeline_mode = #tpu.pipeline_mode<synchronous>, transform_indices = @transform_14, window_bounds = array<i64: 1, 32>}, {pipeline_mode = #tpu.pipeline_mode<synchronous>, transform_indices = @transform_15, window_bounds = array<i64: 1, 32>}, {transform_indices = @transform_16, window_bounds = array<i64: 1, 1>}, {transform_indices = @transform_17, window_bounds = array<i64: 16, 32>}]} {
    %c0_i32 = arith.constant 0 : i32
    %0 = arith.cmpi eq, %arg1, %c0_i32 : i32
    %1 = arith.extui %0 : i1 to i32
    %c0_i32_0 = arith.constant 0 : i32
    %2 = arith.cmpi ne, %1, %c0_i32_0 : i32
    scf.if %2 {
      %cst_69 = arith.constant 0xFF800000 : f32
      %119 = vector.broadcast %cst_69 : f32 to vector<16x1xf32>
      %c0_70 = arith.constant 0 : index
      %c0_71 = arith.constant 0 : index
      %120 = vector.load %arg20[%c0_70, %c0_71] : memref<16x1xf32, #tpu.memory_space<vmem>>, vector<16x1xf32>
      tpu.vector_store %arg20[%c0_70, %c0_71], %119 {strides = array<i32>} : memref<16x1xf32, #tpu.memory_space<vmem>>, vector<16x1xf32>,
      %cst_72 = arith.constant 0.000000e+00 : f32
      %121 = vector.broadcast %cst_72 : f32 to vector<16x1xf32>
      %c0_73 = arith.constant 0 : index
      %c0_74 = arith.constant 0 : index
      %122 = vector.load %arg21[%c0_73, %c0_74] : memref<16x1xf32, #tpu.memory_space<vmem>>, vector<16x1xf32>
      tpu.vector_store %arg21[%c0_73, %c0_74], %121 {strides = array<i32>} : memref<16x1xf32, #tpu.memory_space<vmem>>, vector<16x1xf32>,
      %cst_75 = arith.constant 0.000000e+00 : f32
      %123 = vector.broadcast %cst_75 : f32 to vector<16x32xf32>
      %c0_76 = arith.constant 0 : index
      %c0_77 = arith.constant 0 : index
      %124 = vector.load %arg22[%c0_76, %c0_77] : memref<16x32xf32, #tpu.memory_space<vmem>>, vector<16x32xf32>
      tpu.vector_store %arg22[%c0_76, %c0_77], %123 {strides = array<i32>} : memref<16x32xf32, #tpu.memory_space<vmem>>, vector<16x32xf32>,
    } else {
    }
    %c0 = arith.constant 0 : index
    %c0_1 = arith.constant 0 : index
    %c0_2 = arith.constant 0 : index
    %3 = vector.load %arg2[%c0, %c0_1, %c0_2] : memref<1x16x32xf32, #tpu.memory_space<vmem>>, vector<1x16x32xf32>
    %4 = vector.shape_cast %3 : vector<1x16x32xf32> to vector<16x32xf32>
    %c0_3 = arith.constant 0 : index
    %c0_4 = arith.constant 0 : index
    %c0_5 = arith.constant 0 : index
    %5 = vector.load %arg3[%c0_3, %c0_4, %c0_5] : memref<1x16x32xf32, #tpu.memory_space<vmem>>, vector<1x16x32xf32>
    %6 = vector.shape_cast %5 : vector<1x16x32xf32> to vector<16x32xf32>
    %c0_6 = arith.constant 0 : index
    %c0_7 = arith.constant 0 : index
    %7 = vector.load %arg4[%c0_6, %c0_7] : memref<32x64xf32, #tpu.memory_space<vmem>>, vector<32x64xf32>
    %cst = arith.constant dense<0.000000e+00> : vector<16x64xf32>
    %8 = tpu.matmul %4, %7, %cst {dimension_numbers = #tpu.dot_dimension_numbers<[1], [0], [0], [1], [0, 0, 1, 1], [], []>} : vector<16x32xf32>, vector<32x64xf32>, vector<16x64xf32> -> vector<16x64xf32>
    %c0_8 = arith.constant 0 : index
    %c0_9 = arith.constant 0 : index
    %9 = vector.load %arg5[%c0_8, %c0_9] : memref<32x64xf32, #tpu.memory_space<vmem>>, vector<32x64xf32>
    %cst_10 = arith.constant dense<0.000000e+00> : vector<16x64xf32>
    %10 = tpu.matmul %6, %9, %cst_10 {dimension_numbers = #tpu.dot_dimension_numbers<[1], [0], [0], [1], [0, 0, 1, 1], [], []>} : vector<16x32xf32>, vector<32x64xf32>, vector<16x64xf32> -> vector<16x64xf32>
    %11 = arith.addf %8, %10 : vector<16x64xf32>
    %c0_11 = arith.constant 0 : index
    %c0_12 = arith.constant 0 : index
    %12 = vector.load %arg6[%c0_11, %c0_12] : memref<1x64xf32, #tpu.memory_space<vmem>>, vector<1x64xf32>
    %13 = vector.broadcast %12 : vector<1x64xf32> to vector<16x64xf32>
    %14 = arith.addf %11, %13 : vector<16x64xf32>
    %cst_13 = arith.constant 0.000000e+00 : f32
    %15 = vector.broadcast %cst_13 : f32 to vector<16x64xf32>
    %16 = arith.maximumf %14, %15 : vector<16x64xf32>
    %c0_14 = arith.constant 0 : index
    %c0_15 = arith.constant 0 : index
    %17 = vector.load %arg7[%c0_14, %c0_15] : memref<64x32xf32, #tpu.memory_space<vmem>>, vector<64x32xf32>
    %cst_16 = arith.constant dense<0.000000e+00> : vector<16x32xf32>
    %18 = tpu.matmul %16, %17, %cst_16 {dimension_numbers = #tpu.dot_dimension_numbers<[1], [0], [0], [1], [0, 0, 1, 1], [], []>} : vector<16x64xf32>, vector<64x32xf32>, vector<16x32xf32> -> vector<16x32xf32>
    %c0_17 = arith.constant 0 : index
    %c0_18 = arith.constant 0 : index
    %19 = vector.load %arg11[%c0_17, %c0_18] : memref<1x32xf32, #tpu.memory_space<vmem>>, vector<1x32xf32>
    %20 = vector.broadcast %19 : vector<1x32xf32> to vector<16x32xf32>
    %21 = arith.addf %18, %20 : vector<16x32xf32>
    %22 = arith.negf %21 : vector<16x32xf32>
    %23 = math.exp %22 : vector<16x32xf32>
    %cst_19 = arith.constant 1.000000e+00 : f32
    %24 = vector.broadcast %cst_19 : f32 to vector<16x32xf32>
    %25 = arith.addf %24, %23 : vector<16x32xf32>
    %26 = arith.divf %24, %25 : vector<16x32xf32>
    %c0_20 = arith.constant 0 : index
    %c0_21 = arith.constant 0 : index
    %27 = vector.load %arg8[%c0_20, %c0_21] : memref<64x32xf32, #tpu.memory_space<vmem>>, vector<64x32xf32>
    %cst_22 = arith.constant dense<0.000000e+00> : vector<16x32xf32>
    %28 = tpu.matmul %16, %27, %cst_22 {dimension_numbers = #tpu.dot_dimension_numbers<[1], [0], [0], [1], [0, 0, 1, 1], [], []>} : vector<16x64xf32>, vector<64x32xf32>, vector<16x32xf32> -> vector<16x32xf32>
    %c0_23 = arith.constant 0 : index
    %c0_24 = arith.constant 0 : index
    %29 = vector.load %arg12[%c0_23, %c0_24] : memref<1x32xf32, #tpu.memory_space<vmem>>, vector<1x32xf32>
    %30 = vector.broadcast %29 : vector<1x32xf32> to vector<16x32xf32>
    %31 = arith.addf %28, %30 : vector<16x32xf32>
    %32 = arith.negf %31 : vector<16x32xf32>
    %33 = math.exp %32 : vector<16x32xf32>
    %cst_25 = arith.constant 1.000000e+00 : f32
    %34 = vector.broadcast %cst_25 : f32 to vector<16x32xf32>
    %35 = arith.addf %34, %33 : vector<16x32xf32>
    %36 = arith.divf %34, %35 : vector<16x32xf32>
    %c0_26 = arith.constant 0 : index
    %c0_27 = arith.constant 0 : index
    %37 = vector.load %arg9[%c0_26, %c0_27] : memref<64x32xf32, #tpu.memory_space<vmem>>, vector<64x32xf32>
    %cst_28 = arith.constant dense<0.000000e+00> : vector<16x32xf32>
    %38 = tpu.matmul %16, %37, %cst_28 {dimension_numbers = #tpu.dot_dimension_numbers<[1], [0], [0], [1], [0, 0, 1, 1], [], []>} : vector<16x64xf32>, vector<64x32xf32>, vector<16x32xf32> -> vector<16x32xf32>
    %c0_29 = arith.constant 0 : index
    %c0_30 = arith.constant 0 : index
    %39 = vector.load %arg13[%c0_29, %c0_30] : memref<1x32xf32, #tpu.memory_space<vmem>>, vector<1x32xf32>
    %40 = vector.broadcast %39 : vector<1x32xf32> to vector<16x32xf32>
    %41 = arith.addf %38, %40 : vector<16x32xf32>
    %42 = arith.negf %41 : vector<16x32xf32>
    %43 = math.exp %42 : vector<16x32xf32>
    %cst_31 = arith.constant 1.000000e+00 : f32
    %44 = vector.broadcast %cst_31 : f32 to vector<16x32xf32>
    %45 = arith.addf %44, %43 : vector<16x32xf32>
    %46 = arith.divf %44, %45 : vector<16x32xf32>
    %c0_32 = arith.constant 0 : index
    %c0_33 = arith.constant 0 : index
    %47 = vector.load %arg10[%c0_32, %c0_33] : memref<64x32xf32, #tpu.memory_space<vmem>>, vector<64x32xf32>
    %cst_34 = arith.constant dense<0.000000e+00> : vector<16x32xf32>
    %48 = tpu.matmul %16, %47, %cst_34 {dimension_numbers = #tpu.dot_dimension_numbers<[1], [0], [0], [1], [0, 0, 1, 1], [], []>} : vector<16x64xf32>, vector<64x32xf32>, vector<16x32xf32> -> vector<16x32xf32>
    %c0_35 = arith.constant 0 : index
    %c0_36 = arith.constant 0 : index
    %49 = vector.load %arg14[%c0_35, %c0_36] : memref<1x32xf32, #tpu.memory_space<vmem>>, vector<1x32xf32>
    %50 = vector.broadcast %49 : vector<1x32xf32> to vector<16x32xf32>
    %51 = arith.addf %48, %50 : vector<16x32xf32>
    %52 = arith.mulf %26, %4 : vector<16x32xf32>
    %53 = arith.mulf %36, %6 : vector<16x32xf32>
    %54 = arith.addf %52, %53 : vector<16x32xf32>
    %55 = arith.mulf %46, %51 : vector<16x32xf32>
    %56 = arith.addf %54, %55 : vector<16x32xf32>
    %c0_37 = arith.constant 0 : index
    %c0_38 = arith.constant 0 : index
    %57 = vector.load %arg15[%c0_37, %c0_38] : memref<1x32xf32, #tpu.memory_space<vmem>>, vector<1x32xf32>
    %c0_39 = arith.constant 0 : index
    %c0_40 = arith.constant 0 : index
    %58 = vector.load %arg16[%c0_39, %c0_40] : memref<1x32xf32, #tpu.memory_space<vmem>>, vector<1x32xf32>
    %cst_41 = arith.constant dense<0.000000e+00> : vector<16xf32>
    %59 = vector.multi_reduction <add>, %56, %cst_41 [1] : vector<16x32xf32> to vector<16xf32>
    %60 = vector.shape_cast %59 : vector<16xf32> to vector<16x1xf32>
    %cst_42 = arith.constant 3.200000e+01 : f32
    %61 = vector.broadcast %cst_42 : f32 to vector<16x1xf32>
    %62 = arith.divf %60, %61 : vector<16x1xf32>
    %63 = vector.broadcast %62 : vector<16x1xf32> to vector<16x32xf32>
    %64 = arith.subf %56, %63 : vector<16x32xf32>
    %65 = arith.mulf %64, %64 : vector<16x32xf32>
    %cst_43 = arith.constant dense<0.000000e+00> : vector<16xf32>
    %66 = vector.multi_reduction <add>, %65, %cst_43 [1] : vector<16x32xf32> to vector<16xf32>
    %67 = vector.shape_cast %66 : vector<16xf32> to vector<16x1xf32>
    %cst_44 = arith.constant 3.200000e+01 : f32
    %68 = vector.broadcast %cst_44 : f32 to vector<16x1xf32>
    %69 = arith.divf %67, %68 : vector<16x1xf32>
    %70 = vector.broadcast %62 : vector<16x1xf32> to vector<16x32xf32>
    %71 = arith.subf %56, %70 : vector<16x32xf32>
    %cst_45 = arith.constant 9.99999974E-6 : f32
    %72 = vector.broadcast %cst_45 : f32 to vector<16x1xf32>
    %73 = arith.addf %69, %72 : vector<16x1xf32>
    %74 = math.rsqrt %73 : vector<16x1xf32>
    %75 = vector.broadcast %74 : vector<16x1xf32> to vector<16x32xf32>
    %76 = arith.mulf %71, %75 : vector<16x32xf32>
    %77 = vector.broadcast %57 : vector<1x32xf32> to vector<16x32xf32>
    %78 = arith.mulf %76, %77 : vector<16x32xf32>
    %79 = vector.broadcast %58 : vector<1x32xf32> to vector<16x32xf32>
    %80 = arith.addf %78, %79 : vector<16x32xf32>
    %81 = arith.mulf %80, %80 : vector<16x32xf32>
    %cst_46 = arith.constant dense<0.000000e+00> : vector<16xf32>
    %82 = vector.multi_reduction <add>, %81, %cst_46 [1] : vector<16x32xf32> to vector<16xf32>
    %83 = vector.shape_cast %82 : vector<16xf32> to vector<16x1xf32>
    %84 = math.sqrt %83 : vector<16x1xf32>
    %cst_47 = arith.constant 9.99999993E-9 : f32
    %85 = vector.broadcast %cst_47 : f32 to vector<16x1xf32>
    %86 = arith.addf %84, %85 : vector<16x1xf32>
    %87 = vector.broadcast %86 : vector<16x1xf32> to vector<16x32xf32>
    %88 = arith.divf %80, %87 : vector<16x32xf32>
    %c0_48 = arith.constant 0 : index
    %c0_49 = arith.constant 0 : index
    %89 = vector.load %arg17[%c0_48, %c0_49] : memref<1x32xf32, #tpu.memory_space<vmem>>, vector<1x32xf32>
    %90 = vector.broadcast %89 : vector<1x32xf32> to vector<16x32xf32>
    %91 = arith.mulf %88, %90 : vector<16x32xf32>
    %cst_50 = arith.constant dense<0.000000e+00> : vector<16xf32>
    %92 = vector.multi_reduction <add>, %91, %cst_50 [1] : vector<16x32xf32> to vector<16xf32>
    %93 = vector.shape_cast %92 : vector<16xf32> to vector<16x1xf32>
    %c0_51 = arith.constant 0 : index
    %c0_52 = arith.constant 0 : index
    %94 = memref.load %arg18[%c0_51, %c0_52] : memref<1x1xf32, #tpu.memory_space<smem>>
    %95 = vector.broadcast %94 : f32 to vector<16x1xf32>
    %96 = arith.addf %93, %95 : vector<16x1xf32>
    %c0_53 = arith.constant 0 : index
    %c0_54 = arith.constant 0 : index
    %97 = vector.load %arg20[%c0_53, %c0_54] : memref<16x1xf32, #tpu.memory_space<vmem>>, vector<16x1xf32>
    %98 = arith.maximumf %97, %96 : vector<16x1xf32>
    %c0_55 = arith.constant 0 : index
    %c0_56 = arith.constant 0 : index
    %99 = vector.load %arg20[%c0_55, %c0_56] : memref<16x1xf32, #tpu.memory_space<vmem>>, vector<16x1xf32>
    %100 = arith.subf %99, %98 : vector<16x1xf32>
    %101 = math.exp %100 : vector<16x1xf32>
    %102 = arith.subf %96, %98 : vector<16x1xf32>
    %103 = math.exp %102 : vector<16x1xf32>
    %c0_57 = arith.constant 0 : index
    %c0_58 = arith.constant 0 : index
    %104 = vector.load %arg21[%c0_57, %c0_58] : memref<16x1xf32, #tpu.memory_space<vmem>>, vector<16x1xf32>
    %105 = arith.mulf %101, %104 : vector<16x1xf32>
    %106 = arith.addf %105, %103 : vector<16x1xf32>
    %c0_59 = arith.constant 0 : index
    %c0_60 = arith.constant 0 : index
    %107 = vector.load %arg21[%c0_59, %c0_60] : memref<16x1xf32, #tpu.memory_space<vmem>>, vector<16x1xf32>
    tpu.vector_store %arg21[%c0_59, %c0_60], %106 {strides = array<i32>} : memref<16x1xf32, #tpu.memory_space<vmem>>, vector<16x1xf32>,
    %c0_61 = arith.constant 0 : index
    %c0_62 = arith.constant 0 : index
    %108 = vector.load %arg22[%c0_61, %c0_62] : memref<16x32xf32, #tpu.memory_space<vmem>>, vector<16x32xf32>
    %109 = vector.broadcast %101 : vector<16x1xf32> to vector<16x32xf32>
    %110 = arith.mulf %109, %108 : vector<16x32xf32>
    %111 = vector.broadcast %103 : vector<16x1xf32> to vector<16x32xf32>
    %112 = arith.mulf %111, %88 : vector<16x32xf32>
    %113 = arith.addf %110, %112 : vector<16x32xf32>
    %c0_63 = arith.constant 0 : index
    %c0_64 = arith.constant 0 : index
    %114 = vector.load %arg22[%c0_63, %c0_64] : memref<16x32xf32, #tpu.memory_space<vmem>>, vector<16x32xf32>
    tpu.vector_store %arg22[%c0_63, %c0_64], %113 {strides = array<i32>} : memref<16x32xf32, #tpu.memory_space<vmem>>, vector<16x32xf32>,
    %c0_65 = arith.constant 0 : index
    %c0_66 = arith.constant 0 : index
    %115 = vector.load %arg20[%c0_65, %c0_66] : memref<16x1xf32, #tpu.memory_space<vmem>>, vector<16x1xf32>
    tpu.vector_store %arg20[%c0_65, %c0_66], %98 {strides = array<i32>} : memref<16x1xf32, #tpu.memory_space<vmem>>, vector<16x1xf32>,
    %c0_i32_67 = arith.constant 0 : i32
    %116 = arith.cmpi eq, %arg1, %c0_i32_67 : i32
    %117 = arith.extui %116 : i1 to i32
    %c0_i32_68 = arith.constant 0 : i32
    %118 = arith.cmpi ne, %117, %c0_i32_68 : i32
    scf.if %118 {
      %c0_69 = arith.constant 0 : index
      %c0_70 = arith.constant 0 : index
      %119 = vector.load %arg22[%c0_69, %c0_70] : memref<16x32xf32, #tpu.memory_space<vmem>>, vector<16x32xf32>
      %c0_71 = arith.constant 0 : index
      %c0_72 = arith.constant 0 : index
      %120 = vector.load %arg21[%c0_71, %c0_72] : memref<16x1xf32, #tpu.memory_space<vmem>>, vector<16x1xf32>
      %121 = vector.broadcast %120 : vector<16x1xf32> to vector<16x32xf32>
      %122 = arith.divf %119, %121 : vector<16x32xf32>
      %c0_73 = arith.constant 0 : index
      %c0_74 = arith.constant 0 : index
      %123 = vector.load %arg19[%c0_73, %c0_74] : memref<16x32xf32, #tpu.memory_space<vmem>>, vector<16x32xf32>
      tpu.vector_store %arg19[%c0_73, %c0_74], %122 {strides = array<i32>} : memref<16x32xf32, #tpu.memory_space<vmem>>, vector<16x32xf32>,
    } else {
    }
    return
  }
  func.func @transform_0(%arg0: i32, %arg1: i32) -> (i32, i32, i32) {
    %c0_i32 = arith.constant 0 : i32
    %c0_i32_0 = arith.constant 0 : i32
    return %arg1, %arg0, %c0_i32 : i32, i32, i32
  }
  func.func @transform_1(%arg0: i32, %arg1: i32) -> (i32, i32, i32) {
    %c0_i32 = arith.constant 0 : i32
    %c0_i32_0 = arith.constant 0 : i32
    return %arg1, %arg0, %c0_i32 : i32, i32, i32
  }
  func.func @transform_2(%arg0: i32, %arg1: i32) -> (i32, i32) {
    %c0_i32 = arith.constant 0 : i32
    %c0_i32_0 = arith.constant 0 : i32
    %c0_i32_1 = arith.constant 0 : i32
    return %c0_i32, %c0_i32_0 : i32, i32
  }
  func.func @transform_3(%arg0: i32, %arg1: i32) -> (i32, i32) {
    %c0_i32 = arith.constant 0 : i32
    %c0_i32_0 = arith.constant 0 : i32
    %c0_i32_1 = arith.constant 0 : i32
    return %c0_i32, %c0_i32_0 : i32, i32
  }
  func.func @transform_4(%arg0: i32, %arg1: i32) -> (i32, i32) {
    %c0_i32 = arith.constant 0 : i32
    %c0_i32_0 = arith.constant 0 : i32
    %c0_i32_1 = arith.constant 0 : i32
    return %c0_i32, %c0_i32_0 : i32, i32
  }
  func.func @transform_5(%arg0: i32, %arg1: i32) -> (i32, i32) {
    %c0_i32 = arith.constant 0 : i32
    %c0_i32_0 = arith.constant 0 : i32
    %c0_i32_1 = arith.constant 0 : i32
    return %c0_i32, %c0_i32_0 : i32, i32
  }
  func.func @transform_6(%arg0: i32, %arg1: i32) -> (i32, i32) {
    %c0_i32 = arith.constant 0 : i32
    %c0_i32_0 = arith.constant 0 : i32
    %c0_i32_1 = arith.constant 0 : i32
    return %c0_i32, %c0_i32_0 : i32, i32
  }
  func.func @transform_7(%arg0: i32, %arg1: i32) -> (i32, i32) {
    %c0_i32 = arith.constant 0 : i32
    %c0_i32_0 = arith.constant 0 : i32
    %c0_i32_1 = arith.constant 0 : i32
    return %c0_i32, %c0_i32_0 : i32, i32
  }
  func.func @transform_8(%arg0: i32, %arg1: i32) -> (i32, i32) {
    %c0_i32 = arith.constant 0 : i32
    %c0_i32_0 = arith.constant 0 : i32
    %c0_i32_1 = arith.constant 0 : i32
    return %c0_i32, %c0_i32_0 : i32, i32
  }
  func.func @transform_9(%arg0: i32, %arg1: i32) -> (i32, i32) {
    %c0_i32 = arith.constant 0 : i32
    %c0_i32_0 = arith.constant 0 : i32
    %c0_i32_1 = arith.constant 0 : i32
    return %c0_i32, %c0_i32_0 : i32, i32
  }
  func.func @transform_10(%arg0: i32, %arg1: i32) -> (i32, i32) {
    %c0_i32 = arith.constant 0 : i32
    %c0_i32_0 = arith.constant 0 : i32
    %c0_i32_1 = arith.constant 0 : i32
    return %c0_i32, %c0_i32_0 : i32, i32
  }
  func.func @transform_11(%arg0: i32, %arg1: i32) -> (i32, i32) {
    %c0_i32 = arith.constant 0 : i32
    %c0_i32_0 = arith.constant 0 : i32
    %c0_i32_1 = arith.constant 0 : i32
    return %c0_i32, %c0_i32_0 : i32, i32
  }
  func.func @transform_12(%arg0: i32, %arg1: i32) -> (i32, i32) {
    %c0_i32 = arith.constant 0 : i32
    %c0_i32_0 = arith.constant 0 : i32
    %c0_i32_1 = arith.constant 0 : i32
    return %c0_i32, %c0_i32_0 : i32, i32
  }
  func.func @transform_13(%arg0: i32, %arg1: i32) -> (i32, i32) {
    %c0_i32 = arith.constant 0 : i32
    %c0_i32_0 = arith.constant 0 : i32
    %c0_i32_1 = arith.constant 0 : i32
    return %c0_i32, %c0_i32_0 : i32, i32
  }
  func.func @transform_14(%arg0: i32, %arg1: i32) -> (i32, i32) {
    %c0_i32 = arith.constant 0 : i32
    %c0_i32_0 = arith.constant 0 : i32
    %c0_i32_1 = arith.constant 0 : i32
    return %c0_i32, %c0_i32_0 : i32, i32
  }
  func.func @transform_15(%arg0: i32, %arg1: i32) -> (i32, i32) {
    %c0_i32 = arith.constant 0 : i32
    %c0_i32_0 = arith.constant 0 : i32
    %c0_i32_1 = arith.constant 0 : i32
    return %c0_i32, %c0_i32_0 : i32, i32
  }
  func.func @transform_16(%arg0: i32, %arg1: i32) -> (i32, i32) {
    %c0_i32 = arith.constant 0 : i32
    %c0_i32_0 = arith.constant 0 : i32
    %c0_i32_1 = arith.constant 0 : i32
    return %c0_i32, %c0_i32_0 : i32, i32
  }
  func.func @transform_17(%arg0: i32, %arg1: i32) -> (i32, i32) {
    %c0_i32 = arith.constant 0 : i32
    %c0_i32_0 = arith.constant 0 : i32
    return %arg0, %c0_i32 : i32, i32
  }
}

module attributes {stable_mosaic.version = 11 : i64} {
  func.func @_cyk_row_kernel(%arg0: i32, %arg1: i32, %arg2: memref<1x16x32xf32, #tpu.memory_space<vmem>>, %arg3: memref<1x16x32xf32, #tpu.memory_space<vmem>>, %arg4: memref<32x64xf32, #tpu.memory_space<vmem>>, %arg5: memref<32x64xf32, #tpu.memory_space<vmem>>, %arg6: memref<1x64xf32, #tpu.memory_space<vmem>>, %arg7: memref<64x32xf32, #tpu.memory_space<vmem>>, %arg8: memref<64x32xf32, #tpu.memory_space<vmem>>, %arg9: memref<64x32xf32, #tpu.memory_space<vmem>>, %arg10: memref<64x32xf32, #tpu.memory_space<vmem>>, %arg11: memref<1x32xf32, #tpu.memory_space<vmem>>, %arg12: memref<1x32xf32, #tpu.memory_space<vmem>>, %arg13: memref<1x32xf32, #tpu.memory_space<vmem>>, %arg14: memref<1x32xf32, #tpu.memory_space<vmem>>, %arg15: memref<1x32xf32, #tpu.memory_space<vmem>>, %arg16: memref<1x32xf32, #tpu.memory_space<vmem>>, %arg17: memref<1x32xf32, #tpu.memory_space<vmem>>, %arg18: memref<1x1xf32, #tpu.memory_space<smem>>, %arg19: memref<16x32xf32, #tpu.memory_space<vmem>>, %arg20: memref<16x1xf32, #tpu.memory_space<vmem>>, %arg21: memref<16x1xf32, #tpu.memory_space<vmem>>, %arg22: memref<16x32xf32, #tpu.memory_space<vmem>>) attributes {dimension_semantics = [#tpu.dimension_semantics<parallel>, #tpu.dimension_semantics<arbitrary>], iteration_bounds = array<i64: 1, 2>, scalar_prefetch = 0 : i64, scratch_operands = 3 : i64, tpu.core_type = #tpu.core_type<tc>, window_params = [{transform_indices = @transform_0, window_bounds = array<i64: 1, 16, 32>}, {transform_indices = @transform_1, window_bounds = array<i64: 1, 16, 32>}, {pipeline_mode = #tpu.pipeline_mode<synchronous>, transform_indices = @transform_2, window_bounds = array<i64: 32, 64>}, {pipeline_mode = #tpu.pipeline_mode<synchronous>, transform_indices = @transform_3, window_bounds = array<i64: 32, 64>}, {pipeline_mode = #tpu.pipeline_mode<synchronous>, transform_indices = @transform_4, window_bounds = array<i64: 1, 64>}, {pipeline_mode = #tpu.pipeline_mode<synchronous>, transform_indices = @transform_5, window_bounds = array<i64: 64, 32>}, {pipeline_mode = #tpu.pipeline_mode<synchronous>, transform_indices = @transform_6, window_bounds = array<i64: 64, 32>}, {pipeline_mode = #tpu.pipeline_mode<synchronous>, transform_indices = @transform_7, window_bounds = array<i64: 64, 32>}, {pipeline_mode = #tpu.pipeline_mode<synchronous>, transform_indices = @transform_8, window_bounds = array<i64: 64, 32>}, {pipeline_mode = #tpu.pipeline_mode<synchronous>, transform_indices = @transform_9, window_bounds = array<i64: 1, 32>}, {pipeline_mode = #tpu.pipeline_mode<synchronous>, transform_indices = @transform_10, window_bounds = array<i64: 1, 32>}, {pipeline_mode = #tpu.pipeline_mode<synchronous>, transform_indices = @transform_11, window_bounds = array<i64: 1, 32>}, {pipeline_mode = #tpu.pipeline_mode<synchronous>, transform_indices = @transform_12, window_bounds = array<i64: 1, 32>}, {pipeline_mode = #tpu.pipeline_mode<synchronous>, transform_indices = @transform_13, window_bounds = array<i64: 1, 32>}, {pipeline_mode = #tpu.pipeline_mode<synchronous>, transform_indices = @transform_14, window_bounds = array<i64: 1, 32>}, {pipeline_mode = #tpu.pipeline_mode<synchronous>, transform_indices = @transform_15, window_bounds = array<i64: 1, 32>}, {transform_indices = @transform_16, window_bounds = array<i64: 1, 1>}, {transform_indices = @transform_17, window_bounds = array<i64: 16, 32>}]} {
    %c0_i32 = arith.constant 0 : i32
    %0 = arith.cmpi eq, %arg1, %c0_i32 : i32
    %1 = arith.extui %0 : i1 to i32
    %c0_i32_0 = arith.constant 0 : i32
    %2 = arith.cmpi ne, %1, %c0_i32_0 : i32
    scf.if %2 {
      %cst_68 = arith.constant 0xFF800000 : f32
      %119 = vector.broadcast %cst_68 : f32 to vector<16x1xf32>
      %c0_69 = arith.constant 0 : index
      %c0_70 = arith.constant 0 : index
      %120 = vector.load %arg20[%c0_69, %c0_70] : memref<16x1xf32, #tpu.memory_space<vmem>>, vector<16x1xf32>
      tpu.vector_store %arg20[%c0_69, %c0_70], %119 {strides = array<i32>} : memref<16x1xf32, #tpu.memory_space<vmem>>, vector<16x1xf32>,
      %cst_71 = arith.constant 0.000000e+00 : f32
      %121 = vector.broadcast %cst_71 : f32 to vector<16x1xf32>
      %c0_72 = arith.constant 0 : index
      %c0_73 = arith.constant 0 : index
      %122 = vector.load %arg21[%c0_72, %c0_73] : memref<16x1xf32, #tpu.memory_space<vmem>>, vector<16x1xf32>
      tpu.vector_store %arg21[%c0_72, %c0_73], %121 {strides = array<i32>} : memref<16x1xf32, #tpu.memory_space<vmem>>, vector<16x1xf32>,
      %cst_74 = arith.constant 0.000000e+00 : f32
      %123 = vector.broadcast %cst_74 : f32 to vector<16x32xf32>
      %c0_75 = arith.constant 0 : index
      %c0_76 = arith.constant 0 : index
      %124 = vector.load %arg22[%c0_75, %c0_76] : memref<16x32xf32, #tpu.memory_space<vmem>>, vector<16x32xf32>
      tpu.vector_store %arg22[%c0_75, %c0_76], %123 {strides = array<i32>} : memref<16x32xf32, #tpu.memory_space<vmem>>, vector<16x32xf32>,
    } else {
    }
    %c0 = arith.constant 0 : index
    %c0_1 = arith.constant 0 : index
    %c0_2 = arith.constant 0 : index
    %3 = vector.load %arg2[%c0, %c0_1, %c0_2] : memref<1x16x32xf32, #tpu.memory_space<vmem>>, vector<1x16x32xf32>
    %4 = vector.shape_cast %3 : vector<1x16x32xf32> to vector<16x32xf32>
    %c0_3 = arith.constant 0 : index
    %c0_4 = arith.constant 0 : index
    %c0_5 = arith.constant 0 : index
    %5 = vector.load %arg3[%c0_3, %c0_4, %c0_5] : memref<1x16x32xf32, #tpu.memory_space<vmem>>, vector<1x16x32xf32>
    %6 = vector.shape_cast %5 : vector<1x16x32xf32> to vector<16x32xf32>
    %c0_6 = arith.constant 0 : index
    %c0_7 = arith.constant 0 : index
    %7 = vector.load %arg4[%c0_6, %c0_7] : memref<32x64xf32, #tpu.memory_space<vmem>>, vector<32x64xf32>
    %cst = arith.constant dense<0.000000e+00> : vector<16x64xf32>
    %8 = tpu.matmul %4, %7, %cst {dimension_numbers = #tpu.dot_dimension_numbers<[1], [0], [0], [1], [0, 0, 1, 1], [], []>} : vector<16x32xf32>, vector<32x64xf32>, vector<16x64xf32> -> vector<16x64xf32>
    %c0_8 = arith.constant 0 : index
    %c0_9 = arith.constant 0 : index
    %9 = vector.load %arg5[%c0_8, %c0_9] : memref<32x64xf32, #tpu.memory_space<vmem>>, vector<32x64xf32>
    %cst_10 = arith.constant dense<0.000000e+00> : vector<16x64xf32>
    %10 = tpu.matmul %6, %9, %cst_10 {dimension_numbers = #tpu.dot_dimension_numbers<[1], [0], [0], [1], [0, 0, 1, 1], [], []>} : vector<16x32xf32>, vector<32x64xf32>, vector<16x64xf32> -> vector<16x64xf32>
    %11 = arith.addf %8, %10 : vector<16x64xf32>
    %c0_11 = arith.constant 0 : index
    %c0_12 = arith.constant 0 : index
    %12 = vector.load %arg6[%c0_11, %c0_12] : memref<1x64xf32, #tpu.memory_space<vmem>>, vector<1x64xf32>
    %13 = vector.broadcast %12 : vector<1x64xf32> to vector<16x64xf32>
    %14 = arith.addf %11, %13 : vector<16x64xf32>
    %cst_13 = arith.constant 0.000000e+00 : f32
    %15 = vector.broadcast %cst_13 : f32 to vector<16x64xf32>
    %16 = arith.maximumf %14, %15 : vector<16x64xf32>
    %c0_14 = arith.constant 0 : index
    %c0_15 = arith.constant 0 : index
    %17 = vector.load %arg7[%c0_14, %c0_15] : memref<64x32xf32, #tpu.memory_space<vmem>>, vector<64x32xf32>
    %cst_16 = arith.constant dense<0.000000e+00> : vector<16x32xf32>
    %18 = tpu.matmul %16, %17, %cst_16 {dimension_numbers = #tpu.dot_dimension_numbers<[1], [0], [0], [1], [0, 0, 1, 1], [], []>} : vector<16x64xf32>, vector<64x32xf32>, vector<16x32xf32> -> vector<16x32xf32>
    %c0_17 = arith.constant 0 : index
    %c0_18 = arith.constant 0 : index
    %19 = vector.load %arg11[%c0_17, %c0_18] : memref<1x32xf32, #tpu.memory_space<vmem>>, vector<1x32xf32>
    %20 = vector.broadcast %19 : vector<1x32xf32> to vector<16x32xf32>
    %21 = arith.addf %18, %20 : vector<16x32xf32>
    %22 = arith.negf %21 : vector<16x32xf32>
    %23 = math.exp %22 : vector<16x32xf32>
    %cst_19 = arith.constant 1.000000e+00 : f32
    %24 = vector.broadcast %cst_19 : f32 to vector<16x32xf32>
    %25 = arith.addf %24, %23 : vector<16x32xf32>
    %26 = arith.divf %24, %25 : vector<16x32xf32>
    %c0_20 = arith.constant 0 : index
    %c0_21 = arith.constant 0 : index
    %27 = vector.load %arg8[%c0_20, %c0_21] : memref<64x32xf32, #tpu.memory_space<vmem>>, vector<64x32xf32>
    %cst_22 = arith.constant dense<0.000000e+00> : vector<16x32xf32>
    %28 = tpu.matmul %16, %27, %cst_22 {dimension_numbers = #tpu.dot_dimension_numbers<[1], [0], [0], [1], [0, 0, 1, 1], [], []>} : vector<16x64xf32>, vector<64x32xf32>, vector<16x32xf32> -> vector<16x32xf32>
    %c0_23 = arith.constant 0 : index
    %c0_24 = arith.constant 0 : index
    %29 = vector.load %arg12[%c0_23, %c0_24] : memref<1x32xf32, #tpu.memory_space<vmem>>, vector<1x32xf32>
    %30 = vector.broadcast %29 : vector<1x32xf32> to vector<16x32xf32>
    %31 = arith.addf %28, %30 : vector<16x32xf32>
    %32 = arith.negf %31 : vector<16x32xf32>
    %33 = math.exp %32 : vector<16x32xf32>
    %cst_25 = arith.constant 1.000000e+00 : f32
    %34 = vector.broadcast %cst_25 : f32 to vector<16x32xf32>
    %35 = arith.addf %34, %33 : vector<16x32xf32>
    %36 = arith.divf %34, %35 : vector<16x32xf32>
    %c0_26 = arith.constant 0 : index
    %c0_27 = arith.constant 0 : index
    %37 = vector.load %arg9[%c0_26, %c0_27] : memref<64x32xf32, #tpu.memory_space<vmem>>, vector<64x32xf32>
    %cst_28 = arith.constant dense<0.000000e+00> : vector<16x32xf32>
    %38 = tpu.matmul %16, %37, %cst_28 {dimension_numbers = #tpu.dot_dimension_numbers<[1], [0], [0], [1], [0, 0, 1, 1], [], []>} : vector<16x64xf32>, vector<64x32xf32>, vector<16x32xf32> -> vector<16x32xf32>
    %c0_29 = arith.constant 0 : index
    %c0_30 = arith.constant 0 : index
    %39 = vector.load %arg13[%c0_29, %c0_30] : memref<1x32xf32, #tpu.memory_space<vmem>>, vector<1x32xf32>
    %40 = vector.broadcast %39 : vector<1x32xf32> to vector<16x32xf32>
    %41 = arith.addf %38, %40 : vector<16x32xf32>
    %42 = arith.negf %41 : vector<16x32xf32>
    %43 = math.exp %42 : vector<16x32xf32>
    %cst_31 = arith.constant 1.000000e+00 : f32
    %44 = vector.broadcast %cst_31 : f32 to vector<16x32xf32>
    %45 = arith.addf %44, %43 : vector<16x32xf32>
    %46 = arith.divf %44, %45 : vector<16x32xf32>
    %c0_32 = arith.constant 0 : index
    %c0_33 = arith.constant 0 : index
    %47 = vector.load %arg10[%c0_32, %c0_33] : memref<64x32xf32, #tpu.memory_space<vmem>>, vector<64x32xf32>
    %cst_34 = arith.constant dense<0.000000e+00> : vector<16x32xf32>
    %48 = tpu.matmul %16, %47, %cst_34 {dimension_numbers = #tpu.dot_dimension_numbers<[1], [0], [0], [1], [0, 0, 1, 1], [], []>} : vector<16x64xf32>, vector<64x32xf32>, vector<16x32xf32> -> vector<16x32xf32>
    %c0_35 = arith.constant 0 : index
    %c0_36 = arith.constant 0 : index
    %49 = vector.load %arg14[%c0_35, %c0_36] : memref<1x32xf32, #tpu.memory_space<vmem>>, vector<1x32xf32>
    %50 = vector.broadcast %49 : vector<1x32xf32> to vector<16x32xf32>
    %51 = arith.addf %48, %50 : vector<16x32xf32>
    %52 = arith.mulf %26, %4 : vector<16x32xf32>
    %53 = arith.mulf %36, %6 : vector<16x32xf32>
    %54 = arith.addf %52, %53 : vector<16x32xf32>
    %55 = arith.mulf %46, %51 : vector<16x32xf32>
    %56 = arith.addf %54, %55 : vector<16x32xf32>
    %c0_37 = arith.constant 0 : index
    %c0_38 = arith.constant 0 : index
    %57 = vector.load %arg15[%c0_37, %c0_38] : memref<1x32xf32, #tpu.memory_space<vmem>>, vector<1x32xf32>
    %c0_39 = arith.constant 0 : index
    %c0_40 = arith.constant 0 : index
    %58 = vector.load %arg16[%c0_39, %c0_40] : memref<1x32xf32, #tpu.memory_space<vmem>>, vector<1x32xf32>
    %cst_41 = arith.constant dense<0.000000e+00> : vector<16xf32>
    %59 = vector.multi_reduction <add>, %56, %cst_41 [1] : vector<16x32xf32> to vector<16xf32>
    %60 = vector.shape_cast %59 : vector<16xf32> to vector<16x1xf32>
    %cst_42 = arith.constant 3.200000e+01 : f32
    %61 = vector.broadcast %cst_42 : f32 to vector<16x1xf32>
    %62 = arith.divf %60, %61 : vector<16x1xf32>
    %63 = vector.broadcast %62 : vector<16x1xf32> to vector<16x32xf32>
    %64 = arith.subf %56, %63 : vector<16x32xf32>
    %65 = arith.mulf %64, %64 : vector<16x32xf32>
    %cst_43 = arith.constant dense<0.000000e+00> : vector<16xf32>
    %66 = vector.multi_reduction <add>, %65, %cst_43 [1] : vector<16x32xf32> to vector<16xf32>
    %67 = vector.shape_cast %66 : vector<16xf32> to vector<16x1xf32>
    %cst_44 = arith.constant 3.200000e+01 : f32
    %68 = vector.broadcast %cst_44 : f32 to vector<16x1xf32>
    %69 = arith.divf %67, %68 : vector<16x1xf32>
    %70 = vector.broadcast %62 : vector<16x1xf32> to vector<16x32xf32>
    %71 = arith.subf %56, %70 : vector<16x32xf32>
    %cst_45 = arith.constant 9.99999974E-6 : f32
    %72 = vector.broadcast %cst_45 : f32 to vector<16x1xf32>
    %73 = arith.addf %69, %72 : vector<16x1xf32>
    %74 = math.rsqrt %73 : vector<16x1xf32>
    %75 = vector.broadcast %74 : vector<16x1xf32> to vector<16x32xf32>
    %76 = arith.mulf %71, %75 : vector<16x32xf32>
    %77 = vector.broadcast %57 : vector<1x32xf32> to vector<16x32xf32>
    %78 = arith.mulf %76, %77 : vector<16x32xf32>
    %79 = vector.broadcast %58 : vector<1x32xf32> to vector<16x32xf32>
    %80 = arith.addf %78, %79 : vector<16x32xf32>
    %81 = arith.mulf %80, %80 : vector<16x32xf32>
    %cst_46 = arith.constant dense<0.000000e+00> : vector<16xf32>
    %82 = vector.multi_reduction <add>, %81, %cst_46 [1] : vector<16x32xf32> to vector<16xf32>
    %83 = vector.shape_cast %82 : vector<16xf32> to vector<16x1xf32>
    %84 = math.sqrt %83 : vector<16x1xf32>
    %cst_47 = arith.constant 9.99999993E-9 : f32
    %85 = vector.broadcast %cst_47 : f32 to vector<16x1xf32>
    %86 = arith.addf %84, %85 : vector<16x1xf32>
    %87 = vector.broadcast %86 : vector<16x1xf32> to vector<16x32xf32>
    %88 = arith.divf %80, %87 : vector<16x32xf32>
    %c0_48 = arith.constant 0 : index
    %c0_49 = arith.constant 0 : index
    %89 = vector.load %arg17[%c0_48, %c0_49] : memref<1x32xf32, #tpu.memory_space<vmem>>, vector<1x32xf32>
    %90 = vector.broadcast %89 : vector<1x32xf32> to vector<16x32xf32>
    %91 = arith.mulf %88, %90 : vector<16x32xf32>
    %cst_50 = arith.constant dense<0.000000e+00> : vector<16xf32>
    %92 = vector.multi_reduction <add>, %91, %cst_50 [1] : vector<16x32xf32> to vector<16xf32>
    %93 = vector.shape_cast %92 : vector<16xf32> to vector<16x1xf32>
    %c0_51 = arith.constant 0 : index
    %c0_52 = arith.constant 0 : index
    %94 = memref.load %arg18[%c0_51, %c0_52] : memref<1x1xf32, #tpu.memory_space<smem>>
    %95 = vector.broadcast %94 : f32 to vector<16x1xf32>
    %96 = arith.addf %93, %95 : vector<16x1xf32>
    %c0_53 = arith.constant 0 : index
    %c0_54 = arith.constant 0 : index
    %97 = vector.load %arg20[%c0_53, %c0_54] : memref<16x1xf32, #tpu.memory_space<vmem>>, vector<16x1xf32>
    %98 = arith.maximumf %97, %96 : vector<16x1xf32>
    %c0_55 = arith.constant 0 : index
    %c0_56 = arith.constant 0 : index
    %99 = vector.load %arg20[%c0_55, %c0_56] : memref<16x1xf32, #tpu.memory_space<vmem>>, vector<16x1xf32>
    %100 = arith.subf %99, %98 : vector<16x1xf32>
    %101 = math.exp %100 : vector<16x1xf32>
    %102 = arith.subf %96, %98 : vector<16x1xf32>
    %103 = math.exp %102 : vector<16x1xf32>
    %c0_57 = arith.constant 0 : index
    %c0_58 = arith.constant 0 : index
    %104 = vector.load %arg21[%c0_57, %c0_58] : memref<16x1xf32, #tpu.memory_space<vmem>>, vector<16x1xf32>
    %105 = arith.mulf %101, %104 : vector<16x1xf32>
    %106 = arith.addf %105, %103 : vector<16x1xf32>
    %c0_59 = arith.constant 0 : index
    %c0_60 = arith.constant 0 : index
    %107 = vector.load %arg21[%c0_59, %c0_60] : memref<16x1xf32, #tpu.memory_space<vmem>>, vector<16x1xf32>
    tpu.vector_store %arg21[%c0_59, %c0_60], %106 {strides = array<i32>} : memref<16x1xf32, #tpu.memory_space<vmem>>, vector<16x1xf32>,
    %c0_61 = arith.constant 0 : index
    %c0_62 = arith.constant 0 : index
    %108 = vector.load %arg22[%c0_61, %c0_62] : memref<16x32xf32, #tpu.memory_space<vmem>>, vector<16x32xf32>
    %109 = vector.broadcast %101 : vector<16x1xf32> to vector<16x32xf32>
    %110 = arith.mulf %109, %108 : vector<16x32xf32>
    %111 = vector.broadcast %103 : vector<16x1xf32> to vector<16x32xf32>
    %112 = arith.mulf %111, %88 : vector<16x32xf32>
    %113 = arith.addf %110, %112 : vector<16x32xf32>
    %c0_63 = arith.constant 0 : index
    %c0_64 = arith.constant 0 : index
    %114 = vector.load %arg22[%c0_63, %c0_64] : memref<16x32xf32, #tpu.memory_space<vmem>>, vector<16x32xf32>
    tpu.vector_store %arg22[%c0_63, %c0_64], %113 {strides = array<i32>} : memref<16x32xf32, #tpu.memory_space<vmem>>, vector<16x32xf32>,
    %c0_65 = arith.constant 0 : index
    %c0_66 = arith.constant 0 : index
    %115 = vector.load %arg20[%c0_65, %c0_66] : memref<16x1xf32, #tpu.memory_space<vmem>>, vector<16x1xf32>
    tpu.vector_store %arg20[%c0_65, %c0_66], %98 {strides = array<i32>} : memref<16x1xf32, #tpu.memory_space<vmem>>, vector<16x1xf32>,
    %c1_i32 = arith.constant 1 : i32
    %116 = arith.cmpi eq, %arg1, %c1_i32 : i32
    %117 = arith.extui %116 : i1 to i32
    %c0_i32_67 = arith.constant 0 : i32
    %118 = arith.cmpi ne, %117, %c0_i32_67 : i32
    scf.if %118 {
      %c0_68 = arith.constant 0 : index
      %c0_69 = arith.constant 0 : index
      %119 = vector.load %arg22[%c0_68, %c0_69] : memref<16x32xf32, #tpu.memory_space<vmem>>, vector<16x32xf32>
      %c0_70 = arith.constant 0 : index
      %c0_71 = arith.constant 0 : index
      %120 = vector.load %arg21[%c0_70, %c0_71] : memref<16x1xf32, #tpu.memory_space<vmem>>, vector<16x1xf32>
      %121 = vector.broadcast %120 : vector<16x1xf32> to vector<16x32xf32>
      %122 = arith.divf %119, %121 : vector<16x32xf32>
      %c0_72 = arith.constant 0 : index
      %c0_73 = arith.constant 0 : index
      %123 = vector.load %arg19[%c0_72, %c0_73] : memref<16x32xf32, #tpu.memory_space<vmem>>, vector<16x32xf32>
      tpu.vector_store %arg19[%c0_72, %c0_73], %122 {strides = array<i32>} : memref<16x32xf32, #tpu.memory_space<vmem>>, vector<16x32xf32>,
    } else {
    }
    return
  }
  func.func @transform_0(%arg0: i32, %arg1: i32) -> (i32, i32, i32) {
    %c0_i32 = arith.constant 0 : i32
    %c0_i32_0 = arith.constant 0 : i32
    return %arg1, %arg0, %c0_i32 : i32, i32, i32
  }
  func.func @transform_1(%arg0: i32, %arg1: i32) -> (i32, i32, i32) {
    %c0_i32 = arith.constant 0 : i32
    %c0_i32_0 = arith.constant 0 : i32
    return %arg1, %arg0, %c0_i32 : i32, i32, i32
  }
  func.func @transform_2(%arg0: i32, %arg1: i32) -> (i32, i32) {
    %c0_i32 = arith.constant 0 : i32
    %c0_i32_0 = arith.constant 0 : i32
    %c0_i32_1 = arith.constant 0 : i32
    return %c0_i32, %c0_i32_0 : i32, i32
  }
  func.func @transform_3(%arg0: i32, %arg1: i32) -> (i32, i32) {
    %c0_i32 = arith.constant 0 : i32
    %c0_i32_0 = arith.constant 0 : i32
    %c0_i32_1 = arith.constant 0 : i32
    return %c0_i32, %c0_i32_0 : i32, i32
  }
  func.func @transform_4(%arg0: i32, %arg1: i32) -> (i32, i32) {
    %c0_i32 = arith.constant 0 : i32
    %c0_i32_0 = arith.constant 0 : i32
    %c0_i32_1 = arith.constant 0 : i32
    return %c0_i32, %c0_i32_0 : i32, i32
  }
  func.func @transform_5(%arg0: i32, %arg1: i32) -> (i32, i32) {
    %c0_i32 = arith.constant 0 : i32
    %c0_i32_0 = arith.constant 0 : i32
    %c0_i32_1 = arith.constant 0 : i32
    return %c0_i32, %c0_i32_0 : i32, i32
  }
  func.func @transform_6(%arg0: i32, %arg1: i32) -> (i32, i32) {
    %c0_i32 = arith.constant 0 : i32
    %c0_i32_0 = arith.constant 0 : i32
    %c0_i32_1 = arith.constant 0 : i32
    return %c0_i32, %c0_i32_0 : i32, i32
  }
  func.func @transform_7(%arg0: i32, %arg1: i32) -> (i32, i32) {
    %c0_i32 = arith.constant 0 : i32
    %c0_i32_0 = arith.constant 0 : i32
    %c0_i32_1 = arith.constant 0 : i32
    return %c0_i32, %c0_i32_0 : i32, i32
  }
  func.func @transform_8(%arg0: i32, %arg1: i32) -> (i32, i32) {
    %c0_i32 = arith.constant 0 : i32
    %c0_i32_0 = arith.constant 0 : i32
    %c0_i32_1 = arith.constant 0 : i32
    return %c0_i32, %c0_i32_0 : i32, i32
  }
  func.func @transform_9(%arg0: i32, %arg1: i32) -> (i32, i32) {
    %c0_i32 = arith.constant 0 : i32
    %c0_i32_0 = arith.constant 0 : i32
    %c0_i32_1 = arith.constant 0 : i32
    return %c0_i32, %c0_i32_0 : i32, i32
  }
  func.func @transform_10(%arg0: i32, %arg1: i32) -> (i32, i32) {
    %c0_i32 = arith.constant 0 : i32
    %c0_i32_0 = arith.constant 0 : i32
    %c0_i32_1 = arith.constant 0 : i32
    return %c0_i32, %c0_i32_0 : i32, i32
  }
  func.func @transform_11(%arg0: i32, %arg1: i32) -> (i32, i32) {
    %c0_i32 = arith.constant 0 : i32
    %c0_i32_0 = arith.constant 0 : i32
    %c0_i32_1 = arith.constant 0 : i32
    return %c0_i32, %c0_i32_0 : i32, i32
  }
  func.func @transform_12(%arg0: i32, %arg1: i32) -> (i32, i32) {
    %c0_i32 = arith.constant 0 : i32
    %c0_i32_0 = arith.constant 0 : i32
    %c0_i32_1 = arith.constant 0 : i32
    return %c0_i32, %c0_i32_0 : i32, i32
  }
  func.func @transform_13(%arg0: i32, %arg1: i32) -> (i32, i32) {
    %c0_i32 = arith.constant 0 : i32
    %c0_i32_0 = arith.constant 0 : i32
    %c0_i32_1 = arith.constant 0 : i32
    return %c0_i32, %c0_i32_0 : i32, i32
  }
  func.func @transform_14(%arg0: i32, %arg1: i32) -> (i32, i32) {
    %c0_i32 = arith.constant 0 : i32
    %c0_i32_0 = arith.constant 0 : i32
    %c0_i32_1 = arith.constant 0 : i32
    return %c0_i32, %c0_i32_0 : i32, i32
  }
  func.func @transform_15(%arg0: i32, %arg1: i32) -> (i32, i32) {
    %c0_i32 = arith.constant 0 : i32
    %c0_i32_0 = arith.constant 0 : i32
    %c0_i32_1 = arith.constant 0 : i32
    return %c0_i32, %c0_i32_0 : i32, i32
  }
  func.func @transform_16(%arg0: i32, %arg1: i32) -> (i32, i32) {
    %c0_i32 = arith.constant 0 : i32
    %c0_i32_0 = arith.constant 0 : i32
    %c0_i32_1 = arith.constant 0 : i32
    return %c0_i32, %c0_i32_0 : i32, i32
  }
  func.func @transform_17(%arg0: i32, %arg1: i32) -> (i32, i32) {
    %c0_i32 = arith.constant 0 : i32
    %c0_i32_0 = arith.constant 0 : i32
    return %arg0, %c0_i32 : i32, i32
  }
}

module attributes {stable_mosaic.version = 11 : i64} {
  func.func @_cyk_row_kernel(%arg0: i32, %arg1: i32, %arg2: memref<1x16x32xf32, #tpu.memory_space<vmem>>, %arg3: memref<1x16x32xf32, #tpu.memory_space<vmem>>, %arg4: memref<32x64xf32, #tpu.memory_space<vmem>>, %arg5: memref<32x64xf32, #tpu.memory_space<vmem>>, %arg6: memref<1x64xf32, #tpu.memory_space<vmem>>, %arg7: memref<64x32xf32, #tpu.memory_space<vmem>>, %arg8: memref<64x32xf32, #tpu.memory_space<vmem>>, %arg9: memref<64x32xf32, #tpu.memory_space<vmem>>, %arg10: memref<64x32xf32, #tpu.memory_space<vmem>>, %arg11: memref<1x32xf32, #tpu.memory_space<vmem>>, %arg12: memref<1x32xf32, #tpu.memory_space<vmem>>, %arg13: memref<1x32xf32, #tpu.memory_space<vmem>>, %arg14: memref<1x32xf32, #tpu.memory_space<vmem>>, %arg15: memref<1x32xf32, #tpu.memory_space<vmem>>, %arg16: memref<1x32xf32, #tpu.memory_space<vmem>>, %arg17: memref<1x32xf32, #tpu.memory_space<vmem>>, %arg18: memref<1x1xf32, #tpu.memory_space<smem>>, %arg19: memref<16x32xf32, #tpu.memory_space<vmem>>, %arg20: memref<16x1xf32, #tpu.memory_space<vmem>>, %arg21: memref<16x1xf32, #tpu.memory_space<vmem>>, %arg22: memref<16x32xf32, #tpu.memory_space<vmem>>) attributes {dimension_semantics = [#tpu.dimension_semantics<parallel>, #tpu.dimension_semantics<arbitrary>], iteration_bounds = array<i64: 1, 3>, scalar_prefetch = 0 : i64, scratch_operands = 3 : i64, tpu.core_type = #tpu.core_type<tc>, window_params = [{transform_indices = @transform_0, window_bounds = array<i64: 1, 16, 32>}, {transform_indices = @transform_1, window_bounds = array<i64: 1, 16, 32>}, {pipeline_mode = #tpu.pipeline_mode<synchronous>, transform_indices = @transform_2, window_bounds = array<i64: 32, 64>}, {pipeline_mode = #tpu.pipeline_mode<synchronous>, transform_indices = @transform_3, window_bounds = array<i64: 32, 64>}, {pipeline_mode = #tpu.pipeline_mode<synchronous>, transform_indices = @transform_4, window_bounds = array<i64: 1, 64>}, {pipeline_mode = #tpu.pipeline_mode<synchronous>, transform_indices = @transform_5, window_bounds = array<i64: 64, 32>}, {pipeline_mode = #tpu.pipeline_mode<synchronous>, transform_indices = @transform_6, window_bounds = array<i64: 64, 32>}, {pipeline_mode = #tpu.pipeline_mode<synchronous>, transform_indices = @transform_7, window_bounds = array<i64: 64, 32>}, {pipeline_mode = #tpu.pipeline_mode<synchronous>, transform_indices = @transform_8, window_bounds = array<i64: 64, 32>}, {pipeline_mode = #tpu.pipeline_mode<synchronous>, transform_indices = @transform_9, window_bounds = array<i64: 1, 32>}, {pipeline_mode = #tpu.pipeline_mode<synchronous>, transform_indices = @transform_10, window_bounds = array<i64: 1, 32>}, {pipeline_mode = #tpu.pipeline_mode<synchronous>, transform_indices = @transform_11, window_bounds = array<i64: 1, 32>}, {pipeline_mode = #tpu.pipeline_mode<synchronous>, transform_indices = @transform_12, window_bounds = array<i64: 1, 32>}, {pipeline_mode = #tpu.pipeline_mode<synchronous>, transform_indices = @transform_13, window_bounds = array<i64: 1, 32>}, {pipeline_mode = #tpu.pipeline_mode<synchronous>, transform_indices = @transform_14, window_bounds = array<i64: 1, 32>}, {pipeline_mode = #tpu.pipeline_mode<synchronous>, transform_indices = @transform_15, window_bounds = array<i64: 1, 32>}, {transform_indices = @transform_16, window_bounds = array<i64: 1, 1>}, {transform_indices = @transform_17, window_bounds = array<i64: 16, 32>}]} {
    %c0_i32 = arith.constant 0 : i32
    %0 = arith.cmpi eq, %arg1, %c0_i32 : i32
    %1 = arith.extui %0 : i1 to i32
    %c0_i32_0 = arith.constant 0 : i32
    %2 = arith.cmpi ne, %1, %c0_i32_0 : i32
    scf.if %2 {
      %cst_68 = arith.constant 0xFF800000 : f32
      %119 = vector.broadcast %cst_68 : f32 to vector<16x1xf32>
      %c0_69 = arith.constant 0 : index
      %c0_70 = arith.constant 0 : index
      %120 = vector.load %arg20[%c0_69, %c0_70] : memref<16x1xf32, #tpu.memory_space<vmem>>, vector<16x1xf32>
      tpu.vector_store %arg20[%c0_69, %c0_70], %119 {strides = array<i32>} : memref<16x1xf32, #tpu.memory_space<vmem>>, vector<16x1xf32>,
      %cst_71 = arith.constant 0.000000e+00 : f32
      %121 = vector.broadcast %cst_71 : f32 to vector<16x1xf32>
      %c0_72 = arith.constant 0 : index
      %c0_73 = arith.constant 0 : index
      %122 = vector.load %arg21[%c0_72, %c0_73] : memref<16x1xf32, #tpu.memory_space<vmem>>, vector<16x1xf32>
      tpu.vector_store %arg21[%c0_72, %c0_73], %121 {strides = array<i32>} : memref<16x1xf32, #tpu.memory_space<vmem>>, vector<16x1xf32>,
      %cst_74 = arith.constant 0.000000e+00 : f32
      %123 = vector.broadcast %cst_74 : f32 to vector<16x32xf32>
      %c0_75 = arith.constant 0 : index
      %c0_76 = arith.constant 0 : index
      %124 = vector.load %arg22[%c0_75, %c0_76] : memref<16x32xf32, #tpu.memory_space<vmem>>, vector<16x32xf32>
      tpu.vector_store %arg22[%c0_75, %c0_76], %123 {strides = array<i32>} : memref<16x32xf32, #tpu.memory_space<vmem>>, vector<16x32xf32>,
    } else {
    }
    %c0 = arith.constant 0 : index
    %c0_1 = arith.constant 0 : index
    %c0_2 = arith.constant 0 : index
    %3 = vector.load %arg2[%c0, %c0_1, %c0_2] : memref<1x16x32xf32, #tpu.memory_space<vmem>>, vector<1x16x32xf32>
    %4 = vector.shape_cast %3 : vector<1x16x32xf32> to vector<16x32xf32>
    %c0_3 = arith.constant 0 : index
    %c0_4 = arith.constant 0 : index
    %c0_5 = arith.constant 0 : index
    %5 = vector.load %arg3[%c0_3, %c0_4, %c0_5] : memref<1x16x32xf32, #tpu.memory_space<vmem>>, vector<1x16x32xf32>
    %6 = vector.shape_cast %5 : vector<1x16x32xf32> to vector<16x32xf32>
    %c0_6 = arith.constant 0 : index
    %c0_7 = arith.constant 0 : index
    %7 = vector.load %arg4[%c0_6, %c0_7] : memref<32x64xf32, #tpu.memory_space<vmem>>, vector<32x64xf32>
    %cst = arith.constant dense<0.000000e+00> : vector<16x64xf32>
    %8 = tpu.matmul %4, %7, %cst {dimension_numbers = #tpu.dot_dimension_numbers<[1], [0], [0], [1], [0, 0, 1, 1], [], []>} : vector<16x32xf32>, vector<32x64xf32>, vector<16x64xf32> -> vector<16x64xf32>
    %c0_8 = arith.constant 0 : index
    %c0_9 = arith.constant 0 : index
    %9 = vector.load %arg5[%c0_8, %c0_9] : memref<32x64xf32, #tpu.memory_space<vmem>>, vector<32x64xf32>
    %cst_10 = arith.constant dense<0.000000e+00> : vector<16x64xf32>
    %10 = tpu.matmul %6, %9, %cst_10 {dimension_numbers = #tpu.dot_dimension_numbers<[1], [0], [0], [1], [0, 0, 1, 1], [], []>} : vector<16x32xf32>, vector<32x64xf32>, vector<16x64xf32> -> vector<16x64xf32>
    %11 = arith.addf %8, %10 : vector<16x64xf32>
    %c0_11 = arith.constant 0 : index
    %c0_12 = arith.constant 0 : index
    %12 = vector.load %arg6[%c0_11, %c0_12] : memref<1x64xf32, #tpu.memory_space<vmem>>, vector<1x64xf32>
    %13 = vector.broadcast %12 : vector<1x64xf32> to vector<16x64xf32>
    %14 = arith.addf %11, %13 : vector<16x64xf32>
    %cst_13 = arith.constant 0.000000e+00 : f32
    %15 = vector.broadcast %cst_13 : f32 to vector<16x64xf32>
    %16 = arith.maximumf %14, %15 : vector<16x64xf32>
    %c0_14 = arith.constant 0 : index
    %c0_15 = arith.constant 0 : index
    %17 = vector.load %arg7[%c0_14, %c0_15] : memref<64x32xf32, #tpu.memory_space<vmem>>, vector<64x32xf32>
    %cst_16 = arith.constant dense<0.000000e+00> : vector<16x32xf32>
    %18 = tpu.matmul %16, %17, %cst_16 {dimension_numbers = #tpu.dot_dimension_numbers<[1], [0], [0], [1], [0, 0, 1, 1], [], []>} : vector<16x64xf32>, vector<64x32xf32>, vector<16x32xf32> -> vector<16x32xf32>
    %c0_17 = arith.constant 0 : index
    %c0_18 = arith.constant 0 : index
    %19 = vector.load %arg11[%c0_17, %c0_18] : memref<1x32xf32, #tpu.memory_space<vmem>>, vector<1x32xf32>
    %20 = vector.broadcast %19 : vector<1x32xf32> to vector<16x32xf32>
    %21 = arith.addf %18, %20 : vector<16x32xf32>
    %22 = arith.negf %21 : vector<16x32xf32>
    %23 = math.exp %22 : vector<16x32xf32>
    %cst_19 = arith.constant 1.000000e+00 : f32
    %24 = vector.broadcast %cst_19 : f32 to vector<16x32xf32>
    %25 = arith.addf %24, %23 : vector<16x32xf32>
    %26 = arith.divf %24, %25 : vector<16x32xf32>
    %c0_20 = arith.constant 0 : index
    %c0_21 = arith.constant 0 : index
    %27 = vector.load %arg8[%c0_20, %c0_21] : memref<64x32xf32, #tpu.memory_space<vmem>>, vector<64x32xf32>
    %cst_22 = arith.constant dense<0.000000e+00> : vector<16x32xf32>
    %28 = tpu.matmul %16, %27, %cst_22 {dimension_numbers = #tpu.dot_dimension_numbers<[1], [0], [0], [1], [0, 0, 1, 1], [], []>} : vector<16x64xf32>, vector<64x32xf32>, vector<16x32xf32> -> vector<16x32xf32>
    %c0_23 = arith.constant 0 : index
    %c0_24 = arith.constant 0 : index
    %29 = vector.load %arg12[%c0_23, %c0_24] : memref<1x32xf32, #tpu.memory_space<vmem>>, vector<1x32xf32>
    %30 = vector.broadcast %29 : vector<1x32xf32> to vector<16x32xf32>
    %31 = arith.addf %28, %30 : vector<16x32xf32>
    %32 = arith.negf %31 : vector<16x32xf32>
    %33 = math.exp %32 : vector<16x32xf32>
    %cst_25 = arith.constant 1.000000e+00 : f32
    %34 = vector.broadcast %cst_25 : f32 to vector<16x32xf32>
    %35 = arith.addf %34, %33 : vector<16x32xf32>
    %36 = arith.divf %34, %35 : vector<16x32xf32>
    %c0_26 = arith.constant 0 : index
    %c0_27 = arith.constant 0 : index
    %37 = vector.load %arg9[%c0_26, %c0_27] : memref<64x32xf32, #tpu.memory_space<vmem>>, vector<64x32xf32>
    %cst_28 = arith.constant dense<0.000000e+00> : vector<16x32xf32>
    %38 = tpu.matmul %16, %37, %cst_28 {dimension_numbers = #tpu.dot_dimension_numbers<[1], [0], [0], [1], [0, 0, 1, 1], [], []>} : vector<16x64xf32>, vector<64x32xf32>, vector<16x32xf32> -> vector<16x32xf32>
    %c0_29 = arith.constant 0 : index
    %c0_30 = arith.constant 0 : index
    %39 = vector.load %arg13[%c0_29, %c0_30] : memref<1x32xf32, #tpu.memory_space<vmem>>, vector<1x32xf32>
    %40 = vector.broadcast %39 : vector<1x32xf32> to vector<16x32xf32>
    %41 = arith.addf %38, %40 : vector<16x32xf32>
    %42 = arith.negf %41 : vector<16x32xf32>
    %43 = math.exp %42 : vector<16x32xf32>
    %cst_31 = arith.constant 1.000000e+00 : f32
    %44 = vector.broadcast %cst_31 : f32 to vector<16x32xf32>
    %45 = arith.addf %44, %43 : vector<16x32xf32>
    %46 = arith.divf %44, %45 : vector<16x32xf32>
    %c0_32 = arith.constant 0 : index
    %c0_33 = arith.constant 0 : index
    %47 = vector.load %arg10[%c0_32, %c0_33] : memref<64x32xf32, #tpu.memory_space<vmem>>, vector<64x32xf32>
    %cst_34 = arith.constant dense<0.000000e+00> : vector<16x32xf32>
    %48 = tpu.matmul %16, %47, %cst_34 {dimension_numbers = #tpu.dot_dimension_numbers<[1], [0], [0], [1], [0, 0, 1, 1], [], []>} : vector<16x64xf32>, vector<64x32xf32>, vector<16x32xf32> -> vector<16x32xf32>
    %c0_35 = arith.constant 0 : index
    %c0_36 = arith.constant 0 : index
    %49 = vector.load %arg14[%c0_35, %c0_36] : memref<1x32xf32, #tpu.memory_space<vmem>>, vector<1x32xf32>
    %50 = vector.broadcast %49 : vector<1x32xf32> to vector<16x32xf32>
    %51 = arith.addf %48, %50 : vector<16x32xf32>
    %52 = arith.mulf %26, %4 : vector<16x32xf32>
    %53 = arith.mulf %36, %6 : vector<16x32xf32>
    %54 = arith.addf %52, %53 : vector<16x32xf32>
    %55 = arith.mulf %46, %51 : vector<16x32xf32>
    %56 = arith.addf %54, %55 : vector<16x32xf32>
    %c0_37 = arith.constant 0 : index
    %c0_38 = arith.constant 0 : index
    %57 = vector.load %arg15[%c0_37, %c0_38] : memref<1x32xf32, #tpu.memory_space<vmem>>, vector<1x32xf32>
    %c0_39 = arith.constant 0 : index
    %c0_40 = arith.constant 0 : index
    %58 = vector.load %arg16[%c0_39, %c0_40] : memref<1x32xf32, #tpu.memory_space<vmem>>, vector<1x32xf32>
    %cst_41 = arith.constant dense<0.000000e+00> : vector<16xf32>
    %59 = vector.multi_reduction <add>, %56, %cst_41 [1] : vector<16x32xf32> to vector<16xf32>
    %60 = vector.shape_cast %59 : vector<16xf32> to vector<16x1xf32>
    %cst_42 = arith.constant 3.200000e+01 : f32
    %61 = vector.broadcast %cst_42 : f32 to vector<16x1xf32>
    %62 = arith.divf %60, %61 : vector<16x1xf32>
    %63 = vector.broadcast %62 : vector<16x1xf32> to vector<16x32xf32>
    %64 = arith.subf %56, %63 : vector<16x32xf32>
    %65 = arith.mulf %64, %64 : vector<16x32xf32>
    %cst_43 = arith.constant dense<0.000000e+00> : vector<16xf32>
    %66 = vector.multi_reduction <add>, %65, %cst_43 [1] : vector<16x32xf32> to vector<16xf32>
    %67 = vector.shape_cast %66 : vector<16xf32> to vector<16x1xf32>
    %cst_44 = arith.constant 3.200000e+01 : f32
    %68 = vector.broadcast %cst_44 : f32 to vector<16x1xf32>
    %69 = arith.divf %67, %68 : vector<16x1xf32>
    %70 = vector.broadcast %62 : vector<16x1xf32> to vector<16x32xf32>
    %71 = arith.subf %56, %70 : vector<16x32xf32>
    %cst_45 = arith.constant 9.99999974E-6 : f32
    %72 = vector.broadcast %cst_45 : f32 to vector<16x1xf32>
    %73 = arith.addf %69, %72 : vector<16x1xf32>
    %74 = math.rsqrt %73 : vector<16x1xf32>
    %75 = vector.broadcast %74 : vector<16x1xf32> to vector<16x32xf32>
    %76 = arith.mulf %71, %75 : vector<16x32xf32>
    %77 = vector.broadcast %57 : vector<1x32xf32> to vector<16x32xf32>
    %78 = arith.mulf %76, %77 : vector<16x32xf32>
    %79 = vector.broadcast %58 : vector<1x32xf32> to vector<16x32xf32>
    %80 = arith.addf %78, %79 : vector<16x32xf32>
    %81 = arith.mulf %80, %80 : vector<16x32xf32>
    %cst_46 = arith.constant dense<0.000000e+00> : vector<16xf32>
    %82 = vector.multi_reduction <add>, %81, %cst_46 [1] : vector<16x32xf32> to vector<16xf32>
    %83 = vector.shape_cast %82 : vector<16xf32> to vector<16x1xf32>
    %84 = math.sqrt %83 : vector<16x1xf32>
    %cst_47 = arith.constant 9.99999993E-9 : f32
    %85 = vector.broadcast %cst_47 : f32 to vector<16x1xf32>
    %86 = arith.addf %84, %85 : vector<16x1xf32>
    %87 = vector.broadcast %86 : vector<16x1xf32> to vector<16x32xf32>
    %88 = arith.divf %80, %87 : vector<16x32xf32>
    %c0_48 = arith.constant 0 : index
    %c0_49 = arith.constant 0 : index
    %89 = vector.load %arg17[%c0_48, %c0_49] : memref<1x32xf32, #tpu.memory_space<vmem>>, vector<1x32xf32>
    %90 = vector.broadcast %89 : vector<1x32xf32> to vector<16x32xf32>
    %91 = arith.mulf %88, %90 : vector<16x32xf32>
    %cst_50 = arith.constant dense<0.000000e+00> : vector<16xf32>
    %92 = vector.multi_reduction <add>, %91, %cst_50 [1] : vector<16x32xf32> to vector<16xf32>
    %93 = vector.shape_cast %92 : vector<16xf32> to vector<16x1xf32>
    %c0_51 = arith.constant 0 : index
    %c0_52 = arith.constant 0 : index
    %94 = memref.load %arg18[%c0_51, %c0_52] : memref<1x1xf32, #tpu.memory_space<smem>>
    %95 = vector.broadcast %94 : f32 to vector<16x1xf32>
    %96 = arith.addf %93, %95 : vector<16x1xf32>
    %c0_53 = arith.constant 0 : index
    %c0_54 = arith.constant 0 : index
    %97 = vector.load %arg20[%c0_53, %c0_54] : memref<16x1xf32, #tpu.memory_space<vmem>>, vector<16x1xf32>
    %98 = arith.maximumf %97, %96 : vector<16x1xf32>
    %c0_55 = arith.constant 0 : index
    %c0_56 = arith.constant 0 : index
    %99 = vector.load %arg20[%c0_55, %c0_56] : memref<16x1xf32, #tpu.memory_space<vmem>>, vector<16x1xf32>
    %100 = arith.subf %99, %98 : vector<16x1xf32>
    %101 = math.exp %100 : vector<16x1xf32>
    %102 = arith.subf %96, %98 : vector<16x1xf32>
    %103 = math.exp %102 : vector<16x1xf32>
    %c0_57 = arith.constant 0 : index
    %c0_58 = arith.constant 0 : index
    %104 = vector.load %arg21[%c0_57, %c0_58] : memref<16x1xf32, #tpu.memory_space<vmem>>, vector<16x1xf32>
    %105 = arith.mulf %101, %104 : vector<16x1xf32>
    %106 = arith.addf %105, %103 : vector<16x1xf32>
    %c0_59 = arith.constant 0 : index
    %c0_60 = arith.constant 0 : index
    %107 = vector.load %arg21[%c0_59, %c0_60] : memref<16x1xf32, #tpu.memory_space<vmem>>, vector<16x1xf32>
    tpu.vector_store %arg21[%c0_59, %c0_60], %106 {strides = array<i32>} : memref<16x1xf32, #tpu.memory_space<vmem>>, vector<16x1xf32>,
    %c0_61 = arith.constant 0 : index
    %c0_62 = arith.constant 0 : index
    %108 = vector.load %arg22[%c0_61, %c0_62] : memref<16x32xf32, #tpu.memory_space<vmem>>, vector<16x32xf32>
    %109 = vector.broadcast %101 : vector<16x1xf32> to vector<16x32xf32>
    %110 = arith.mulf %109, %108 : vector<16x32xf32>
    %111 = vector.broadcast %103 : vector<16x1xf32> to vector<16x32xf32>
    %112 = arith.mulf %111, %88 : vector<16x32xf32>
    %113 = arith.addf %110, %112 : vector<16x32xf32>
    %c0_63 = arith.constant 0 : index
    %c0_64 = arith.constant 0 : index
    %114 = vector.load %arg22[%c0_63, %c0_64] : memref<16x32xf32, #tpu.memory_space<vmem>>, vector<16x32xf32>
    tpu.vector_store %arg22[%c0_63, %c0_64], %113 {strides = array<i32>} : memref<16x32xf32, #tpu.memory_space<vmem>>, vector<16x32xf32>,
    %c0_65 = arith.constant 0 : index
    %c0_66 = arith.constant 0 : index
    %115 = vector.load %arg20[%c0_65, %c0_66] : memref<16x1xf32, #tpu.memory_space<vmem>>, vector<16x1xf32>
    tpu.vector_store %arg20[%c0_65, %c0_66], %98 {strides = array<i32>} : memref<16x1xf32, #tpu.memory_space<vmem>>, vector<16x1xf32>,
    %c2_i32 = arith.constant 2 : i32
    %116 = arith.cmpi eq, %arg1, %c2_i32 : i32
    %117 = arith.extui %116 : i1 to i32
    %c0_i32_67 = arith.constant 0 : i32
    %118 = arith.cmpi ne, %117, %c0_i32_67 : i32
    scf.if %118 {
      %c0_68 = arith.constant 0 : index
      %c0_69 = arith.constant 0 : index
      %119 = vector.load %arg22[%c0_68, %c0_69] : memref<16x32xf32, #tpu.memory_space<vmem>>, vector<16x32xf32>
      %c0_70 = arith.constant 0 : index
      %c0_71 = arith.constant 0 : index
      %120 = vector.load %arg21[%c0_70, %c0_71] : memref<16x1xf32, #tpu.memory_space<vmem>>, vector<16x1xf32>
      %121 = vector.broadcast %120 : vector<16x1xf32> to vector<16x32xf32>
      %122 = arith.divf %119, %121 : vector<16x32xf32>
      %c0_72 = arith.constant 0 : index
      %c0_73 = arith.constant 0 : index
      %123 = vector.load %arg19[%c0_72, %c0_73] : memref<16x32xf32, #tpu.memory_space<vmem>>, vector<16x32xf32>
      tpu.vector_store %arg19[%c0_72, %c0_73], %122 {strides = array<i32>} : memref<16x32xf32, #tpu.memory_space<vmem>>, vector<16x32xf32>,
    } else {
    }
    return
  }
  func.func @transform_0(%arg0: i32, %arg1: i32) -> (i32, i32, i32) {
    %c0_i32 = arith.constant 0 : i32
    %c0_i32_0 = arith.constant 0 : i32
    return %arg1, %arg0, %c0_i32 : i32, i32, i32
  }
  func.func @transform_1(%arg0: i32, %arg1: i32) -> (i32, i32, i32) {
    %c0_i32 = arith.constant 0 : i32
    %c0_i32_0 = arith.constant 0 : i32
    return %arg1, %arg0, %c0_i32 : i32, i32, i32
  }
  func.func @transform_2(%arg0: i32, %arg1: i32) -> (i32, i32) {
    %c0_i32 = arith.constant 0 : i32
    %c0_i32_0 = arith.constant 0 : i32
    %c0_i32_1 = arith.constant 0 : i32
    return %c0_i32, %c0_i32_0 : i32, i32
  }
  func.func @transform_3(%arg0: i32, %arg1: i32) -> (i32, i32) {
    %c0_i32 = arith.constant 0 : i32
    %c0_i32_0 = arith.constant 0 : i32
    %c0_i32_1 = arith.constant 0 : i32
    return %c0_i32, %c0_i32_0 : i32, i32
  }
  func.func @transform_4(%arg0: i32, %arg1: i32) -> (i32, i32) {
    %c0_i32 = arith.constant 0 : i32
    %c0_i32_0 = arith.constant 0 : i32
    %c0_i32_1 = arith.constant 0 : i32
    return %c0_i32, %c0_i32_0 : i32, i32
  }
  func.func @transform_5(%arg0: i32, %arg1: i32) -> (i32, i32) {
    %c0_i32 = arith.constant 0 : i32
    %c0_i32_0 = arith.constant 0 : i32
    %c0_i32_1 = arith.constant 0 : i32
    return %c0_i32, %c0_i32_0 : i32, i32
  }
  func.func @transform_6(%arg0: i32, %arg1: i32) -> (i32, i32) {
    %c0_i32 = arith.constant 0 : i32
    %c0_i32_0 = arith.constant 0 : i32
    %c0_i32_1 = arith.constant 0 : i32
    return %c0_i32, %c0_i32_0 : i32, i32
  }
  func.func @transform_7(%arg0: i32, %arg1: i32) -> (i32, i32) {
    %c0_i32 = arith.constant 0 : i32
    %c0_i32_0 = arith.constant 0 : i32
    %c0_i32_1 = arith.constant 0 : i32
    return %c0_i32, %c0_i32_0 : i32, i32
  }
  func.func @transform_8(%arg0: i32, %arg1: i32) -> (i32, i32) {
    %c0_i32 = arith.constant 0 : i32
    %c0_i32_0 = arith.constant 0 : i32
    %c0_i32_1 = arith.constant 0 : i32
    return %c0_i32, %c0_i32_0 : i32, i32
  }
  func.func @transform_9(%arg0: i32, %arg1: i32) -> (i32, i32) {
    %c0_i32 = arith.constant 0 : i32
    %c0_i32_0 = arith.constant 0 : i32
    %c0_i32_1 = arith.constant 0 : i32
    return %c0_i32, %c0_i32_0 : i32, i32
  }
  func.func @transform_10(%arg0: i32, %arg1: i32) -> (i32, i32) {
    %c0_i32 = arith.constant 0 : i32
    %c0_i32_0 = arith.constant 0 : i32
    %c0_i32_1 = arith.constant 0 : i32
    return %c0_i32, %c0_i32_0 : i32, i32
  }
  func.func @transform_11(%arg0: i32, %arg1: i32) -> (i32, i32) {
    %c0_i32 = arith.constant 0 : i32
    %c0_i32_0 = arith.constant 0 : i32
    %c0_i32_1 = arith.constant 0 : i32
    return %c0_i32, %c0_i32_0 : i32, i32
  }
  func.func @transform_12(%arg0: i32, %arg1: i32) -> (i32, i32) {
    %c0_i32 = arith.constant 0 : i32
    %c0_i32_0 = arith.constant 0 : i32
    %c0_i32_1 = arith.constant 0 : i32
    return %c0_i32, %c0_i32_0 : i32, i32
  }
  func.func @transform_13(%arg0: i32, %arg1: i32) -> (i32, i32) {
    %c0_i32 = arith.constant 0 : i32
    %c0_i32_0 = arith.constant 0 : i32
    %c0_i32_1 = arith.constant 0 : i32
    return %c0_i32, %c0_i32_0 : i32, i32
  }
  func.func @transform_14(%arg0: i32, %arg1: i32) -> (i32, i32) {
    %c0_i32 = arith.constant 0 : i32
    %c0_i32_0 = arith.constant 0 : i32
    %c0_i32_1 = arith.constant 0 : i32
    return %c0_i32, %c0_i32_0 : i32, i32
  }
  func.func @transform_15(%arg0: i32, %arg1: i32) -> (i32, i32) {
    %c0_i32 = arith.constant 0 : i32
    %c0_i32_0 = arith.constant 0 : i32
    %c0_i32_1 = arith.constant 0 : i32
    return %c0_i32, %c0_i32_0 : i32, i32
  }
  func.func @transform_16(%arg0: i32, %arg1: i32) -> (i32, i32) {
    %c0_i32 = arith.constant 0 : i32
    %c0_i32_0 = arith.constant 0 : i32
    %c0_i32_1 = arith.constant 0 : i32
    return %c0_i32, %c0_i32_0 : i32, i32
  }
  func.func @transform_17(%arg0: i32, %arg1: i32) -> (i32, i32) {
    %c0_i32 = arith.constant 0 : i32
    %c0_i32_0 = arith.constant 0 : i32
    return %arg0, %c0_i32 : i32, i32
  }
}

module attributes {stable_mosaic.version = 11 : i64} {
  func.func @_cyk_row_kernel(%arg0: i32, %arg1: i32, %arg2: memref<1x8x32xf32, #tpu.memory_space<vmem>>, %arg3: memref<1x8x32xf32, #tpu.memory_space<vmem>>, %arg4: memref<32x64xf32, #tpu.memory_space<vmem>>, %arg5: memref<32x64xf32, #tpu.memory_space<vmem>>, %arg6: memref<1x64xf32, #tpu.memory_space<vmem>>, %arg7: memref<64x32xf32, #tpu.memory_space<vmem>>, %arg8: memref<64x32xf32, #tpu.memory_space<vmem>>, %arg9: memref<64x32xf32, #tpu.memory_space<vmem>>, %arg10: memref<64x32xf32, #tpu.memory_space<vmem>>, %arg11: memref<1x32xf32, #tpu.memory_space<vmem>>, %arg12: memref<1x32xf32, #tpu.memory_space<vmem>>, %arg13: memref<1x32xf32, #tpu.memory_space<vmem>>, %arg14: memref<1x32xf32, #tpu.memory_space<vmem>>, %arg15: memref<1x32xf32, #tpu.memory_space<vmem>>, %arg16: memref<1x32xf32, #tpu.memory_space<vmem>>, %arg17: memref<1x32xf32, #tpu.memory_space<vmem>>, %arg18: memref<1x1xf32, #tpu.memory_space<smem>>, %arg19: memref<8x32xf32, #tpu.memory_space<vmem>>, %arg20: memref<8x1xf32, #tpu.memory_space<vmem>>, %arg21: memref<8x1xf32, #tpu.memory_space<vmem>>, %arg22: memref<8x32xf32, #tpu.memory_space<vmem>>) attributes {dimension_semantics = [#tpu.dimension_semantics<parallel>, #tpu.dimension_semantics<arbitrary>], iteration_bounds = array<i64: 1, 4>, scalar_prefetch = 0 : i64, scratch_operands = 3 : i64, tpu.core_type = #tpu.core_type<tc>, window_params = [{transform_indices = @transform_0, window_bounds = array<i64: 1, 8, 32>}, {transform_indices = @transform_1, window_bounds = array<i64: 1, 8, 32>}, {pipeline_mode = #tpu.pipeline_mode<synchronous>, transform_indices = @transform_2, window_bounds = array<i64: 32, 64>}, {pipeline_mode = #tpu.pipeline_mode<synchronous>, transform_indices = @transform_3, window_bounds = array<i64: 32, 64>}, {pipeline_mode = #tpu.pipeline_mode<synchronous>, transform_indices = @transform_4, window_bounds = array<i64: 1, 64>}, {pipeline_mode = #tpu.pipeline_mode<synchronous>, transform_indices = @transform_5, window_bounds = array<i64: 64, 32>}, {pipeline_mode = #tpu.pipeline_mode<synchronous>, transform_indices = @transform_6, window_bounds = array<i64: 64, 32>}, {pipeline_mode = #tpu.pipeline_mode<synchronous>, transform_indices = @transform_7, window_bounds = array<i64: 64, 32>}, {pipeline_mode = #tpu.pipeline_mode<synchronous>, transform_indices = @transform_8, window_bounds = array<i64: 64, 32>}, {pipeline_mode = #tpu.pipeline_mode<synchronous>, transform_indices = @transform_9, window_bounds = array<i64: 1, 32>}, {pipeline_mode = #tpu.pipeline_mode<synchronous>, transform_indices = @transform_10, window_bounds = array<i64: 1, 32>}, {pipeline_mode = #tpu.pipeline_mode<synchronous>, transform_indices = @transform_11, window_bounds = array<i64: 1, 32>}, {pipeline_mode = #tpu.pipeline_mode<synchronous>, transform_indices = @transform_12, window_bounds = array<i64: 1, 32>}, {pipeline_mode = #tpu.pipeline_mode<synchronous>, transform_indices = @transform_13, window_bounds = array<i64: 1, 32>}, {pipeline_mode = #tpu.pipeline_mode<synchronous>, transform_indices = @transform_14, window_bounds = array<i64: 1, 32>}, {pipeline_mode = #tpu.pipeline_mode<synchronous>, transform_indices = @transform_15, window_bounds = array<i64: 1, 32>}, {transform_indices = @transform_16, window_bounds = array<i64: 1, 1>}, {transform_indices = @transform_17, window_bounds = array<i64: 8, 32>}]} {
    %c0_i32 = arith.constant 0 : i32
    %0 = arith.cmpi eq, %arg1, %c0_i32 : i32
    %1 = arith.extui %0 : i1 to i32
    %c0_i32_0 = arith.constant 0 : i32
    %2 = arith.cmpi ne, %1, %c0_i32_0 : i32
    scf.if %2 {
      %cst_68 = arith.constant 0xFF800000 : f32
      %119 = vector.broadcast %cst_68 : f32 to vector<8x1xf32>
      %c0_69 = arith.constant 0 : index
      %c0_70 = arith.constant 0 : index
      %120 = vector.load %arg20[%c0_69, %c0_70] : memref<8x1xf32, #tpu.memory_space<vmem>>, vector<8x1xf32>
      tpu.vector_store %arg20[%c0_69, %c0_70], %119 {strides = array<i32>} : memref<8x1xf32, #tpu.memory_space<vmem>>, vector<8x1xf32>,
      %cst_71 = arith.constant 0.000000e+00 : f32
      %121 = vector.broadcast %cst_71 : f32 to vector<8x1xf32>
      %c0_72 = arith.constant 0 : index
      %c0_73 = arith.constant 0 : index
      %122 = vector.load %arg21[%c0_72, %c0_73] : memref<8x1xf32, #tpu.memory_space<vmem>>, vector<8x1xf32>
      tpu.vector_store %arg21[%c0_72, %c0_73], %121 {strides = array<i32>} : memref<8x1xf32, #tpu.memory_space<vmem>>, vector<8x1xf32>,
      %cst_74 = arith.constant 0.000000e+00 : f32
      %123 = vector.broadcast %cst_74 : f32 to vector<8x32xf32>
      %c0_75 = arith.constant 0 : index
      %c0_76 = arith.constant 0 : index
      %124 = vector.load %arg22[%c0_75, %c0_76] : memref<8x32xf32, #tpu.memory_space<vmem>>, vector<8x32xf32>
      tpu.vector_store %arg22[%c0_75, %c0_76], %123 {strides = array<i32>} : memref<8x32xf32, #tpu.memory_space<vmem>>, vector<8x32xf32>,
    } else {
    }
    %c0 = arith.constant 0 : index
    %c0_1 = arith.constant 0 : index
    %c0_2 = arith.constant 0 : index
    %3 = vector.load %arg2[%c0, %c0_1, %c0_2] : memref<1x8x32xf32, #tpu.memory_space<vmem>>, vector<1x8x32xf32>
    %4 = vector.shape_cast %3 : vector<1x8x32xf32> to vector<8x32xf32>
    %c0_3 = arith.constant 0 : index
    %c0_4 = arith.constant 0 : index
    %c0_5 = arith.constant 0 : index
    %5 = vector.load %arg3[%c0_3, %c0_4, %c0_5] : memref<1x8x32xf32, #tpu.memory_space<vmem>>, vector<1x8x32xf32>
    %6 = vector.shape_cast %5 : vector<1x8x32xf32> to vector<8x32xf32>
    %c0_6 = arith.constant 0 : index
    %c0_7 = arith.constant 0 : index
    %7 = vector.load %arg4[%c0_6, %c0_7] : memref<32x64xf32, #tpu.memory_space<vmem>>, vector<32x64xf32>
    %cst = arith.constant dense<0.000000e+00> : vector<8x64xf32>
    %8 = tpu.matmul %4, %7, %cst {dimension_numbers = #tpu.dot_dimension_numbers<[1], [0], [0], [1], [0, 0, 1, 1], [], []>} : vector<8x32xf32>, vector<32x64xf32>, vector<8x64xf32> -> vector<8x64xf32>
    %c0_8 = arith.constant 0 : index
    %c0_9 = arith.constant 0 : index
    %9 = vector.load %arg5[%c0_8, %c0_9] : memref<32x64xf32, #tpu.memory_space<vmem>>, vector<32x64xf32>
    %cst_10 = arith.constant dense<0.000000e+00> : vector<8x64xf32>
    %10 = tpu.matmul %6, %9, %cst_10 {dimension_numbers = #tpu.dot_dimension_numbers<[1], [0], [0], [1], [0, 0, 1, 1], [], []>} : vector<8x32xf32>, vector<32x64xf32>, vector<8x64xf32> -> vector<8x64xf32>
    %11 = arith.addf %8, %10 : vector<8x64xf32>
    %c0_11 = arith.constant 0 : index
    %c0_12 = arith.constant 0 : index
    %12 = vector.load %arg6[%c0_11, %c0_12] : memref<1x64xf32, #tpu.memory_space<vmem>>, vector<1x64xf32>
    %13 = vector.broadcast %12 : vector<1x64xf32> to vector<8x64xf32>
    %14 = arith.addf %11, %13 : vector<8x64xf32>
    %cst_13 = arith.constant 0.000000e+00 : f32
    %15 = vector.broadcast %cst_13 : f32 to vector<8x64xf32>
    %16 = arith.maximumf %14, %15 : vector<8x64xf32>
    %c0_14 = arith.constant 0 : index
    %c0_15 = arith.constant 0 : index
    %17 = vector.load %arg7[%c0_14, %c0_15] : memref<64x32xf32, #tpu.memory_space<vmem>>, vector<64x32xf32>
    %cst_16 = arith.constant dense<0.000000e+00> : vector<8x32xf32>
    %18 = tpu.matmul %16, %17, %cst_16 {dimension_numbers = #tpu.dot_dimension_numbers<[1], [0], [0], [1], [0, 0, 1, 1], [], []>} : vector<8x64xf32>, vector<64x32xf32>, vector<8x32xf32> -> vector<8x32xf32>
    %c0_17 = arith.constant 0 : index
    %c0_18 = arith.constant 0 : index
    %19 = vector.load %arg11[%c0_17, %c0_18] : memref<1x32xf32, #tpu.memory_space<vmem>>, vector<1x32xf32>
    %20 = vector.broadcast %19 : vector<1x32xf32> to vector<8x32xf32>
    %21 = arith.addf %18, %20 : vector<8x32xf32>
    %22 = arith.negf %21 : vector<8x32xf32>
    %23 = math.exp %22 : vector<8x32xf32>
    %cst_19 = arith.constant 1.000000e+00 : f32
    %24 = vector.broadcast %cst_19 : f32 to vector<8x32xf32>
    %25 = arith.addf %24, %23 : vector<8x32xf32>
    %26 = arith.divf %24, %25 : vector<8x32xf32>
    %c0_20 = arith.constant 0 : index
    %c0_21 = arith.constant 0 : index
    %27 = vector.load %arg8[%c0_20, %c0_21] : memref<64x32xf32, #tpu.memory_space<vmem>>, vector<64x32xf32>
    %cst_22 = arith.constant dense<0.000000e+00> : vector<8x32xf32>
    %28 = tpu.matmul %16, %27, %cst_22 {dimension_numbers = #tpu.dot_dimension_numbers<[1], [0], [0], [1], [0, 0, 1, 1], [], []>} : vector<8x64xf32>, vector<64x32xf32>, vector<8x32xf32> -> vector<8x32xf32>
    %c0_23 = arith.constant 0 : index
    %c0_24 = arith.constant 0 : index
    %29 = vector.load %arg12[%c0_23, %c0_24] : memref<1x32xf32, #tpu.memory_space<vmem>>, vector<1x32xf32>
    %30 = vector.broadcast %29 : vector<1x32xf32> to vector<8x32xf32>
    %31 = arith.addf %28, %30 : vector<8x32xf32>
    %32 = arith.negf %31 : vector<8x32xf32>
    %33 = math.exp %32 : vector<8x32xf32>
    %cst_25 = arith.constant 1.000000e+00 : f32
    %34 = vector.broadcast %cst_25 : f32 to vector<8x32xf32>
    %35 = arith.addf %34, %33 : vector<8x32xf32>
    %36 = arith.divf %34, %35 : vector<8x32xf32>
    %c0_26 = arith.constant 0 : index
    %c0_27 = arith.constant 0 : index
    %37 = vector.load %arg9[%c0_26, %c0_27] : memref<64x32xf32, #tpu.memory_space<vmem>>, vector<64x32xf32>
    %cst_28 = arith.constant dense<0.000000e+00> : vector<8x32xf32>
    %38 = tpu.matmul %16, %37, %cst_28 {dimension_numbers = #tpu.dot_dimension_numbers<[1], [0], [0], [1], [0, 0, 1, 1], [], []>} : vector<8x64xf32>, vector<64x32xf32>, vector<8x32xf32> -> vector<8x32xf32>
    %c0_29 = arith.constant 0 : index
    %c0_30 = arith.constant 0 : index
    %39 = vector.load %arg13[%c0_29, %c0_30] : memref<1x32xf32, #tpu.memory_space<vmem>>, vector<1x32xf32>
    %40 = vector.broadcast %39 : vector<1x32xf32> to vector<8x32xf32>
    %41 = arith.addf %38, %40 : vector<8x32xf32>
    %42 = arith.negf %41 : vector<8x32xf32>
    %43 = math.exp %42 : vector<8x32xf32>
    %cst_31 = arith.constant 1.000000e+00 : f32
    %44 = vector.broadcast %cst_31 : f32 to vector<8x32xf32>
    %45 = arith.addf %44, %43 : vector<8x32xf32>
    %46 = arith.divf %44, %45 : vector<8x32xf32>
    %c0_32 = arith.constant 0 : index
    %c0_33 = arith.constant 0 : index
    %47 = vector.load %arg10[%c0_32, %c0_33] : memref<64x32xf32, #tpu.memory_space<vmem>>, vector<64x32xf32>
    %cst_34 = arith.constant dense<0.000000e+00> : vector<8x32xf32>
    %48 = tpu.matmul %16, %47, %cst_34 {dimension_numbers = #tpu.dot_dimension_numbers<[1], [0], [0], [1], [0, 0, 1, 1], [], []>} : vector<8x64xf32>, vector<64x32xf32>, vector<8x32xf32> -> vector<8x32xf32>
    %c0_35 = arith.constant 0 : index
    %c0_36 = arith.constant 0 : index
    %49 = vector.load %arg14[%c0_35, %c0_36] : memref<1x32xf32, #tpu.memory_space<vmem>>, vector<1x32xf32>
    %50 = vector.broadcast %49 : vector<1x32xf32> to vector<8x32xf32>
    %51 = arith.addf %48, %50 : vector<8x32xf32>
    %52 = arith.mulf %26, %4 : vector<8x32xf32>
    %53 = arith.mulf %36, %6 : vector<8x32xf32>
    %54 = arith.addf %52, %53 : vector<8x32xf32>
    %55 = arith.mulf %46, %51 : vector<8x32xf32>
    %56 = arith.addf %54, %55 : vector<8x32xf32>
    %c0_37 = arith.constant 0 : index
    %c0_38 = arith.constant 0 : index
    %57 = vector.load %arg15[%c0_37, %c0_38] : memref<1x32xf32, #tpu.memory_space<vmem>>, vector<1x32xf32>
    %c0_39 = arith.constant 0 : index
    %c0_40 = arith.constant 0 : index
    %58 = vector.load %arg16[%c0_39, %c0_40] : memref<1x32xf32, #tpu.memory_space<vmem>>, vector<1x32xf32>
    %cst_41 = arith.constant dense<0.000000e+00> : vector<8xf32>
    %59 = vector.multi_reduction <add>, %56, %cst_41 [1] : vector<8x32xf32> to vector<8xf32>
    %60 = vector.shape_cast %59 : vector<8xf32> to vector<8x1xf32>
    %cst_42 = arith.constant 3.200000e+01 : f32
    %61 = vector.broadcast %cst_42 : f32 to vector<8x1xf32>
    %62 = arith.divf %60, %61 : vector<8x1xf32>
    %63 = vector.broadcast %62 : vector<8x1xf32> to vector<8x32xf32>
    %64 = arith.subf %56, %63 : vector<8x32xf32>
    %65 = arith.mulf %64, %64 : vector<8x32xf32>
    %cst_43 = arith.constant dense<0.000000e+00> : vector<8xf32>
    %66 = vector.multi_reduction <add>, %65, %cst_43 [1] : vector<8x32xf32> to vector<8xf32>
    %67 = vector.shape_cast %66 : vector<8xf32> to vector<8x1xf32>
    %cst_44 = arith.constant 3.200000e+01 : f32
    %68 = vector.broadcast %cst_44 : f32 to vector<8x1xf32>
    %69 = arith.divf %67, %68 : vector<8x1xf32>
    %70 = vector.broadcast %62 : vector<8x1xf32> to vector<8x32xf32>
    %71 = arith.subf %56, %70 : vector<8x32xf32>
    %cst_45 = arith.constant 9.99999974E-6 : f32
    %72 = vector.broadcast %cst_45 : f32 to vector<8x1xf32>
    %73 = arith.addf %69, %72 : vector<8x1xf32>
    %74 = math.rsqrt %73 : vector<8x1xf32>
    %75 = vector.broadcast %74 : vector<8x1xf32> to vector<8x32xf32>
    %76 = arith.mulf %71, %75 : vector<8x32xf32>
    %77 = vector.broadcast %57 : vector<1x32xf32> to vector<8x32xf32>
    %78 = arith.mulf %76, %77 : vector<8x32xf32>
    %79 = vector.broadcast %58 : vector<1x32xf32> to vector<8x32xf32>
    %80 = arith.addf %78, %79 : vector<8x32xf32>
    %81 = arith.mulf %80, %80 : vector<8x32xf32>
    %cst_46 = arith.constant dense<0.000000e+00> : vector<8xf32>
    %82 = vector.multi_reduction <add>, %81, %cst_46 [1] : vector<8x32xf32> to vector<8xf32>
    %83 = vector.shape_cast %82 : vector<8xf32> to vector<8x1xf32>
    %84 = math.sqrt %83 : vector<8x1xf32>
    %cst_47 = arith.constant 9.99999993E-9 : f32
    %85 = vector.broadcast %cst_47 : f32 to vector<8x1xf32>
    %86 = arith.addf %84, %85 : vector<8x1xf32>
    %87 = vector.broadcast %86 : vector<8x1xf32> to vector<8x32xf32>
    %88 = arith.divf %80, %87 : vector<8x32xf32>
    %c0_48 = arith.constant 0 : index
    %c0_49 = arith.constant 0 : index
    %89 = vector.load %arg17[%c0_48, %c0_49] : memref<1x32xf32, #tpu.memory_space<vmem>>, vector<1x32xf32>
    %90 = vector.broadcast %89 : vector<1x32xf32> to vector<8x32xf32>
    %91 = arith.mulf %88, %90 : vector<8x32xf32>
    %cst_50 = arith.constant dense<0.000000e+00> : vector<8xf32>
    %92 = vector.multi_reduction <add>, %91, %cst_50 [1] : vector<8x32xf32> to vector<8xf32>
    %93 = vector.shape_cast %92 : vector<8xf32> to vector<8x1xf32>
    %c0_51 = arith.constant 0 : index
    %c0_52 = arith.constant 0 : index
    %94 = memref.load %arg18[%c0_51, %c0_52] : memref<1x1xf32, #tpu.memory_space<smem>>
    %95 = vector.broadcast %94 : f32 to vector<8x1xf32>
    %96 = arith.addf %93, %95 : vector<8x1xf32>
    %c0_53 = arith.constant 0 : index
    %c0_54 = arith.constant 0 : index
    %97 = vector.load %arg20[%c0_53, %c0_54] : memref<8x1xf32, #tpu.memory_space<vmem>>, vector<8x1xf32>
    %98 = arith.maximumf %97, %96 : vector<8x1xf32>
    %c0_55 = arith.constant 0 : index
    %c0_56 = arith.constant 0 : index
    %99 = vector.load %arg20[%c0_55, %c0_56] : memref<8x1xf32, #tpu.memory_space<vmem>>, vector<8x1xf32>
    %100 = arith.subf %99, %98 : vector<8x1xf32>
    %101 = math.exp %100 : vector<8x1xf32>
    %102 = arith.subf %96, %98 : vector<8x1xf32>
    %103 = math.exp %102 : vector<8x1xf32>
    %c0_57 = arith.constant 0 : index
    %c0_58 = arith.constant 0 : index
    %104 = vector.load %arg21[%c0_57, %c0_58] : memref<8x1xf32, #tpu.memory_space<vmem>>, vector<8x1xf32>
    %105 = arith.mulf %101, %104 : vector<8x1xf32>
    %106 = arith.addf %105, %103 : vector<8x1xf32>
    %c0_59 = arith.constant 0 : index
    %c0_60 = arith.constant 0 : index
    %107 = vector.load %arg21[%c0_59, %c0_60] : memref<8x1xf32, #tpu.memory_space<vmem>>, vector<8x1xf32>
    tpu.vector_store %arg21[%c0_59, %c0_60], %106 {strides = array<i32>} : memref<8x1xf32, #tpu.memory_space<vmem>>, vector<8x1xf32>,
    %c0_61 = arith.constant 0 : index
    %c0_62 = arith.constant 0 : index
    %108 = vector.load %arg22[%c0_61, %c0_62] : memref<8x32xf32, #tpu.memory_space<vmem>>, vector<8x32xf32>
    %109 = vector.broadcast %101 : vector<8x1xf32> to vector<8x32xf32>
    %110 = arith.mulf %109, %108 : vector<8x32xf32>
    %111 = vector.broadcast %103 : vector<8x1xf32> to vector<8x32xf32>
    %112 = arith.mulf %111, %88 : vector<8x32xf32>
    %113 = arith.addf %110, %112 : vector<8x32xf32>
    %c0_63 = arith.constant 0 : index
    %c0_64 = arith.constant 0 : index
    %114 = vector.load %arg22[%c0_63, %c0_64] : memref<8x32xf32, #tpu.memory_space<vmem>>, vector<8x32xf32>
    tpu.vector_store %arg22[%c0_63, %c0_64], %113 {strides = array<i32>} : memref<8x32xf32, #tpu.memory_space<vmem>>, vector<8x32xf32>,
    %c0_65 = arith.constant 0 : index
    %c0_66 = arith.constant 0 : index
    %115 = vector.load %arg20[%c0_65, %c0_66] : memref<8x1xf32, #tpu.memory_space<vmem>>, vector<8x1xf32>
    tpu.vector_store %arg20[%c0_65, %c0_66], %98 {strides = array<i32>} : memref<8x1xf32, #tpu.memory_space<vmem>>, vector<8x1xf32>,
    %c3_i32 = arith.constant 3 : i32
    %116 = arith.cmpi eq, %arg1, %c3_i32 : i32
    %117 = arith.extui %116 : i1 to i32
    %c0_i32_67 = arith.constant 0 : i32
    %118 = arith.cmpi ne, %117, %c0_i32_67 : i32
    scf.if %118 {
      %c0_68 = arith.constant 0 : index
      %c0_69 = arith.constant 0 : index
      %119 = vector.load %arg22[%c0_68, %c0_69] : memref<8x32xf32, #tpu.memory_space<vmem>>, vector<8x32xf32>
      %c0_70 = arith.constant 0 : index
      %c0_71 = arith.constant 0 : index
      %120 = vector.load %arg21[%c0_70, %c0_71] : memref<8x1xf32, #tpu.memory_space<vmem>>, vector<8x1xf32>
      %121 = vector.broadcast %120 : vector<8x1xf32> to vector<8x32xf32>
      %122 = arith.divf %119, %121 : vector<8x32xf32>
      %c0_72 = arith.constant 0 : index
      %c0_73 = arith.constant 0 : index
      %123 = vector.load %arg19[%c0_72, %c0_73] : memref<8x32xf32, #tpu.memory_space<vmem>>, vector<8x32xf32>
      tpu.vector_store %arg19[%c0_72, %c0_73], %122 {strides = array<i32>} : memref<8x32xf32, #tpu.memory_space<vmem>>, vector<8x32xf32>,
    } else {
    }
    return
  }
  func.func @transform_0(%arg0: i32, %arg1: i32) -> (i32, i32, i32) {
    %c0_i32 = arith.constant 0 : i32
    %c0_i32_0 = arith.constant 0 : i32
    return %arg1, %arg0, %c0_i32 : i32, i32, i32
  }
  func.func @transform_1(%arg0: i32, %arg1: i32) -> (i32, i32, i32) {
    %c0_i32 = arith.constant 0 : i32
    %c0_i32_0 = arith.constant 0 : i32
    return %arg1, %arg0, %c0_i32 : i32, i32, i32
  }
  func.func @transform_2(%arg0: i32, %arg1: i32) -> (i32, i32) {
    %c0_i32 = arith.constant 0 : i32
    %c0_i32_0 = arith.constant 0 : i32
    %c0_i32_1 = arith.constant 0 : i32
    return %c0_i32, %c0_i32_0 : i32, i32
  }
  func.func @transform_3(%arg0: i32, %arg1: i32) -> (i32, i32) {
    %c0_i32 = arith.constant 0 : i32
    %c0_i32_0 = arith.constant 0 : i32
    %c0_i32_1 = arith.constant 0 : i32
    return %c0_i32, %c0_i32_0 : i32, i32
  }
  func.func @transform_4(%arg0: i32, %arg1: i32) -> (i32, i32) {
    %c0_i32 = arith.constant 0 : i32
    %c0_i32_0 = arith.constant 0 : i32
    %c0_i32_1 = arith.constant 0 : i32
    return %c0_i32, %c0_i32_0 : i32, i32
  }
  func.func @transform_5(%arg0: i32, %arg1: i32) -> (i32, i32) {
    %c0_i32 = arith.constant 0 : i32
    %c0_i32_0 = arith.constant 0 : i32
    %c0_i32_1 = arith.constant 0 : i32
    return %c0_i32, %c0_i32_0 : i32, i32
  }
  func.func @transform_6(%arg0: i32, %arg1: i32) -> (i32, i32) {
    %c0_i32 = arith.constant 0 : i32
    %c0_i32_0 = arith.constant 0 : i32
    %c0_i32_1 = arith.constant 0 : i32
    return %c0_i32, %c0_i32_0 : i32, i32
  }
  func.func @transform_7(%arg0: i32, %arg1: i32) -> (i32, i32) {
    %c0_i32 = arith.constant 0 : i32
    %c0_i32_0 = arith.constant 0 : i32
    %c0_i32_1 = arith.constant 0 : i32
    return %c0_i32, %c0_i32_0 : i32, i32
  }
  func.func @transform_8(%arg0: i32, %arg1: i32) -> (i32, i32) {
    %c0_i32 = arith.constant 0 : i32
    %c0_i32_0 = arith.constant 0 : i32
    %c0_i32_1 = arith.constant 0 : i32
    return %c0_i32, %c0_i32_0 : i32, i32
  }
  func.func @transform_9(%arg0: i32, %arg1: i32) -> (i32, i32) {
    %c0_i32 = arith.constant 0 : i32
    %c0_i32_0 = arith.constant 0 : i32
    %c0_i32_1 = arith.constant 0 : i32
    return %c0_i32, %c0_i32_0 : i32, i32
  }
  func.func @transform_10(%arg0: i32, %arg1: i32) -> (i32, i32) {
    %c0_i32 = arith.constant 0 : i32
    %c0_i32_0 = arith.constant 0 : i32
    %c0_i32_1 = arith.constant 0 : i32
    return %c0_i32, %c0_i32_0 : i32, i32
  }
  func.func @transform_11(%arg0: i32, %arg1: i32) -> (i32, i32) {
    %c0_i32 = arith.constant 0 : i32
    %c0_i32_0 = arith.constant 0 : i32
    %c0_i32_1 = arith.constant 0 : i32
    return %c0_i32, %c0_i32_0 : i32, i32
  }
  func.func @transform_12(%arg0: i32, %arg1: i32) -> (i32, i32) {
    %c0_i32 = arith.constant 0 : i32
    %c0_i32_0 = arith.constant 0 : i32
    %c0_i32_1 = arith.constant 0 : i32
    return %c0_i32, %c0_i32_0 : i32, i32
  }
  func.func @transform_13(%arg0: i32, %arg1: i32) -> (i32, i32) {
    %c0_i32 = arith.constant 0 : i32
    %c0_i32_0 = arith.constant 0 : i32
    %c0_i32_1 = arith.constant 0 : i32
    return %c0_i32, %c0_i32_0 : i32, i32
  }
  func.func @transform_14(%arg0: i32, %arg1: i32) -> (i32, i32) {
    %c0_i32 = arith.constant 0 : i32
    %c0_i32_0 = arith.constant 0 : i32
    %c0_i32_1 = arith.constant 0 : i32
    return %c0_i32, %c0_i32_0 : i32, i32
  }
  func.func @transform_15(%arg0: i32, %arg1: i32) -> (i32, i32) {
    %c0_i32 = arith.constant 0 : i32
    %c0_i32_0 = arith.constant 0 : i32
    %c0_i32_1 = arith.constant 0 : i32
    return %c0_i32, %c0_i32_0 : i32, i32
  }
  func.func @transform_16(%arg0: i32, %arg1: i32) -> (i32, i32) {
    %c0_i32 = arith.constant 0 : i32
    %c0_i32_0 = arith.constant 0 : i32
    %c0_i32_1 = arith.constant 0 : i32
    return %c0_i32, %c0_i32_0 : i32, i32
  }
  func.func @transform_17(%arg0: i32, %arg1: i32) -> (i32, i32) {
    %c0_i32 = arith.constant 0 : i32
    %c0_i32_0 = arith.constant 0 : i32
    return %arg0, %c0_i32 : i32, i32
  }
}

module attributes {stable_mosaic.version = 11 : i64} {
  func.func @_cyk_row_kernel(%arg0: i32, %arg1: i32, %arg2: memref<1x8x32xf32, #tpu.memory_space<vmem>>, %arg3: memref<1x8x32xf32, #tpu.memory_space<vmem>>, %arg4: memref<32x64xf32, #tpu.memory_space<vmem>>, %arg5: memref<32x64xf32, #tpu.memory_space<vmem>>, %arg6: memref<1x64xf32, #tpu.memory_space<vmem>>, %arg7: memref<64x32xf32, #tpu.memory_space<vmem>>, %arg8: memref<64x32xf32, #tpu.memory_space<vmem>>, %arg9: memref<64x32xf32, #tpu.memory_space<vmem>>, %arg10: memref<64x32xf32, #tpu.memory_space<vmem>>, %arg11: memref<1x32xf32, #tpu.memory_space<vmem>>, %arg12: memref<1x32xf32, #tpu.memory_space<vmem>>, %arg13: memref<1x32xf32, #tpu.memory_space<vmem>>, %arg14: memref<1x32xf32, #tpu.memory_space<vmem>>, %arg15: memref<1x32xf32, #tpu.memory_space<vmem>>, %arg16: memref<1x32xf32, #tpu.memory_space<vmem>>, %arg17: memref<1x32xf32, #tpu.memory_space<vmem>>, %arg18: memref<1x1xf32, #tpu.memory_space<smem>>, %arg19: memref<8x32xf32, #tpu.memory_space<vmem>>, %arg20: memref<8x1xf32, #tpu.memory_space<vmem>>, %arg21: memref<8x1xf32, #tpu.memory_space<vmem>>, %arg22: memref<8x32xf32, #tpu.memory_space<vmem>>) attributes {dimension_semantics = [#tpu.dimension_semantics<parallel>, #tpu.dimension_semantics<arbitrary>], iteration_bounds = array<i64: 1, 5>, scalar_prefetch = 0 : i64, scratch_operands = 3 : i64, tpu.core_type = #tpu.core_type<tc>, window_params = [{transform_indices = @transform_0, window_bounds = array<i64: 1, 8, 32>}, {transform_indices = @transform_1, window_bounds = array<i64: 1, 8, 32>}, {pipeline_mode = #tpu.pipeline_mode<synchronous>, transform_indices = @transform_2, window_bounds = array<i64: 32, 64>}, {pipeline_mode = #tpu.pipeline_mode<synchronous>, transform_indices = @transform_3, window_bounds = array<i64: 32, 64>}, {pipeline_mode = #tpu.pipeline_mode<synchronous>, transform_indices = @transform_4, window_bounds = array<i64: 1, 64>}, {pipeline_mode = #tpu.pipeline_mode<synchronous>, transform_indices = @transform_5, window_bounds = array<i64: 64, 32>}, {pipeline_mode = #tpu.pipeline_mode<synchronous>, transform_indices = @transform_6, window_bounds = array<i64: 64, 32>}, {pipeline_mode = #tpu.pipeline_mode<synchronous>, transform_indices = @transform_7, window_bounds = array<i64: 64, 32>}, {pipeline_mode = #tpu.pipeline_mode<synchronous>, transform_indices = @transform_8, window_bounds = array<i64: 64, 32>}, {pipeline_mode = #tpu.pipeline_mode<synchronous>, transform_indices = @transform_9, window_bounds = array<i64: 1, 32>}, {pipeline_mode = #tpu.pipeline_mode<synchronous>, transform_indices = @transform_10, window_bounds = array<i64: 1, 32>}, {pipeline_mode = #tpu.pipeline_mode<synchronous>, transform_indices = @transform_11, window_bounds = array<i64: 1, 32>}, {pipeline_mode = #tpu.pipeline_mode<synchronous>, transform_indices = @transform_12, window_bounds = array<i64: 1, 32>}, {pipeline_mode = #tpu.pipeline_mode<synchronous>, transform_indices = @transform_13, window_bounds = array<i64: 1, 32>}, {pipeline_mode = #tpu.pipeline_mode<synchronous>, transform_indices = @transform_14, window_bounds = array<i64: 1, 32>}, {pipeline_mode = #tpu.pipeline_mode<synchronous>, transform_indices = @transform_15, window_bounds = array<i64: 1, 32>}, {transform_indices = @transform_16, window_bounds = array<i64: 1, 1>}, {transform_indices = @transform_17, window_bounds = array<i64: 8, 32>}]} {
    %c0_i32 = arith.constant 0 : i32
    %0 = arith.cmpi eq, %arg1, %c0_i32 : i32
    %1 = arith.extui %0 : i1 to i32
    %c0_i32_0 = arith.constant 0 : i32
    %2 = arith.cmpi ne, %1, %c0_i32_0 : i32
    scf.if %2 {
      %cst_68 = arith.constant 0xFF800000 : f32
      %119 = vector.broadcast %cst_68 : f32 to vector<8x1xf32>
      %c0_69 = arith.constant 0 : index
      %c0_70 = arith.constant 0 : index
      %120 = vector.load %arg20[%c0_69, %c0_70] : memref<8x1xf32, #tpu.memory_space<vmem>>, vector<8x1xf32>
      tpu.vector_store %arg20[%c0_69, %c0_70], %119 {strides = array<i32>} : memref<8x1xf32, #tpu.memory_space<vmem>>, vector<8x1xf32>,
      %cst_71 = arith.constant 0.000000e+00 : f32
      %121 = vector.broadcast %cst_71 : f32 to vector<8x1xf32>
      %c0_72 = arith.constant 0 : index
      %c0_73 = arith.constant 0 : index
      %122 = vector.load %arg21[%c0_72, %c0_73] : memref<8x1xf32, #tpu.memory_space<vmem>>, vector<8x1xf32>
      tpu.vector_store %arg21[%c0_72, %c0_73], %121 {strides = array<i32>} : memref<8x1xf32, #tpu.memory_space<vmem>>, vector<8x1xf32>,
      %cst_74 = arith.constant 0.000000e+00 : f32
      %123 = vector.broadcast %cst_74 : f32 to vector<8x32xf32>
      %c0_75 = arith.constant 0 : index
      %c0_76 = arith.constant 0 : index
      %124 = vector.load %arg22[%c0_75, %c0_76] : memref<8x32xf32, #tpu.memory_space<vmem>>, vector<8x32xf32>
      tpu.vector_store %arg22[%c0_75, %c0_76], %123 {strides = array<i32>} : memref<8x32xf32, #tpu.memory_space<vmem>>, vector<8x32xf32>,
    } else {
    }
    %c0 = arith.constant 0 : index
    %c0_1 = arith.constant 0 : index
    %c0_2 = arith.constant 0 : index
    %3 = vector.load %arg2[%c0, %c0_1, %c0_2] : memref<1x8x32xf32, #tpu.memory_space<vmem>>, vector<1x8x32xf32>
    %4 = vector.shape_cast %3 : vector<1x8x32xf32> to vector<8x32xf32>
    %c0_3 = arith.constant 0 : index
    %c0_4 = arith.constant 0 : index
    %c0_5 = arith.constant 0 : index
    %5 = vector.load %arg3[%c0_3, %c0_4, %c0_5] : memref<1x8x32xf32, #tpu.memory_space<vmem>>, vector<1x8x32xf32>
    %6 = vector.shape_cast %5 : vector<1x8x32xf32> to vector<8x32xf32>
    %c0_6 = arith.constant 0 : index
    %c0_7 = arith.constant 0 : index
    %7 = vector.load %arg4[%c0_6, %c0_7] : memref<32x64xf32, #tpu.memory_space<vmem>>, vector<32x64xf32>
    %cst = arith.constant dense<0.000000e+00> : vector<8x64xf32>
    %8 = tpu.matmul %4, %7, %cst {dimension_numbers = #tpu.dot_dimension_numbers<[1], [0], [0], [1], [0, 0, 1, 1], [], []>} : vector<8x32xf32>, vector<32x64xf32>, vector<8x64xf32> -> vector<8x64xf32>
    %c0_8 = arith.constant 0 : index
    %c0_9 = arith.constant 0 : index
    %9 = vector.load %arg5[%c0_8, %c0_9] : memref<32x64xf32, #tpu.memory_space<vmem>>, vector<32x64xf32>
    %cst_10 = arith.constant dense<0.000000e+00> : vector<8x64xf32>
    %10 = tpu.matmul %6, %9, %cst_10 {dimension_numbers = #tpu.dot_dimension_numbers<[1], [0], [0], [1], [0, 0, 1, 1], [], []>} : vector<8x32xf32>, vector<32x64xf32>, vector<8x64xf32> -> vector<8x64xf32>
    %11 = arith.addf %8, %10 : vector<8x64xf32>
    %c0_11 = arith.constant 0 : index
    %c0_12 = arith.constant 0 : index
    %12 = vector.load %arg6[%c0_11, %c0_12] : memref<1x64xf32, #tpu.memory_space<vmem>>, vector<1x64xf32>
    %13 = vector.broadcast %12 : vector<1x64xf32> to vector<8x64xf32>
    %14 = arith.addf %11, %13 : vector<8x64xf32>
    %cst_13 = arith.constant 0.000000e+00 : f32
    %15 = vector.broadcast %cst_13 : f32 to vector<8x64xf32>
    %16 = arith.maximumf %14, %15 : vector<8x64xf32>
    %c0_14 = arith.constant 0 : index
    %c0_15 = arith.constant 0 : index
    %17 = vector.load %arg7[%c0_14, %c0_15] : memref<64x32xf32, #tpu.memory_space<vmem>>, vector<64x32xf32>
    %cst_16 = arith.constant dense<0.000000e+00> : vector<8x32xf32>
    %18 = tpu.matmul %16, %17, %cst_16 {dimension_numbers = #tpu.dot_dimension_numbers<[1], [0], [0], [1], [0, 0, 1, 1], [], []>} : vector<8x64xf32>, vector<64x32xf32>, vector<8x32xf32> -> vector<8x32xf32>
    %c0_17 = arith.constant 0 : index
    %c0_18 = arith.constant 0 : index
    %19 = vector.load %arg11[%c0_17, %c0_18] : memref<1x32xf32, #tpu.memory_space<vmem>>, vector<1x32xf32>
    %20 = vector.broadcast %19 : vector<1x32xf32> to vector<8x32xf32>
    %21 = arith.addf %18, %20 : vector<8x32xf32>
    %22 = arith.negf %21 : vector<8x32xf32>
    %23 = math.exp %22 : vector<8x32xf32>
    %cst_19 = arith.constant 1.000000e+00 : f32
    %24 = vector.broadcast %cst_19 : f32 to vector<8x32xf32>
    %25 = arith.addf %24, %23 : vector<8x32xf32>
    %26 = arith.divf %24, %25 : vector<8x32xf32>
    %c0_20 = arith.constant 0 : index
    %c0_21 = arith.constant 0 : index
    %27 = vector.load %arg8[%c0_20, %c0_21] : memref<64x32xf32, #tpu.memory_space<vmem>>, vector<64x32xf32>
    %cst_22 = arith.constant dense<0.000000e+00> : vector<8x32xf32>
    %28 = tpu.matmul %16, %27, %cst_22 {dimension_numbers = #tpu.dot_dimension_numbers<[1], [0], [0], [1], [0, 0, 1, 1], [], []>} : vector<8x64xf32>, vector<64x32xf32>, vector<8x32xf32> -> vector<8x32xf32>
    %c0_23 = arith.constant 0 : index
    %c0_24 = arith.constant 0 : index
    %29 = vector.load %arg12[%c0_23, %c0_24] : memref<1x32xf32, #tpu.memory_space<vmem>>, vector<1x32xf32>
    %30 = vector.broadcast %29 : vector<1x32xf32> to vector<8x32xf32>
    %31 = arith.addf %28, %30 : vector<8x32xf32>
    %32 = arith.negf %31 : vector<8x32xf32>
    %33 = math.exp %32 : vector<8x32xf32>
    %cst_25 = arith.constant 1.000000e+00 : f32
    %34 = vector.broadcast %cst_25 : f32 to vector<8x32xf32>
    %35 = arith.addf %34, %33 : vector<8x32xf32>
    %36 = arith.divf %34, %35 : vector<8x32xf32>
    %c0_26 = arith.constant 0 : index
    %c0_27 = arith.constant 0 : index
    %37 = vector.load %arg9[%c0_26, %c0_27] : memref<64x32xf32, #tpu.memory_space<vmem>>, vector<64x32xf32>
    %cst_28 = arith.constant dense<0.000000e+00> : vector<8x32xf32>
    %38 = tpu.matmul %16, %37, %cst_28 {dimension_numbers = #tpu.dot_dimension_numbers<[1], [0], [0], [1], [0, 0, 1, 1], [], []>} : vector<8x64xf32>, vector<64x32xf32>, vector<8x32xf32> -> vector<8x32xf32>
    %c0_29 = arith.constant 0 : index
    %c0_30 = arith.constant 0 : index
    %39 = vector.load %arg13[%c0_29, %c0_30] : memref<1x32xf32, #tpu.memory_space<vmem>>, vector<1x32xf32>
    %40 = vector.broadcast %39 : vector<1x32xf32> to vector<8x32xf32>
    %41 = arith.addf %38, %40 : vector<8x32xf32>
    %42 = arith.negf %41 : vector<8x32xf32>
    %43 = math.exp %42 : vector<8x32xf32>
    %cst_31 = arith.constant 1.000000e+00 : f32
    %44 = vector.broadcast %cst_31 : f32 to vector<8x32xf32>
    %45 = arith.addf %44, %43 : vector<8x32xf32>
    %46 = arith.divf %44, %45 : vector<8x32xf32>
    %c0_32 = arith.constant 0 : index
    %c0_33 = arith.constant 0 : index
    %47 = vector.load %arg10[%c0_32, %c0_33] : memref<64x32xf32, #tpu.memory_space<vmem>>, vector<64x32xf32>
    %cst_34 = arith.constant dense<0.000000e+00> : vector<8x32xf32>
    %48 = tpu.matmul %16, %47, %cst_34 {dimension_numbers = #tpu.dot_dimension_numbers<[1], [0], [0], [1], [0, 0, 1, 1], [], []>} : vector<8x64xf32>, vector<64x32xf32>, vector<8x32xf32> -> vector<8x32xf32>
    %c0_35 = arith.constant 0 : index
    %c0_36 = arith.constant 0 : index
    %49 = vector.load %arg14[%c0_35, %c0_36] : memref<1x32xf32, #tpu.memory_space<vmem>>, vector<1x32xf32>
    %50 = vector.broadcast %49 : vector<1x32xf32> to vector<8x32xf32>
    %51 = arith.addf %48, %50 : vector<8x32xf32>
    %52 = arith.mulf %26, %4 : vector<8x32xf32>
    %53 = arith.mulf %36, %6 : vector<8x32xf32>
    %54 = arith.addf %52, %53 : vector<8x32xf32>
    %55 = arith.mulf %46, %51 : vector<8x32xf32>
    %56 = arith.addf %54, %55 : vector<8x32xf32>
    %c0_37 = arith.constant 0 : index
    %c0_38 = arith.constant 0 : index
    %57 = vector.load %arg15[%c0_37, %c0_38] : memref<1x32xf32, #tpu.memory_space<vmem>>, vector<1x32xf32>
    %c0_39 = arith.constant 0 : index
    %c0_40 = arith.constant 0 : index
    %58 = vector.load %arg16[%c0_39, %c0_40] : memref<1x32xf32, #tpu.memory_space<vmem>>, vector<1x32xf32>
    %cst_41 = arith.constant dense<0.000000e+00> : vector<8xf32>
    %59 = vector.multi_reduction <add>, %56, %cst_41 [1] : vector<8x32xf32> to vector<8xf32>
    %60 = vector.shape_cast %59 : vector<8xf32> to vector<8x1xf32>
    %cst_42 = arith.constant 3.200000e+01 : f32
    %61 = vector.broadcast %cst_42 : f32 to vector<8x1xf32>
    %62 = arith.divf %60, %61 : vector<8x1xf32>
    %63 = vector.broadcast %62 : vector<8x1xf32> to vector<8x32xf32>
    %64 = arith.subf %56, %63 : vector<8x32xf32>
    %65 = arith.mulf %64, %64 : vector<8x32xf32>
    %cst_43 = arith.constant dense<0.000000e+00> : vector<8xf32>
    %66 = vector.multi_reduction <add>, %65, %cst_43 [1] : vector<8x32xf32> to vector<8xf32>
    %67 = vector.shape_cast %66 : vector<8xf32> to vector<8x1xf32>
    %cst_44 = arith.constant 3.200000e+01 : f32
    %68 = vector.broadcast %cst_44 : f32 to vector<8x1xf32>
    %69 = arith.divf %67, %68 : vector<8x1xf32>
    %70 = vector.broadcast %62 : vector<8x1xf32> to vector<8x32xf32>
    %71 = arith.subf %56, %70 : vector<8x32xf32>
    %cst_45 = arith.constant 9.99999974E-6 : f32
    %72 = vector.broadcast %cst_45 : f32 to vector<8x1xf32>
    %73 = arith.addf %69, %72 : vector<8x1xf32>
    %74 = math.rsqrt %73 : vector<8x1xf32>
    %75 = vector.broadcast %74 : vector<8x1xf32> to vector<8x32xf32>
    %76 = arith.mulf %71, %75 : vector<8x32xf32>
    %77 = vector.broadcast %57 : vector<1x32xf32> to vector<8x32xf32>
    %78 = arith.mulf %76, %77 : vector<8x32xf32>
    %79 = vector.broadcast %58 : vector<1x32xf32> to vector<8x32xf32>
    %80 = arith.addf %78, %79 : vector<8x32xf32>
    %81 = arith.mulf %80, %80 : vector<8x32xf32>
    %cst_46 = arith.constant dense<0.000000e+00> : vector<8xf32>
    %82 = vector.multi_reduction <add>, %81, %cst_46 [1] : vector<8x32xf32> to vector<8xf32>
    %83 = vector.shape_cast %82 : vector<8xf32> to vector<8x1xf32>
    %84 = math.sqrt %83 : vector<8x1xf32>
    %cst_47 = arith.constant 9.99999993E-9 : f32
    %85 = vector.broadcast %cst_47 : f32 to vector<8x1xf32>
    %86 = arith.addf %84, %85 : vector<8x1xf32>
    %87 = vector.broadcast %86 : vector<8x1xf32> to vector<8x32xf32>
    %88 = arith.divf %80, %87 : vector<8x32xf32>
    %c0_48 = arith.constant 0 : index
    %c0_49 = arith.constant 0 : index
    %89 = vector.load %arg17[%c0_48, %c0_49] : memref<1x32xf32, #tpu.memory_space<vmem>>, vector<1x32xf32>
    %90 = vector.broadcast %89 : vector<1x32xf32> to vector<8x32xf32>
    %91 = arith.mulf %88, %90 : vector<8x32xf32>
    %cst_50 = arith.constant dense<0.000000e+00> : vector<8xf32>
    %92 = vector.multi_reduction <add>, %91, %cst_50 [1] : vector<8x32xf32> to vector<8xf32>
    %93 = vector.shape_cast %92 : vector<8xf32> to vector<8x1xf32>
    %c0_51 = arith.constant 0 : index
    %c0_52 = arith.constant 0 : index
    %94 = memref.load %arg18[%c0_51, %c0_52] : memref<1x1xf32, #tpu.memory_space<smem>>
    %95 = vector.broadcast %94 : f32 to vector<8x1xf32>
    %96 = arith.addf %93, %95 : vector<8x1xf32>
    %c0_53 = arith.constant 0 : index
    %c0_54 = arith.constant 0 : index
    %97 = vector.load %arg20[%c0_53, %c0_54] : memref<8x1xf32, #tpu.memory_space<vmem>>, vector<8x1xf32>
    %98 = arith.maximumf %97, %96 : vector<8x1xf32>
    %c0_55 = arith.constant 0 : index
    %c0_56 = arith.constant 0 : index
    %99 = vector.load %arg20[%c0_55, %c0_56] : memref<8x1xf32, #tpu.memory_space<vmem>>, vector<8x1xf32>
    %100 = arith.subf %99, %98 : vector<8x1xf32>
    %101 = math.exp %100 : vector<8x1xf32>
    %102 = arith.subf %96, %98 : vector<8x1xf32>
    %103 = math.exp %102 : vector<8x1xf32>
    %c0_57 = arith.constant 0 : index
    %c0_58 = arith.constant 0 : index
    %104 = vector.load %arg21[%c0_57, %c0_58] : memref<8x1xf32, #tpu.memory_space<vmem>>, vector<8x1xf32>
    %105 = arith.mulf %101, %104 : vector<8x1xf32>
    %106 = arith.addf %105, %103 : vector<8x1xf32>
    %c0_59 = arith.constant 0 : index
    %c0_60 = arith.constant 0 : index
    %107 = vector.load %arg21[%c0_59, %c0_60] : memref<8x1xf32, #tpu.memory_space<vmem>>, vector<8x1xf32>
    tpu.vector_store %arg21[%c0_59, %c0_60], %106 {strides = array<i32>} : memref<8x1xf32, #tpu.memory_space<vmem>>, vector<8x1xf32>,
    %c0_61 = arith.constant 0 : index
    %c0_62 = arith.constant 0 : index
    %108 = vector.load %arg22[%c0_61, %c0_62] : memref<8x32xf32, #tpu.memory_space<vmem>>, vector<8x32xf32>
    %109 = vector.broadcast %101 : vector<8x1xf32> to vector<8x32xf32>
    %110 = arith.mulf %109, %108 : vector<8x32xf32>
    %111 = vector.broadcast %103 : vector<8x1xf32> to vector<8x32xf32>
    %112 = arith.mulf %111, %88 : vector<8x32xf32>
    %113 = arith.addf %110, %112 : vector<8x32xf32>
    %c0_63 = arith.constant 0 : index
    %c0_64 = arith.constant 0 : index
    %114 = vector.load %arg22[%c0_63, %c0_64] : memref<8x32xf32, #tpu.memory_space<vmem>>, vector<8x32xf32>
    tpu.vector_store %arg22[%c0_63, %c0_64], %113 {strides = array<i32>} : memref<8x32xf32, #tpu.memory_space<vmem>>, vector<8x32xf32>,
    %c0_65 = arith.constant 0 : index
    %c0_66 = arith.constant 0 : index
    %115 = vector.load %arg20[%c0_65, %c0_66] : memref<8x1xf32, #tpu.memory_space<vmem>>, vector<8x1xf32>
    tpu.vector_store %arg20[%c0_65, %c0_66], %98 {strides = array<i32>} : memref<8x1xf32, #tpu.memory_space<vmem>>, vector<8x1xf32>,
    %c4_i32 = arith.constant 4 : i32
    %116 = arith.cmpi eq, %arg1, %c4_i32 : i32
    %117 = arith.extui %116 : i1 to i32
    %c0_i32_67 = arith.constant 0 : i32
    %118 = arith.cmpi ne, %117, %c0_i32_67 : i32
    scf.if %118 {
      %c0_68 = arith.constant 0 : index
      %c0_69 = arith.constant 0 : index
      %119 = vector.load %arg22[%c0_68, %c0_69] : memref<8x32xf32, #tpu.memory_space<vmem>>, vector<8x32xf32>
      %c0_70 = arith.constant 0 : index
      %c0_71 = arith.constant 0 : index
      %120 = vector.load %arg21[%c0_70, %c0_71] : memref<8x1xf32, #tpu.memory_space<vmem>>, vector<8x1xf32>
      %121 = vector.broadcast %120 : vector<8x1xf32> to vector<8x32xf32>
      %122 = arith.divf %119, %121 : vector<8x32xf32>
      %c0_72 = arith.constant 0 : index
      %c0_73 = arith.constant 0 : index
      %123 = vector.load %arg19[%c0_72, %c0_73] : memref<8x32xf32, #tpu.memory_space<vmem>>, vector<8x32xf32>
      tpu.vector_store %arg19[%c0_72, %c0_73], %122 {strides = array<i32>} : memref<8x32xf32, #tpu.memory_space<vmem>>, vector<8x32xf32>,
    } else {
    }
    return
  }
  func.func @transform_0(%arg0: i32, %arg1: i32) -> (i32, i32, i32) {
    %c0_i32 = arith.constant 0 : i32
    %c0_i32_0 = arith.constant 0 : i32
    return %arg1, %arg0, %c0_i32 : i32, i32, i32
  }
  func.func @transform_1(%arg0: i32, %arg1: i32) -> (i32, i32, i32) {
    %c0_i32 = arith.constant 0 : i32
    %c0_i32_0 = arith.constant 0 : i32
    return %arg1, %arg0, %c0_i32 : i32, i32, i32
  }
  func.func @transform_2(%arg0: i32, %arg1: i32) -> (i32, i32) {
    %c0_i32 = arith.constant 0 : i32
    %c0_i32_0 = arith.constant 0 : i32
    %c0_i32_1 = arith.constant 0 : i32
    return %c0_i32, %c0_i32_0 : i32, i32
  }
  func.func @transform_3(%arg0: i32, %arg1: i32) -> (i32, i32) {
    %c0_i32 = arith.constant 0 : i32
    %c0_i32_0 = arith.constant 0 : i32
    %c0_i32_1 = arith.constant 0 : i32
    return %c0_i32, %c0_i32_0 : i32, i32
  }
  func.func @transform_4(%arg0: i32, %arg1: i32) -> (i32, i32) {
    %c0_i32 = arith.constant 0 : i32
    %c0_i32_0 = arith.constant 0 : i32
    %c0_i32_1 = arith.constant 0 : i32
    return %c0_i32, %c0_i32_0 : i32, i32
  }
  func.func @transform_5(%arg0: i32, %arg1: i32) -> (i32, i32) {
    %c0_i32 = arith.constant 0 : i32
    %c0_i32_0 = arith.constant 0 : i32
    %c0_i32_1 = arith.constant 0 : i32
    return %c0_i32, %c0_i32_0 : i32, i32
  }
  func.func @transform_6(%arg0: i32, %arg1: i32) -> (i32, i32) {
    %c0_i32 = arith.constant 0 : i32
    %c0_i32_0 = arith.constant 0 : i32
    %c0_i32_1 = arith.constant 0 : i32
    return %c0_i32, %c0_i32_0 : i32, i32
  }
  func.func @transform_7(%arg0: i32, %arg1: i32) -> (i32, i32) {
    %c0_i32 = arith.constant 0 : i32
    %c0_i32_0 = arith.constant 0 : i32
    %c0_i32_1 = arith.constant 0 : i32
    return %c0_i32, %c0_i32_0 : i32, i32
  }
  func.func @transform_8(%arg0: i32, %arg1: i32) -> (i32, i32) {
    %c0_i32 = arith.constant 0 : i32
    %c0_i32_0 = arith.constant 0 : i32
    %c0_i32_1 = arith.constant 0 : i32
    return %c0_i32, %c0_i32_0 : i32, i32
  }
  func.func @transform_9(%arg0: i32, %arg1: i32) -> (i32, i32) {
    %c0_i32 = arith.constant 0 : i32
    %c0_i32_0 = arith.constant 0 : i32
    %c0_i32_1 = arith.constant 0 : i32
    return %c0_i32, %c0_i32_0 : i32, i32
  }
  func.func @transform_10(%arg0: i32, %arg1: i32) -> (i32, i32) {
    %c0_i32 = arith.constant 0 : i32
    %c0_i32_0 = arith.constant 0 : i32
    %c0_i32_1 = arith.constant 0 : i32
    return %c0_i32, %c0_i32_0 : i32, i32
  }
  func.func @transform_11(%arg0: i32, %arg1: i32) -> (i32, i32) {
    %c0_i32 = arith.constant 0 : i32
    %c0_i32_0 = arith.constant 0 : i32
    %c0_i32_1 = arith.constant 0 : i32
    return %c0_i32, %c0_i32_0 : i32, i32
  }
  func.func @transform_12(%arg0: i32, %arg1: i32) -> (i32, i32) {
    %c0_i32 = arith.constant 0 : i32
    %c0_i32_0 = arith.constant 0 : i32
    %c0_i32_1 = arith.constant 0 : i32
    return %c0_i32, %c0_i32_0 : i32, i32
  }
  func.func @transform_13(%arg0: i32, %arg1: i32) -> (i32, i32) {
    %c0_i32 = arith.constant 0 : i32
    %c0_i32_0 = arith.constant 0 : i32
    %c0_i32_1 = arith.constant 0 : i32
    return %c0_i32, %c0_i32_0 : i32, i32
  }
  func.func @transform_14(%arg0: i32, %arg1: i32) -> (i32, i32) {
    %c0_i32 = arith.constant 0 : i32
    %c0_i32_0 = arith.constant 0 : i32
    %c0_i32_1 = arith.constant 0 : i32
    return %c0_i32, %c0_i32_0 : i32, i32
  }
  func.func @transform_15(%arg0: i32, %arg1: i32) -> (i32, i32) {
    %c0_i32 = arith.constant 0 : i32
    %c0_i32_0 = arith.constant 0 : i32
    %c0_i32_1 = arith.constant 0 : i32
    return %c0_i32, %c0_i32_0 : i32, i32
  }
  func.func @transform_16(%arg0: i32, %arg1: i32) -> (i32, i32) {
    %c0_i32 = arith.constant 0 : i32
    %c0_i32_0 = arith.constant 0 : i32
    %c0_i32_1 = arith.constant 0 : i32
    return %c0_i32, %c0_i32_0 : i32, i32
  }
  func.func @transform_17(%arg0: i32, %arg1: i32) -> (i32, i32) {
    %c0_i32 = arith.constant 0 : i32
    %c0_i32_0 = arith.constant 0 : i32
    return %arg0, %c0_i32 : i32, i32
  }
}

module attributes {stable_mosaic.version = 11 : i64} {
  func.func @_cyk_row_kernel(%arg0: i32, %arg1: i32, %arg2: memref<1x8x32xf32, #tpu.memory_space<vmem>>, %arg3: memref<1x8x32xf32, #tpu.memory_space<vmem>>, %arg4: memref<32x64xf32, #tpu.memory_space<vmem>>, %arg5: memref<32x64xf32, #tpu.memory_space<vmem>>, %arg6: memref<1x64xf32, #tpu.memory_space<vmem>>, %arg7: memref<64x32xf32, #tpu.memory_space<vmem>>, %arg8: memref<64x32xf32, #tpu.memory_space<vmem>>, %arg9: memref<64x32xf32, #tpu.memory_space<vmem>>, %arg10: memref<64x32xf32, #tpu.memory_space<vmem>>, %arg11: memref<1x32xf32, #tpu.memory_space<vmem>>, %arg12: memref<1x32xf32, #tpu.memory_space<vmem>>, %arg13: memref<1x32xf32, #tpu.memory_space<vmem>>, %arg14: memref<1x32xf32, #tpu.memory_space<vmem>>, %arg15: memref<1x32xf32, #tpu.memory_space<vmem>>, %arg16: memref<1x32xf32, #tpu.memory_space<vmem>>, %arg17: memref<1x32xf32, #tpu.memory_space<vmem>>, %arg18: memref<1x1xf32, #tpu.memory_space<smem>>, %arg19: memref<8x32xf32, #tpu.memory_space<vmem>>, %arg20: memref<8x1xf32, #tpu.memory_space<vmem>>, %arg21: memref<8x1xf32, #tpu.memory_space<vmem>>, %arg22: memref<8x32xf32, #tpu.memory_space<vmem>>) attributes {dimension_semantics = [#tpu.dimension_semantics<parallel>, #tpu.dimension_semantics<arbitrary>], iteration_bounds = array<i64: 1, 6>, scalar_prefetch = 0 : i64, scratch_operands = 3 : i64, tpu.core_type = #tpu.core_type<tc>, window_params = [{transform_indices = @transform_0, window_bounds = array<i64: 1, 8, 32>}, {transform_indices = @transform_1, window_bounds = array<i64: 1, 8, 32>}, {pipeline_mode = #tpu.pipeline_mode<synchronous>, transform_indices = @transform_2, window_bounds = array<i64: 32, 64>}, {pipeline_mode = #tpu.pipeline_mode<synchronous>, transform_indices = @transform_3, window_bounds = array<i64: 32, 64>}, {pipeline_mode = #tpu.pipeline_mode<synchronous>, transform_indices = @transform_4, window_bounds = array<i64: 1, 64>}, {pipeline_mode = #tpu.pipeline_mode<synchronous>, transform_indices = @transform_5, window_bounds = array<i64: 64, 32>}, {pipeline_mode = #tpu.pipeline_mode<synchronous>, transform_indices = @transform_6, window_bounds = array<i64: 64, 32>}, {pipeline_mode = #tpu.pipeline_mode<synchronous>, transform_indices = @transform_7, window_bounds = array<i64: 64, 32>}, {pipeline_mode = #tpu.pipeline_mode<synchronous>, transform_indices = @transform_8, window_bounds = array<i64: 64, 32>}, {pipeline_mode = #tpu.pipeline_mode<synchronous>, transform_indices = @transform_9, window_bounds = array<i64: 1, 32>}, {pipeline_mode = #tpu.pipeline_mode<synchronous>, transform_indices = @transform_10, window_bounds = array<i64: 1, 32>}, {pipeline_mode = #tpu.pipeline_mode<synchronous>, transform_indices = @transform_11, window_bounds = array<i64: 1, 32>}, {pipeline_mode = #tpu.pipeline_mode<synchronous>, transform_indices = @transform_12, window_bounds = array<i64: 1, 32>}, {pipeline_mode = #tpu.pipeline_mode<synchronous>, transform_indices = @transform_13, window_bounds = array<i64: 1, 32>}, {pipeline_mode = #tpu.pipeline_mode<synchronous>, transform_indices = @transform_14, window_bounds = array<i64: 1, 32>}, {pipeline_mode = #tpu.pipeline_mode<synchronous>, transform_indices = @transform_15, window_bounds = array<i64: 1, 32>}, {transform_indices = @transform_16, window_bounds = array<i64: 1, 1>}, {transform_indices = @transform_17, window_bounds = array<i64: 8, 32>}]} {
    %c0_i32 = arith.constant 0 : i32
    %0 = arith.cmpi eq, %arg1, %c0_i32 : i32
    %1 = arith.extui %0 : i1 to i32
    %c0_i32_0 = arith.constant 0 : i32
    %2 = arith.cmpi ne, %1, %c0_i32_0 : i32
    scf.if %2 {
      %cst_68 = arith.constant 0xFF800000 : f32
      %119 = vector.broadcast %cst_68 : f32 to vector<8x1xf32>
      %c0_69 = arith.constant 0 : index
      %c0_70 = arith.constant 0 : index
      %120 = vector.load %arg20[%c0_69, %c0_70] : memref<8x1xf32, #tpu.memory_space<vmem>>, vector<8x1xf32>
      tpu.vector_store %arg20[%c0_69, %c0_70], %119 {strides = array<i32>} : memref<8x1xf32, #tpu.memory_space<vmem>>, vector<8x1xf32>,
      %cst_71 = arith.constant 0.000000e+00 : f32
      %121 = vector.broadcast %cst_71 : f32 to vector<8x1xf32>
      %c0_72 = arith.constant 0 : index
      %c0_73 = arith.constant 0 : index
      %122 = vector.load %arg21[%c0_72, %c0_73] : memref<8x1xf32, #tpu.memory_space<vmem>>, vector<8x1xf32>
      tpu.vector_store %arg21[%c0_72, %c0_73], %121 {strides = array<i32>} : memref<8x1xf32, #tpu.memory_space<vmem>>, vector<8x1xf32>,
      %cst_74 = arith.constant 0.000000e+00 : f32
      %123 = vector.broadcast %cst_74 : f32 to vector<8x32xf32>
      %c0_75 = arith.constant 0 : index
      %c0_76 = arith.constant 0 : index
      %124 = vector.load %arg22[%c0_75, %c0_76] : memref<8x32xf32, #tpu.memory_space<vmem>>, vector<8x32xf32>
      tpu.vector_store %arg22[%c0_75, %c0_76], %123 {strides = array<i32>} : memref<8x32xf32, #tpu.memory_space<vmem>>, vector<8x32xf32>,
    } else {
    }
    %c0 = arith.constant 0 : index
    %c0_1 = arith.constant 0 : index
    %c0_2 = arith.constant 0 : index
    %3 = vector.load %arg2[%c0, %c0_1, %c0_2] : memref<1x8x32xf32, #tpu.memory_space<vmem>>, vector<1x8x32xf32>
    %4 = vector.shape_cast %3 : vector<1x8x32xf32> to vector<8x32xf32>
    %c0_3 = arith.constant 0 : index
    %c0_4 = arith.constant 0 : index
    %c0_5 = arith.constant 0 : index
    %5 = vector.load %arg3[%c0_3, %c0_4, %c0_5] : memref<1x8x32xf32, #tpu.memory_space<vmem>>, vector<1x8x32xf32>
    %6 = vector.shape_cast %5 : vector<1x8x32xf32> to vector<8x32xf32>
    %c0_6 = arith.constant 0 : index
    %c0_7 = arith.constant 0 : index
    %7 = vector.load %arg4[%c0_6, %c0_7] : memref<32x64xf32, #tpu.memory_space<vmem>>, vector<32x64xf32>
    %cst = arith.constant dense<0.000000e+00> : vector<8x64xf32>
    %8 = tpu.matmul %4, %7, %cst {dimension_numbers = #tpu.dot_dimension_numbers<[1], [0], [0], [1], [0, 0, 1, 1], [], []>} : vector<8x32xf32>, vector<32x64xf32>, vector<8x64xf32> -> vector<8x64xf32>
    %c0_8 = arith.constant 0 : index
    %c0_9 = arith.constant 0 : index
    %9 = vector.load %arg5[%c0_8, %c0_9] : memref<32x64xf32, #tpu.memory_space<vmem>>, vector<32x64xf32>
    %cst_10 = arith.constant dense<0.000000e+00> : vector<8x64xf32>
    %10 = tpu.matmul %6, %9, %cst_10 {dimension_numbers = #tpu.dot_dimension_numbers<[1], [0], [0], [1], [0, 0, 1, 1], [], []>} : vector<8x32xf32>, vector<32x64xf32>, vector<8x64xf32> -> vector<8x64xf32>
    %11 = arith.addf %8, %10 : vector<8x64xf32>
    %c0_11 = arith.constant 0 : index
    %c0_12 = arith.constant 0 : index
    %12 = vector.load %arg6[%c0_11, %c0_12] : memref<1x64xf32, #tpu.memory_space<vmem>>, vector<1x64xf32>
    %13 = vector.broadcast %12 : vector<1x64xf32> to vector<8x64xf32>
    %14 = arith.addf %11, %13 : vector<8x64xf32>
    %cst_13 = arith.constant 0.000000e+00 : f32
    %15 = vector.broadcast %cst_13 : f32 to vector<8x64xf32>
    %16 = arith.maximumf %14, %15 : vector<8x64xf32>
    %c0_14 = arith.constant 0 : index
    %c0_15 = arith.constant 0 : index
    %17 = vector.load %arg7[%c0_14, %c0_15] : memref<64x32xf32, #tpu.memory_space<vmem>>, vector<64x32xf32>
    %cst_16 = arith.constant dense<0.000000e+00> : vector<8x32xf32>
    %18 = tpu.matmul %16, %17, %cst_16 {dimension_numbers = #tpu.dot_dimension_numbers<[1], [0], [0], [1], [0, 0, 1, 1], [], []>} : vector<8x64xf32>, vector<64x32xf32>, vector<8x32xf32> -> vector<8x32xf32>
    %c0_17 = arith.constant 0 : index
    %c0_18 = arith.constant 0 : index
    %19 = vector.load %arg11[%c0_17, %c0_18] : memref<1x32xf32, #tpu.memory_space<vmem>>, vector<1x32xf32>
    %20 = vector.broadcast %19 : vector<1x32xf32> to vector<8x32xf32>
    %21 = arith.addf %18, %20 : vector<8x32xf32>
    %22 = arith.negf %21 : vector<8x32xf32>
    %23 = math.exp %22 : vector<8x32xf32>
    %cst_19 = arith.constant 1.000000e+00 : f32
    %24 = vector.broadcast %cst_19 : f32 to vector<8x32xf32>
    %25 = arith.addf %24, %23 : vector<8x32xf32>
    %26 = arith.divf %24, %25 : vector<8x32xf32>
    %c0_20 = arith.constant 0 : index
    %c0_21 = arith.constant 0 : index
    %27 = vector.load %arg8[%c0_20, %c0_21] : memref<64x32xf32, #tpu.memory_space<vmem>>, vector<64x32xf32>
    %cst_22 = arith.constant dense<0.000000e+00> : vector<8x32xf32>
    %28 = tpu.matmul %16, %27, %cst_22 {dimension_numbers = #tpu.dot_dimension_numbers<[1], [0], [0], [1], [0, 0, 1, 1], [], []>} : vector<8x64xf32>, vector<64x32xf32>, vector<8x32xf32> -> vector<8x32xf32>
    %c0_23 = arith.constant 0 : index
    %c0_24 = arith.constant 0 : index
    %29 = vector.load %arg12[%c0_23, %c0_24] : memref<1x32xf32, #tpu.memory_space<vmem>>, vector<1x32xf32>
    %30 = vector.broadcast %29 : vector<1x32xf32> to vector<8x32xf32>
    %31 = arith.addf %28, %30 : vector<8x32xf32>
    %32 = arith.negf %31 : vector<8x32xf32>
    %33 = math.exp %32 : vector<8x32xf32>
    %cst_25 = arith.constant 1.000000e+00 : f32
    %34 = vector.broadcast %cst_25 : f32 to vector<8x32xf32>
    %35 = arith.addf %34, %33 : vector<8x32xf32>
    %36 = arith.divf %34, %35 : vector<8x32xf32>
    %c0_26 = arith.constant 0 : index
    %c0_27 = arith.constant 0 : index
    %37 = vector.load %arg9[%c0_26, %c0_27] : memref<64x32xf32, #tpu.memory_space<vmem>>, vector<64x32xf32>
    %cst_28 = arith.constant dense<0.000000e+00> : vector<8x32xf32>
    %38 = tpu.matmul %16, %37, %cst_28 {dimension_numbers = #tpu.dot_dimension_numbers<[1], [0], [0], [1], [0, 0, 1, 1], [], []>} : vector<8x64xf32>, vector<64x32xf32>, vector<8x32xf32> -> vector<8x32xf32>
    %c0_29 = arith.constant 0 : index
    %c0_30 = arith.constant 0 : index
    %39 = vector.load %arg13[%c0_29, %c0_30] : memref<1x32xf32, #tpu.memory_space<vmem>>, vector<1x32xf32>
    %40 = vector.broadcast %39 : vector<1x32xf32> to vector<8x32xf32>
    %41 = arith.addf %38, %40 : vector<8x32xf32>
    %42 = arith.negf %41 : vector<8x32xf32>
    %43 = math.exp %42 : vector<8x32xf32>
    %cst_31 = arith.constant 1.000000e+00 : f32
    %44 = vector.broadcast %cst_31 : f32 to vector<8x32xf32>
    %45 = arith.addf %44, %43 : vector<8x32xf32>
    %46 = arith.divf %44, %45 : vector<8x32xf32>
    %c0_32 = arith.constant 0 : index
    %c0_33 = arith.constant 0 : index
    %47 = vector.load %arg10[%c0_32, %c0_33] : memref<64x32xf32, #tpu.memory_space<vmem>>, vector<64x32xf32>
    %cst_34 = arith.constant dense<0.000000e+00> : vector<8x32xf32>
    %48 = tpu.matmul %16, %47, %cst_34 {dimension_numbers = #tpu.dot_dimension_numbers<[1], [0], [0], [1], [0, 0, 1, 1], [], []>} : vector<8x64xf32>, vector<64x32xf32>, vector<8x32xf32> -> vector<8x32xf32>
    %c0_35 = arith.constant 0 : index
    %c0_36 = arith.constant 0 : index
    %49 = vector.load %arg14[%c0_35, %c0_36] : memref<1x32xf32, #tpu.memory_space<vmem>>, vector<1x32xf32>
    %50 = vector.broadcast %49 : vector<1x32xf32> to vector<8x32xf32>
    %51 = arith.addf %48, %50 : vector<8x32xf32>
    %52 = arith.mulf %26, %4 : vector<8x32xf32>
    %53 = arith.mulf %36, %6 : vector<8x32xf32>
    %54 = arith.addf %52, %53 : vector<8x32xf32>
    %55 = arith.mulf %46, %51 : vector<8x32xf32>
    %56 = arith.addf %54, %55 : vector<8x32xf32>
    %c0_37 = arith.constant 0 : index
    %c0_38 = arith.constant 0 : index
    %57 = vector.load %arg15[%c0_37, %c0_38] : memref<1x32xf32, #tpu.memory_space<vmem>>, vector<1x32xf32>
    %c0_39 = arith.constant 0 : index
    %c0_40 = arith.constant 0 : index
    %58 = vector.load %arg16[%c0_39, %c0_40] : memref<1x32xf32, #tpu.memory_space<vmem>>, vector<1x32xf32>
    %cst_41 = arith.constant dense<0.000000e+00> : vector<8xf32>
    %59 = vector.multi_reduction <add>, %56, %cst_41 [1] : vector<8x32xf32> to vector<8xf32>
    %60 = vector.shape_cast %59 : vector<8xf32> to vector<8x1xf32>
    %cst_42 = arith.constant 3.200000e+01 : f32
    %61 = vector.broadcast %cst_42 : f32 to vector<8x1xf32>
    %62 = arith.divf %60, %61 : vector<8x1xf32>
    %63 = vector.broadcast %62 : vector<8x1xf32> to vector<8x32xf32>
    %64 = arith.subf %56, %63 : vector<8x32xf32>
    %65 = arith.mulf %64, %64 : vector<8x32xf32>
    %cst_43 = arith.constant dense<0.000000e+00> : vector<8xf32>
    %66 = vector.multi_reduction <add>, %65, %cst_43 [1] : vector<8x32xf32> to vector<8xf32>
    %67 = vector.shape_cast %66 : vector<8xf32> to vector<8x1xf32>
    %cst_44 = arith.constant 3.200000e+01 : f32
    %68 = vector.broadcast %cst_44 : f32 to vector<8x1xf32>
    %69 = arith.divf %67, %68 : vector<8x1xf32>
    %70 = vector.broadcast %62 : vector<8x1xf32> to vector<8x32xf32>
    %71 = arith.subf %56, %70 : vector<8x32xf32>
    %cst_45 = arith.constant 9.99999974E-6 : f32
    %72 = vector.broadcast %cst_45 : f32 to vector<8x1xf32>
    %73 = arith.addf %69, %72 : vector<8x1xf32>
    %74 = math.rsqrt %73 : vector<8x1xf32>
    %75 = vector.broadcast %74 : vector<8x1xf32> to vector<8x32xf32>
    %76 = arith.mulf %71, %75 : vector<8x32xf32>
    %77 = vector.broadcast %57 : vector<1x32xf32> to vector<8x32xf32>
    %78 = arith.mulf %76, %77 : vector<8x32xf32>
    %79 = vector.broadcast %58 : vector<1x32xf32> to vector<8x32xf32>
    %80 = arith.addf %78, %79 : vector<8x32xf32>
    %81 = arith.mulf %80, %80 : vector<8x32xf32>
    %cst_46 = arith.constant dense<0.000000e+00> : vector<8xf32>
    %82 = vector.multi_reduction <add>, %81, %cst_46 [1] : vector<8x32xf32> to vector<8xf32>
    %83 = vector.shape_cast %82 : vector<8xf32> to vector<8x1xf32>
    %84 = math.sqrt %83 : vector<8x1xf32>
    %cst_47 = arith.constant 9.99999993E-9 : f32
    %85 = vector.broadcast %cst_47 : f32 to vector<8x1xf32>
    %86 = arith.addf %84, %85 : vector<8x1xf32>
    %87 = vector.broadcast %86 : vector<8x1xf32> to vector<8x32xf32>
    %88 = arith.divf %80, %87 : vector<8x32xf32>
    %c0_48 = arith.constant 0 : index
    %c0_49 = arith.constant 0 : index
    %89 = vector.load %arg17[%c0_48, %c0_49] : memref<1x32xf32, #tpu.memory_space<vmem>>, vector<1x32xf32>
    %90 = vector.broadcast %89 : vector<1x32xf32> to vector<8x32xf32>
    %91 = arith.mulf %88, %90 : vector<8x32xf32>
    %cst_50 = arith.constant dense<0.000000e+00> : vector<8xf32>
    %92 = vector.multi_reduction <add>, %91, %cst_50 [1] : vector<8x32xf32> to vector<8xf32>
    %93 = vector.shape_cast %92 : vector<8xf32> to vector<8x1xf32>
    %c0_51 = arith.constant 0 : index
    %c0_52 = arith.constant 0 : index
    %94 = memref.load %arg18[%c0_51, %c0_52] : memref<1x1xf32, #tpu.memory_space<smem>>
    %95 = vector.broadcast %94 : f32 to vector<8x1xf32>
    %96 = arith.addf %93, %95 : vector<8x1xf32>
    %c0_53 = arith.constant 0 : index
    %c0_54 = arith.constant 0 : index
    %97 = vector.load %arg20[%c0_53, %c0_54] : memref<8x1xf32, #tpu.memory_space<vmem>>, vector<8x1xf32>
    %98 = arith.maximumf %97, %96 : vector<8x1xf32>
    %c0_55 = arith.constant 0 : index
    %c0_56 = arith.constant 0 : index
    %99 = vector.load %arg20[%c0_55, %c0_56] : memref<8x1xf32, #tpu.memory_space<vmem>>, vector<8x1xf32>
    %100 = arith.subf %99, %98 : vector<8x1xf32>
    %101 = math.exp %100 : vector<8x1xf32>
    %102 = arith.subf %96, %98 : vector<8x1xf32>
    %103 = math.exp %102 : vector<8x1xf32>
    %c0_57 = arith.constant 0 : index
    %c0_58 = arith.constant 0 : index
    %104 = vector.load %arg21[%c0_57, %c0_58] : memref<8x1xf32, #tpu.memory_space<vmem>>, vector<8x1xf32>
    %105 = arith.mulf %101, %104 : vector<8x1xf32>
    %106 = arith.addf %105, %103 : vector<8x1xf32>
    %c0_59 = arith.constant 0 : index
    %c0_60 = arith.constant 0 : index
    %107 = vector.load %arg21[%c0_59, %c0_60] : memref<8x1xf32, #tpu.memory_space<vmem>>, vector<8x1xf32>
    tpu.vector_store %arg21[%c0_59, %c0_60], %106 {strides = array<i32>} : memref<8x1xf32, #tpu.memory_space<vmem>>, vector<8x1xf32>,
    %c0_61 = arith.constant 0 : index
    %c0_62 = arith.constant 0 : index
    %108 = vector.load %arg22[%c0_61, %c0_62] : memref<8x32xf32, #tpu.memory_space<vmem>>, vector<8x32xf32>
    %109 = vector.broadcast %101 : vector<8x1xf32> to vector<8x32xf32>
    %110 = arith.mulf %109, %108 : vector<8x32xf32>
    %111 = vector.broadcast %103 : vector<8x1xf32> to vector<8x32xf32>
    %112 = arith.mulf %111, %88 : vector<8x32xf32>
    %113 = arith.addf %110, %112 : vector<8x32xf32>
    %c0_63 = arith.constant 0 : index
    %c0_64 = arith.constant 0 : index
    %114 = vector.load %arg22[%c0_63, %c0_64] : memref<8x32xf32, #tpu.memory_space<vmem>>, vector<8x32xf32>
    tpu.vector_store %arg22[%c0_63, %c0_64], %113 {strides = array<i32>} : memref<8x32xf32, #tpu.memory_space<vmem>>, vector<8x32xf32>,
    %c0_65 = arith.constant 0 : index
    %c0_66 = arith.constant 0 : index
    %115 = vector.load %arg20[%c0_65, %c0_66] : memref<8x1xf32, #tpu.memory_space<vmem>>, vector<8x1xf32>
    tpu.vector_store %arg20[%c0_65, %c0_66], %98 {strides = array<i32>} : memref<8x1xf32, #tpu.memory_space<vmem>>, vector<8x1xf32>,
    %c5_i32 = arith.constant 5 : i32
    %116 = arith.cmpi eq, %arg1, %c5_i32 : i32
    %117 = arith.extui %116 : i1 to i32
    %c0_i32_67 = arith.constant 0 : i32
    %118 = arith.cmpi ne, %117, %c0_i32_67 : i32
    scf.if %118 {
      %c0_68 = arith.constant 0 : index
      %c0_69 = arith.constant 0 : index
      %119 = vector.load %arg22[%c0_68, %c0_69] : memref<8x32xf32, #tpu.memory_space<vmem>>, vector<8x32xf32>
      %c0_70 = arith.constant 0 : index
      %c0_71 = arith.constant 0 : index
      %120 = vector.load %arg21[%c0_70, %c0_71] : memref<8x1xf32, #tpu.memory_space<vmem>>, vector<8x1xf32>
      %121 = vector.broadcast %120 : vector<8x1xf32> to vector<8x32xf32>
      %122 = arith.divf %119, %121 : vector<8x32xf32>
      %c0_72 = arith.constant 0 : index
      %c0_73 = arith.constant 0 : index
      %123 = vector.load %arg19[%c0_72, %c0_73] : memref<8x32xf32, #tpu.memory_space<vmem>>, vector<8x32xf32>
      tpu.vector_store %arg19[%c0_72, %c0_73], %122 {strides = array<i32>} : memref<8x32xf32, #tpu.memory_space<vmem>>, vector<8x32xf32>,
    } else {
    }
    return
  }
  func.func @transform_0(%arg0: i32, %arg1: i32) -> (i32, i32, i32) {
    %c0_i32 = arith.constant 0 : i32
    %c0_i32_0 = arith.constant 0 : i32
    return %arg1, %arg0, %c0_i32 : i32, i32, i32
  }
  func.func @transform_1(%arg0: i32, %arg1: i32) -> (i32, i32, i32) {
    %c0_i32 = arith.constant 0 : i32
    %c0_i32_0 = arith.constant 0 : i32
    return %arg1, %arg0, %c0_i32 : i32, i32, i32
  }
  func.func @transform_2(%arg0: i32, %arg1: i32) -> (i32, i32) {
    %c0_i32 = arith.constant 0 : i32
    %c0_i32_0 = arith.constant 0 : i32
    %c0_i32_1 = arith.constant 0 : i32
    return %c0_i32, %c0_i32_0 : i32, i32
  }
  func.func @transform_3(%arg0: i32, %arg1: i32) -> (i32, i32) {
    %c0_i32 = arith.constant 0 : i32
    %c0_i32_0 = arith.constant 0 : i32
    %c0_i32_1 = arith.constant 0 : i32
    return %c0_i32, %c0_i32_0 : i32, i32
  }
  func.func @transform_4(%arg0: i32, %arg1: i32) -> (i32, i32) {
    %c0_i32 = arith.constant 0 : i32
    %c0_i32_0 = arith.constant 0 : i32
    %c0_i32_1 = arith.constant 0 : i32
    return %c0_i32, %c0_i32_0 : i32, i32
  }
  func.func @transform_5(%arg0: i32, %arg1: i32) -> (i32, i32) {
    %c0_i32 = arith.constant 0 : i32
    %c0_i32_0 = arith.constant 0 : i32
    %c0_i32_1 = arith.constant 0 : i32
    return %c0_i32, %c0_i32_0 : i32, i32
  }
  func.func @transform_6(%arg0: i32, %arg1: i32) -> (i32, i32) {
    %c0_i32 = arith.constant 0 : i32
    %c0_i32_0 = arith.constant 0 : i32
    %c0_i32_1 = arith.constant 0 : i32
    return %c0_i32, %c0_i32_0 : i32, i32
  }
  func.func @transform_7(%arg0: i32, %arg1: i32) -> (i32, i32) {
    %c0_i32 = arith.constant 0 : i32
    %c0_i32_0 = arith.constant 0 : i32
    %c0_i32_1 = arith.constant 0 : i32
    return %c0_i32, %c0_i32_0 : i32, i32
  }
  func.func @transform_8(%arg0: i32, %arg1: i32) -> (i32, i32) {
    %c0_i32 = arith.constant 0 : i32
    %c0_i32_0 = arith.constant 0 : i32
    %c0_i32_1 = arith.constant 0 : i32
    return %c0_i32, %c0_i32_0 : i32, i32
  }
  func.func @transform_9(%arg0: i32, %arg1: i32) -> (i32, i32) {
    %c0_i32 = arith.constant 0 : i32
    %c0_i32_0 = arith.constant 0 : i32
    %c0_i32_1 = arith.constant 0 : i32
    return %c0_i32, %c0_i32_0 : i32, i32
  }
  func.func @transform_10(%arg0: i32, %arg1: i32) -> (i32, i32) {
    %c0_i32 = arith.constant 0 : i32
    %c0_i32_0 = arith.constant 0 : i32
    %c0_i32_1 = arith.constant 0 : i32
    return %c0_i32, %c0_i32_0 : i32, i32
  }
  func.func @transform_11(%arg0: i32, %arg1: i32) -> (i32, i32) {
    %c0_i32 = arith.constant 0 : i32
    %c0_i32_0 = arith.constant 0 : i32
    %c0_i32_1 = arith.constant 0 : i32
    return %c0_i32, %c0_i32_0 : i32, i32
  }
  func.func @transform_12(%arg0: i32, %arg1: i32) -> (i32, i32) {
    %c0_i32 = arith.constant 0 : i32
    %c0_i32_0 = arith.constant 0 : i32
    %c0_i32_1 = arith.constant 0 : i32
    return %c0_i32, %c0_i32_0 : i32, i32
  }
  func.func @transform_13(%arg0: i32, %arg1: i32) -> (i32, i32) {
    %c0_i32 = arith.constant 0 : i32
    %c0_i32_0 = arith.constant 0 : i32
    %c0_i32_1 = arith.constant 0 : i32
    return %c0_i32, %c0_i32_0 : i32, i32
  }
  func.func @transform_14(%arg0: i32, %arg1: i32) -> (i32, i32) {
    %c0_i32 = arith.constant 0 : i32
    %c0_i32_0 = arith.constant 0 : i32
    %c0_i32_1 = arith.constant 0 : i32
    return %c0_i32, %c0_i32_0 : i32, i32
  }
  func.func @transform_15(%arg0: i32, %arg1: i32) -> (i32, i32) {
    %c0_i32 = arith.constant 0 : i32
    %c0_i32_0 = arith.constant 0 : i32
    %c0_i32_1 = arith.constant 0 : i32
    return %c0_i32, %c0_i32_0 : i32, i32
  }
  func.func @transform_16(%arg0: i32, %arg1: i32) -> (i32, i32) {
    %c0_i32 = arith.constant 0 : i32
    %c0_i32_0 = arith.constant 0 : i32
    %c0_i32_1 = arith.constant 0 : i32
    return %c0_i32, %c0_i32_0 : i32, i32
  }
  func.func @transform_17(%arg0: i32, %arg1: i32) -> (i32, i32) {
    %c0_i32 = arith.constant 0 : i32
    %c0_i32_0 = arith.constant 0 : i32
    return %arg0, %c0_i32 : i32, i32
  }
}

module attributes {stable_mosaic.version = 11 : i64} {
  func.func @_cyk_row_kernel(%arg0: i32, %arg1: i32, %arg2: memref<1x8x32xf32, #tpu.memory_space<vmem>>, %arg3: memref<1x8x32xf32, #tpu.memory_space<vmem>>, %arg4: memref<32x64xf32, #tpu.memory_space<vmem>>, %arg5: memref<32x64xf32, #tpu.memory_space<vmem>>, %arg6: memref<1x64xf32, #tpu.memory_space<vmem>>, %arg7: memref<64x32xf32, #tpu.memory_space<vmem>>, %arg8: memref<64x32xf32, #tpu.memory_space<vmem>>, %arg9: memref<64x32xf32, #tpu.memory_space<vmem>>, %arg10: memref<64x32xf32, #tpu.memory_space<vmem>>, %arg11: memref<1x32xf32, #tpu.memory_space<vmem>>, %arg12: memref<1x32xf32, #tpu.memory_space<vmem>>, %arg13: memref<1x32xf32, #tpu.memory_space<vmem>>, %arg14: memref<1x32xf32, #tpu.memory_space<vmem>>, %arg15: memref<1x32xf32, #tpu.memory_space<vmem>>, %arg16: memref<1x32xf32, #tpu.memory_space<vmem>>, %arg17: memref<1x32xf32, #tpu.memory_space<vmem>>, %arg18: memref<1x1xf32, #tpu.memory_space<smem>>, %arg19: memref<8x32xf32, #tpu.memory_space<vmem>>, %arg20: memref<8x1xf32, #tpu.memory_space<vmem>>, %arg21: memref<8x1xf32, #tpu.memory_space<vmem>>, %arg22: memref<8x32xf32, #tpu.memory_space<vmem>>) attributes {dimension_semantics = [#tpu.dimension_semantics<parallel>, #tpu.dimension_semantics<arbitrary>], iteration_bounds = array<i64: 1, 7>, scalar_prefetch = 0 : i64, scratch_operands = 3 : i64, tpu.core_type = #tpu.core_type<tc>, window_params = [{transform_indices = @transform_0, window_bounds = array<i64: 1, 8, 32>}, {transform_indices = @transform_1, window_bounds = array<i64: 1, 8, 32>}, {pipeline_mode = #tpu.pipeline_mode<synchronous>, transform_indices = @transform_2, window_bounds = array<i64: 32, 64>}, {pipeline_mode = #tpu.pipeline_mode<synchronous>, transform_indices = @transform_3, window_bounds = array<i64: 32, 64>}, {pipeline_mode = #tpu.pipeline_mode<synchronous>, transform_indices = @transform_4, window_bounds = array<i64: 1, 64>}, {pipeline_mode = #tpu.pipeline_mode<synchronous>, transform_indices = @transform_5, window_bounds = array<i64: 64, 32>}, {pipeline_mode = #tpu.pipeline_mode<synchronous>, transform_indices = @transform_6, window_bounds = array<i64: 64, 32>}, {pipeline_mode = #tpu.pipeline_mode<synchronous>, transform_indices = @transform_7, window_bounds = array<i64: 64, 32>}, {pipeline_mode = #tpu.pipeline_mode<synchronous>, transform_indices = @transform_8, window_bounds = array<i64: 64, 32>}, {pipeline_mode = #tpu.pipeline_mode<synchronous>, transform_indices = @transform_9, window_bounds = array<i64: 1, 32>}, {pipeline_mode = #tpu.pipeline_mode<synchronous>, transform_indices = @transform_10, window_bounds = array<i64: 1, 32>}, {pipeline_mode = #tpu.pipeline_mode<synchronous>, transform_indices = @transform_11, window_bounds = array<i64: 1, 32>}, {pipeline_mode = #tpu.pipeline_mode<synchronous>, transform_indices = @transform_12, window_bounds = array<i64: 1, 32>}, {pipeline_mode = #tpu.pipeline_mode<synchronous>, transform_indices = @transform_13, window_bounds = array<i64: 1, 32>}, {pipeline_mode = #tpu.pipeline_mode<synchronous>, transform_indices = @transform_14, window_bounds = array<i64: 1, 32>}, {pipeline_mode = #tpu.pipeline_mode<synchronous>, transform_indices = @transform_15, window_bounds = array<i64: 1, 32>}, {transform_indices = @transform_16, window_bounds = array<i64: 1, 1>}, {transform_indices = @transform_17, window_bounds = array<i64: 8, 32>}]} {
    %c0_i32 = arith.constant 0 : i32
    %0 = arith.cmpi eq, %arg1, %c0_i32 : i32
    %1 = arith.extui %0 : i1 to i32
    %c0_i32_0 = arith.constant 0 : i32
    %2 = arith.cmpi ne, %1, %c0_i32_0 : i32
    scf.if %2 {
      %cst_68 = arith.constant 0xFF800000 : f32
      %119 = vector.broadcast %cst_68 : f32 to vector<8x1xf32>
      %c0_69 = arith.constant 0 : index
      %c0_70 = arith.constant 0 : index
      %120 = vector.load %arg20[%c0_69, %c0_70] : memref<8x1xf32, #tpu.memory_space<vmem>>, vector<8x1xf32>
      tpu.vector_store %arg20[%c0_69, %c0_70], %119 {strides = array<i32>} : memref<8x1xf32, #tpu.memory_space<vmem>>, vector<8x1xf32>,
      %cst_71 = arith.constant 0.000000e+00 : f32
      %121 = vector.broadcast %cst_71 : f32 to vector<8x1xf32>
      %c0_72 = arith.constant 0 : index
      %c0_73 = arith.constant 0 : index
      %122 = vector.load %arg21[%c0_72, %c0_73] : memref<8x1xf32, #tpu.memory_space<vmem>>, vector<8x1xf32>
      tpu.vector_store %arg21[%c0_72, %c0_73], %121 {strides = array<i32>} : memref<8x1xf32, #tpu.memory_space<vmem>>, vector<8x1xf32>,
      %cst_74 = arith.constant 0.000000e+00 : f32
      %123 = vector.broadcast %cst_74 : f32 to vector<8x32xf32>
      %c0_75 = arith.constant 0 : index
      %c0_76 = arith.constant 0 : index
      %124 = vector.load %arg22[%c0_75, %c0_76] : memref<8x32xf32, #tpu.memory_space<vmem>>, vector<8x32xf32>
      tpu.vector_store %arg22[%c0_75, %c0_76], %123 {strides = array<i32>} : memref<8x32xf32, #tpu.memory_space<vmem>>, vector<8x32xf32>,
    } else {
    }
    %c0 = arith.constant 0 : index
    %c0_1 = arith.constant 0 : index
    %c0_2 = arith.constant 0 : index
    %3 = vector.load %arg2[%c0, %c0_1, %c0_2] : memref<1x8x32xf32, #tpu.memory_space<vmem>>, vector<1x8x32xf32>
    %4 = vector.shape_cast %3 : vector<1x8x32xf32> to vector<8x32xf32>
    %c0_3 = arith.constant 0 : index
    %c0_4 = arith.constant 0 : index
    %c0_5 = arith.constant 0 : index
    %5 = vector.load %arg3[%c0_3, %c0_4, %c0_5] : memref<1x8x32xf32, #tpu.memory_space<vmem>>, vector<1x8x32xf32>
    %6 = vector.shape_cast %5 : vector<1x8x32xf32> to vector<8x32xf32>
    %c0_6 = arith.constant 0 : index
    %c0_7 = arith.constant 0 : index
    %7 = vector.load %arg4[%c0_6, %c0_7] : memref<32x64xf32, #tpu.memory_space<vmem>>, vector<32x64xf32>
    %cst = arith.constant dense<0.000000e+00> : vector<8x64xf32>
    %8 = tpu.matmul %4, %7, %cst {dimension_numbers = #tpu.dot_dimension_numbers<[1], [0], [0], [1], [0, 0, 1, 1], [], []>} : vector<8x32xf32>, vector<32x64xf32>, vector<8x64xf32> -> vector<8x64xf32>
    %c0_8 = arith.constant 0 : index
    %c0_9 = arith.constant 0 : index
    %9 = vector.load %arg5[%c0_8, %c0_9] : memref<32x64xf32, #tpu.memory_space<vmem>>, vector<32x64xf32>
    %cst_10 = arith.constant dense<0.000000e+00> : vector<8x64xf32>
    %10 = tpu.matmul %6, %9, %cst_10 {dimension_numbers = #tpu.dot_dimension_numbers<[1], [0], [0], [1], [0, 0, 1, 1], [], []>} : vector<8x32xf32>, vector<32x64xf32>, vector<8x64xf32> -> vector<8x64xf32>
    %11 = arith.addf %8, %10 : vector<8x64xf32>
    %c0_11 = arith.constant 0 : index
    %c0_12 = arith.constant 0 : index
    %12 = vector.load %arg6[%c0_11, %c0_12] : memref<1x64xf32, #tpu.memory_space<vmem>>, vector<1x64xf32>
    %13 = vector.broadcast %12 : vector<1x64xf32> to vector<8x64xf32>
    %14 = arith.addf %11, %13 : vector<8x64xf32>
    %cst_13 = arith.constant 0.000000e+00 : f32
    %15 = vector.broadcast %cst_13 : f32 to vector<8x64xf32>
    %16 = arith.maximumf %14, %15 : vector<8x64xf32>
    %c0_14 = arith.constant 0 : index
    %c0_15 = arith.constant 0 : index
    %17 = vector.load %arg7[%c0_14, %c0_15] : memref<64x32xf32, #tpu.memory_space<vmem>>, vector<64x32xf32>
    %cst_16 = arith.constant dense<0.000000e+00> : vector<8x32xf32>
    %18 = tpu.matmul %16, %17, %cst_16 {dimension_numbers = #tpu.dot_dimension_numbers<[1], [0], [0], [1], [0, 0, 1, 1], [], []>} : vector<8x64xf32>, vector<64x32xf32>, vector<8x32xf32> -> vector<8x32xf32>
    %c0_17 = arith.constant 0 : index
    %c0_18 = arith.constant 0 : index
    %19 = vector.load %arg11[%c0_17, %c0_18] : memref<1x32xf32, #tpu.memory_space<vmem>>, vector<1x32xf32>
    %20 = vector.broadcast %19 : vector<1x32xf32> to vector<8x32xf32>
    %21 = arith.addf %18, %20 : vector<8x32xf32>
    %22 = arith.negf %21 : vector<8x32xf32>
    %23 = math.exp %22 : vector<8x32xf32>
    %cst_19 = arith.constant 1.000000e+00 : f32
    %24 = vector.broadcast %cst_19 : f32 to vector<8x32xf32>
    %25 = arith.addf %24, %23 : vector<8x32xf32>
    %26 = arith.divf %24, %25 : vector<8x32xf32>
    %c0_20 = arith.constant 0 : index
    %c0_21 = arith.constant 0 : index
    %27 = vector.load %arg8[%c0_20, %c0_21] : memref<64x32xf32, #tpu.memory_space<vmem>>, vector<64x32xf32>
    %cst_22 = arith.constant dense<0.000000e+00> : vector<8x32xf32>
    %28 = tpu.matmul %16, %27, %cst_22 {dimension_numbers = #tpu.dot_dimension_numbers<[1], [0], [0], [1], [0, 0, 1, 1], [], []>} : vector<8x64xf32>, vector<64x32xf32>, vector<8x32xf32> -> vector<8x32xf32>
    %c0_23 = arith.constant 0 : index
    %c0_24 = arith.constant 0 : index
    %29 = vector.load %arg12[%c0_23, %c0_24] : memref<1x32xf32, #tpu.memory_space<vmem>>, vector<1x32xf32>
    %30 = vector.broadcast %29 : vector<1x32xf32> to vector<8x32xf32>
    %31 = arith.addf %28, %30 : vector<8x32xf32>
    %32 = arith.negf %31 : vector<8x32xf32>
    %33 = math.exp %32 : vector<8x32xf32>
    %cst_25 = arith.constant 1.000000e+00 : f32
    %34 = vector.broadcast %cst_25 : f32 to vector<8x32xf32>
    %35 = arith.addf %34, %33 : vector<8x32xf32>
    %36 = arith.divf %34, %35 : vector<8x32xf32>
    %c0_26 = arith.constant 0 : index
    %c0_27 = arith.constant 0 : index
    %37 = vector.load %arg9[%c0_26, %c0_27] : memref<64x32xf32, #tpu.memory_space<vmem>>, vector<64x32xf32>
    %cst_28 = arith.constant dense<0.000000e+00> : vector<8x32xf32>
    %38 = tpu.matmul %16, %37, %cst_28 {dimension_numbers = #tpu.dot_dimension_numbers<[1], [0], [0], [1], [0, 0, 1, 1], [], []>} : vector<8x64xf32>, vector<64x32xf32>, vector<8x32xf32> -> vector<8x32xf32>
    %c0_29 = arith.constant 0 : index
    %c0_30 = arith.constant 0 : index
    %39 = vector.load %arg13[%c0_29, %c0_30] : memref<1x32xf32, #tpu.memory_space<vmem>>, vector<1x32xf32>
    %40 = vector.broadcast %39 : vector<1x32xf32> to vector<8x32xf32>
    %41 = arith.addf %38, %40 : vector<8x32xf32>
    %42 = arith.negf %41 : vector<8x32xf32>
    %43 = math.exp %42 : vector<8x32xf32>
    %cst_31 = arith.constant 1.000000e+00 : f32
    %44 = vector.broadcast %cst_31 : f32 to vector<8x32xf32>
    %45 = arith.addf %44, %43 : vector<8x32xf32>
    %46 = arith.divf %44, %45 : vector<8x32xf32>
    %c0_32 = arith.constant 0 : index
    %c0_33 = arith.constant 0 : index
    %47 = vector.load %arg10[%c0_32, %c0_33] : memref<64x32xf32, #tpu.memory_space<vmem>>, vector<64x32xf32>
    %cst_34 = arith.constant dense<0.000000e+00> : vector<8x32xf32>
    %48 = tpu.matmul %16, %47, %cst_34 {dimension_numbers = #tpu.dot_dimension_numbers<[1], [0], [0], [1], [0, 0, 1, 1], [], []>} : vector<8x64xf32>, vector<64x32xf32>, vector<8x32xf32> -> vector<8x32xf32>
    %c0_35 = arith.constant 0 : index
    %c0_36 = arith.constant 0 : index
    %49 = vector.load %arg14[%c0_35, %c0_36] : memref<1x32xf32, #tpu.memory_space<vmem>>, vector<1x32xf32>
    %50 = vector.broadcast %49 : vector<1x32xf32> to vector<8x32xf32>
    %51 = arith.addf %48, %50 : vector<8x32xf32>
    %52 = arith.mulf %26, %4 : vector<8x32xf32>
    %53 = arith.mulf %36, %6 : vector<8x32xf32>
    %54 = arith.addf %52, %53 : vector<8x32xf32>
    %55 = arith.mulf %46, %51 : vector<8x32xf32>
    %56 = arith.addf %54, %55 : vector<8x32xf32>
    %c0_37 = arith.constant 0 : index
    %c0_38 = arith.constant 0 : index
    %57 = vector.load %arg15[%c0_37, %c0_38] : memref<1x32xf32, #tpu.memory_space<vmem>>, vector<1x32xf32>
    %c0_39 = arith.constant 0 : index
    %c0_40 = arith.constant 0 : index
    %58 = vector.load %arg16[%c0_39, %c0_40] : memref<1x32xf32, #tpu.memory_space<vmem>>, vector<1x32xf32>
    %cst_41 = arith.constant dense<0.000000e+00> : vector<8xf32>
    %59 = vector.multi_reduction <add>, %56, %cst_41 [1] : vector<8x32xf32> to vector<8xf32>
    %60 = vector.shape_cast %59 : vector<8xf32> to vector<8x1xf32>
    %cst_42 = arith.constant 3.200000e+01 : f32
    %61 = vector.broadcast %cst_42 : f32 to vector<8x1xf32>
    %62 = arith.divf %60, %61 : vector<8x1xf32>
    %63 = vector.broadcast %62 : vector<8x1xf32> to vector<8x32xf32>
    %64 = arith.subf %56, %63 : vector<8x32xf32>
    %65 = arith.mulf %64, %64 : vector<8x32xf32>
    %cst_43 = arith.constant dense<0.000000e+00> : vector<8xf32>
    %66 = vector.multi_reduction <add>, %65, %cst_43 [1] : vector<8x32xf32> to vector<8xf32>
    %67 = vector.shape_cast %66 : vector<8xf32> to vector<8x1xf32>
    %cst_44 = arith.constant 3.200000e+01 : f32
    %68 = vector.broadcast %cst_44 : f32 to vector<8x1xf32>
    %69 = arith.divf %67, %68 : vector<8x1xf32>
    %70 = vector.broadcast %62 : vector<8x1xf32> to vector<8x32xf32>
    %71 = arith.subf %56, %70 : vector<8x32xf32>
    %cst_45 = arith.constant 9.99999974E-6 : f32
    %72 = vector.broadcast %cst_45 : f32 to vector<8x1xf32>
    %73 = arith.addf %69, %72 : vector<8x1xf32>
    %74 = math.rsqrt %73 : vector<8x1xf32>
    %75 = vector.broadcast %74 : vector<8x1xf32> to vector<8x32xf32>
    %76 = arith.mulf %71, %75 : vector<8x32xf32>
    %77 = vector.broadcast %57 : vector<1x32xf32> to vector<8x32xf32>
    %78 = arith.mulf %76, %77 : vector<8x32xf32>
    %79 = vector.broadcast %58 : vector<1x32xf32> to vector<8x32xf32>
    %80 = arith.addf %78, %79 : vector<8x32xf32>
    %81 = arith.mulf %80, %80 : vector<8x32xf32>
    %cst_46 = arith.constant dense<0.000000e+00> : vector<8xf32>
    %82 = vector.multi_reduction <add>, %81, %cst_46 [1] : vector<8x32xf32> to vector<8xf32>
    %83 = vector.shape_cast %82 : vector<8xf32> to vector<8x1xf32>
    %84 = math.sqrt %83 : vector<8x1xf32>
    %cst_47 = arith.constant 9.99999993E-9 : f32
    %85 = vector.broadcast %cst_47 : f32 to vector<8x1xf32>
    %86 = arith.addf %84, %85 : vector<8x1xf32>
    %87 = vector.broadcast %86 : vector<8x1xf32> to vector<8x32xf32>
    %88 = arith.divf %80, %87 : vector<8x32xf32>
    %c0_48 = arith.constant 0 : index
    %c0_49 = arith.constant 0 : index
    %89 = vector.load %arg17[%c0_48, %c0_49] : memref<1x32xf32, #tpu.memory_space<vmem>>, vector<1x32xf32>
    %90 = vector.broadcast %89 : vector<1x32xf32> to vector<8x32xf32>
    %91 = arith.mulf %88, %90 : vector<8x32xf32>
    %cst_50 = arith.constant dense<0.000000e+00> : vector<8xf32>
    %92 = vector.multi_reduction <add>, %91, %cst_50 [1] : vector<8x32xf32> to vector<8xf32>
    %93 = vector.shape_cast %92 : vector<8xf32> to vector<8x1xf32>
    %c0_51 = arith.constant 0 : index
    %c0_52 = arith.constant 0 : index
    %94 = memref.load %arg18[%c0_51, %c0_52] : memref<1x1xf32, #tpu.memory_space<smem>>
    %95 = vector.broadcast %94 : f32 to vector<8x1xf32>
    %96 = arith.addf %93, %95 : vector<8x1xf32>
    %c0_53 = arith.constant 0 : index
    %c0_54 = arith.constant 0 : index
    %97 = vector.load %arg20[%c0_53, %c0_54] : memref<8x1xf32, #tpu.memory_space<vmem>>, vector<8x1xf32>
    %98 = arith.maximumf %97, %96 : vector<8x1xf32>
    %c0_55 = arith.constant 0 : index
    %c0_56 = arith.constant 0 : index
    %99 = vector.load %arg20[%c0_55, %c0_56] : memref<8x1xf32, #tpu.memory_space<vmem>>, vector<8x1xf32>
    %100 = arith.subf %99, %98 : vector<8x1xf32>
    %101 = math.exp %100 : vector<8x1xf32>
    %102 = arith.subf %96, %98 : vector<8x1xf32>
    %103 = math.exp %102 : vector<8x1xf32>
    %c0_57 = arith.constant 0 : index
    %c0_58 = arith.constant 0 : index
    %104 = vector.load %arg21[%c0_57, %c0_58] : memref<8x1xf32, #tpu.memory_space<vmem>>, vector<8x1xf32>
    %105 = arith.mulf %101, %104 : vector<8x1xf32>
    %106 = arith.addf %105, %103 : vector<8x1xf32>
    %c0_59 = arith.constant 0 : index
    %c0_60 = arith.constant 0 : index
    %107 = vector.load %arg21[%c0_59, %c0_60] : memref<8x1xf32, #tpu.memory_space<vmem>>, vector<8x1xf32>
    tpu.vector_store %arg21[%c0_59, %c0_60], %106 {strides = array<i32>} : memref<8x1xf32, #tpu.memory_space<vmem>>, vector<8x1xf32>,
    %c0_61 = arith.constant 0 : index
    %c0_62 = arith.constant 0 : index
    %108 = vector.load %arg22[%c0_61, %c0_62] : memref<8x32xf32, #tpu.memory_space<vmem>>, vector<8x32xf32>
    %109 = vector.broadcast %101 : vector<8x1xf32> to vector<8x32xf32>
    %110 = arith.mulf %109, %108 : vector<8x32xf32>
    %111 = vector.broadcast %103 : vector<8x1xf32> to vector<8x32xf32>
    %112 = arith.mulf %111, %88 : vector<8x32xf32>
    %113 = arith.addf %110, %112 : vector<8x32xf32>
    %c0_63 = arith.constant 0 : index
    %c0_64 = arith.constant 0 : index
    %114 = vector.load %arg22[%c0_63, %c0_64] : memref<8x32xf32, #tpu.memory_space<vmem>>, vector<8x32xf32>
    tpu.vector_store %arg22[%c0_63, %c0_64], %113 {strides = array<i32>} : memref<8x32xf32, #tpu.memory_space<vmem>>, vector<8x32xf32>,
    %c0_65 = arith.constant 0 : index
    %c0_66 = arith.constant 0 : index
    %115 = vector.load %arg20[%c0_65, %c0_66] : memref<8x1xf32, #tpu.memory_space<vmem>>, vector<8x1xf32>
    tpu.vector_store %arg20[%c0_65, %c0_66], %98 {strides = array<i32>} : memref<8x1xf32, #tpu.memory_space<vmem>>, vector<8x1xf32>,
    %c6_i32 = arith.constant 6 : i32
    %116 = arith.cmpi eq, %arg1, %c6_i32 : i32
    %117 = arith.extui %116 : i1 to i32
    %c0_i32_67 = arith.constant 0 : i32
    %118 = arith.cmpi ne, %117, %c0_i32_67 : i32
    scf.if %118 {
      %c0_68 = arith.constant 0 : index
      %c0_69 = arith.constant 0 : index
      %119 = vector.load %arg22[%c0_68, %c0_69] : memref<8x32xf32, #tpu.memory_space<vmem>>, vector<8x32xf32>
      %c0_70 = arith.constant 0 : index
      %c0_71 = arith.constant 0 : index
      %120 = vector.load %arg21[%c0_70, %c0_71] : memref<8x1xf32, #tpu.memory_space<vmem>>, vector<8x1xf32>
      %121 = vector.broadcast %120 : vector<8x1xf32> to vector<8x32xf32>
      %122 = arith.divf %119, %121 : vector<8x32xf32>
      %c0_72 = arith.constant 0 : index
      %c0_73 = arith.constant 0 : index
      %123 = vector.load %arg19[%c0_72, %c0_73] : memref<8x32xf32, #tpu.memory_space<vmem>>, vector<8x32xf32>
      tpu.vector_store %arg19[%c0_72, %c0_73], %122 {strides = array<i32>} : memref<8x32xf32, #tpu.memory_space<vmem>>, vector<8x32xf32>,
    } else {
    }
    return
  }
  func.func @transform_0(%arg0: i32, %arg1: i32) -> (i32, i32, i32) {
    %c0_i32 = arith.constant 0 : i32
    %c0_i32_0 = arith.constant 0 : i32
    return %arg1, %arg0, %c0_i32 : i32, i32, i32
  }
  func.func @transform_1(%arg0: i32, %arg1: i32) -> (i32, i32, i32) {
    %c0_i32 = arith.constant 0 : i32
    %c0_i32_0 = arith.constant 0 : i32
    return %arg1, %arg0, %c0_i32 : i32, i32, i32
  }
  func.func @transform_2(%arg0: i32, %arg1: i32) -> (i32, i32) {
    %c0_i32 = arith.constant 0 : i32
    %c0_i32_0 = arith.constant 0 : i32
    %c0_i32_1 = arith.constant 0 : i32
    return %c0_i32, %c0_i32_0 : i32, i32
  }
  func.func @transform_3(%arg0: i32, %arg1: i32) -> (i32, i32) {
    %c0_i32 = arith.constant 0 : i32
    %c0_i32_0 = arith.constant 0 : i32
    %c0_i32_1 = arith.constant 0 : i32
    return %c0_i32, %c0_i32_0 : i32, i32
  }
  func.func @transform_4(%arg0: i32, %arg1: i32) -> (i32, i32) {
    %c0_i32 = arith.constant 0 : i32
    %c0_i32_0 = arith.constant 0 : i32
    %c0_i32_1 = arith.constant 0 : i32
    return %c0_i32, %c0_i32_0 : i32, i32
  }
  func.func @transform_5(%arg0: i32, %arg1: i32) -> (i32, i32) {
    %c0_i32 = arith.constant 0 : i32
    %c0_i32_0 = arith.constant 0 : i32
    %c0_i32_1 = arith.constant 0 : i32
    return %c0_i32, %c0_i32_0 : i32, i32
  }
  func.func @transform_6(%arg0: i32, %arg1: i32) -> (i32, i32) {
    %c0_i32 = arith.constant 0 : i32
    %c0_i32_0 = arith.constant 0 : i32
    %c0_i32_1 = arith.constant 0 : i32
    return %c0_i32, %c0_i32_0 : i32, i32
  }
  func.func @transform_7(%arg0: i32, %arg1: i32) -> (i32, i32) {
    %c0_i32 = arith.constant 0 : i32
    %c0_i32_0 = arith.constant 0 : i32
    %c0_i32_1 = arith.constant 0 : i32
    return %c0_i32, %c0_i32_0 : i32, i32
  }
  func.func @transform_8(%arg0: i32, %arg1: i32) -> (i32, i32) {
    %c0_i32 = arith.constant 0 : i32
    %c0_i32_0 = arith.constant 0 : i32
    %c0_i32_1 = arith.constant 0 : i32
    return %c0_i32, %c0_i32_0 : i32, i32
  }
  func.func @transform_9(%arg0: i32, %arg1: i32) -> (i32, i32) {
    %c0_i32 = arith.constant 0 : i32
    %c0_i32_0 = arith.constant 0 : i32
    %c0_i32_1 = arith.constant 0 : i32
    return %c0_i32, %c0_i32_0 : i32, i32
  }
  func.func @transform_10(%arg0: i32, %arg1: i32) -> (i32, i32) {
    %c0_i32 = arith.constant 0 : i32
    %c0_i32_0 = arith.constant 0 : i32
    %c0_i32_1 = arith.constant 0 : i32
    return %c0_i32, %c0_i32_0 : i32, i32
  }
  func.func @transform_11(%arg0: i32, %arg1: i32) -> (i32, i32) {
    %c0_i32 = arith.constant 0 : i32
    %c0_i32_0 = arith.constant 0 : i32
    %c0_i32_1 = arith.constant 0 : i32
    return %c0_i32, %c0_i32_0 : i32, i32
  }
  func.func @transform_12(%arg0: i32, %arg1: i32) -> (i32, i32) {
    %c0_i32 = arith.constant 0 : i32
    %c0_i32_0 = arith.constant 0 : i32
    %c0_i32_1 = arith.constant 0 : i32
    return %c0_i32, %c0_i32_0 : i32, i32
  }
  func.func @transform_13(%arg0: i32, %arg1: i32) -> (i32, i32) {
    %c0_i32 = arith.constant 0 : i32
    %c0_i32_0 = arith.constant 0 : i32
    %c0_i32_1 = arith.constant 0 : i32
    return %c0_i32, %c0_i32_0 : i32, i32
  }
  func.func @transform_14(%arg0: i32, %arg1: i32) -> (i32, i32) {
    %c0_i32 = arith.constant 0 : i32
    %c0_i32_0 = arith.constant 0 : i32
    %c0_i32_1 = arith.constant 0 : i32
    return %c0_i32, %c0_i32_0 : i32, i32
  }
  func.func @transform_15(%arg0: i32, %arg1: i32) -> (i32, i32) {
    %c0_i32 = arith.constant 0 : i32
    %c0_i32_0 = arith.constant 0 : i32
    %c0_i32_1 = arith.constant 0 : i32
    return %c0_i32, %c0_i32_0 : i32, i32
  }
  func.func @transform_16(%arg0: i32, %arg1: i32) -> (i32, i32) {
    %c0_i32 = arith.constant 0 : i32
    %c0_i32_0 = arith.constant 0 : i32
    %c0_i32_1 = arith.constant 0 : i32
    return %c0_i32, %c0_i32_0 : i32, i32
  }
  func.func @transform_17(%arg0: i32, %arg1: i32) -> (i32, i32) {
    %c0_i32 = arith.constant 0 : i32
    %c0_i32_0 = arith.constant 0 : i32
    return %arg0, %c0_i32 : i32, i32
  }
}

</mosaic_0001>

<bundles_post_ra>
// kernel: cyk_cell_forward.8
= control target key start
LH: loop header
LB: loop body
LE: loop exit
PB: predicated region body
PF: predicated region fallthrough
CT: control target
= control target key end

     0   :  { %v166_v0 = vmov 0   ;;  %vm47_vm0 = vcmask 261120   ;;  %v167_v20 = vmov 32.0   ;;  %s258_s1 = inlined_call_operand.vmem [shape: f32[16,1], index: 1, kind: input, shape index: {}]   ;;  %s259_s2 = inlined_call_operand.vmem [shape: f32[32,32], index: 2, kind: input, shape index: {}]   ;;  %s260_s3 = inlined_call_operand.vmem [shape: f32[1,32], index: 3, kind: input, shape index: {}]   ;;  %s261_s0 = inlined_call_operand.vmem [shape: f32[16,32], index: 0, kind: input, shape index: {}]   ;;  %s262_s4 = inlined_call_operand.vmem [shape: f32[1,32], index: 4, kind: input, shape index: {}]   ;;  %s263_s5 = inlined_call_operand.vmem [shape: f32[1,32], index: 5, kind: input, shape index: {}]   ;;  %s264_s6 = inlined_call_operand.vmem [shape: f32[16,32], index: 6, kind: output, shape index: {}]  }
   0x1   :  { %156 = vset.pattern.permute.xlu0 %v166_v0  ;;  %v25_v1 = vld [vmem:[%s258_s1] sm:$0xff]  ;;  %v42_v2 = vld [vmem:[%s259_s2 + $0x18] sm:$0xff]  ;;  %v41_v3 = vld [vmem:[%s259_s2 + $0x10] sm:$0xff]  ;;  %160 = vrcp.f32 %v167_v20 }
   0x2   :  { %29 = vperm.xlu0 %156, %v25_v1   ;;  %66 = vmatpush.msra.mxu0 %v42_v2  ;;  %v40_v4 = vld [vmem:[%s259_s2 + $0x8] sm:$0xff]  ;;  %v39_v6 = vld [vmem:[%s259_s2] sm:$0xff] }
   0x3   :  { %150 = vmatpush.msra.mxu1 %v42_v2  ;;  %v26_v5 = vld [vmem:[%s258_s1 + $0x8] sm:$0xff]  ;;  %v23_v7 = vld [vmem:[%s261_s0] sm:$0xff] }
   0x4   :  { %67 = vmatpush.msra.mxu0 %v41_v3  ;;  %v24_v10 = vld [vmem:[%s261_s0 + $0x8] sm:$0xff]  ;;  %v157_v13 = vld [vmem:[%s260_s3] ss:$0 sm:$0xff] }
   0x5   :  { %151 = vmatpush.msra.mxu1 %v41_v3  ;;  %v158_v51 = vld [vmem:[%s262_s4] ss:$0 sm:$0xff] }
   0x6   :  { %68 = vmatpush.msra.mxu0 %v40_v4  ;;  %v159_v54 = vld [vmem:[%s263_s5] ss:$0 sm:$0xff] }
   0x7   :  { %152 = vmatpush.msra.mxu1 %v40_v4  ;;  %v161_v21 = vpop.eup %160 }
   0x8   :  { %69 = vmatpush.msra.mxu0 %v39_v6  ;;  %v86_v22 = vmul.f32 32.0, %v161_v21  ;;  %vm90_vm1 = vweird.f32 %v161_v21 }
   0x9   :  { %153 = vmatpush.msra.mxu1 %v39_v6 }
   0xa   :  { %34 = vperm.xlu0 %156, %v26_v5   ;;  %v87_v23 = vsub.f32 1.0, %v86_v22 }
   0xc   :  { %v88_v24 = vmul.f32 %v161_v21, %v87_v23 }
   0xe   :  { %v89_v25 = vadd.f32 %v161_v21, %v88_v24 }
  0x10   :  { %v91_v26 = vsel %vm90_vm1, %v161_v21, %v89_v25 }
  0x74   :  { %v224_v8 = vpop.permute.xlu0 %29 }
  0x75   :  { %v37_v9 = vmul.f32 %v224_v8, %v23_v7 }
  0x77   :  { %148 = vmatmul.msk.f32.vlgmr.msra.gmra.mxu0 %vm47_vm0, %v37_v9 }
  0x7c   :  { %v231_v11 = vpop.permute.xlu0 %34 }
  0x7d   :  { %v38_v12 = vmul.f32 %v231_v11, %v24_v10 }
  0x7f   :  { %149 = vmatmul.msk.f32.vlgmr.msra.gmra.mxu1 %vm47_vm0, %v38_v12 }
  0xf4   :  { %v71_v14 = vpop.f32.mrf.mxu0 }
  0xf5   :  { %v72_v15 = vadd.f32 %v157_v13, %v71_v14 }
  0xf7   :  { %v79_v16 = vsel %vm47_vm0, %v72_v15, 0.0 }
  0xf8   :  { %80 = vadd.xlane.f32.xlu1 %v79_v16 }
  0xfc   :  { %v74_v17 = vpop.f32.mrf.mxu1 }
  0xfd   :  { %v75_v18 = vadd.f32 %v157_v13, %v74_v17 }
  0xff   :  { %v82_v19 = vsel %vm47_vm0, %v75_v18, 0.0 }
 0x100   :  { %83 = vadd.xlane.f32.xlu1 %v82_v19 }
 0x16b   :  { %v81_v27 = vpop.xlane.xlu1 %80 }
 0x16c   :  { %v92_v28 = vmul.f32 %v91_v26, %v81_v27 }
 0x16e   :  { %v94_v29 = vsub.f32 %v72_v15, %v92_v28 }
 0x170   :  { %v96_v30 = vmul.f32 %v94_v29, %v94_v29 }
 0x172   :  { %v98_v31 = vsel %vm47_vm0, %v96_v30, 0.0 }
 0x173   :  { %99 = vadd.xlane.f32.xlu2 %v98_v31  ;;  %v84_v32 = vpop.xlane.xlu1 %83 }
 0x174   :  { %v93_v33 = vmul.f32 %v91_v26, %v84_v32 }
 0x176   :  { %v95_v34 = vsub.f32 %v75_v18, %v93_v33 }
 0x178   :  { %v97_v35 = vmul.f32 %v95_v34, %v95_v34 }
 0x17a   :  { %v101_v36 = vsel %vm47_vm0, %v97_v35, 0.0 }
 0x17b   :  { %102 = vadd.xlane.f32.xlu2 %v101_v36 }
 0x1e6   :  { %v100_v37 = vpop.xlane.xlu2 %99 }
 0x1e7   :  { %v104_v38 = vmul.f32 %v100_v37, %v91_v26 }
 0x1e9   :  { %v106_v39 = vadd.f32 1e-05, %v104_v38 }
 0x1eb   :  { %162 = vrsqrt.f32 %v106_v39  ;;  %vm114_vm3 = vweird.f32 %v106_v39 }
 0x1ee   :  { %v103_v40 = vpop.xlane.xlu2 %102 }
 0x1ef   :  { %v105_v41 = vmul.f32 %v103_v40, %v91_v26 }
 0x1f1   :  { %v163_v42 = vpop.eup %162  ;;  %v107_v43 = vadd.f32 1e-05, %v105_v41 }
 0x1f2   :  { %v109_v44 = vmul.f32 %v163_v42, %v106_v39  ;;  %vm115_vm2 = vweird.f32 %v163_v42 }
 0x1f3   :  { %164 = vrsqrt.f32 %v107_v43  ;;  %vm116_vm4 = vmor %vm114_vm3, %vm115_vm2  ;;  %vm124_vm6 = vweird.f32 %v107_v43 }
 0x1f4   :  { %v110_v45 = vmul.f32 %v163_v42, %v109_v44 }
 0x1f6   :  { %v111_v46 = vmul.f32 0.5, %v110_v45 }
 0x1f8   :  { %v112_v47 = vsub.f32 1.5, %v111_v46 }
 0x1f9   :  { %v165_v48 = vpop.eup %164 }
 0x1fa   :  { %v113_v49 = vmul.f32 %v163_v42, %v112_v47  ;;  %v119_v50 = vmul.f32 %v165_v48, %v107_v43  ;;  %vm125_vm5 = vweird.f32 %v165_v48 }
 0x1fb   :  { %vm126_vm7 = vmor %vm124_vm6, %vm125_vm5 }
 0x1fc   :  { %v117_v52 = vsel %vm116_vm4, %v163_v42, %v113_v49  ;;  %v120_v53 = vmul.f32 %v165_v48, %v119_v50 }
 0x1fd   :  { %v128_v55 = vmul.f32 %v117_v52, %v94_v29 }
 0x1fe   :  { %v121_v56 = vmul.f32 0.5, %v120_v53 }
 0x1ff   :  { %v133_v57 = vmul.f32 %v158_v51, %v128_v55 }
 0x200   :  { %v122_v58 = vsub.f32 1.5, %v121_v56 }
 0x201   :  { %v138_v59 = vadd.f32 %v159_v54, %v133_v57 }
 0x202   :  { %v123_v60 = vmul.f32 %v165_v48, %v122_v58 }
 0x203   :  { %v140_v61 = vmul.f32 %v138_v59, %v224_v8 }
 0x204   :  { %v127_v62 = vsel %vm126_vm7, %v165_v48, %v123_v60 }
 0x205   :  { %142 = vst.msk [vmem:[%s264_s6] sm:$0xff] %vm47_vm0, %v140_v61  ;;  %v129_v63 = vmul.f32 %v127_v62, %v95_v34 }
 0x207   :  { %v134_v0 = vmul.f32 %v158_v51, %v129_v63 }
 0x209   :  { %v139_v1 = vadd.f32 %v159_v54, %v134_v0 }
 0x20b   :  { %v141_v2 = vmul.f32 %v139_v1, %v231_v11 }
 0x20d   :  { %143 = vst.msk [vmem:[%s264_s6 + $0x8] sm:$0xff] %vm47_vm0, %v141_v2 }

// kernel: cyk_cell_forward.9
= control target key start
LH: loop header
LB: loop body
LE: loop exit
PB: predicated region body
PF: predicated region fallthrough
CT: control target
= control target key end

     0   :  { %vm66_vm0 = vcmask 261120   ;;  %vm160_vm1 = vcmask 523264   ;;  %s1139_s3 = inlined_call_operand.vmem [shape: f32[32,64], index: 3, kind: input, shape index: {}]   ;;  %s1140_s2 = inlined_call_operand.vmem [shape: f32[32,64], index: 2, kind: input, shape index: {}]   ;;  %s1141_s5 = inlined_call_operand.vmem [shape: f32[64,32], index: 5, kind: input, shape index: {}]   ;;  %s1142_s6 = inlined_call_operand.vmem [shape: f32[64,32], index: 6, kind: input, shape index: {}]   ;;  %s1143_s1 = inlined_call_operand.vmem [shape: f32[1,16,32], index: 1, kind: input, shape index: {}]   ;;  %s1144_s0 = inlined_call_operand.vmem [shape: f32[1,16,32], index: 0, kind: input, shape index: {}]   ;;  %s1145_s7 = inlined_call_operand.vmem [shape: f32[64,32], index: 7, kind: input, shape index: {}]   ;;  %s1146_s8 = inlined_call_operand.vmem [shape: f32[64,32], index: 8, kind: input, shape index: {}]   ;;  %s1147_s4 = inlined_call_operand.vmem [shape: f32[1,64], index: 4, kind: input, shape index: {}]   ;;  %s1148_s11 = inlined_call_operand.vmem [shape: f32[1,32], index: 11, kind: input, shape index: {}]   ;;  %s1149_s12 = inlined_call_operand.vmem [shape: f32[1,32], index: 12, kind: input, shape index: {}]   ;;  %s1150_s9 = inlined_call_operand.vmem [shape: f32[1,32], index: 9, kind: input, shape index: {}]   ;;  %s1151_s10 = inlined_call_operand.vmem [shape: f32[1,32], index: 10, kind: input, shape index: {}]   ;;  %s1152_s13 = inlined_call_operand.vmem [shape: f32[1,32], index: 13, kind: input, shape index: {}]   ;;  %s1153_s14 = inlined_call_operand.vmem [shape: f32[1,32], index: 14, kind: input, shape index: {}]   ;;  %s1154_s15 = inlined_call_operand.vmem [shape: f32[1,32], index: 15, kind: input, shape index: {}]   ;;  %s1155_s16 = inlined_call_operand.<no memory space> [shape: f32[1,1], index: 16, kind: input, shape index: {}]   ;;  %s1156_s17 = inlined_call_operand.vmem [shape: f32[16,32], index: 17, kind: output, shape index: {}]  }
   0x1   :  { %1159 = sst [smem:[#allocation6_spill]] %s1139_s3  ;;  %v155_v8 = vld [vmem:[%s1141_s5 + $0x38] sm:$0xff]  ;;  %v882_v10 = vld [vmem:[%s1143_s1] sm:$0xff]  ;;  %v154_v14 = vld [vmem:[%s1141_s5 + $0x30] sm:$0xff] }
   0x2   :  { %1160 = sst [smem:[#allocation7_spill]] %s1140_s2  ;;  %v235_v9 = vld [vmem:[%s1142_s6 + $0x38] sm:$0xff]  ;;  %v887_v11 = vld [vmem:[%s1144_s0] sm:$0xff]  ;;  %175 = vmatpush.msra.mxu2 %v155_v8  ;;  %v234_v15 = vld [vmem:[%s1142_s6 + $0x30] sm:$0xff] }
   0x3   :  { %1161 = sst [smem:[#allocation8_spill]] %s1149_s12  ;;  %248 = vmatpush.msra.mxu3 %v235_v9  ;;  %v308_v12 = vld [vmem:[%s1145_s7 + $0x38] sm:$0xff]  ;;  %v307_v16 = vld [vmem:[%s1145_s7 + $0x30] sm:$0xff]  ;;  %v153_v18 = vld [vmem:[%s1141_s5 + $0x28] sm:$0xff] }
   0x4   :  { %s1162_s26 = sld [smem:[#allocation6_spill]]  ;;  %v381_v13 = vld [vmem:[%s1146_s8 + $0x38] sm:$0xff]  ;;  %v380_v17 = vld [vmem:[%s1146_s8 + $0x30] sm:$0xff]  ;;  %v233_v19 = vld [vmem:[%s1142_s6 + $0x28] sm:$0xff]  ;;  %176 = vmatpush.msra.mxu2 %v154_v14 }
   0x5   :  { %s1163_s12 = sld [smem:[#allocation7_spill]]  ;;  %249 = vmatpush.msra.mxu3 %v234_v15  ;;  %v306_v20 = vld [vmem:[%s1145_s7 + $0x28] sm:$0xff]  ;;  %v152_v22 = vld [vmem:[%s1141_s5 + $0x20] sm:$0xff]  ;;  %v151_v28 = vld [vmem:[%s1141_s5 + $0x18] sm:$0xff] }
   0x6   :  { %v379_v21 = vld [vmem:[%s1146_s8 + $0x28] sm:$0xff]  ;;  %v232_v23 = vld [vmem:[%s1142_s6 + $0x20] sm:$0xff]  ;;  %177 = vmatpush.msra.mxu2 %v153_v18  ;;  %v231_v29 = vld [vmem:[%s1142_s6 + $0x18] sm:$0xff] }
   0x7   :  { %250 = vmatpush.msra.mxu3 %v233_v19  ;;  %v305_v24 = vld [vmem:[%s1145_s7 + $0x20] sm:$0xff]  ;;  %v938_v26 = vld [vmem:[%s1143_s1 + $0x8] sm:$0xff]  ;;  %v304_v30 = vld [vmem:[%s1145_s7 + $0x18] sm:$0xff] }
   0x8   :  { %v378_v25 = vld [vmem:[%s1146_s8 + $0x20] sm:$0xff]  ;;  %v943_v27 = vld [vmem:[%s1144_s0 + $0x8] sm:$0xff]  ;;  %178 = vmatpush.msra.mxu2 %v152_v22  ;;  %v377_v31 = vld [vmem:[%s1146_s8 + $0x18] sm:$0xff] }
   0x9   :  { %251 = vmatpush.msra.mxu3 %v232_v23  ;;  %v150_v32 = vld [vmem:[%s1141_s5 + $0x10] sm:$0xff]  ;;  %v149_v36 = vld [vmem:[%s1141_s5 + $0x8] sm:$0xff]  ;;  %v148_v40 = vld [vmem:[%s1141_s5] sm:$0xff] }
   0xa   :  { %v80_v0 = vld [vmem:[%s1162_s26 + $0x18] sm:$0xff]  ;;  %v79_v2 = vld [vmem:[%s1162_s26 + $0x10] sm:$0xff]  ;;  %v78_v4 = vld [vmem:[%s1162_s26 + $0x8] sm:$0xff]  ;;  %179 = vmatpush.msra.mxu2 %v151_v28 }
   0xb   :  { %v76_v1 = vld [vmem:[%s1163_s12 + $0x18] sm:$0xff]  ;;  %100 = vmatpush.msra.mxu0 %v80_v0  ;;  %v75_v3 = vld [vmem:[%s1163_s12 + $0x10] sm:$0xff]  ;;  %v74_v5 = vld [vmem:[%s1163_s12 + $0x8] sm:$0xff]  ;;  %252 = vmatpush.msra.mxu3 %v231_v29 }
   0xc   :  { %129 = vmatpush.msra.mxu1 %v76_v1  ;;  %v77_v6 = vld [vmem:[%s1162_s26] sm:$0xff]  ;;  %v230_v33 = vld [vmem:[%s1142_s6 + $0x10] sm:$0xff]  ;;  %180 = vmatpush.msra.mxu2 %v150_v32  ;;  %v229_v37 = vld [vmem:[%s1142_s6 + $0x8] sm:$0xff] }
   0xd   :  { %101 = vmatpush.msra.mxu0 %v79_v2  ;;  %v73_v7 = vld [vmem:[%s1163_s12] sm:$0xff]  ;;  %253 = vmatpush.msra.mxu3 %v230_v33  ;;  %v303_v34 = vld [vmem:[%s1145_s7 + $0x10] sm:$0xff]  ;;  %v302_v38 = vld [vmem:[%s1145_s7 + $0x8] sm:$0xff] }
   0xe   :  { %130 = vmatpush.msra.mxu1 %v75_v3  ;;  %v376_v35 = vld [vmem:[%s1146_s8 + $0x10] sm:$0xff]  ;;  %181 = vmatpush.msra.mxu2 %v149_v36  ;;  %v375_v39 = vld [vmem:[%s1146_s8 + $0x8] sm:$0xff]  ;;  %v228_v41 = vld [vmem:[%s1142_s6] sm:$0xff] }
   0xf   :  { %102 = vmatpush.msra.mxu0 %v78_v4  ;;  %254 = vmatpush.msra.mxu3 %v229_v37  ;;  %v301_v42 = vld [vmem:[%s1145_s7] sm:$0xff] }
  0x10   :  { %131 = vmatpush.msra.mxu1 %v74_v5  ;;  %182 = vmatpush.msra.mxu2 %v148_v40  ;;  %v374_v43 = vld [vmem:[%s1146_s8] sm:$0xff] }
  0x11   :  { %103 = vmatpush.msra.mxu0 %v77_v6  ;;  %255 = vmatpush.msra.mxu3 %v228_v41  ;;  %v697_v44 = vld [vmem:[%s1147_s4] ss:$0 sm:$0xff] }
  0x12   :  { %132 = vmatpush.msra.mxu1 %v73_v7  ;;  %672 = vmatmul.msk.f32.vlgmr.msra.gmra.mxu0 %vm66_vm0, %v882_v10  ;;  %v698_v55 = vld [vmem:[%s1148_s11] ss:$0 sm:$0xff]  ;;  %s1166_s11 = sld [smem:[#allocation8_spill]] }
  0x13   :  { %674 = vmatmul.msk.f32.vlgmr.msra.gmra.mxu1 %vm66_vm0, %v887_v11  ;;  %321 = vmatpush.msrb.mxu0 %v308_v12  ;;  %v700_v58 = vld [vmem:[%s1150_s9] ss:$0 sm:$0xff] }
  0x14   :  { %394 = vmatpush.msrb.mxu1 %v381_v13  ;;  %v701_v59 = vld [vmem:[%s1151_s10] ss:$0 sm:$0xff] }
  0x15   :  { %322 = vmatpush.msrb.mxu0 %v307_v16 }
  0x16   :  { %395 = vmatpush.msrb.mxu1 %v380_v17 }
  0x17   :  { %323 = vmatpush.msrb.mxu0 %v306_v20 }
  0x18   :  { %396 = vmatpush.msrb.mxu1 %v379_v21 }
  0x19   :  { %324 = vmatpush.msrb.mxu0 %v305_v24 }
  0x1a   :  { %397 = vmatpush.msrb.mxu1 %v378_v25  ;;  %673 = vmatmul.msk.f32.gmra.mxu0 %vm66_vm0, %v938_v26 }
  0x1b   :  { %675 = vmatmul.msk.f32.gmra.mxu1 %vm66_vm0, %v943_v27  ;;  %325 = vmatpush.msrb.mxu0 %v304_v30 }
  0x1c   :  { %398 = vmatpush.msrb.mxu1 %v377_v31 }
  0x1d   :  { %326 = vmatpush.msrb.mxu0 %v303_v34 }
  0x1e   :  { %399 = vmatpush.msrb.mxu1 %v376_v35 }
  0x1f   :  { %327 = vmatpush.msrb.mxu0 %v302_v38 }
  0x20   :  { %400 = vmatpush.msrb.mxu1 %v375_v39 }
  0x21   :  { %328 = vmatpush.msrb.mxu0 %v301_v42 }
  0x22   :  { %401 = vmatpush.msrb.mxu1 %v374_v43 }
  0x8f   :  { %v105_v45 = vpop.f32.mrf.mxu0 }
  0x90   :  { %v134_v46 = vpop.f32.mrf.mxu1 }
  0x91   :  { %v135_v47 = vadd.f32 %v134_v46, %v105_v45 }
  0x93   :  { %v144_v48 = vadd.f32 %v697_v44, %v135_v47 }
  0x95   :  { %v146_v49 = vmax.f32 %v144_v48, 0.0 }
  0x97   :  { %676 = vmatmul.msk.f32.vlgmr.msra.gmra.mxu2 %vm160_vm1, %v146_v49  ;;  %680 = vmatmul.msk.f32.vlgmr.msra.gmra.mxu3 %vm160_vm1, %v146_v49  ;;  %v108_v50 = vpop.f32.mrf.mxu0 }
  0x98   :  { %684 = vmatmul.msk.f32.vlgmr.msrb.gmra.mxu0 %vm160_vm1, %v146_v49  ;;  %688 = vmatmul.msk.f32.vlgmr.msrb.gmra.mxu1 %vm160_vm1, %v146_v49  ;;  %v137_v51 = vpop.f32.mrf.mxu1 }
  0x99   :  { %v138_v52 = vadd.f32 %v137_v51, %v108_v50 }
  0x9b   :  { %v145_v53 = vadd.f32 %v697_v44, %v138_v52 }
  0x9d   :  { %v147_v54 = vmax.f32 %v145_v53, 0.0  ;;  %v1049_v53 = vld [vmem:[%s1166_s11] ss:$0 sm:$0xff] }
  0x9f   :  { %677 = vmatmul.msk.f32.gmra.mxu2 %vm160_vm1, %v147_v54  ;;  %681 = vmatmul.msk.f32.gmra.mxu3 %vm160_vm1, %v147_v54 }
  0xa0   :  { %685 = vmatmul.msk.f32.gmra.mxu0 %vm160_vm1, %v147_v54  ;;  %689 = vmatmul.msk.f32.gmra.mxu1 %vm160_vm1, %v147_v54 }
 0x115   :  { %v330_v56 = vpop.f32.mrf.mxu0 }
 0x116   :  { %v331_v57 = vadd.f32 %v698_v55, %v330_v56 }
 0x118   :  { %v686_v60 = vmul.f32 -1.442695, %v331_v57  ;;  %v403_v57 = vpop.f32.mrf.mxu1 }
 0x11a   :  { %705 = vpow2.f32 %v686_v60  ;;  %v184_v61 = vpop.f32.mrf.mxu2  ;;  %v257_v62 = vpop.f32.mrf.mxu3 }
 0x11b   :  { %v185_v63 = vadd.f32 %v700_v58, %v184_v61  ;;  %v258_v0 = vadd.f32 %v701_v59, %v257_v62 }
 0x11d   :  { %v678_v1 = vmul.f32 -1.442695, %v185_v63  ;;  %v682_v2 = vmul.f32 -1.442695, %v258_v0  ;;  %v333_v3 = vpop.f32.mrf.mxu0 }
 0x11e   :  { %v334_v4 = vadd.f32 %v698_v55, %v333_v3  ;;  %v404_v3 = vadd.f32 %v1049_v53, %v403_v57 }
 0x11f   :  { %707 = vpow2.f32 %v678_v1 }
 0x120   :  { %v706_v5 = vpop.eup %705  ;;  %709 = vpow2.f32 %v682_v2  ;;  %v687_v6 = vmul.f32 -1.442695, %v334_v4 }
 0x121   :  { %v1017_v7 = vadd.f32 1.0, %v706_v5 }
 0x122   :  { %711 = vpow2.f32 %v687_v6  ;;  %v187_v8 = vpop.f32.mrf.mxu2  ;;  %v260_v9 = vpop.f32.mrf.mxu3 }
 0x123   :  { %713 = vrcp.f32 %v1017_v7  ;;  %v188_v12 = vadd.f32 %v700_v58, %v187_v8  ;;  %v261_v13 = vadd.f32 %v701_v59, %v260_v9  ;;  %vm349_vm2 = vweird.f32 %v1017_v7 }
 0x124   :  { %v355_v32 = vand.u32 2147483648, %v1017_v7  ;;  %v353_v46 = vand.u32 2147483647, %v1017_v7 }
 0x125   :  { %v708_v14 = vpop.eup %707  ;;  %v679_v17 = vmul.f32 -1.442695, %v188_v12  ;;  %v683_v20 = vmul.f32 -1.442695, %v261_v13 }
 0x126   :  { %v710_v15 = vpop.eup %709  ;;  %v196_v16 = vadd.f32 1.0, %v708_v14  ;;  %v356_v56 = vor.u32 1.1754944e-38, %v355_v32  ;;  %vm354_vm12 = vcmp.eq.f32.partialorder %v353_v46, 8.507059e+37  ;;  %v406_v32 = vpop.f32.mrf.mxu1 }
 0x127   :  { %v269_v18 = vadd.f32 1.0, %v710_v15 }
 0x128   :  { %v712_v19 = vpop.eup %711  ;;  %715 = vrcp.f32 %v196_v16  ;;  %v207_v34 = vand.u32 2147483647, %v196_v16  ;;  %v209_v38 = vand.u32 2147483648, %v196_v16  ;;  %vm203_vm7 = vweird.f32 %v196_v16 }
 0x129   :  { %v714_v21 = vpop.eup %713  ;;  %717 = vrcp.f32 %v269_v18  ;;  %v1020_v22 = vadd.f32 1.0, %v712_v19  ;;  %v282_v43 = vand.u32 2147483648, %v269_v18  ;;  %v280_v48 = vand.u32 2147483647, %v269_v18 }
 0x12a   :  { %v345_v23 = vmul.f32 %v714_v21, %v1017_v7  ;;  %719 = vpow2.f32 %v679_v17  ;;  %vm350_vm3 = vweird.f32 %v714_v21  ;;  %v210_v54 = vor.u32 1.1754944e-38, %v209_v38 }
 0x12b   :  { %721 = vrcp.f32 %v1020_v22  ;;  %vm1039_vm6 = vmor %vm349_vm2, %vm350_vm3  ;;  %vm276_vm9 = vweird.f32 %v269_v18  ;;  %vm208_vm10 = vcmp.eq.f32.partialorder %v207_v34, 8.507059e+37  ;;  %v283_v59 = vor.u32 1.1754944e-38, %v282_v43 }
 0x12c   :  { %v346_v24 = vsub.f32 1.0, %v345_v23  ;;  %723 = vpow2.f32 %v683_v20  ;;  %vm281_vm13 = vcmp.eq.f32.partialorder %v280_v48, 8.507059e+37  ;;  %vm364_vm14 = vweird.f32 %v1020_v22 }
 0x12d   :  { %v368_v7 = vand.u32 2147483647, %v1020_v22 }
 0x12e   :  { %v716_v25 = vpop.eup %715  ;;  %v347_v28 = vmul.f32 %v714_v21, %v346_v24 }
 0x12f   :  { %v718_v29 = vpop.eup %717  ;;  %v199_v30 = vmul.f32 %v716_v25, %v196_v16  ;;  %vm204_vm4 = vweird.f32 %v716_v25 }
 0x130   :  { %v720_v31 = vpop.eup %719  ;;  %v272_v33 = vmul.f32 %v718_v29, %v269_v18  ;;  %v348_v40 = vadd.f32 %v714_v21, %v347_v28  ;;  %vm277_vm5 = vweird.f32 %v718_v29  ;;  %vm205_vm8 = vmor %vm203_vm7, %vm204_vm4  ;;  %v370_v18 = vand.u32 2147483648, %v1020_v22 }
 0x131   :  { %v1026_v35 = vpop.eup %721  ;;  %v200_v36 = vsub.f32 1.0, %v199_v30  ;;  %v1028_v37 = vadd.f32 1.0, %v720_v31  ;;  %vm278_vm11 = vmor %vm276_vm9, %vm277_vm5  ;;  %vm369_vm9 = vcmp.eq.f32.partialorder %v368_v7, 8.507059e+37 }
 0x132   :  { %v724_v39 = vpop.eup %723  ;;  %v273_v41 = vsub.f32 1.0, %v272_v33  ;;  %v360_v42 = vmul.f32 %v1026_v35, %v1020_v22  ;;  %v352_v52 = vsel %vm1039_vm6, %v714_v21, %v348_v40  ;;  %vm365_vm15 = vweird.f32 %v1026_v35 }
 0x133   :  { %725 = vrcp.f32 %v1028_v37  ;;  %v1033_v44 = vadd.f32 1.0, %v724_v39  ;;  %v201_v45 = vmul.f32 %v716_v25, %v200_v36  ;;  %v357_v63 = vsel %vm354_vm12, %v356_v56, %v352_v52  ;;  %vm1070_vm3 = vmor %vm364_vm14, %vm365_vm15 }
 0x134   :  { %v274_v47 = vmul.f32 %v718_v29, %v273_v41  ;;  %v361_v50 = vsub.f32 1.0, %v360_v42  ;;  %v415_v8 = vmul.f32 %v404_v3, %v357_v63  ;;  %v224_v15 = vand.u32 2147483648, %v1028_v37 }
 0x135   :  { %727 = vrcp.f32 %v1033_v44  ;;  %v202_v51 = vadd.f32 %v716_v25, %v201_v45  ;;  %vm218_vm2 = vweird.f32 %v1028_v37  ;;  %v295_v19 = vand.u32 2147483647, %v1033_v44 }
 0x136   :  { %v275_v55 = vadd.f32 %v718_v29, %v274_v47  ;;  %v362_v0 = vmul.f32 %v1026_v35, %v361_v50  ;;  %v297_v20 = vand.u32 2147483648, %v1033_v44  ;;  %v225_v28 = vor.u32 1.1754944e-38, %v224_v15 }
 0x137   :  { %v206_v58 = vsel %vm205_vm8, %v716_v25, %v202_v51  ;;  %vm291_vm6 = vweird.f32 %v1033_v44  ;;  %v371_v31 = vor.u32 1.1754944e-38, %v370_v18  ;;  %v407_v40 = vadd.f32 %v1049_v53, %v406_v32 }
 0x138   :  { %v211_v60 = vsel %vm208_vm10, %v210_v54, %v206_v58  ;;  %v279_v61 = vsel %vm278_vm11, %v718_v29, %v275_v55  ;;  %v363_v14 = vadd.f32 %v1026_v35, %v362_v0  ;;  %v298_v34 = vor.u32 1.1754944e-38, %v297_v20 }
 0x139   :  { %v726_v62 = vpop.eup %725  ;;  %v284_v1 = vsel %vm281_vm13, %v283_v59, %v279_v61  ;;  %v409_v2 = vmul.f32 %v211_v60, %v887_v11  ;;  %v222_v11 = vand.u32 2147483647, %v1028_v37  ;;  %vm296_vm10 = vcmp.eq.f32.partialorder %v295_v19, 8.507059e+37 }
 0x13a   :  { %v214_v4 = vmul.f32 %v726_v62, %v1028_v37  ;;  %v411_v5 = vmul.f32 %v284_v1, %v882_v10  ;;  %vm219_vm1 = vweird.f32 %v726_v62  ;;  %v367_v29 = vsel %vm1070_vm3, %v1026_v35, %v363_v14  ;;  %v703_v14 = vld [vmem:[%s1153_s14] ss:$0 sm:$0xff] }
 0x13b   :  { %v728_v6 = vpop.eup %727  ;;  %vm220_vm5 = vmor %vm218_vm2, %vm219_vm1  ;;  %vm223_vm7 = vcmp.eq.f32.partialorder %v222_v11, 8.507059e+37  ;;  %v372_v38 = vsel %vm369_vm9, %v371_v31, %v367_v29  ;;  %v755_v45 = vmov 32.0  }
 0x13c   :  { %v215_v9 = vsub.f32 1.0, %v214_v4  ;;  %v287_v12 = vmul.f32 %v728_v6, %v1033_v44  ;;  %v413_v13 = vadd.f32 %v411_v5, %v409_v2  ;;  %vm292_vm4 = vweird.f32 %v728_v6 }
 0x13d   :  { %vm293_vm8 = vmor %vm291_vm6, %vm292_vm4  ;;  %v416_v35 = vmul.f32 %v407_v40, %v372_v38  ;;  %729 = vrcp.f32 %v755_v45 }
 0x13e   :  { %v288_v16 = vsub.f32 1.0, %v287_v12  ;;  %v417_v10 = vadd.f32 %v415_v8, %v413_v13  ;;  %v216_v17 = vmul.f32 %v726_v62, %v215_v9  ;;  %v702_v8 = vld [vmem:[%s1152_s13] ss:$0 sm:$0xff] }
 0x140   :  { %v421_v23 = vsel %vm66_vm0, %v417_v10, 0.0  ;;  %v217_v24 = vadd.f32 %v726_v62, %v216_v17  ;;  %v289_v25 = vmul.f32 %v728_v6, %v288_v16 }
 0x141   :  { %422 = vadd.xlane.f32.xlu0 %v421_v23 }
 0x142   :  { %v221_v30 = vsel %vm220_vm5, %v726_v62, %v217_v24  ;;  %v290_v22 = vadd.f32 %v728_v6, %v289_v25  ;;  %vm61_vm5 = vcmask 7168  }
 0x143   :  { %v226_v33 = vsel %vm223_vm7, %v225_v28, %v221_v30  ;;  %v730_v46 = vpop.eup %729 }
 0x144   :  { %v294_v36 = vsel %vm293_vm8, %v728_v6, %v290_v22  ;;  %v410_v37 = vmul.f32 %v226_v33, %v943_v27  ;;  %v428_v47 = vmul.f32 32.0, %v730_v46  ;;  %vm432_vm11 = vweird.f32 %v730_v46 }
 0x145   :  { %v299_v39 = vsel %vm296_vm10, %v298_v34, %v294_v36 }
 0x146   :  { %v412_v41 = vmul.f32 %v299_v39, %v938_v26  ;;  %v429_v48 = vsub.f32 1.0, %v428_v47 }
 0x148   :  { %v414_v42 = vadd.f32 %v412_v41, %v410_v37  ;;  %v430_v49 = vmul.f32 %v730_v46, %v429_v48  ;;  %v756_v48 = vmov -inf  }
 0x149   :  { %62 = vst.msk [vmem:[#allocation2] sm:$0xff] %vm61_vm5, %v756_v48 }
 0x14a   :  { %v418_v43 = vadd.f32 %v416_v35, %v414_v42  ;;  %v431_v50 = vadd.f32 %v730_v46, %v430_v49  ;;  %63 = vst.msk [vmem:[#allocation2 + $0x8] sm:$0xff] %vm61_vm5, %v756_v48 }
 0x14c   :  { %v424_v44 = vsel %vm66_vm0, %v418_v43, 0.0  ;;  %v433_v27 = vsel %vm432_vm11, %v730_v46, %v431_v50  ;;  %v757_v50 = vmov 0.0  }
 0x14d   :  { %425 = vadd.xlane.f32.xlu0 %v424_v44  ;;  %64 = vst.msk [vmem:[#allocation3] sm:$0xff] %vm61_vm5, %v757_v50 }
 0x14e   :  { %67 = vst.msk [vmem:[#allocation4] sm:$0xff] %vm66_vm0, %v757_v50 }
 0x14f   :  { %68 = vst.msk [vmem:[#allocation4 + $0x8] sm:$0xff] %vm66_vm0, %v757_v50 }
 0x150   :  { %65 = vst.msk [vmem:[#allocation3 + $0x8] sm:$0xff] %vm61_vm5, %v757_v50 }
 0x1b4   :  { %v423_v51 = vpop.xlane.xlu0 %422 }
 0x1b5   :  { %v434_v52 = vmul.f32 %v433_v27, %v423_v51 }
 0x1b7   :  { %v436_v53 = vsub.f32 %v417_v10, %v434_v52 }
 0x1b9   :  { %v438_v54 = vmul.f32 %v436_v53, %v436_v53 }
 0x1bb   :  { %v440_v26 = vsel %vm66_vm0, %v438_v54, 0.0 }
 0x1bc   :  { %441 = vadd.xlane.f32.xlu1 %v440_v26 }
 0x1c0   :  { %v426_v55 = vpop.xlane.xlu0 %425 }
 0x1c1   :  { %v435_v56 = vmul.f32 %v433_v27, %v426_v55 }
 0x1c3   :  { %v437_v57 = vsub.f32 %v418_v43, %v435_v56 }
 0x1c5   :  { %v439_v58 = vmul.f32 %v437_v57, %v437_v57 }
 0x1c7   :  { %v443_v59 = vsel %vm66_vm0, %v439_v58, 0.0 }
 0x1c8   :  { %444 = vadd.xlane.f32.xlu1 %v443_v59 }
 0x22f   :  { %v442_v60 = vpop.xlane.xlu1 %441 }
 0x230   :  { %v446_v61 = vmul.f32 %v442_v60, %v433_v27 }
 0x232   :  { %v448_v62 = vadd.f32 1e-05, %v446_v61 }
 0x234   :  { %731 = vrsqrt.f32 %v448_v62  ;;  %vm456_vm13 = vweird.f32 %v448_v62 }
 0x23a   :  { %v732_v63 = vpop.eup %731 }
 0x23b   :  { %v451_v0 = vmul.f32 %v732_v63, %v448_v62  ;;  %v445_v1 = vpop.xlane.xlu1 %444  ;;  %vm457_vm12 = vweird.f32 %v732_v63 }
 0x23c   :  { %v447_v2 = vmul.f32 %v445_v1, %v433_v27  ;;  %vm458_vm14 = vmor %vm456_vm13, %vm457_vm12 }
 0x23d   :  { %v452_v3 = vmul.f32 %v732_v63, %v451_v0 }
 0x23e   :  { %v449_v4 = vadd.f32 1e-05, %v447_v2 }
 0x23f   :  { %v453_v5 = vmul.f32 0.5, %v452_v3 }
 0x240   :  { %733 = vrsqrt.f32 %v449_v4  ;;  %vm466_vm1 = vweird.f32 %v449_v4 }
 0x241   :  { %v454_v6 = vsub.f32 1.5, %v453_v5 }
 0x243   :  { %v455_v7 = vmul.f32 %v732_v63, %v454_v6 }
 0x245   :  { %v459_v9 = vsel %vm458_vm14, %v732_v63, %v455_v7  ;;  %v704_v63 = vld [vmem:[%s1154_s15] ss:$0 sm:$0xff] }
 0x246   :  { %v734_v12 = vpop.eup %733  ;;  %v470_v13 = vmul.f32 %v459_v9, %v436_v53 }
 0x247   :  { %v461_v11 = vmul.f32 %v734_v12, %v449_v4  ;;  %vm467_vm15 = vweird.f32 %v734_v12 }
 0x248   :  { %v475_v15 = vmul.f32 %v702_v8, %v470_v13  ;;  %vm468_vm2 = vmor %vm466_vm1, %vm467_vm15 }
 0x249   :  { %v462_v16 = vmul.f32 %v734_v12, %v461_v11 }
 0x24a   :  { %v1091_v10 = vadd.f32 %v703_v14, %v475_v15 }
 0x24b   :  { %v463_v17 = vmul.f32 0.5, %v462_v16 }
 0x24c   :  { %v482_v18 = vmul.f32 %v1091_v10, %v1091_v10 }
 0x24d   :  { %v464_v19 = vsub.f32 1.5, %v463_v17  ;;  %v758_v17 = vmov 0  }
 0x24e   :  { %v484_v20 = vsel %vm66_vm0, %v482_v18, 0.0  ;;  %696 = vset.pattern.permute.xlu1 %v758_v17  ;;  %694 = vset.pattern.permute.xlu2 %v758_v17  ;;  %v559_v18 = vstv %s1155_s16 }
 0x24f   :  { %v465_v21 = vmul.f32 %v734_v12, %v464_v19  ;;  %485 = vadd.xlane.f32.xlu2 %v484_v20  ;;  %695 = vset.pattern.permute.xlu0 %v758_v17  ;;  %v562_v19 = vld [vmem:[#allocation2] sm:$0xff] }
 0x251   :  { %v469_v23 = vsel %vm468_vm2, %v734_v12, %v465_v21 }
 0x252   :  { %v471_v24 = vmul.f32 %v469_v23, %v437_v57 }
 0x254   :  { %v476_v25 = vmul.f32 %v702_v8, %v471_v24 }
 0x256   :  { %v1096_v28 = vadd.f32 %v703_v14, %v476_v25 }
 0x258   :  { %v483_v29 = vmul.f32 %v1096_v28, %v1096_v28 }
 0x25a   :  { %v487_v30 = vsel %vm66_vm0, %v483_v29, 0.0 }
 0x25b   :  { %488 = vadd.xlane.f32.xlu2 %v487_v30  ;;  %v563_v30 = vld [vmem:[#allocation2 + $0x8] sm:$0xff] }
 0x2c2   :  { %v486_v22 = vpop.xlane.xlu2 %485 }
 0x2c3   :  { %735 = vrsqrt.f32 %v486_v22  ;;  %vm497_vm3 = vcmp.eq.f32.partialorder %v486_v22, inf  ;;  %v500_v41 = vand.u32 2147483648, %v486_v22  ;;  %vm499_vm4 = vcmp.eq.f32.partialorder %v486_v22, 0.0 }
 0x2c9   :  { %v736_v31 = vpop.eup %735 }
 0x2ca   :  { %v491_v32 = vmul.f32 %v736_v31, %v486_v22 }
 0x2cc   :  { %v492_v33 = vmul.f32 %v736_v31, %v491_v32 }
 0x2ce   :  { %v493_v34 = vmul.f32 0.5, %v492_v33  ;;  %v489_v36 = vpop.xlane.xlu2 %488 }
 0x2cf   :  { %737 = vrsqrt.f32 %v489_v36  ;;  %vm509_vm6 = vcmp.eq.f32.partialorder %v489_v36, inf  ;;  %v512_v52 = vand.u32 2147483648, %v489_v36  ;;  %vm511_vm7 = vcmp.eq.f32.partialorder %v489_v36, 0.0 }
 0x2d0   :  { %v494_v37 = vsub.f32 1.5, %v493_v34 }
 0x2d2   :  { %v495_v38 = vmul.f32 %v736_v31, %v494_v37  ;;  %v578_v31 = vld [vmem:[#allocation3] sm:$0xff] }
 0x2d4   :  { %v496_v39 = vmul.f32 %v495_v38, %v486_v22 }
 0x2d5   :  { %v738_v40 = vpop.eup %737 }
 0x2d6   :  { %v498_v35 = vsel %vm497_vm3, %v486_v22, %v496_v39  ;;  %v503_v42 = vmul.f32 %v738_v40, %v489_v36 }
 0x2d7   :  { %v501_v43 = vsel %vm499_vm4, %v500_v41, %v498_v35 }
 0x2d8   :  { %v514_v44 = vadd.f32 1e-08, %v501_v43  ;;  %v504_v45 = vmul.f32 %v738_v40, %v503_v42  ;;  %v579_v42 = vld [vmem:[#allocation3 + $0x8] sm:$0xff] }
 0x2da   :  { %739 = vrcp.f32 %v514_v44  ;;  %v505_v46 = vmul.f32 0.5, %v504_v45  ;;  %v527_v57 = vand.u32 2147483648, %v514_v44  ;;  %v525_v59 = vand.u32 2147483647, %v514_v44 }
 0x2db   :  { %vm521_vm9 = vweird.f32 %v514_v44 }
 0x2dc   :  { %v506_v47 = vsub.f32 1.5, %v505_v46  ;;  %v528_v61 = vor.u32 1.1754944e-38, %v527_v57  ;;  %vm526_vm11 = vcmp.eq.f32.partialorder %v525_v59, 8.507059e+37 }
 0x2de   :  { %v507_v49 = vmul.f32 %v738_v40, %v506_v47 }
 0x2e0   :  { %v740_v27 = vpop.eup %739  ;;  %v508_v51 = vmul.f32 %v507_v49, %v489_v36 }
 0x2e1   :  { %v517_v53 = vmul.f32 %v740_v27, %v514_v44  ;;  %vm522_vm8 = vweird.f32 %v740_v27 }
 0x2e2   :  { %v510_v54 = vsel %vm509_vm6, %v489_v36, %v508_v51  ;;  %vm523_vm10 = vmor %vm521_vm9, %vm522_vm8 }
 0x2e3   :  { %v513_v26 = vsel %vm511_vm7, %v512_v52, %v510_v54  ;;  %v518_v55 = vsub.f32 1.0, %v517_v53  ;;  %v587_v53 = vld [vmem:[#allocation4] sm:$0xff] }
 0x2e4   :  { %v515_v56 = vadd.f32 1e-08, %v513_v26 }
 0x2e5   :  { %v519_v58 = vmul.f32 %v740_v27, %v518_v55 }
 0x2e6   :  { %741 = vrcp.f32 %v515_v56  ;;  %v542_v7 = vand.u32 2147483648, %v515_v56  ;;  %v540_v9 = vand.u32 2147483647, %v515_v56  ;;  %vm536_vm13 = vweird.f32 %v515_v56 }
 0x2e7   :  { %v520_v60 = vadd.f32 %v740_v27, %v519_v58 }
 0x2e8   :  { %v543_v13 = vor.u32 1.1754944e-38, %v542_v7  ;;  %vm541_vm15 = vcmp.eq.f32.partialorder %v540_v9, 8.507059e+37 }
 0x2e9   :  { %v524_v62 = vsel %vm523_vm10, %v740_v27, %v520_v60 }
 0x2ea   :  { %v529_v0 = vsel %vm526_vm11, %v528_v61, %v524_v62  ;;  %v588_v62 = vld [vmem:[#allocation4 + $0x8] sm:$0xff] }
 0x2eb   :  { %v1111_v1 = vmul.f32 %v529_v0, %v1091_v10 }
 0x2ec   :  { %v742_v2 = vpop.eup %741 }
 0x2ed   :  { %v550_v3 = vmul.f32 %v704_v63, %v1111_v1  ;;  %v532_v4 = vmul.f32 %v742_v2, %v515_v56  ;;  %vm537_vm12 = vweird.f32 %v742_v2 }
 0x2ee   :  { %vm538_vm14 = vmor %vm536_vm13, %vm537_vm12 }
 0x2ef   :  { %v552_v5 = vsel %vm66_vm0, %v550_v3, 0.0  ;;  %v533_v6 = vsub.f32 1.0, %v532_v4 }
 0x2f0   :  { %553 = vadd.xlane.f32.xlu0 %v552_v5 }
 0x2f1   :  { %v534_v8 = vmul.f32 %v742_v2, %v533_v6 }
 0x2f3   :  { %v535_v12 = vadd.f32 %v742_v2, %v534_v8 }
 0x2f5   :  { %v539_v14 = vsel %vm538_vm14, %v742_v2, %v535_v12 }
 0x2f6   :  { %v544_v11 = vsel %vm541_vm15, %v543_v13, %v539_v14 }
 0x2f7   :  { %v1116_v15 = vmul.f32 %v544_v11, %v1096_v28 }
 0x2f9   :  { %v551_v16 = vmul.f32 %v704_v63, %v1116_v15 }
 0x2fb   :  { %v555_v10 = vsel %vm66_vm0, %v551_v16, 0.0 }
 0x2fc   :  { %556 = vadd.xlane.f32.xlu1 %v555_v10 }
 0x363   :  { %v554_v20 = vpop.xlane.xlu0 %553 }
 0x364   :  { %v560_v21 = vadd.f32 %v559_v18, %v554_v20 }
 0x366   :  { %v564_v23 = vmax.f32 %v562_v19, %v560_v21 }
 0x368   :  { %v566_v24 = vsub.f32 %v562_v19, %v564_v23  ;;  %v572_v25 = vsub.f32 %v560_v21, %v564_v23  ;;  %617 = vst.msk [vmem:[#allocation2] sm:$0xff] %vm61_vm5, %v564_v23 }
 0x36a   :  { %v568_v28 = vmul.f32 1.442695, %v566_v24  ;;  %v574_v29 = vmul.f32 1.442695, %v572_v25 }
 0x36c   :  { %743 = vpow2.f32 %v568_v28 }
 0x36d   :  { %745 = vpow2.f32 %v574_v29 }
 0x36f   :  { %v557_v22 = vpop.xlane.xlu1 %556 }
 0x370   :  { %v561_v32 = vadd.f32 %v559_v18, %v557_v22 }
 0x372   :  { %v744_v33 = vpop.eup %743  ;;  %v565_v34 = vmax.f32 %v563_v30, %v561_v32 }
 0x373   :  { %v580_v36 = vmul.f32 %v744_v33, %v578_v31  ;;  %591 = vperm.xlu1 %696, %v744_v33   ;;  %v746_v37 = vpop.eup %745 }
 0x374   :  { %v567_v38 = vsub.f32 %v563_v30, %v565_v34  ;;  %v573_v39 = vsub.f32 %v561_v32, %v565_v34  ;;  %618 = vst.msk [vmem:[#allocation2 + $0x8] sm:$0xff] %vm61_vm5, %v565_v34 }
 0x375   :  { %v582_v40 = vadd.f32 %v746_v37, %v580_v36 }
 0x376   :  { %v570_v41 = vmul.f32 1.442695, %v567_v38  ;;  %v576_v35 = vmul.f32 1.442695, %v573_v39 }
 0x377   :  { %585 = vst.msk [vmem:[#allocation3] sm:$0xff] %vm61_vm5, %v582_v40 }
 0x378   :  { %747 = vpow2.f32 %v570_v41 }
 0x379   :  { %749 = vpow2.f32 %v576_v35 }
 0x37e   :  { %v748_v43 = vpop.eup %747  ;;  %v624_v44 = vld [vmem:[#allocation3] sm:$0xff] }
 0x37f   :  { %v750_v45 = vpop.eup %749  ;;  %v581_v46 = vmul.f32 %v748_v43, %v579_v42  ;;  %628 = vperm.xlu2 %694, %v624_v44  }
 0x380   :  { %608 = vperm.xlu1 %696, %v750_v45  }
 0x381   :  { %v583_v47 = vadd.f32 %v750_v45, %v581_v46 }
 0x383   :  { %586 = vst.msk [vmem:[#allocation3 + $0x8] sm:$0xff] %vm61_vm5, %v583_v47 }
 0x387   :  { %596 = vperm.xlu2 %694, %v748_v43  }
 0x38a   :  { %v625_v48 = vld [vmem:[#allocation3 + $0x8] sm:$0xff] }
 0x38b   :  { %633 = vperm.xlu0 %695, %v625_v48  }
 0x38f   :  { %603 = vperm.xlu2 %694, %v746_v37  }
 0x3d9   :  { %v629_v49 = vpop.permute.xlu2 %628 }
 0x3da   :  { %751 = vrcp.f32 %v629_v49  ;;  %v647_v60 = vand.u32 2147483648, %v629_v49  ;;  %vm641_vm2 = vweird.f32 %v629_v49  ;;  %v645_v61 = vand.u32 2147483647, %v629_v49 }
 0x3dc   :  { %v648_v2 = vor.u32 1.1754944e-38, %v647_v60  ;;  %vm646_vm4 = vcmp.eq.f32.partialorder %v645_v61, 8.507059e+37 }
 0x3e0   :  { %v752_v50 = vpop.eup %751 }
 0x3e1   :  { %v597_v27 = vpop.permute.xlu2 %596  ;;  %v637_v51 = vmul.f32 %v752_v50, %v629_v49  ;;  %vm642_vm1 = vweird.f32 %v752_v50 }
 0x3e2   :  { %vm643_vm3 = vmor %vm641_vm2, %vm642_vm1  ;;  %v600_v3 = vmul.f32 %v597_v27, %v588_v62 }
 0x3e3   :  { %v638_v52 = vsub.f32 1.0, %v637_v51 }
 0x3e5   :  { %v592_v54 = vpop.permute.xlu1 %591  ;;  %v639_v55 = vmul.f32 %v752_v50, %v638_v52 }
 0x3e6   :  { %v599_v56 = vmul.f32 %v592_v54, %v587_v53 }
 0x3e7   :  { %v640_v59 = vadd.f32 %v752_v50, %v639_v55 }
 0x3e9   :  { %v604_v26 = vpop.permute.xlu2 %603  ;;  %v644_v63 = vsel %vm643_vm3, %v752_v50, %v640_v59 }
 0x3ea   :  { %v611_v57 = vmul.f32 %v604_v26, %v1111_v1  ;;  %v649_v5 = vsel %vm646_vm4, %v648_v2, %v644_v63 }
 0x3ec   :  { %v613_v58 = vadd.f32 %v611_v57, %v599_v56 }
 0x3ee   :  { %615 = vst.msk [vmem:[#allocation4] sm:$0xff] %vm66_vm0, %v613_v58 }
 0x3f2   :  { %v609_v0 = vpop.permute.xlu1 %608 }
 0x3f3   :  { %v612_v4 = vmul.f32 %v609_v0, %v1116_v15 }
 0x3f5   :  { %v614_v6 = vadd.f32 %v612_v4, %v600_v3  ;;  %v622_v1 = vld [vmem:[#allocation4] sm:$0xff] }
 0x3f6   :  { %v650_v7 = vmul.f32 %v649_v5, %v622_v1 }
 0x3f7   :  { %616 = vst.msk [vmem:[#allocation4 + $0x8] sm:$0xff] %vm66_vm0, %v614_v6 }
 0x3f8   :  { %666 = vst.msk [vmem:[%s1156_s17] sm:$0xff] %vm66_vm0, %v650_v7 }
 0x3fd   :  { %v634_v8 = vpop.permute.xlu0 %633 }
 0x3fe   :  { %753 = vrcp.f32 %v634_v8  ;;  %v662_v14 = vand.u32 2147483648, %v634_v8  ;;  %v660_v15 = vand.u32 2147483647, %v634_v8  ;;  %vm656_vm6 = vweird.f32 %v634_v8  ;;  %v623_v18 = vld [vmem:[#allocation4 + $0x8] sm:$0xff] }
 0x400   :  { %v663_v10 = vor.u32 1.1754944e-38, %v662_v14  ;;  %vm661_vm8 = vcmp.eq.f32.partialorder %v660_v15, 8.507059e+37 }
 0x404   :  { %v754_v9 = vpop.eup %753 }
 0x405   :  { %v652_v12 = vmul.f32 %v754_v9, %v634_v8  ;;  %vm657_vm5 = vweird.f32 %v754_v9 }
 0x406   :  { %vm658_vm7 = vmor %vm656_vm6, %vm657_vm5 }
 0x407   :  { %v653_v13 = vsub.f32 1.0, %v652_v12 }
 0x409   :  { %v654_v11 = vmul.f32 %v754_v9, %v653_v13 }
 0x40b   :  { %v655_v16 = vadd.f32 %v754_v9, %v654_v11 }
 0x40d   :  { %v659_v17 = vsel %vm658_vm7, %v754_v9, %v655_v16 }
 0x40e   :  { %v664_v19 = vsel %vm661_vm8, %v663_v10, %v659_v17 }
 0x40f   :  { %v665_v20 = vmul.f32 %v664_v19, %v623_v18 }
 0x411   :  { %667 = vst.msk [vmem:[%s1156_s17 + $0x8] sm:$0xff] %vm66_vm0, %v665_v20 }

// kernel: cyk_cell_forward.10
= control target key start
LH: loop header
LB: loop body
LE: loop exit
PB: predicated region body
PF: predicated region fallthrough
CT: control target
= control target key end

     0   :  { %s1560_s26 = smov 0   ;;  %s1562_s27 = smov 0   ;;  %s1864_s0 = inlined_call_operand.vmem [shape: f32[2,16,32], index: 0, kind: input, shape index: {}]   ;;  %s1865_s1 = inlined_call_operand.vmem [shape: f32[2,16,32], index: 1, kind: input, shape index: {}]   ;;  %s1866_s2 = inlined_call_operand.vmem [shape: f32[32,64], index: 2, kind: input, shape index: {}]   ;;  %s1867_s3 = inlined_call_operand.vmem [shape: f32[32,64], index: 3, kind: input, shape index: {}]   ;;  %s1868_s4 = inlined_call_operand.vmem [shape: f32[1,64], index: 4, kind: input, shape index: {}]   ;;  %s1869_s5 = inlined_call_operand.vmem [shape: f32[64,32], index: 5, kind: input, shape index: {}]   ;;  %s1870_s6 = inlined_call_operand.vmem [shape: f32[64,32], index: 6, kind: input, shape index: {}]   ;;  %s1871_s7 = inlined_call_operand.vmem [shape: f32[64,32], index: 7, kind: input, shape index: {}]   ;;  %s1872_s8 = inlined_call_operand.vmem [shape: f32[64,32], index: 8, kind: input, shape index: {}]   ;;  %s1873_s9 = inlined_call_operand.vmem [shape: f32[1,32], index: 9, kind: input, shape index: {}]   ;;  %s1874_s10 = inlined_call_operand.vmem [shape: f32[1,32], index: 10, kind: input, shape index: {}]   ;;  %s1875_s11 = inlined_call_operand.vmem [shape: f32[1,32], index: 11, kind: input, shape index: {}]   ;;  %s1876_s12 = inlined_call_operand.vmem [shape: f32[1,32], index: 12, kind: input, shape index: {}]   ;;  %s1877_s13 = inlined_call_operand.vmem [shape: f32[1,32], index: 13, kind: input, shape index: {}]   ;;  %s1878_s14 = inlined_call_operand.vmem [shape: f32[1,32], index: 14, kind: input, shape index: {}]   ;;  %s1879_s15 = inlined_call_operand.vmem [shape: f32[1,32], index: 15, kind: input, shape index: {}]   ;;  %s1880_s16 = inlined_call_operand.<no memory space> [shape: f32[1,1], index: 16, kind: input, shape index: {}]   ;;  %s1881_s17 = inlined_call_operand.vmem [shape: f32[16,32], index: 17, kind: output, shape index: {}]  }
   0x1   :  { %1882 = sst [smem:[#allocation6_spill]] %s1864_s0  ;;  %s1564_s28 = smov 0  }
   0x2   :  { %1883 = sst [smem:[#allocation7_spill]] %s1865_s1 }
   0x3   :  { %22 = sst [smem:[#allocation5]] %s1880_s16 }
   0x4 LB: > { %s37_s16 = sadd.s32 1, %s1456_s27  ;;  %p1316_p0 = scmp.ge.s32.totalorder %s1460_s28, 1  ;;  %s1460_s28 = sphi %s1564_s28, %s28_s28   ;;  %s1456_s27 = sphi %s1562_s27, %s1891_s27   ;;  %s1452_s26 = sphi %s1560_s26, %s1890_s26  }
   0x5   : > { %p38_p1 = scmp.ge.s32.totalorder %s37_s16, 2  ;;  %p524_p2 = scmp.lt.s32.totalorder %s1460_s28, 3 }
   0x7   : > { %s1893_s16 = smov (%p38_p1, %s37_s16), 0  ;;  %p525_p3 = pnand %p1316_p0, %p524_p2 }
   0x8   : > { %p590_p4 = scmp.lt.s32.totalorder (!%p525_p3), %s1452_s26, 1  ;;  %s1884_s19 = sld [smem:[#allocation6_spill]] (!%p525_p3) }
   0x9   : > { %528 = sbr.rel (%p525_p3) target bundleno = 1177 (0x499), region = 88  ;;  %s1885_s22 = sld [smem:[#allocation7_spill]] (!%p525_p3) }
   0xa   : > { %p1321_p5 = scmp.ne.s32.totalorder (!%p525_p3), %s1452_s26, 0 }
   0xe   : > { %s591_s29 = scalar_select %p590_p4, %s1452_s26, 1 }
   0xf   : > { %618 = sbr.rel (%p1321_p5) target bundleno = 27 (0x1b), region = 92 }
  0x10   : > { %s1345_s0 = sshll.u32 %s591_s29, 4 }
  0x11   : > { %s1585_s1 = scalar_lea.vmem %s1884_s19, %s1345_s0  ;;  %s1590_s23 = scalar_lea.vmem %s1885_s22, %s1345_s0 }
  0x14   : > { %vm619_vm0 = vcmask 7168   ;;  %v1462_v0 = vmov -inf   ;;  %vm624_vm1 = vcmask 261120   ;;  %v1463_v1 = vmov 0.0  }
  0x15   : > { %620 = vst.msk [vmem:[#allocation2] sm:$0xff] %vm619_vm0, %v1462_v0 }
  0x16   : > { %621 = vst.msk [vmem:[#allocation2 + $0x8] sm:$0xff] %vm619_vm0, %v1462_v0 }
  0x17   : > { %622 = vst.msk [vmem:[#allocation3] sm:$0xff] %vm619_vm0, %v1463_v1 }
  0x18   : > { %623 = vst.msk [vmem:[#allocation3 + $0x8] sm:$0xff] %vm619_vm0, %v1463_v1 }
  0x19   : > { %625 = vst.msk [vmem:[#allocation4] sm:$0xff] %vm624_vm1, %v1463_v1 }
  0x1a   : > { %626 = vst.msk [vmem:[#allocation4 + $0x8] sm:$0xff] %vm624_vm1, %v1463_v1 }
  0x1b PF: > { %v638_v2 = vld [vmem:[%s1867_s3 + $0x18] sm:$0xff]  ;;  %v637_v4 = vld [vmem:[%s1867_s3 + $0x10] sm:$0xff]  ;;  %v636_v6 = vld [vmem:[%s1867_s3 + $0x8] sm:$0xff]  ;;  %vm639_vm2 = vcmask 261120   ;;  %vm718_vm3 = vcmask 523264   ;;  %s1116_s21 = sld [smem:[#allocation5]] }
  0x1c   : > { %v634_v3 = vld [vmem:[%s1866_s2 + $0x18] sm:$0xff]  ;;  %658 = vmatpush.msra.mxu0 %v638_v2  ;;  %v633_v5 = vld [vmem:[%s1866_s2 + $0x10] sm:$0xff]  ;;  %v632_v7 = vld [vmem:[%s1866_s2 + $0x8] sm:$0xff]  ;;  %p1340_p6 = scmp.ne.s32.totalorder %s1452_s26, 1 }
  0x1d   : > { %687 = vmatpush.msra.mxu1 %v634_v3  ;;  %v635_v8 = vld [vmem:[%s1867_s3] sm:$0xff]  ;;  %v713_v10 = vld [vmem:[%s1869_s5 + $0x38] sm:$0xff]  ;;  %v712_v16 = vld [vmem:[%s1869_s5 + $0x30] sm:$0xff] }
  0x1e   : > { %659 = vmatpush.msra.mxu0 %v637_v4  ;;  %v631_v9 = vld [vmem:[%s1866_s2] sm:$0xff]  ;;  %v793_v11 = vld [vmem:[%s1870_s6 + $0x38] sm:$0xff]  ;;  %733 = vmatpush.msra.mxu2 %v713_v10  ;;  %v792_v17 = vld [vmem:[%s1870_s6 + $0x30] sm:$0xff] }
  0x1f   : > { %688 = vmatpush.msra.mxu1 %v633_v5  ;;  %v1624_v12 = vld [vmem:[%s1590_s23] sm:$0xff]  ;;  %v866_v14 = vld [vmem:[%s1871_s7 + $0x38] sm:$0xff]  ;;  %806 = vmatpush.msra.mxu3 %v793_v11  ;;  %v865_v18 = vld [vmem:[%s1871_s7 + $0x30] sm:$0xff] }
  0x20   : > { %660 = vmatpush.msra.mxu0 %v636_v6  ;;  %v1627_v13 = vld [vmem:[%s1585_s1] sm:$0xff]  ;;  %v939_v15 = vld [vmem:[%s1872_s8 + $0x38] sm:$0xff]  ;;  %v938_v19 = vld [vmem:[%s1872_s8 + $0x30] sm:$0xff]  ;;  %734 = vmatpush.msra.mxu2 %v712_v16 }
  0x21   : > { %689 = vmatpush.msra.mxu1 %v632_v7  ;;  %v711_v20 = vld [vmem:[%s1869_s5 + $0x28] sm:$0xff]  ;;  %v710_v24 = vld [vmem:[%s1869_s5 + $0x20] sm:$0xff]  ;;  %807 = vmatpush.msra.mxu3 %v792_v17  ;;  %v709_v30 = vld [vmem:[%s1869_s5 + $0x18] sm:$0xff] }
  0x22   : > { %661 = vmatpush.msra.mxu0 %v635_v8  ;;  %v791_v21 = vld [vmem:[%s1870_s6 + $0x28] sm:$0xff]  ;;  %v790_v25 = vld [vmem:[%s1870_s6 + $0x20] sm:$0xff]  ;;  %735 = vmatpush.msra.mxu2 %v711_v20  ;;  %v789_v31 = vld [vmem:[%s1870_s6 + $0x18] sm:$0xff] }
  0x23   : > { %690 = vmatpush.msra.mxu1 %v631_v9  ;;  %1322 = vmatmul.msk.f32.vlgmr.msra.gmra.mxu0 %vm639_vm2, %v1624_v12  ;;  %v864_v22 = vld [vmem:[%s1871_s7 + $0x28] sm:$0xff]  ;;  %v863_v26 = vld [vmem:[%s1871_s7 + $0x20] sm:$0xff]  ;;  %v862_v32 = vld [vmem:[%s1871_s7 + $0x18] sm:$0xff] }
  0x24   : > { %1324 = vmatmul.msk.f32.vlgmr.msra.gmra.mxu1 %vm639_vm2, %v1627_v13  ;;  %v937_v23 = vld [vmem:[%s1872_s8 + $0x28] sm:$0xff]  ;;  %879 = vmatpush.msrb.mxu0 %v866_v14  ;;  %v936_v27 = vld [vmem:[%s1872_s8 + $0x20] sm:$0xff]  ;;  %v935_v33 = vld [vmem:[%s1872_s8 + $0x18] sm:$0xff] }
  0x25   : > { %952 = vmatpush.msrb.mxu1 %v939_v15  ;;  %808 = vmatpush.msra.mxu3 %v791_v21  ;;  %v1676_v28 = vld [vmem:[%s1590_s23 + $0x8] sm:$0xff]  ;;  %v708_v34 = vld [vmem:[%s1869_s5 + $0x10] sm:$0xff]  ;;  %v706_v42 = vld [vmem:[%s1869_s5] sm:$0xff] }
  0x26   : > { %880 = vmatpush.msrb.mxu0 %v865_v18  ;;  %v1679_v29 = vld [vmem:[%s1585_s1 + $0x8] sm:$0xff]  ;;  %736 = vmatpush.msra.mxu2 %v710_v24  ;;  %v788_v35 = vld [vmem:[%s1870_s6 + $0x10] sm:$0xff]  ;;  %v786_v43 = vld [vmem:[%s1870_s6] sm:$0xff] }
  0x27   : > { %953 = vmatpush.msrb.mxu1 %v938_v19  ;;  %809 = vmatpush.msra.mxu3 %v790_v25  ;;  %v861_v36 = vld [vmem:[%s1871_s7 + $0x10] sm:$0xff]  ;;  %v707_v38 = vld [vmem:[%s1869_s5 + $0x8] sm:$0xff]  ;;  %v859_v44 = vld [vmem:[%s1871_s7] sm:$0xff] }
  0x28   : > { %881 = vmatpush.msrb.mxu0 %v864_v22  ;;  %737 = vmatpush.msra.mxu2 %v709_v30  ;;  %v934_v37 = vld [vmem:[%s1872_s8 + $0x10] sm:$0xff]  ;;  %v787_v39 = vld [vmem:[%s1870_s6 + $0x8] sm:$0xff]  ;;  %v932_v45 = vld [vmem:[%s1872_s8] sm:$0xff] }
  0x29   : > { %954 = vmatpush.msrb.mxu1 %v937_v23  ;;  %810 = vmatpush.msra.mxu3 %v789_v31  ;;  %v860_v40 = vld [vmem:[%s1871_s7 + $0x8] sm:$0xff]  ;;  %v1379_v46 = vld [vmem:[%s1868_s4] ss:$0 sm:$0xff] }
  0x2a   : > { %882 = vmatpush.msrb.mxu0 %v863_v26  ;;  %738 = vmatpush.msra.mxu2 %v708_v34  ;;  %v933_v41 = vld [vmem:[%s1872_s8 + $0x8] sm:$0xff]  ;;  %v1380_v57 = vld [vmem:[%s1875_s11] ss:$0 sm:$0xff] }
  0x2b   : > { %955 = vmatpush.msrb.mxu1 %v936_v27  ;;  %1323 = vmatmul.msk.f32.gmra.mxu0 %vm639_vm2, %v1676_v28  ;;  %v1382_v60 = vld [vmem:[%s1873_s9] ss:$0 sm:$0xff] }
  0x2c   : > { %1325 = vmatmul.msk.f32.gmra.mxu1 %vm639_vm2, %v1679_v29  ;;  %883 = vmatpush.msrb.mxu0 %v862_v32  ;;  %v1383_v61 = vld [vmem:[%s1874_s10] ss:$0 sm:$0xff] }
  0x2d   : > { %956 = vmatpush.msrb.mxu1 %v935_v33  ;;  %811 = vmatpush.msra.mxu3 %v788_v35 }
  0x2e   : > { %884 = vmatpush.msrb.mxu0 %v861_v36  ;;  %739 = vmatpush.msra.mxu2 %v707_v38 }
  0x2f   : > { %957 = vmatpush.msrb.mxu1 %v934_v37  ;;  %812 = vmatpush.msra.mxu3 %v787_v39 }
  0x30   : > { %885 = vmatpush.msrb.mxu0 %v860_v40  ;;  %740 = vmatpush.msra.mxu2 %v706_v42 }
  0x31   : > { %958 = vmatpush.msrb.mxu1 %v933_v41  ;;  %813 = vmatpush.msra.mxu3 %v786_v43 }
  0x32   : > { %886 = vmatpush.msrb.mxu0 %v859_v44 }
  0x33   : > { %959 = vmatpush.msrb.mxu1 %v932_v45 }
  0xa0   : > { %v663_v47 = vpop.f32.mrf.mxu0 }
  0xa1   : > { %v692_v48 = vpop.f32.mrf.mxu1 }
  0xa2   : > { %v693_v49 = vadd.f32 %v692_v48, %v663_v47 }
  0xa4   : > { %v702_v50 = vadd.f32 %v1379_v46, %v693_v49 }
  0xa6   : > { %v704_v51 = vmax.f32 %v702_v50, 0.0 }
  0xa8   : > { %1326 = vmatmul.msk.f32.vlgmr.msra.gmra.mxu2 %vm718_vm3, %v704_v51  ;;  %1330 = vmatmul.msk.f32.vlgmr.msra.gmra.mxu3 %vm718_vm3, %v704_v51  ;;  %v666_v52 = vpop.f32.mrf.mxu0 }
  0xa9   : > { %1334 = vmatmul.msk.f32.vlgmr.msrb.gmra.mxu0 %vm718_vm3, %v704_v51  ;;  %1338 = vmatmul.msk.f32.vlgmr.msrb.gmra.mxu1 %vm718_vm3, %v704_v51  ;;  %v695_v53 = vpop.f32.mrf.mxu1 }
  0xaa   : > { %v696_v54 = vadd.f32 %v695_v53, %v666_v52 }
  0xac   : > { %v703_v55 = vadd.f32 %v1379_v46, %v696_v54 }
  0xae   : > { %v705_v56 = vmax.f32 %v703_v55, 0.0  ;;  %v1777_v55 = vld [vmem:[%s1876_s12] ss:$0 sm:$0xff] }
  0xb0   : > { %1327 = vmatmul.msk.f32.gmra.mxu2 %vm718_vm3, %v705_v56  ;;  %1331 = vmatmul.msk.f32.gmra.mxu3 %vm718_vm3, %v705_v56 }
  0xb1   : > { %1335 = vmatmul.msk.f32.gmra.mxu0 %vm718_vm3, %v705_v56  ;;  %1339 = vmatmul.msk.f32.gmra.mxu1 %vm718_vm3, %v705_v56 }
 0x126   : > { %v888_v58 = vpop.f32.mrf.mxu0 }
 0x127   : > { %v889_v59 = vadd.f32 %v1380_v57, %v888_v58 }
 0x129   : > { %v1336_v62 = vmul.f32 -1.442695, %v889_v59  ;;  %v961_v59 = vpop.f32.mrf.mxu1 }
 0x12b   : > { %1387 = vpow2.f32 %v1336_v62  ;;  %v742_v63 = vpop.f32.mrf.mxu2  ;;  %v815_v0 = vpop.f32.mrf.mxu3 }
 0x12c   : > { %v743_v1 = vadd.f32 %v1382_v60, %v742_v63  ;;  %v816_v2 = vadd.f32 %v1383_v61, %v815_v0 }
 0x12e   : > { %v1328_v3 = vmul.f32 -1.442695, %v743_v1  ;;  %v1332_v4 = vmul.f32 -1.442695, %v816_v2  ;;  %v891_v5 = vpop.f32.mrf.mxu0 }
 0x12f   : > { %v892_v6 = vadd.f32 %v1380_v57, %v891_v5  ;;  %v962_v5 = vadd.f32 %v1777_v55, %v961_v59 }
 0x130   : > { %1389 = vpow2.f32 %v1328_v3 }
 0x131   : > { %v1388_v7 = vpop.eup %1387  ;;  %1391 = vpow2.f32 %v1332_v4  ;;  %v1337_v8 = vmul.f32 -1.442695, %v892_v6 }
 0x132   : > { %v1745_v9 = vadd.f32 1.0, %v1388_v7 }
 0x133   : > { %1393 = vpow2.f32 %v1337_v8  ;;  %v745_v10 = vpop.f32.mrf.mxu2  ;;  %v818_v11 = vpop.f32.mrf.mxu3 }
 0x134   : > { %1395 = vrcp.f32 %v1745_v9  ;;  %v746_v14 = vadd.f32 %v1382_v60, %v745_v10  ;;  %v819_v15 = vadd.f32 %v1383_v61, %v818_v11  ;;  %vm907_vm4 = vweird.f32 %v1745_v9 }
 0x135   : > { %v913_v34 = vand.u32 2147483648, %v1745_v9  ;;  %v911_v48 = vand.u32 2147483647, %v1745_v9 }
 0x136   : > { %v1390_v16 = vpop.eup %1389  ;;  %v1329_v19 = vmul.f32 -1.442695, %v746_v14  ;;  %v1333_v22 = vmul.f32 -1.442695, %v819_v15 }
 0x137   : > { %v1392_v17 = vpop.eup %1391  ;;  %v754_v18 = vadd.f32 1.0, %v1390_v16  ;;  %v914_v58 = vor.u32 1.1754944e-38, %v913_v34  ;;  %vm912_vm14 = vcmp.eq.f32.partialorder %v911_v48, 8.507059e+37  ;;  %v964_v34 = vpop.f32.mrf.mxu1 }
 0x138   : > { %v827_v20 = vadd.f32 1.0, %v1392_v17 }
 0x139   : > { %v1394_v21 = vpop.eup %1393  ;;  %1397 = vrcp.f32 %v754_v18  ;;  %v765_v36 = vand.u32 2147483647, %v754_v18  ;;  %v767_v40 = vand.u32 2147483648, %v754_v18  ;;  %vm761_vm9 = vweird.f32 %v754_v18 }
 0x13a   : > { %v1396_v23 = vpop.eup %1395  ;;  %1399 = vrcp.f32 %v827_v20  ;;  %v1748_v24 = vadd.f32 1.0, %v1394_v21  ;;  %v840_v45 = vand.u32 2147483648, %v827_v20  ;;  %v838_v50 = vand.u32 2147483647, %v827_v20 }
 0x13b   : > { %v903_v25 = vmul.f32 %v1396_v23, %v1745_v9  ;;  %1401 = vpow2.f32 %v1329_v19  ;;  %vm908_vm5 = vweird.f32 %v1396_v23  ;;  %v768_v56 = vor.u32 1.1754944e-38, %v767_v40 }
 0x13c   : > { %1403 = vrcp.f32 %v1748_v24  ;;  %vm1767_vm8 = vmor %vm907_vm4, %vm908_vm5  ;;  %vm834_vm11 = vweird.f32 %v827_v20  ;;  %vm766_vm12 = vcmp.eq.f32.partialorder %v765_v36, 8.507059e+37  ;;  %v841_v61 = vor.u32 1.1754944e-38, %v840_v45 }
 0x13d   : > { %v904_v26 = vsub.f32 1.0, %v903_v25  ;;  %1405 = vpow2.f32 %v1333_v22  ;;  %vm839_vm15 = vcmp.eq.f32.partialorder %v838_v50, 8.507059e+37  ;;  %vm922_vm0 = vweird.f32 %v1748_v24 }
 0x13e   : > { %v926_v9 = vand.u32 2147483647, %v1748_v24 }
 0x13f   : > { %v1398_v27 = vpop.eup %1397  ;;  %v905_v30 = vmul.f32 %v1396_v23, %v904_v26 }
 0x140   : > { %v1400_v31 = vpop.eup %1399  ;;  %v757_v32 = vmul.f32 %v1398_v27, %v754_v18  ;;  %vm762_vm6 = vweird.f32 %v1398_v27 }
 0x141   : > { %v1402_v33 = vpop.eup %1401  ;;  %v830_v35 = vmul.f32 %v1400_v31, %v827_v20  ;;  %v906_v42 = vadd.f32 %v1396_v23, %v905_v30  ;;  %vm835_vm7 = vweird.f32 %v1400_v31  ;;  %vm763_vm10 = vmor %vm761_vm9, %vm762_vm6  ;;  %v928_v20 = vand.u32 2147483648, %v1748_v24 }
 0x142   : > { %v1754_v37 = vpop.eup %1403  ;;  %v758_v38 = vsub.f32 1.0, %v757_v32  ;;  %v1756_v39 = vadd.f32 1.0, %v1402_v33  ;;  %vm836_vm13 = vmor %vm834_vm11, %vm835_vm7  ;;  %vm927_vm11 = vcmp.eq.f32.partialorder %v926_v9, 8.507059e+37 }
 0x143   : > { %v1406_v41 = vpop.eup %1405  ;;  %v831_v43 = vsub.f32 1.0, %v830_v35  ;;  %v918_v44 = vmul.f32 %v1754_v37, %v1748_v24  ;;  %v910_v54 = vsel %vm1767_vm8, %v1396_v23, %v906_v42  ;;  %vm923_vm1 = vweird.f32 %v1754_v37 }
 0x144   : > { %1407 = vrcp.f32 %v1756_v39  ;;  %v1761_v46 = vadd.f32 1.0, %v1406_v41  ;;  %v759_v47 = vmul.f32 %v1398_v27, %v758_v38  ;;  %v915_v1 = vsel %vm912_vm14, %v914_v58, %v910_v54  ;;  %vm1798_vm5 = vmor %vm922_vm0, %vm923_vm1 }
 0x145   : > { %v832_v49 = vmul.f32 %v1400_v31, %v831_v43  ;;  %v919_v52 = vsub.f32 1.0, %v918_v44  ;;  %v973_v10 = vmul.f32 %v962_v5, %v915_v1  ;;  %v782_v17 = vand.u32 2147483648, %v1756_v39 }
 0x146   : > { %1409 = vrcp.f32 %v1761_v46  ;;  %v760_v53 = vadd.f32 %v1398_v27, %v759_v47  ;;  %vm776_vm4 = vweird.f32 %v1756_v39  ;;  %v853_v21 = vand.u32 2147483647, %v1761_v46 }
 0x147   : > { %v833_v57 = vadd.f32 %v1400_v31, %v832_v49  ;;  %v920_v2 = vmul.f32 %v1754_v37, %v919_v52  ;;  %v855_v22 = vand.u32 2147483648, %v1761_v46  ;;  %v783_v30 = vor.u32 1.1754944e-38, %v782_v17 }
 0x148   : > { %v764_v60 = vsel %vm763_vm10, %v1398_v27, %v760_v53  ;;  %vm849_vm8 = vweird.f32 %v1761_v46  ;;  %v929_v33 = vor.u32 1.1754944e-38, %v928_v20  ;;  %v965_v42 = vadd.f32 %v1777_v55, %v964_v34 }
 0x149   : > { %v769_v62 = vsel %vm766_vm12, %v768_v56, %v764_v60  ;;  %v837_v63 = vsel %vm836_vm13, %v1400_v31, %v833_v57  ;;  %v921_v16 = vadd.f32 %v1754_v37, %v920_v2  ;;  %v856_v36 = vor.u32 1.1754944e-38, %v855_v22 }
 0x14a   : > { %v1408_v0 = vpop.eup %1407  ;;  %v842_v3 = vsel %vm839_vm15, %v841_v61, %v837_v63  ;;  %v967_v4 = vmul.f32 %v769_v62, %v1627_v13  ;;  %v780_v13 = vand.u32 2147483647, %v1756_v39  ;;  %vm854_vm12 = vcmp.eq.f32.partialorder %v853_v21, 8.507059e+37 }
 0x14b   : > { %v772_v6 = vmul.f32 %v1408_v0, %v1756_v39  ;;  %v969_v7 = vmul.f32 %v842_v3, %v1624_v12  ;;  %vm777_vm3 = vweird.f32 %v1408_v0  ;;  %v925_v31 = vsel %vm1798_vm5, %v1754_v37, %v921_v16  ;;  %v1385_v16 = vld [vmem:[%s1878_s14] ss:$0 sm:$0xff] }
 0x14c   : > { %v1410_v8 = vpop.eup %1409  ;;  %vm778_vm7 = vmor %vm776_vm4, %vm777_vm3  ;;  %vm781_vm9 = vcmp.eq.f32.partialorder %v780_v13, 8.507059e+37  ;;  %v930_v40 = vsel %vm927_vm11, %v929_v33, %v925_v31  ;;  %v1464_v47 = vmov 32.0  }
 0x14d   : > { %v773_v11 = vsub.f32 1.0, %v772_v6  ;;  %v845_v14 = vmul.f32 %v1410_v8, %v1761_v46  ;;  %v971_v15 = vadd.f32 %v969_v7, %v967_v4  ;;  %vm850_vm6 = vweird.f32 %v1410_v8 }
 0x14e   : > { %vm851_vm10 = vmor %vm849_vm8, %vm850_vm6  ;;  %v974_v37 = vmul.f32 %v965_v42, %v930_v40  ;;  %1411 = vrcp.f32 %v1464_v47 }
 0x14f   : > { %v846_v18 = vsub.f32 1.0, %v845_v14  ;;  %v975_v12 = vadd.f32 %v973_v10, %v971_v15  ;;  %v774_v19 = vmul.f32 %v1408_v0, %v773_v11  ;;  %v1384_v10 = vld [vmem:[%s1877_s13] ss:$0 sm:$0xff] }
 0x151   : > { %v979_v25 = vsel %vm639_vm2, %v975_v12, 0.0  ;;  %v775_v26 = vadd.f32 %v1408_v0, %v774_v19  ;;  %v847_v27 = vmul.f32 %v1410_v8, %v846_v18 }
 0x152   : > { %980 = vadd.xlane.f32.xlu0 %v979_v25 }
 0x153   : > { %v779_v32 = vsel %vm778_vm7, %v1408_v0, %v775_v26  ;;  %v848_v24 = vadd.f32 %v1410_v8, %v847_v27 }
 0x154   : > { %v784_v35 = vsel %vm781_vm9, %v783_v30, %v779_v32  ;;  %v1412_v48 = vpop.eup %1411 }
 0x155   : > { %v852_v38 = vsel %vm851_vm10, %v1410_v8, %v848_v24  ;;  %v968_v39 = vmul.f32 %v784_v35, %v1679_v29  ;;  %v986_v49 = vmul.f32 32.0, %v1412_v48  ;;  %vm990_vm13 = vweird.f32 %v1412_v48 }
 0x156   : > { %v857_v41 = vsel %vm854_vm12, %v856_v36, %v852_v38 }
 0x157   : > { %v970_v43 = vmul.f32 %v857_v41, %v1676_v28  ;;  %v987_v50 = vsub.f32 1.0, %v986_v49 }
 0x159   : > { %v972_v44 = vadd.f32 %v970_v43, %v968_v39  ;;  %v988_v51 = vmul.f32 %v1412_v48, %v987_v50 }
 0x15b   : > { %v976_v45 = vadd.f32 %v974_v37, %v972_v44  ;;  %v989_v52 = vadd.f32 %v1412_v48, %v988_v51 }
 0x15d   : > { %v982_v46 = vsel %vm639_vm2, %v976_v45, 0.0  ;;  %v991_v29 = vsel %vm990_vm13, %v1412_v48, %v989_v52 }
 0x15e   : > { %983 = vadd.xlane.f32.xlu0 %v982_v46 }
 0x1c5   : > { %v981_v53 = vpop.xlane.xlu0 %980 }
 0x1c6   : > { %v992_v54 = vmul.f32 %v991_v29, %v981_v53 }
 0x1c8   : > { %v994_v55 = vsub.f32 %v975_v12, %v992_v54 }
 0x1ca   : > { %v996_v56 = vmul.f32 %v994_v55, %v994_v55 }
 0x1cc   : > { %v998_v28 = vsel %vm639_vm2, %v996_v56, 0.0 }
 0x1cd   : > { %999 = vadd.xlane.f32.xlu1 %v998_v28 }
 0x1d1   : > { %v984_v57 = vpop.xlane.xlu0 %983 }
 0x1d2   : > { %v993_v58 = vmul.f32 %v991_v29, %v984_v57 }
 0x1d4   : > { %v995_v59 = vsub.f32 %v976_v45, %v993_v58 }
 0x1d6   : > { %v997_v60 = vmul.f32 %v995_v59, %v995_v59 }
 0x1d8   : > { %v1001_v61 = vsel %vm639_vm2, %v997_v60, 0.0 }
 0x1d9   : > { %1002 = vadd.xlane.f32.xlu1 %v1001_v61 }
 0x240   : > { %v1000_v62 = vpop.xlane.xlu1 %999 }
 0x241   : > { %v1004_v63 = vmul.f32 %v1000_v62, %v991_v29 }
 0x243   : > { %v1006_v0 = vadd.f32 1e-05, %v1004_v63  ;;  %v1386_v63 = vld [vmem:[%s1879_s15] ss:$0 sm:$0xff] }
 0x245   : > { %1413 = vrsqrt.f32 %v1006_v0  ;;  %vm1014_vm15 = vweird.f32 %v1006_v0 }
 0x24b   : > { %v1414_v1 = vpop.eup %1413 }
 0x24c   : > { %v1009_v2 = vmul.f32 %v1414_v1, %v1006_v0  ;;  %v1003_v3 = vpop.xlane.xlu1 %1002  ;;  %vm1015_vm14 = vweird.f32 %v1414_v1 }
 0x24d   : > { %v1005_v4 = vmul.f32 %v1003_v3, %v991_v29  ;;  %vm1016_vm0 = vmor %vm1014_vm15, %vm1015_vm14 }
 0x24e   : > { %v1010_v5 = vmul.f32 %v1414_v1, %v1009_v2 }
 0x24f   : > { %v1007_v6 = vadd.f32 1e-05, %v1005_v4 }
 0x250   : > { %v1011_v7 = vmul.f32 0.5, %v1010_v5 }
 0x251   : > { %1415 = vrsqrt.f32 %v1007_v6  ;;  %vm1024_vm3 = vweird.f32 %v1007_v6 }
 0x252   : > { %v1012_v8 = vsub.f32 1.5, %v1011_v7 }
 0x254   : > { %v1013_v9 = vmul.f32 %v1414_v1, %v1012_v8 }
 0x256   : > { %v1017_v11 = vsel %vm1016_vm0, %v1414_v1, %v1013_v9 }
 0x257   : > { %v1416_v14 = vpop.eup %1415  ;;  %v1028_v15 = vmul.f32 %v1017_v11, %v994_v55 }
 0x258   : > { %v1019_v13 = vmul.f32 %v1416_v14, %v1007_v6  ;;  %vm1025_vm1 = vweird.f32 %v1416_v14 }
 0x259   : > { %v1033_v17 = vmul.f32 %v1384_v10, %v1028_v15  ;;  %vm1026_vm4 = vmor %vm1024_vm3, %vm1025_vm1  ;;  %vm1142_vm1 = vcmask 7168  }
 0x25a   : > { %v1020_v18 = vmul.f32 %v1416_v14, %v1019_v13 }
 0x25b   : > { %v1819_v12 = vadd.f32 %v1385_v16, %v1033_v17 }
 0x25c   : > { %v1021_v19 = vmul.f32 0.5, %v1020_v18  ;;  %v1465_v18 = vmov 0  }
 0x25d   : > { %v1040_v20 = vmul.f32 %v1819_v12, %v1819_v12  ;;  %1378 = vset.pattern.permute.xlu1 %v1465_v18  ;;  %1376 = vset.pattern.permute.xlu2 %v1465_v18 }
 0x25e   : > { %v1022_v21 = vsub.f32 1.5, %v1021_v19  ;;  %1377 = vset.pattern.permute.xlu0 %v1465_v18  ;;  %v1120_v19 = vld [vmem:[#allocation2] sm:$0xff] }
 0x25f   : > { %v1042_v22 = vsel %vm639_vm2, %v1040_v20, 0.0 }
 0x260   : > { %v1023_v23 = vmul.f32 %v1416_v14, %v1022_v21  ;;  %1043 = vadd.xlane.f32.xlu2 %v1042_v22 }
 0x262   : > { %v1027_v25 = vsel %vm1026_vm4, %v1416_v14, %v1023_v23 }
 0x263   : > { %v1029_v26 = vmul.f32 %v1027_v25, %v995_v59 }
 0x265   : > { %v1034_v27 = vmul.f32 %v1384_v10, %v1029_v26 }
 0x267   : > { %v1824_v30 = vadd.f32 %v1385_v16, %v1034_v27 }
 0x269   : > { %v1041_v31 = vmul.f32 %v1824_v30, %v1824_v30 }
 0x26b   : > { %v1045_v32 = vsel %vm639_vm2, %v1041_v31, 0.0 }
 0x26c   : > { %1046 = vadd.xlane.f32.xlu2 %v1045_v32  ;;  %v1136_v32 = vld [vmem:[#allocation3] sm:$0xff] }
 0x2d3   : > { %v1044_v24 = vpop.xlane.xlu2 %1043 }
 0x2d4   : > { %1417 = vrsqrt.f32 %v1044_v24  ;;  %vm1055_vm5 = vcmp.eq.f32.partialorder %v1044_v24, inf  ;;  %v1058_v43 = vand.u32 2147483648, %v1044_v24  ;;  %vm1057_vm6 = vcmp.eq.f32.partialorder %v1044_v24, 0.0 }
 0x2da   : > { %v1418_v33 = vpop.eup %1417 }
 0x2db   : > { %v1049_v34 = vmul.f32 %v1418_v33, %v1044_v24 }
 0x2dd   : > { %v1050_v35 = vmul.f32 %v1418_v33, %v1049_v34 }
 0x2df   : > { %v1051_v36 = vmul.f32 0.5, %v1050_v35  ;;  %v1047_v38 = vpop.xlane.xlu2 %1046 }
 0x2e0   : > { %1419 = vrsqrt.f32 %v1047_v38  ;;  %vm1067_vm7 = vcmp.eq.f32.partialorder %v1047_v38, inf  ;;  %v1070_v29 = vand.u32 2147483648, %v1047_v38  ;;  %vm1069_vm8 = vcmp.eq.f32.partialorder %v1047_v38, 0.0 }
 0x2e1   : > { %v1052_v39 = vsub.f32 1.5, %v1051_v36 }
 0x2e3   : > { %v1053_v40 = vmul.f32 %v1418_v33, %v1052_v39 }
 0x2e5   : > { %v1054_v41 = vmul.f32 %v1053_v40, %v1044_v24 }
 0x2e6   : > { %v1420_v42 = vpop.eup %1419 }
 0x2e7   : > { %v1056_v37 = vsel %vm1055_vm5, %v1044_v24, %v1054_v41  ;;  %v1061_v44 = vmul.f32 %v1420_v42, %v1047_v38 }
 0x2e8   : > { %v1059_v45 = vsel %vm1057_vm6, %v1058_v43, %v1056_v37  ;;  %v1137_v43 = vld [vmem:[#allocation3 + $0x8] sm:$0xff] }
 0x2e9   : > { %v1072_v46 = vadd.f32 1e-08, %v1059_v45  ;;  %v1062_v47 = vmul.f32 %v1420_v42, %v1061_v44 }
 0x2eb   : > { %1421 = vrcp.f32 %v1072_v46  ;;  %v1063_v48 = vmul.f32 0.5, %v1062_v47  ;;  %v1085_v57 = vand.u32 2147483648, %v1072_v46  ;;  %v1083_v59 = vand.u32 2147483647, %v1072_v46  ;;  %v1145_v47 = vld [vmem:[#allocation4] sm:$0xff] }
 0x2ec   : > { %vm1079_vm10 = vweird.f32 %v1072_v46 }
 0x2ed   : > { %v1064_v49 = vsub.f32 1.5, %v1063_v48  ;;  %v1086_v61 = vor.u32 1.1754944e-38, %v1085_v57  ;;  %vm1084_vm12 = vcmp.eq.f32.partialorder %v1083_v59, 8.507059e+37 }
 0x2ef   : > { %v1065_v50 = vmul.f32 %v1420_v42, %v1064_v49 }
 0x2f1   : > { %v1422_v51 = vpop.eup %1421  ;;  %v1066_v52 = vmul.f32 %v1065_v50, %v1047_v38 }
 0x2f2   : > { %v1075_v53 = vmul.f32 %v1422_v51, %v1072_v46  ;;  %vm1080_vm9 = vweird.f32 %v1422_v51 }
 0x2f3   : > { %v1068_v54 = vsel %vm1067_vm7, %v1047_v38, %v1066_v52  ;;  %vm1081_vm11 = vmor %vm1079_vm10, %vm1080_vm9 }
 0x2f4   : > { %v1071_v55 = vsel %vm1069_vm8, %v1070_v29, %v1068_v54  ;;  %v1076_v56 = vsub.f32 1.0, %v1075_v53  ;;  %v1146_v53 = vld [vmem:[#allocation4 + $0x8] sm:$0xff] }
 0x2f5   : > { %v1073_v28 = vadd.f32 1e-08, %v1071_v55 }
 0x2f6   : > { %v1077_v58 = vmul.f32 %v1422_v51, %v1076_v56 }
 0x2f7   : > { %1423 = vrcp.f32 %v1073_v28  ;;  %v1100_v7 = vand.u32 2147483648, %v1073_v28  ;;  %v1098_v9 = vand.u32 2147483647, %v1073_v28  ;;  %vm1094_vm14 = vweird.f32 %v1073_v28 }
 0x2f8   : > { %v1078_v60 = vadd.f32 %v1422_v51, %v1077_v58 }
 0x2f9   : > { %v1101_v11 = vor.u32 1.1754944e-38, %v1100_v7  ;;  %vm1099_vm0 = vcmp.eq.f32.partialorder %v1098_v9, 8.507059e+37 }
 0x2fa   : > { %v1082_v62 = vsel %vm1081_vm11, %v1422_v51, %v1078_v60 }
 0x2fb   : > { %v1087_v0 = vsel %vm1084_vm12, %v1086_v61, %v1082_v62 }
 0x2fc   : > { %v1833_v1 = vmul.f32 %v1087_v0, %v1819_v12  ;;  %v1117_v12 = vstv %s1116_s21 }
 0x2fd   : > { %v1424_v2 = vpop.eup %1423 }
 0x2fe   : > { %v1108_v3 = vmul.f32 %v1386_v63, %v1833_v1  ;;  %v1090_v4 = vmul.f32 %v1424_v2, %v1073_v28  ;;  %vm1095_vm13 = vweird.f32 %v1424_v2 }
 0x2ff   : > { %vm1096_vm15 = vmor %vm1094_vm14, %vm1095_vm13 }
 0x300   : > { %v1110_v5 = vsel %vm639_vm2, %v1108_v3, 0.0  ;;  %v1091_v6 = vsub.f32 1.0, %v1090_v4 }
 0x301   : > { %1111 = vadd.xlane.f32.xlu0 %v1110_v5 }
 0x302   : > { %v1092_v8 = vmul.f32 %v1424_v2, %v1091_v6 }
 0x304   : > { %v1093_v10 = vadd.f32 %v1424_v2, %v1092_v8 }
 0x306   : > { %v1097_v14 = vsel %vm1096_vm15, %v1424_v2, %v1093_v10 }
 0x307   : > { %v1102_v15 = vsel %vm1099_vm0, %v1101_v11, %v1097_v14 }
 0x308   : > { %v1103_v16 = vmul.f32 %v1102_v15, %v1824_v30  ;;  %v1121_v30 = vld [vmem:[#allocation2 + $0x8] sm:$0xff] }
 0x30a   : > { %v1109_v13 = vmul.f32 %v1386_v63, %v1103_v16 }
 0x30c   : > { %v1113_v17 = vsel %vm639_vm2, %v1109_v13, 0.0 }
 0x30d   : > { %1114 = vadd.xlane.f32.xlu1 %v1113_v17 }
 0x374   : > { %v1112_v20 = vpop.xlane.xlu0 %1111 }
 0x375   : > { %v1118_v21 = vadd.f32 %v1117_v12, %v1112_v20 }
 0x377   : > { %v1122_v22 = vmax.f32 %v1120_v19, %v1118_v21 }
 0x379   : > { %v1124_v23 = vsub.f32 %v1120_v19, %v1122_v22  ;;  %v1130_v25 = vsub.f32 %v1118_v21, %v1122_v22  ;;  %1175 = vst.msk [vmem:[#allocation2] sm:$0xff] %vm1142_vm1, %v1122_v22 }
 0x37b   : > { %v1126_v26 = vmul.f32 1.442695, %v1124_v23  ;;  %v1132_v27 = vmul.f32 1.442695, %v1130_v25 }
 0x37d   : > { %1425 = vpow2.f32 %v1126_v26 }
 0x37e   : > { %1427 = vpow2.f32 %v1132_v27 }
 0x380   : > { %v1115_v31 = vpop.xlane.xlu1 %1114 }
 0x381   : > { %v1119_v24 = vadd.f32 %v1117_v12, %v1115_v31 }
 0x383   : > { %v1426_v33 = vpop.eup %1425  ;;  %v1123_v34 = vmax.f32 %v1121_v30, %v1119_v24 }
 0x384   : > { %v1428_v35 = vpop.eup %1427  ;;  %v1138_v36 = vmul.f32 %v1426_v33, %v1136_v32  ;;  %1149 = vperm.xlu2 %1376, %v1426_v33  }
 0x385   : > { %v1125_v38 = vsub.f32 %v1121_v30, %v1123_v34  ;;  %v1131_v39 = vsub.f32 %v1119_v24, %v1123_v34  ;;  %1176 = vst.msk [vmem:[#allocation2 + $0x8] sm:$0xff] %vm1142_vm1, %v1123_v34  ;;  %1161 = vperm.xlu1 %1378, %v1428_v35  }
 0x386   : > { %v1140_v40 = vadd.f32 %v1428_v35, %v1138_v36 }
 0x387   : > { %v1128_v41 = vmul.f32 1.442695, %v1125_v38  ;;  %v1134_v42 = vmul.f32 1.442695, %v1131_v39 }
 0x388   : > { %1143 = vst.msk [vmem:[#allocation3] sm:$0xff] %vm1142_vm1, %v1140_v40 }
 0x389   : > { %1429 = vpow2.f32 %v1128_v41 }
 0x38a   : > { %1431 = vpow2.f32 %v1134_v42 }
 0x38f   : > { %v1430_v37 = vpop.eup %1429 }
 0x390   : > { %v1432_v44 = vpop.eup %1431  ;;  %v1139_v45 = vmul.f32 %v1430_v37, %v1137_v43  ;;  %1154 = vperm.xlu0 %1377, %v1430_v37  }
 0x391   : > { %1166 = vperm.xlu2 %1376, %v1432_v44  }
 0x392   : > { %v1141_v46 = vadd.f32 %v1432_v44, %v1139_v45 }
 0x394   : > { %1144 = vst.msk [vmem:[#allocation3 + $0x8] sm:$0xff] %vm1142_vm1, %v1141_v46 }
 0x3de   : > { %v1150_v48 = vpop.permute.xlu2 %1149 }
 0x3df   : > { %v1157_v50 = vmul.f32 %v1150_v48, %v1145_v47 }
 0x3eb   : > { %v1167_v29 = vpop.permute.xlu2 %1166 }
 0x3ec   : > { %v1170_v55 = vmul.f32 %v1167_v29, %v1103_v16 }
 0x3f7   : > { %v1162_v49 = vpop.permute.xlu1 %1161 }
 0x3f8   : > { %v1169_v51 = vmul.f32 %v1162_v49, %v1833_v1 }
 0x3fa   : > { %v1171_v52 = vadd.f32 %v1169_v51, %v1157_v50 }
 0x3fc   : > { %1173 = vst.msk [vmem:[#allocation4] sm:$0xff] %vm639_vm2, %v1171_v52 }
 0x402   : > { %v1155_v54 = vpop.permute.xlu0 %1154 }
 0x403   : > { %v1158_v56 = vmul.f32 %v1155_v54, %v1146_v53  ;;  %1180 = sbr.rel (%p1340_p6) target bundleno = 1177 (0x499), region = 96 }
 0x405   : > { %v1172_v28 = vadd.f32 %v1170_v55, %v1158_v56 }
 0x407   : > { %1174 = vst.msk [vmem:[#allocation4 + $0x8] sm:$0xff] %vm639_vm2, %v1172_v28 }
 0x408   : > { %v1183_v57 = vld [vmem:[#allocation3] sm:$0xff]  ;;  %v1466_v58 = vmov 0   ;;  %v1184_v59 = vld [vmem:[#allocation3 + $0x8] sm:$0xff]  ;;  %v1181_v6 = vld [vmem:[#allocation4] sm:$0xff] }
 0x409   : > { %1433 = vset.pattern.permute.xlu0 %v1466_v58 }
 0x40a   : > { %1187 = vperm.xlu0 %1433, %v1183_v57  }
 0x40e   : > { %v1182_v18 = vld [vmem:[#allocation4 + $0x8] sm:$0xff] }
 0x412   : > { %1192 = vperm.xlu0 %1433, %v1184_v59  }
 0x47c   : > { %v1188_v60 = vpop.permute.xlu0 %1187 }
 0x47d   : > { %1434 = vrcp.f32 %v1188_v60  ;;  %v1206_v1 = vand.u32 2147483648, %v1188_v60  ;;  %v1204_v3 = vand.u32 2147483647, %v1188_v60  ;;  %vm1200_vm4 = vweird.f32 %v1188_v60 }
 0x47f   : > { %v1207_v7 = vor.u32 1.1754944e-38, %v1206_v1  ;;  %vm1205_vm6 = vcmp.eq.f32.partialorder %v1204_v3, 8.507059e+37 }
 0x483   : > { %v1435_v61 = vpop.eup %1434 }
 0x484   : > { %v1196_v62 = vmul.f32 %v1435_v61, %v1188_v60  ;;  %v1193_v63 = vpop.permute.xlu0 %1192  ;;  %vm1201_vm3 = vweird.f32 %v1435_v61 }
 0x485   : > { %1436 = vrcp.f32 %v1193_v63  ;;  %vm1202_vm5 = vmor %vm1200_vm4, %vm1201_vm3  ;;  %v1221_v15 = vand.u32 2147483648, %v1193_v63  ;;  %v1219_v13 = vand.u32 2147483647, %v1193_v63  ;;  %vm1215_vm8 = vweird.f32 %v1193_v63 }
 0x486   : > { %v1197_v0 = vsub.f32 1.0, %v1196_v62 }
 0x487   : > { %v1222_v12 = vor.u32 1.1754944e-38, %v1221_v15  ;;  %vm1220_vm10 = vcmp.eq.f32.partialorder %v1219_v13, 8.507059e+37 }
 0x488   : > { %v1198_v2 = vmul.f32 %v1435_v61, %v1197_v0 }
 0x48a   : > { %v1199_v4 = vadd.f32 %v1435_v61, %v1198_v2 }
 0x48b   : > { %v1437_v5 = vpop.eup %1436 }
 0x48c   : > { %v1203_v8 = vsel %vm1202_vm5, %v1435_v61, %v1199_v4  ;;  %v1211_v9 = vmul.f32 %v1437_v5, %v1193_v63  ;;  %vm1216_vm7 = vweird.f32 %v1437_v5 }
 0x48d   : > { %v1208_v10 = vsel %vm1205_vm6, %v1207_v7, %v1203_v8  ;;  %vm1217_vm9 = vmor %vm1215_vm8, %vm1216_vm7 }
 0x48e   : > { %v1209_v11 = vmul.f32 %v1208_v10, %v1181_v6  ;;  %v1212_v14 = vsub.f32 1.0, %v1211_v9 }
 0x490   : > { %1225 = vst.msk [vmem:[%s1881_s17] sm:$0xff] %vm639_vm2, %v1209_v11  ;;  %v1213_v16 = vmul.f32 %v1437_v5, %v1212_v14 }
 0x492   : > { %v1214_v17 = vadd.f32 %v1437_v5, %v1213_v16 }
 0x494   : > { %v1218_v19 = vsel %vm1217_vm9, %v1437_v5, %v1214_v17 }
 0x495   : > { %v1223_v20 = vsel %vm1220_vm10, %v1222_v12, %v1218_v19 }
 0x496   : > { %v1224_v21 = vmul.f32 %v1223_v20, %v1182_v18 }
 0x498   : > { %1226 = vst.msk [vmem:[%s1881_s17 + $0x8] sm:$0xff] %vm639_vm2, %v1224_v21 }
 0x499 PF: > { %s28_s28 = sadd.s32 1, %s1460_s28   ;;  %s1890_s26 = smov %s1456_s27 }
 0x49a   : > { %p25_p7 = scmp.ge.s32.totalorder %s28_s28, 4   ;;  %s1891_s27 = smov %s1893_s16 }
 0x49c   :  { %27 = sbr.rel (!%p25_p7) target bundleno = 4 (0x4), region = 129 }

// kernel: cyk_cell_forward.12
= control target key start
LH: loop header
LB: loop body
LE: loop exit
PB: predicated region body
PF: predicated region fallthrough
CT: control target
= control target key end

     0   :  { %s1285_s26 = smov 0   ;;  %s1287_s27 = smov 0   ;;  %s1498_s0 = inlined_call_operand.vmem [shape: f32[4,8,32], index: 0, kind: input, shape index: {}]   ;;  %s1499_s1 = inlined_call_operand.vmem [shape: f32[4,8,32], index: 1, kind: input, shape index: {}]   ;;  %s1500_s2 = inlined_call_operand.vmem [shape: f32[32,64], index: 2, kind: input, shape index: {}]   ;;  %s1501_s3 = inlined_call_operand.vmem [shape: f32[32,64], index: 3, kind: input, shape index: {}]   ;;  %s1502_s4 = inlined_call_operand.vmem [shape: f32[1,64], index: 4, kind: input, shape index: {}]   ;;  %s1503_s5 = inlined_call_operand.vmem [shape: f32[64,32], index: 5, kind: input, shape index: {}]   ;;  %s1504_s6 = inlined_call_operand.vmem [shape: f32[64,32], index: 6, kind: input, shape index: {}]   ;;  %s1505_s7 = inlined_call_operand.vmem [shape: f32[64,32], index: 7, kind: input, shape index: {}]   ;;  %s1506_s8 = inlined_call_operand.vmem [shape: f32[64,32], index: 8, kind: input, shape index: {}]   ;;  %s1507_s9 = inlined_call_operand.vmem [shape: f32[1,32], index: 9, kind: input, shape index: {}]   ;;  %s1508_s10 = inlined_call_operand.vmem [shape: f32[1,32], index: 10, kind: input, shape index: {}]   ;;  %s1509_s11 = inlined_call_operand.vmem [shape: f32[1,32], index: 11, kind: input, shape index: {}]   ;;  %s1510_s12 = inlined_call_operand.vmem [shape: f32[1,32], index: 12, kind: input, shape index: {}]   ;;  %s1511_s13 = inlined_call_operand.vmem [shape: f32[1,32], index: 13, kind: input, shape index: {}]   ;;  %s1512_s14 = inlined_call_operand.vmem [shape: f32[1,32], index: 14, kind: input, shape index: {}]   ;;  %s1513_s15 = inlined_call_operand.vmem [shape: f32[1,32], index: 15, kind: input, shape index: {}]   ;;  %s1514_s16 = inlined_call_operand.<no memory space> [shape: f32[1,1], index: 16, kind: input, shape index: {}]   ;;  %s1515_s17 = inlined_call_operand.vmem [shape: f32[8,32], index: 17, kind: output, shape index: {}]  }
   0x1   :  { %1516 = sst [smem:[#allocation6_spill]] %s1498_s0  ;;  %s1289_s28 = smov 0  }
   0x2   :  { %1517 = sst [smem:[#allocation7_spill]] %s1499_s1 }
   0x3   :  { %22 = sst [smem:[#allocation5]] %s1514_s16 }
   0x4 LB: > { %s37_s16 = sadd.s32 1, %s1181_s27  ;;  %p1080_p0 = scmp.ge.s32.totalorder %s1185_s28, 1  ;;  %s1185_s28 = sphi %s1289_s28, %s28_s28   ;;  %s1181_s27 = sphi %s1287_s27, %s1523_s27   ;;  %s1177_s26 = sphi %s1285_s26, %s1522_s26  }
   0x5   : > { %p38_p1 = scmp.ge.s32.totalorder %s37_s16, 4  ;;  %p518_p2 = scmp.lt.s32.totalorder %s1185_s28, 5 }
   0x7   : > { %s1525_s16 = smov (%p38_p1, %s37_s16), 0  ;;  %p519_p3 = pnand %p1080_p0, %p518_p2 }
   0x8   : > { %p578_p4 = scmp.lt.s32.totalorder (!%p519_p3), %s1177_s26, 3  ;;  %s1518_s19 = sld [smem:[#allocation6_spill]] (!%p519_p3) }
   0x9   : > { %522 = sbr.rel (%p519_p3) target bundleno = 1138 (0x472), region = 88  ;;  %s1519_s22 = sld [smem:[#allocation7_spill]] (!%p519_p3) }
   0xa   : > { %p1083_p5 = scmp.ne.s32.totalorder (!%p519_p3), %s1177_s26, 0 }
   0xe   : > { %s579_s29 = scalar_select %p578_p4, %s1177_s26, 3 }
   0xf   : > { %599 = sbr.rel (%p1083_p5) target bundleno = 24 (0x18), region = 92 }
  0x10   : > { %s1081_s0 = sshll.u32 %s579_s29, 3 }
  0x11   : > { %s1310_s1 = scalar_lea.vmem %s1518_s19, %s1081_s0  ;;  %s591_s23 = scalar_lea.vmem %s1519_s22, %s1081_s0 }
  0x14   : > { %vm600_vm0 = vcmask 7168   ;;  %vm603_vm1 = vcmask 261120   ;;  %v1187_v0 = vmov -inf   ;;  %v1188_v1 = vmov 0.0  }
  0x15   : > { %601 = vst.msk [vmem:[#allocation2] sm:$0xff] %vm600_vm0, %v1187_v0 }
  0x16   : > { %602 = vst.msk [vmem:[#allocation3] sm:$0xff] %vm600_vm0, %v1188_v1 }
  0x17   : > { %604 = vst.msk [vmem:[#allocation4] sm:$0xff] %vm603_vm1, %v1188_v1 }
  0x18 PF: > { %v614_v2 = vld [vmem:[%s1501_s3 + $0x18] sm:$0xff]  ;;  %v613_v4 = vld [vmem:[%s1501_s3 + $0x10] sm:$0xff]  ;;  %v612_v6 = vld [vmem:[%s1501_s3 + $0x8] sm:$0xff]  ;;  %vm615_vm2 = vcmask 261120   ;;  %vm680_vm3 = vcmask 523264   ;;  %s941_s0 = sld [smem:[#allocation5]] }
  0x19   : > { %v610_v3 = vld [vmem:[%s1500_s2 + $0x18] sm:$0xff]  ;;  %631 = vmatpush.msra.mxu0 %v614_v2  ;;  %v609_v5 = vld [vmem:[%s1500_s2 + $0x10] sm:$0xff]  ;;  %v608_v7 = vld [vmem:[%s1500_s2 + $0x8] sm:$0xff]  ;;  %p1093_p6 = scmp.ne.s32.totalorder %s1177_s26, 3 }
  0x1a   : > { %654 = vmatpush.msra.mxu1 %v610_v3  ;;  %v675_v8 = vld [vmem:[%s1503_s5 + $0x38] sm:$0xff]  ;;  %v611_v10 = vld [vmem:[%s1501_s3] sm:$0xff]  ;;  %v674_v12 = vld [vmem:[%s1503_s5 + $0x30] sm:$0xff] }
  0x1b   : > { %632 = vmatpush.msra.mxu0 %v613_v4  ;;  %v730_v9 = vld [vmem:[%s1504_s6 + $0x38] sm:$0xff]  ;;  %v607_v11 = vld [vmem:[%s1500_s2] sm:$0xff]  ;;  %692 = vmatpush.msra.mxu2 %v675_v8  ;;  %v729_v15 = vld [vmem:[%s1504_s6 + $0x30] sm:$0xff] }
  0x1c   : > { %655 = vmatpush.msra.mxu1 %v609_v5  ;;  %743 = vmatpush.msra.mxu3 %v730_v9  ;;  %v1349_v13 = vld [vmem:[%s591_s23] sm:$0xff]  ;;  %v781_v16 = vld [vmem:[%s1505_s7 + $0x38] sm:$0xff]  ;;  %v780_v18 = vld [vmem:[%s1505_s7 + $0x30] sm:$0xff] }
  0x1d   : > { %633 = vmatpush.msra.mxu0 %v612_v6  ;;  %v1352_v14 = vld [vmem:[%s1310_s1] sm:$0xff]  ;;  %v832_v17 = vld [vmem:[%s1506_s8 + $0x38] sm:$0xff]  ;;  %693 = vmatpush.msra.mxu2 %v674_v12  ;;  %v831_v19 = vld [vmem:[%s1506_s8 + $0x30] sm:$0xff] }
  0x1e   : > { %656 = vmatpush.msra.mxu1 %v608_v7  ;;  %744 = vmatpush.msra.mxu3 %v729_v15  ;;  %v673_v20 = vld [vmem:[%s1503_s5 + $0x28] sm:$0xff]  ;;  %v672_v24 = vld [vmem:[%s1503_s5 + $0x20] sm:$0xff]  ;;  %v671_v28 = vld [vmem:[%s1503_s5 + $0x18] sm:$0xff] }
  0x1f   : > { %634 = vmatpush.msra.mxu0 %v611_v10  ;;  %v728_v21 = vld [vmem:[%s1504_s6 + $0x28] sm:$0xff]  ;;  %v727_v25 = vld [vmem:[%s1504_s6 + $0x20] sm:$0xff]  ;;  %694 = vmatpush.msra.mxu2 %v673_v20  ;;  %v726_v29 = vld [vmem:[%s1504_s6 + $0x18] sm:$0xff] }
  0x20   : > { %657 = vmatpush.msra.mxu1 %v607_v11  ;;  %1084 = vmatmul.msk.f32.vlgmr.msra.gmra.mxu0 %vm615_vm2, %v1349_v13  ;;  %v779_v22 = vld [vmem:[%s1505_s7 + $0x28] sm:$0xff]  ;;  %v778_v26 = vld [vmem:[%s1505_s7 + $0x20] sm:$0xff]  ;;  %v777_v30 = vld [vmem:[%s1505_s7 + $0x18] sm:$0xff] }
  0x21   : > { %1085 = vmatmul.msk.f32.vlgmr.msra.gmra.mxu1 %vm615_vm2, %v1352_v14  ;;  %v830_v23 = vld [vmem:[%s1506_s8 + $0x28] sm:$0xff]  ;;  %794 = vmatpush.msrb.mxu0 %v781_v16  ;;  %v829_v27 = vld [vmem:[%s1506_s8 + $0x20] sm:$0xff]  ;;  %v828_v31 = vld [vmem:[%s1506_s8 + $0x18] sm:$0xff] }
  0x22   : > { %845 = vmatpush.msrb.mxu1 %v832_v17  ;;  %745 = vmatpush.msra.mxu3 %v728_v21  ;;  %v670_v32 = vld [vmem:[%s1503_s5 + $0x10] sm:$0xff]  ;;  %v669_v36 = vld [vmem:[%s1503_s5 + $0x8] sm:$0xff]  ;;  %v668_v40 = vld [vmem:[%s1503_s5] sm:$0xff] }
  0x23   : > { %795 = vmatpush.msrb.mxu0 %v780_v18  ;;  %695 = vmatpush.msra.mxu2 %v672_v24  ;;  %v725_v33 = vld [vmem:[%s1504_s6 + $0x10] sm:$0xff]  ;;  %v724_v37 = vld [vmem:[%s1504_s6 + $0x8] sm:$0xff]  ;;  %v723_v41 = vld [vmem:[%s1504_s6] sm:$0xff] }
  0x24   : > { %846 = vmatpush.msrb.mxu1 %v831_v19  ;;  %746 = vmatpush.msra.mxu3 %v727_v25  ;;  %v776_v34 = vld [vmem:[%s1505_s7 + $0x10] sm:$0xff]  ;;  %v775_v38 = vld [vmem:[%s1505_s7 + $0x8] sm:$0xff]  ;;  %v774_v42 = vld [vmem:[%s1505_s7] sm:$0xff] }
  0x25   : > { %796 = vmatpush.msrb.mxu0 %v779_v22  ;;  %696 = vmatpush.msra.mxu2 %v671_v28  ;;  %v827_v35 = vld [vmem:[%s1506_s8 + $0x10] sm:$0xff]  ;;  %v826_v39 = vld [vmem:[%s1506_s8 + $0x8] sm:$0xff]  ;;  %v825_v43 = vld [vmem:[%s1506_s8] sm:$0xff] }
  0x26   : > { %847 = vmatpush.msrb.mxu1 %v830_v23  ;;  %747 = vmatpush.msra.mxu3 %v726_v29  ;;  %v1128_v44 = vld [vmem:[%s1502_s4] ss:$0 sm:$0xff] }
  0x27   : > { %797 = vmatpush.msrb.mxu0 %v778_v26  ;;  %697 = vmatpush.msra.mxu2 %v670_v32  ;;  %v1129_v50 = vld [vmem:[%s1509_s11] ss:$0 sm:$0xff] }
  0x28   : > { %848 = vmatpush.msrb.mxu1 %v829_v27  ;;  %748 = vmatpush.msra.mxu3 %v725_v33  ;;  %v1131_v53 = vld [vmem:[%s1507_s9] ss:$0 sm:$0xff] }
  0x29   : > { %798 = vmatpush.msrb.mxu0 %v777_v30  ;;  %698 = vmatpush.msra.mxu2 %v669_v36  ;;  %v1132_v54 = vld [vmem:[%s1508_s10] ss:$0 sm:$0xff] }
  0x2a   : > { %849 = vmatpush.msrb.mxu1 %v828_v31  ;;  %749 = vmatpush.msra.mxu3 %v724_v37  ;;  %v1130_v28 = vld [vmem:[%s1510_s12] ss:$0 sm:$0xff] }
  0x2b   : > { %799 = vmatpush.msrb.mxu0 %v776_v34  ;;  %699 = vmatpush.msra.mxu2 %v668_v40 }
  0x2c   : > { %850 = vmatpush.msrb.mxu1 %v827_v35  ;;  %750 = vmatpush.msra.mxu3 %v723_v41 }
  0x2d   : > { %800 = vmatpush.msrb.mxu0 %v775_v38 }
  0x2e   : > { %851 = vmatpush.msrb.mxu1 %v826_v39 }
  0x2f   : > { %801 = vmatpush.msrb.mxu0 %v774_v42 }
  0x30   : > { %852 = vmatpush.msrb.mxu1 %v825_v43 }
  0x9d   : > { %v636_v45 = vpop.f32.mrf.mxu0 }
  0x9e   : > { %v659_v46 = vpop.f32.mrf.mxu1 }
  0x9f   : > { %v660_v47 = vadd.f32 %v659_v46, %v636_v45  ;;  %v1189_v46 = vmov 32.0  }
  0xa1   : > { %v666_v48 = vadd.f32 %v1128_v44, %v660_v47 }
  0xa3   : > { %v667_v49 = vmax.f32 %v666_v48, 0.0 }
  0xa5   : > { %1086 = vmatmul.msk.f32.vlgmr.msra.gmra.mxu2 %vm680_vm3, %v667_v49  ;;  %1088 = vmatmul.msk.f32.vlgmr.msra.gmra.mxu3 %vm680_vm3, %v667_v49 }
  0xa6   : > { %1090 = vmatmul.msk.f32.vlgmr.msrb.gmra.mxu0 %vm680_vm3, %v667_v49  ;;  %1092 = vmatmul.msk.f32.vlgmr.msrb.gmra.mxu1 %vm680_vm3, %v667_v49 }
 0x123   : > { %v803_v51 = vpop.f32.mrf.mxu0  ;;  %v854_v32 = vpop.f32.mrf.mxu1 }
 0x124   : > { %v804_v52 = vadd.f32 %v1129_v50, %v803_v51  ;;  %v855_v40 = vadd.f32 %v1130_v28, %v854_v32  ;;  %v1135_v32 = vld [vmem:[%s1513_s15] ss:$0 sm:$0xff] }
 0x126   : > { %v1091_v55 = vmul.f32 -1.442695, %v804_v52 }
 0x128   : > { %1136 = vpow2.f32 %v1091_v55  ;;  %v701_v56 = vpop.f32.mrf.mxu2  ;;  %v752_v57 = vpop.f32.mrf.mxu3 }
 0x129   : > { %v702_v58 = vadd.f32 %v1131_v53, %v701_v56  ;;  %v753_v59 = vadd.f32 %v1132_v54, %v752_v57 }
 0x12b   : > { %v1087_v60 = vmul.f32 -1.442695, %v702_v58  ;;  %v1089_v61 = vmul.f32 -1.442695, %v753_v59 }
 0x12d   : > { %1138 = vpow2.f32 %v1087_v60 }
 0x12e   : > { %v1137_v62 = vpop.eup %1136  ;;  %1140 = vpow2.f32 %v1089_v61 }
 0x12f   : > { %v809_v63 = vadd.f32 1.0, %v1137_v62 }
 0x131   : > { %1142 = vrcp.f32 %v809_v63  ;;  %vm815_vm4 = vweird.f32 %v809_v63  ;;  %v821_v12 = vand.u32 2147483648, %v809_v63  ;;  %v819_v22 = vand.u32 2147483647, %v809_v63 }
 0x133   : > { %v1139_v0 = vpop.eup %1138  ;;  %v822_v31 = vor.u32 1.1754944e-38, %v821_v12  ;;  %vm820_vm14 = vcmp.eq.f32.partialorder %v819_v22, 8.507059e+37 }
 0x134   : > { %v1141_v1 = vpop.eup %1140  ;;  %v707_v2 = vadd.f32 1.0, %v1139_v0 }
 0x135   : > { %v758_v3 = vadd.f32 1.0, %v1141_v1  ;;  %v1133_v1 = vld [vmem:[%s1511_s13] ss:$0 sm:$0xff] }
 0x136   : > { %1144 = vrcp.f32 %v707_v2  ;;  %v719_v18 = vand.u32 2147483648, %v707_v2  ;;  %v717_v20 = vand.u32 2147483647, %v707_v2  ;;  %vm713_vm9 = vweird.f32 %v707_v2 }
 0x137   : > { %v1143_v4 = vpop.eup %1142  ;;  %1146 = vrcp.f32 %v758_v3  ;;  %v770_v21 = vand.u32 2147483648, %v758_v3  ;;  %v768_v24 = vand.u32 2147483647, %v758_v3  ;;  %vm764_vm11 = vweird.f32 %v758_v3 }
 0x138   : > { %v811_v5 = vmul.f32 %v1143_v4, %v809_v63  ;;  %vm816_vm5 = vweird.f32 %v1143_v4  ;;  %v720_v29 = vor.u32 1.1754944e-38, %v719_v18  ;;  %vm718_vm12 = vcmp.eq.f32.partialorder %v717_v20, 8.507059e+37 }
 0x139   : > { %vm1458_vm8 = vmor %vm815_vm4, %vm816_vm5  ;;  %v771_v34 = vor.u32 1.1754944e-38, %v770_v21  ;;  %vm769_vm15 = vcmp.eq.f32.partialorder %v768_v24, 8.507059e+37  ;;  %1148 = vrcp.f32 %v1189_v46 }
 0x13a   : > { %v812_v6 = vsub.f32 1.0, %v811_v5 }
 0x13c   : > { %v1145_v7 = vpop.eup %1144  ;;  %v813_v8 = vmul.f32 %v1143_v4, %v812_v6 }
 0x13d   : > { %v1147_v9 = vpop.eup %1146  ;;  %v709_v10 = vmul.f32 %v1145_v7, %v707_v2  ;;  %vm714_vm6 = vweird.f32 %v1145_v7 }
 0x13e   : > { %v760_v11 = vmul.f32 %v1147_v9, %v758_v3  ;;  %v814_v16 = vadd.f32 %v1143_v4, %v813_v8  ;;  %vm765_vm7 = vweird.f32 %v1147_v9  ;;  %vm715_vm10 = vmor %vm713_vm9, %vm714_vm6 }
 0x13f   : > { %v710_v15 = vsub.f32 1.0, %v709_v10  ;;  %vm766_vm13 = vmor %vm764_vm11, %vm765_vm7  ;;  %v1149_v47 = vpop.eup %1148  ;;  %vm955_vm11 = vcmask 7168  }
 0x140   : > { %v761_v17 = vsub.f32 1.0, %v760_v11  ;;  %v818_v27 = vsel %vm1458_vm8, %v1143_v4, %v814_v16  ;;  %v868_v48 = vmul.f32 32.0, %v1149_v47  ;;  %vm872_vm0 = vweird.f32 %v1149_v47  ;;  %v1134_v4 = vld [vmem:[%s1512_s14] ss:$0 sm:$0xff] }
 0x141   : > { %v711_v19 = vmul.f32 %v1145_v7, %v710_v15  ;;  %v823_v37 = vsel %vm820_vm14, %v822_v31, %v818_v27 }
 0x142   : > { %v762_v23 = vmul.f32 %v1147_v9, %v761_v17  ;;  %v860_v42 = vmul.f32 %v855_v40, %v823_v37  ;;  %v869_v49 = vsub.f32 1.0, %v868_v48  ;;  %v1190_v37 = vmov 0  }
 0x143   : > { %v712_v26 = vadd.f32 %v1145_v7, %v711_v19  ;;  %1126 = vset.pattern.permute.xlu2 %v1190_v37  ;;  %1127 = vset.pattern.permute.xlu0 %v1190_v37 }
 0x144   : > { %v763_v30 = vadd.f32 %v1147_v9, %v762_v23  ;;  %v870_v50 = vmul.f32 %v1149_v47, %v869_v49 }
 0x145   : > { %v716_v33 = vsel %vm715_vm10, %v1145_v7, %v712_v26 }
 0x146   : > { %v721_v35 = vsel %vm718_vm12, %v720_v29, %v716_v33  ;;  %v767_v36 = vsel %vm766_vm13, %v1147_v9, %v763_v30  ;;  %v871_v51 = vadd.f32 %v1149_v47, %v870_v50 }
 0x147   : > { %v772_v38 = vsel %vm769_vm15, %v771_v34, %v767_v36  ;;  %v857_v39 = vmul.f32 %v721_v35, %v1352_v14 }
 0x148   : > { %v858_v41 = vmul.f32 %v772_v38, %v1349_v13  ;;  %v873_v52 = vsel %vm872_vm0, %v1149_v47, %v871_v51  ;;  %v942_v38 = vstv %s941_s0  ;;  %v952_v47 = vld [vmem:[#allocation3] sm:$0xff] }
 0x14a   : > { %v859_v43 = vadd.f32 %v858_v41, %v857_v39  ;;  %v944_v39 = vld [vmem:[#allocation2] sm:$0xff] }
 0x14c   : > { %v861_v44 = vadd.f32 %v860_v42, %v859_v43 }
 0x14e   : > { %v864_v45 = vsel %vm615_vm2, %v861_v44, 0.0 }
 0x14f   : > { %865 = vadd.xlane.f32.xlu0 %v864_v45 }
 0x1c2   : > { %v866_v53 = vpop.xlane.xlu0 %865 }
 0x1c3   : > { %v874_v14 = vmul.f32 %v873_v52, %v866_v53  ;;  %v957_v53 = vld [vmem:[#allocation4] sm:$0xff] }
 0x1c5   : > { %v875_v54 = vsub.f32 %v861_v44, %v874_v14 }
 0x1c7   : > { %v876_v55 = vmul.f32 %v875_v54, %v875_v54 }
 0x1c9   : > { %v877_v13 = vsel %vm615_vm2, %v876_v55, 0.0 }
 0x1ca   : > { %878 = vadd.xlane.f32.xlu0 %v877_v13 }
 0x23d   : > { %v879_v56 = vpop.xlane.xlu0 %878 }
 0x23e   : > { %v880_v57 = vmul.f32 %v879_v56, %v873_v52 }
 0x240   : > { %v881_v58 = vadd.f32 1e-05, %v880_v57 }
 0x242   : > { %1150 = vrsqrt.f32 %v881_v58  ;;  %vm888_vm3 = vweird.f32 %v881_v58 }
 0x248   : > { %v1151_v59 = vpop.eup %1150 }
 0x249   : > { %v883_v60 = vmul.f32 %v1151_v59, %v881_v58  ;;  %vm889_vm1 = vweird.f32 %v1151_v59 }
 0x24a   : > { %vm890_vm4 = vmor %vm888_vm3, %vm889_vm1 }
 0x24b   : > { %v884_v61 = vmul.f32 %v1151_v59, %v883_v60 }
 0x24d   : > { %v885_v62 = vmul.f32 0.5, %v884_v61 }
 0x24f   : > { %v886_v63 = vsub.f32 1.5, %v885_v62 }
 0x251   : > { %v887_v0 = vmul.f32 %v1151_v59, %v886_v63 }
 0x253   : > { %v891_v2 = vsel %vm890_vm4, %v1151_v59, %v887_v0 }
 0x254   : > { %v892_v3 = vmul.f32 %v891_v2, %v875_v54 }
 0x256   : > { %v896_v5 = vmul.f32 %v1133_v1, %v892_v3 }
 0x258   : > { %v900_v6 = vadd.f32 %v1134_v4, %v896_v5 }
 0x25a   : > { %v901_v7 = vmul.f32 %v900_v6, %v900_v6 }
 0x25c   : > { %v902_v8 = vsel %vm615_vm2, %v901_v7, 0.0 }
 0x25d   : > { %903 = vadd.xlane.f32.xlu1 %v902_v8 }
 0x2d0   : > { %v904_v9 = vpop.xlane.xlu1 %903 }
 0x2d1   : > { %1152 = vrsqrt.f32 %v904_v9  ;;  %vm912_vm5 = vcmp.eq.f32.partialorder %v904_v9, inf  ;;  %v915_v19 = vand.u32 2147483648, %v904_v9  ;;  %vm914_vm6 = vcmp.eq.f32.partialorder %v904_v9, 0.0 }
 0x2d7   : > { %v1153_v10 = vpop.eup %1152 }
 0x2d8   : > { %v906_v11 = vmul.f32 %v1153_v10, %v904_v9 }
 0x2da   : > { %v907_v12 = vmul.f32 %v1153_v10, %v906_v11 }
 0x2dc   : > { %v908_v15 = vmul.f32 0.5, %v907_v12 }
 0x2de   : > { %v909_v16 = vsub.f32 1.5, %v908_v15 }
 0x2e0   : > { %v910_v17 = vmul.f32 %v1153_v10, %v909_v16 }
 0x2e2   : > { %v911_v18 = vmul.f32 %v910_v17, %v904_v9 }
 0x2e4   : > { %v913_v20 = vsel %vm912_vm5, %v904_v9, %v911_v18 }
 0x2e5   : > { %v916_v21 = vsel %vm914_vm6, %v915_v19, %v913_v20 }
 0x2e6   : > { %v917_v22 = vadd.f32 1e-08, %v916_v21 }
 0x2e8   : > { %1154 = vrcp.f32 %v917_v22  ;;  %v929_v26 = vand.u32 2147483648, %v917_v22  ;;  %v927_v28 = vand.u32 2147483647, %v917_v22  ;;  %vm923_vm8 = vweird.f32 %v917_v22 }
 0x2ea   : > { %v930_v30 = vor.u32 1.1754944e-38, %v929_v26  ;;  %vm928_vm10 = vcmp.eq.f32.partialorder %v927_v28, 8.507059e+37 }
 0x2ee   : > { %v1155_v23 = vpop.eup %1154 }
 0x2ef   : > { %v919_v24 = vmul.f32 %v1155_v23, %v917_v22  ;;  %vm924_vm7 = vweird.f32 %v1155_v23 }
 0x2f0   : > { %vm925_vm9 = vmor %vm923_vm8, %vm924_vm7 }
 0x2f1   : > { %v920_v25 = vsub.f32 1.0, %v919_v24 }
 0x2f3   : > { %v921_v27 = vmul.f32 %v1155_v23, %v920_v25 }
 0x2f5   : > { %v922_v29 = vadd.f32 %v1155_v23, %v921_v27 }
 0x2f7   : > { %v926_v31 = vsel %vm925_vm9, %v1155_v23, %v922_v29 }
 0x2f8   : > { %v931_v33 = vsel %vm928_vm10, %v930_v30, %v926_v31 }
 0x2f9   : > { %v932_v34 = vmul.f32 %v931_v33, %v900_v6 }
 0x2fb   : > { %v937_v35 = vmul.f32 %v1135_v32, %v932_v34 }
 0x2fd   : > { %v938_v36 = vsel %vm615_vm2, %v937_v35, 0.0 }
 0x2fe   : > { %939 = vadd.xlane.f32.xlu1 %v938_v36 }
 0x371   : > { %v940_v40 = vpop.xlane.xlu1 %939 }
 0x372   : > { %v943_v41 = vadd.f32 %v942_v38, %v940_v40 }
 0x374   : > { %v945_v42 = vmax.f32 %v944_v39, %v943_v41 }
 0x376   : > { %v946_v43 = vsub.f32 %v944_v39, %v945_v42  ;;  %v949_v44 = vsub.f32 %v943_v41, %v945_v42  ;;  %972 = vst.msk [vmem:[#allocation2] sm:$0xff] %vm955_vm11, %v945_v42 }
 0x378   : > { %v947_v45 = vmul.f32 1.442695, %v946_v43  ;;  %v950_v46 = vmul.f32 1.442695, %v949_v44 }
 0x37a   : > { %1156 = vpow2.f32 %v947_v45 }
 0x37b   : > { %1158 = vpow2.f32 %v950_v46 }
 0x380   : > { %v1157_v48 = vpop.eup %1156 }
 0x381   : > { %960 = vperm.xlu2 %1126, %v1157_v48   ;;  %v953_v49 = vmul.f32 %v1157_v48, %v952_v47  ;;  %v1159_v50 = vpop.eup %1158 }
 0x383   : > { %v954_v51 = vadd.f32 %v1159_v50, %v953_v49 }
 0x385   : > { %956 = vst.msk [vmem:[#allocation3] sm:$0xff] %vm955_vm11, %v954_v51 }
 0x389   : > { %966 = vperm.xlu2 %1126, %v1159_v50  }
 0x3db   : > { %v961_v52 = vpop.permute.xlu2 %960 }
 0x3dc   : > { %v963_v54 = vmul.f32 %v961_v52, %v957_v53 }
 0x3e3   : > { %v967_v14 = vpop.permute.xlu2 %966 }
 0x3e4   : > { %v969_v55 = vmul.f32 %v967_v14, %v932_v34  ;;  %976 = sbr.rel (%p1093_p6) target bundleno = 1138 (0x472), region = 96 }
 0x3e6   : > { %v970_v13 = vadd.f32 %v969_v55, %v963_v54 }
 0x3e8   : > { %971 = vst.msk [vmem:[#allocation4] sm:$0xff] %vm615_vm2, %v970_v13 }
 0x3e9   : > { %v978_v56 = vld [vmem:[#allocation3] sm:$0xff]  ;;  %v1191_v57 = vmov 0  }
 0x3ea   : > { %1160 = vset.pattern.permute.xlu0 %v1191_v57 }
 0x3eb   : > { %981 = vperm.xlu0 %1160, %v978_v56  }
 0x3ef   : > { %v977_v2 = vld [vmem:[#allocation4] sm:$0xff] }
 0x45d   : > { %v982_v58 = vpop.permute.xlu0 %981 }
 0x45e   : > { %1161 = vrcp.f32 %v982_v58  ;;  %v995_v62 = vand.u32 2147483648, %v982_v58  ;;  %v993_v0 = vand.u32 2147483647, %v982_v58  ;;  %vm989_vm13 = vweird.f32 %v982_v58 }
 0x460   : > { %v996_v3 = vor.u32 1.1754944e-38, %v995_v62  ;;  %vm994_vm15 = vcmp.eq.f32.partialorder %v993_v0, 8.507059e+37 }
 0x464   : > { %v1162_v59 = vpop.eup %1161 }
 0x465   : > { %v985_v60 = vmul.f32 %v1162_v59, %v982_v58  ;;  %vm990_vm12 = vweird.f32 %v1162_v59 }
 0x466   : > { %vm991_vm14 = vmor %vm989_vm13, %vm990_vm12 }
 0x467   : > { %v986_v61 = vsub.f32 1.0, %v985_v60 }
 0x469   : > { %v987_v63 = vmul.f32 %v1162_v59, %v986_v61 }
 0x46b   : > { %v988_v1 = vadd.f32 %v1162_v59, %v987_v63 }
 0x46d   : > { %v992_v4 = vsel %vm991_vm14, %v1162_v59, %v988_v1 }
 0x46e   : > { %v997_v5 = vsel %vm994_vm15, %v996_v3, %v992_v4 }
 0x46f   : > { %v998_v6 = vmul.f32 %v997_v5, %v977_v2 }
 0x471   : > { %999 = vst.msk [vmem:[%s1515_s17] sm:$0xff] %vm615_vm2, %v998_v6 }
 0x472 PF: > { %s28_s28 = sadd.s32 1, %s1185_s28   ;;  %s1522_s26 = smov %s1181_s27 }
 0x473   : > { %p25_p7 = scmp.ge.s32.totalorder %s28_s28, 6   ;;  %s1523_s27 = smov %s1525_s16 }
 0x475   :  { %27 = sbr.rel (!%p25_p7) target bundleno = 4 (0x4), region = 129 }

// kernel: cyk_cell_forward.11
= control target key start
LH: loop header
LB: loop body
LE: loop exit
PB: predicated region body
PF: predicated region fallthrough
CT: control target
= control target key end

     0   :  { %s1560_s26 = smov 0   ;;  %s1562_s27 = smov 0   ;;  %s1864_s0 = inlined_call_operand.vmem [shape: f32[3,16,32], index: 0, kind: input, shape index: {}]   ;;  %s1865_s1 = inlined_call_operand.vmem [shape: f32[3,16,32], index: 1, kind: input, shape index: {}]   ;;  %s1866_s2 = inlined_call_operand.vmem [shape: f32[32,64], index: 2, kind: input, shape index: {}]   ;;  %s1867_s3 = inlined_call_operand.vmem [shape: f32[32,64], index: 3, kind: input, shape index: {}]   ;;  %s1868_s4 = inlined_call_operand.vmem [shape: f32[1,64], index: 4, kind: input, shape index: {}]   ;;  %s1869_s5 = inlined_call_operand.vmem [shape: f32[64,32], index: 5, kind: input, shape index: {}]   ;;  %s1870_s6 = inlined_call_operand.vmem [shape: f32[64,32], index: 6, kind: input, shape index: {}]   ;;  %s1871_s7 = inlined_call_operand.vmem [shape: f32[64,32], index: 7, kind: input, shape index: {}]   ;;  %s1872_s8 = inlined_call_operand.vmem [shape: f32[64,32], index: 8, kind: input, shape index: {}]   ;;  %s1873_s9 = inlined_call_operand.vmem [shape: f32[1,32], index: 9, kind: input, shape index: {}]   ;;  %s1874_s10 = inlined_call_operand.vmem [shape: f32[1,32], index: 10, kind: input, shape index: {}]   ;;  %s1875_s11 = inlined_call_operand.vmem [shape: f32[1,32], index: 11, kind: input, shape index: {}]   ;;  %s1876_s12 = inlined_call_operand.vmem [shape: f32[1,32], index: 12, kind: input, shape index: {}]   ;;  %s1877_s13 = inlined_call_operand.vmem [shape: f32[1,32], index: 13, kind: input, shape index: {}]   ;;  %s1878_s14 = inlined_call_operand.vmem [shape: f32[1,32], index: 14, kind: input, shape index: {}]   ;;  %s1879_s15 = inlined_call_operand.vmem [shape: f32[1,32], index: 15, kind: input, shape index: {}]   ;;  %s1880_s16 = inlined_call_operand.<no memory space> [shape: f32[1,1], index: 16, kind: input, shape index: {}]   ;;  %s1881_s17 = inlined_call_operand.vmem [shape: f32[16,32], index: 17, kind: output, shape index: {}]  }
   0x1   :  { %1882 = sst [smem:[#allocation6_spill]] %s1864_s0  ;;  %s1564_s28 = smov 0  }
   0x2   :  { %1883 = sst [smem:[#allocation7_spill]] %s1865_s1 }
   0x3   :  { %22 = sst [smem:[#allocation5]] %s1880_s16 }
   0x4 LB: > { %s37_s16 = sadd.s32 1, %s1456_s27  ;;  %p1316_p0 = scmp.ge.s32.totalorder %s1460_s28, 1  ;;  %s1460_s28 = sphi %s1564_s28, %s28_s28   ;;  %s1456_s27 = sphi %s1562_s27, %s1891_s27   ;;  %s1452_s26 = sphi %s1560_s26, %s1890_s26  }
   0x5   : > { %p38_p1 = scmp.ge.s32.totalorder %s37_s16, 3  ;;  %p524_p2 = scmp.lt.s32.totalorder %s1460_s28, 4 }
   0x7   : > { %s1893_s16 = smov (%p38_p1, %s37_s16), 0  ;;  %p525_p3 = pnand %p1316_p0, %p524_p2 }
   0x8   : > { %p590_p4 = scmp.lt.s32.totalorder (!%p525_p3), %s1452_s26, 2  ;;  %s1884_s19 = sld [smem:[#allocation6_spill]] (!%p525_p3) }
   0x9   : > { %528 = sbr.rel (%p525_p3) target bundleno = 1177 (0x499), region = 88  ;;  %s1885_s22 = sld [smem:[#allocation7_spill]] (!%p525_p3) }
   0xa   : > { %p1321_p5 = scmp.ne.s32.totalorder (!%p525_p3), %s1452_s26, 0 }
   0xe   : > { %s591_s29 = scalar_select %p590_p4, %s1452_s26, 2 }
   0xf   : > { %618 = sbr.rel (%p1321_p5) target bundleno = 27 (0x1b), region = 92 }
  0x10   : > { %s1345_s0 = sshll.u32 %s591_s29, 4 }
  0x11   : > { %s1585_s1 = scalar_lea.vmem %s1884_s19, %s1345_s0  ;;  %s1590_s23 = scalar_lea.vmem %s1885_s22, %s1345_s0 }
  0x14   : > { %vm619_vm0 = vcmask 7168   ;;  %v1462_v0 = vmov -inf   ;;  %vm624_vm1 = vcmask 261120   ;;  %v1463_v1 = vmov 0.0  }
  0x15   : > { %620 = vst.msk [vmem:[#allocation2] sm:$0xff] %vm619_vm0, %v1462_v0 }
  0x16   : > { %621 = vst.msk [vmem:[#allocation2 + $0x8] sm:$0xff] %vm619_vm0, %v1462_v0 }
  0x17   : > { %622 = vst.msk [vmem:[#allocation3] sm:$0xff] %vm619_vm0, %v1463_v1 }
  0x18   : > { %623 = vst.msk [vmem:[#allocation3 + $0x8] sm:$0xff] %vm619_vm0, %v1463_v1 }
  0x19   : > { %625 = vst.msk [vmem:[#allocation4] sm:$0xff] %vm624_vm1, %v1463_v1 }
  0x1a   : > { %626 = vst.msk [vmem:[#allocation4 + $0x8] sm:$0xff] %vm624_vm1, %v1463_v1 }
  0x1b PF: > { %v638_v2 = vld [vmem:[%s1867_s3 + $0x18] sm:$0xff]  ;;  %v637_v4 = vld [vmem:[%s1867_s3 + $0x10] sm:$0xff]  ;;  %v636_v6 = vld [vmem:[%s1867_s3 + $0x8] sm:$0xff]  ;;  %vm639_vm2 = vcmask 261120   ;;  %vm718_vm3 = vcmask 523264   ;;  %s1116_s21 = sld [smem:[#allocation5]] }
  0x1c   : > { %v634_v3 = vld [vmem:[%s1866_s2 + $0x18] sm:$0xff]  ;;  %658 = vmatpush.msra.mxu0 %v638_v2  ;;  %v633_v5 = vld [vmem:[%s1866_s2 + $0x10] sm:$0xff]  ;;  %v632_v7 = vld [vmem:[%s1866_s2 + $0x8] sm:$0xff]  ;;  %p1340_p6 = scmp.ne.s32.totalorder %s1452_s26, 2 }
  0x1d   : > { %687 = vmatpush.msra.mxu1 %v634_v3  ;;  %v635_v8 = vld [vmem:[%s1867_s3] sm:$0xff]  ;;  %v713_v10 = vld [vmem:[%s1869_s5 + $0x38] sm:$0xff]  ;;  %v712_v16 = vld [vmem:[%s1869_s5 + $0x30] sm:$0xff] }
  0x1e   : > { %659 = vmatpush.msra.mxu0 %v637_v4  ;;  %v631_v9 = vld [vmem:[%s1866_s2] sm:$0xff]  ;;  %v793_v11 = vld [vmem:[%s1870_s6 + $0x38] sm:$0xff]  ;;  %733 = vmatpush.msra.mxu2 %v713_v10  ;;  %v792_v17 = vld [vmem:[%s1870_s6 + $0x30] sm:$0xff] }
  0x1f   : > { %688 = vmatpush.msra.mxu1 %v633_v5  ;;  %v1624_v12 = vld [vmem:[%s1590_s23] sm:$0xff]  ;;  %v866_v14 = vld [vmem:[%s1871_s7 + $0x38] sm:$0xff]  ;;  %806 = vmatpush.msra.mxu3 %v793_v11  ;;  %v865_v18 = vld [vmem:[%s1871_s7 + $0x30] sm:$0xff] }
  0x20   : > { %660 = vmatpush.msra.mxu0 %v636_v6  ;;  %v1627_v13 = vld [vmem:[%s1585_s1] sm:$0xff]  ;;  %v939_v15 = vld [vmem:[%s1872_s8 + $0x38] sm:$0xff]  ;;  %v938_v19 = vld [vmem:[%s1872_s8 + $0x30] sm:$0xff]  ;;  %734 = vmatpush.msra.mxu2 %v712_v16 }
  0x21   : > { %689 = vmatpush.msra.mxu1 %v632_v7  ;;  %v711_v20 = vld [vmem:[%s1869_s5 + $0x28] sm:$0xff]  ;;  %v710_v24 = vld [vmem:[%s1869_s5 + $0x20] sm:$0xff]  ;;  %807 = vmatpush.msra.mxu3 %v792_v17  ;;  %v709_v30 = vld [vmem:[%s1869_s5 + $0x18] sm:$0xff] }
  0x22   : > { %661 = vmatpush.msra.mxu0 %v635_v8  ;;  %v791_v21 = vld [vmem:[%s1870_s6 + $0x28] sm:$0xff]  ;;  %v790_v25 = vld [vmem:[%s1870_s6 + $0x20] sm:$0xff]  ;;  %735 = vmatpush.msra.mxu2 %v711_v20  ;;  %v789_v31 = vld [vmem:[%s1870_s6 + $0x18] sm:$0xff] }
  0x23   : > { %690 = vmatpush.msra.mxu1 %v631_v9  ;;  %1322 = vmatmul.msk.f32.vlgmr.msra.gmra.mxu0 %vm639_vm2, %v1624_v12  ;;  %v864_v22 = vld [vmem:[%s1871_s7 + $0x28] sm:$0xff]  ;;  %v863_v26 = vld [vmem:[%s1871_s7 + $0x20] sm:$0xff]  ;;  %v862_v32 = vld [vmem:[%s1871_s7 + $0x18] sm:$0xff] }
  0x24   : > { %1324 = vmatmul.msk.f32.vlgmr.msra.gmra.mxu1 %vm639_vm2, %v1627_v13  ;;  %v937_v23 = vld [vmem:[%s1872_s8 + $0x28] sm:$0xff]  ;;  %879 = vmatpush.msrb.mxu0 %v866_v14  ;;  %v936_v27 = vld [vmem:[%s1872_s8 + $0x20] sm:$0xff]  ;;  %v935_v33 = vld [vmem:[%s1872_s8 + $0x18] sm:$0xff] }
  0x25   : > { %952 = vmatpush.msrb.mxu1 %v939_v15  ;;  %808 = vmatpush.msra.mxu3 %v791_v21  ;;  %v1676_v28 = vld [vmem:[%s1590_s23 + $0x8] sm:$0xff]  ;;  %v708_v34 = vld [vmem:[%s1869_s5 + $0x10] sm:$0xff]  ;;  %v706_v42 = vld [vmem:[%s1869_s5] sm:$0xff] }
  0x26   : > { %880 = vmatpush.msrb.mxu0 %v865_v18  ;;  %v1679_v29 = vld [vmem:[%s1585_s1 + $0x8] sm:$0xff]  ;;  %736 = vmatpush.msra.mxu2 %v710_v24  ;;  %v788_v35 = vld [vmem:[%s1870_s6 + $0x10] sm:$0xff]  ;;  %v786_v43 = vld [vmem:[%s1870_s6] sm:$0xff] }
  0x27   : > { %953 = vmatpush.msrb.mxu1 %v938_v19  ;;  %809 = vmatpush.msra.mxu3 %v790_v25  ;;  %v861_v36 = vld [vmem:[%s1871_s7 + $0x10] sm:$0xff]  ;;  %v707_v38 = vld [vmem:[%s1869_s5 + $0x8] sm:$0xff]  ;;  %v859_v44 = vld [vmem:[%s1871_s7] sm:$0xff] }
  0x28   : > { %881 = vmatpush.msrb.mxu0 %v864_v22  ;;  %737 = vmatpush.msra.mxu2 %v709_v30  ;;  %v934_v37 = vld [vmem:[%s1872_s8 + $0x10] sm:$0xff]  ;;  %v787_v39 = vld [vmem:[%s1870_s6 + $0x8] sm:$0xff]  ;;  %v932_v45 = vld [vmem:[%s1872_s8] sm:$0xff] }
  0x29   : > { %954 = vmatpush.msrb.mxu1 %v937_v23  ;;  %810 = vmatpush.msra.mxu3 %v789_v31  ;;  %v860_v40 = vld [vmem:[%s1871_s7 + $0x8] sm:$0xff]  ;;  %v1379_v46 = vld [vmem:[%s1868_s4] ss:$0 sm:$0xff] }
  0x2a   : > { %882 = vmatpush.msrb.mxu0 %v863_v26  ;;  %738 = vmatpush.msra.mxu2 %v708_v34  ;;  %v933_v41 = vld [vmem:[%s1872_s8 + $0x8] sm:$0xff]  ;;  %v1380_v57 = vld [vmem:[%s1875_s11] ss:$0 sm:$0xff] }
  0x2b   : > { %955 = vmatpush.msrb.mxu1 %v936_v27  ;;  %1323 = vmatmul.msk.f32.gmra.mxu0 %vm639_vm2, %v1676_v28  ;;  %v1382_v60 = vld [vmem:[%s1873_s9] ss:$0 sm:$0xff] }
  0x2c   : > { %1325 = vmatmul.msk.f32.gmra.mxu1 %vm639_vm2, %v1679_v29  ;;  %883 = vmatpush.msrb.mxu0 %v862_v32  ;;  %v1383_v61 = vld [vmem:[%s1874_s10] ss:$0 sm:$0xff] }
  0x2d   : > { %956 = vmatpush.msrb.mxu1 %v935_v33  ;;  %811 = vmatpush.msra.mxu3 %v788_v35 }
  0x2e   : > { %884 = vmatpush.msrb.mxu0 %v861_v36  ;;  %739 = vmatpush.msra.mxu2 %v707_v38 }
  0x2f   : > { %957 = vmatpush.msrb.mxu1 %v934_v37  ;;  %812 = vmatpush.msra.mxu3 %v787_v39 }
  0x30   : > { %885 = vmatpush.msrb.mxu0 %v860_v40  ;;  %740 = vmatpush.msra.mxu2 %v706_v42 }
  0x31   : > { %958 = vmatpush.msrb.mxu1 %v933_v41  ;;  %813 = vmatpush.msra.mxu3 %v786_v43 }
  0x32   : > { %886 = vmatpush.msrb.mxu0 %v859_v44 }
  0x33   : > { %959 = vmatpush.msrb.mxu1 %v932_v45 }
  0xa0   : > { %v663_v47 = vpop.f32.mrf.mxu0 }
  0xa1   : > { %v692_v48 = vpop.f32.mrf.mxu1 }
  0xa2   : > { %v693_v49 = vadd.f32 %v692_v48, %v663_v47 }
  0xa4   : > { %v702_v50 = vadd.f32 %v1379_v46, %v693_v49 }
  0xa6   : > { %v704_v51 = vmax.f32 %v702_v50, 0.0 }
  0xa8   : > { %1326 = vmatmul.msk.f32.vlgmr.msra.gmra.mxu2 %vm718_vm3, %v704_v51  ;;  %1330 = vmatmul.msk.f32.vlgmr.msra.gmra.mxu3 %vm718_vm3, %v704_v51  ;;  %v666_v52 = vpop.f32.mrf.mxu0 }
  0xa9   : > { %1334 = vmatmul.msk.f32.vlgmr.msrb.gmra.mxu0 %vm718_vm3, %v704_v51  ;;  %1338 = vmatmul.msk.f32.vlgmr.msrb.gmra.mxu1 %vm718_vm3, %v704_v51  ;;  %v695_v53 = vpop.f32.mrf.mxu1 }
  0xaa   : > { %v696_v54 = vadd.f32 %v695_v53, %v666_v52 }
  0xac   : > { %v703_v55 = vadd.f32 %v1379_v46, %v696_v54 }
  0xae   : > { %v705_v56 = vmax.f32 %v703_v55, 0.0  ;;  %v1777_v55 = vld [vmem:[%s1876_s12] ss:$0 sm:$0xff] }
  0xb0   : > { %1327 = vmatmul.msk.f32.gmra.mxu2 %vm718_vm3, %v705_v56  ;;  %1331 = vmatmul.msk.f32.gmra.mxu3 %vm718_vm3, %v705_v56 }
  0xb1   : > { %1335 = vmatmul.msk.f32.gmra.mxu0 %vm718_vm3, %v705_v56  ;;  %1339 = vmatmul.msk.f32.gmra.mxu1 %vm718_vm3, %v705_v56 }
 0x126   : > { %v888_v58 = vpop.f32.mrf.mxu0 }
 0x127   : > { %v889_v59 = vadd.f32 %v1380_v57, %v888_v58 }
 0x129   : > { %v1336_v62 = vmul.f32 -1.442695, %v889_v59  ;;  %v961_v59 = vpop.f32.mrf.mxu1 }
 0x12b   : > { %1387 = vpow2.f32 %v1336_v62  ;;  %v742_v63 = vpop.f32.mrf.mxu2  ;;  %v815_v0 = vpop.f32.mrf.mxu3 }
 0x12c   : > { %v743_v1 = vadd.f32 %v1382_v60, %v742_v63  ;;  %v816_v2 = vadd.f32 %v1383_v61, %v815_v0 }
 0x12e   : > { %v1328_v3 = vmul.f32 -1.442695, %v743_v1  ;;  %v1332_v4 = vmul.f32 -1.442695, %v816_v2  ;;  %v891_v5 = vpop.f32.mrf.mxu0 }
 0x12f   : > { %v892_v6 = vadd.f32 %v1380_v57, %v891_v5  ;;  %v962_v5 = vadd.f32 %v1777_v55, %v961_v59 }
 0x130   : > { %1389 = vpow2.f32 %v1328_v3 }
 0x131   : > { %v1388_v7 = vpop.eup %1387  ;;  %1391 = vpow2.f32 %v1332_v4  ;;  %v1337_v8 = vmul.f32 -1.442695, %v892_v6 }
 0x132   : > { %v1745_v9 = vadd.f32 1.0, %v1388_v7 }
 0x133   : > { %1393 = vpow2.f32 %v1337_v8  ;;  %v745_v10 = vpop.f32.mrf.mxu2  ;;  %v818_v11 = vpop.f32.mrf.mxu3 }
 0x134   : > { %1395 = vrcp.f32 %v1745_v9  ;;  %v746_v14 = vadd.f32 %v1382_v60, %v745_v10  ;;  %v819_v15 = vadd.f32 %v1383_v61, %v818_v11  ;;  %vm907_vm4 = vweird.f32 %v1745_v9 }
 0x135   : > { %v913_v34 = vand.u32 2147483648, %v1745_v9  ;;  %v911_v48 = vand.u32 2147483647, %v1745_v9 }
 0x136   : > { %v1390_v16 = vpop.eup %1389  ;;  %v1329_v19 = vmul.f32 -1.442695, %v746_v14  ;;  %v1333_v22 = vmul.f32 -1.442695, %v819_v15 }
 0x137   : > { %v1392_v17 = vpop.eup %1391  ;;  %v754_v18 = vadd.f32 1.0, %v1390_v16  ;;  %v914_v58 = vor.u32 1.1754944e-38, %v913_v34  ;;  %vm912_vm14 = vcmp.eq.f32.partialorder %v911_v48, 8.507059e+37  ;;  %v964_v34 = vpop.f32.mrf.mxu1 }
 0x138   : > { %v827_v20 = vadd.f32 1.0, %v1392_v17 }
 0x139   : > { %v1394_v21 = vpop.eup %1393  ;;  %1397 = vrcp.f32 %v754_v18  ;;  %v765_v36 = vand.u32 2147483647, %v754_v18  ;;  %v767_v40 = vand.u32 2147483648, %v754_v18  ;;  %vm761_vm9 = vweird.f32 %v754_v18 }
 0x13a   : > { %v1396_v23 = vpop.eup %1395  ;;  %1399 = vrcp.f32 %v827_v20  ;;  %v1748_v24 = vadd.f32 1.0, %v1394_v21  ;;  %v840_v45 = vand.u32 2147483648, %v827_v20  ;;  %v838_v50 = vand.u32 2147483647, %v827_v20 }
 0x13b   : > { %v903_v25 = vmul.f32 %v1396_v23, %v1745_v9  ;;  %1401 = vpow2.f32 %v1329_v19  ;;  %vm908_vm5 = vweird.f32 %v1396_v23  ;;  %v768_v56 = vor.u32 1.1754944e-38, %v767_v40 }
 0x13c   : > { %1403 = vrcp.f32 %v1748_v24  ;;  %vm1767_vm8 = vmor %vm907_vm4, %vm908_vm5  ;;  %vm834_vm11 = vweird.f32 %v827_v20  ;;  %vm766_vm12 = vcmp.eq.f32.partialorder %v765_v36, 8.507059e+37  ;;  %v841_v61 = vor.u32 1.1754944e-38, %v840_v45 }
 0x13d   : > { %v904_v26 = vsub.f32 1.0, %v903_v25  ;;  %1405 = vpow2.f32 %v1333_v22  ;;  %vm839_vm15 = vcmp.eq.f32.partialorder %v838_v50, 8.507059e+37  ;;  %vm922_vm0 = vweird.f32 %v1748_v24 }
 0x13e   : > { %v926_v9 = vand.u32 2147483647, %v1748_v24 }
 0x13f   : > { %v1398_v27 = vpop.eup %1397  ;;  %v905_v30 = vmul.f32 %v1396_v23, %v904_v26 }
 0x140   : > { %v1400_v31 = vpop.eup %1399  ;;  %v757_v32 = vmul.f32 %v1398_v27, %v754_v18  ;;  %vm762_vm6 = vweird.f32 %v1398_v27 }
 0x141   : > { %v1402_v33 = vpop.eup %1401  ;;  %v830_v35 = vmul.f32 %v1400_v31, %v827_v20  ;;  %v906_v42 = vadd.f32 %v1396_v23, %v905_v30  ;;  %vm835_vm7 = vweird.f32 %v1400_v31  ;;  %vm763_vm10 = vmor %vm761_vm9, %vm762_vm6  ;;  %v928_v20 = vand.u32 2147483648, %v1748_v24 }
 0x142   : > { %v1754_v37 = vpop.eup %1403  ;;  %v758_v38 = vsub.f32 1.0, %v757_v32  ;;  %v1756_v39 = vadd.f32 1.0, %v1402_v33  ;;  %vm836_vm13 = vmor %vm834_vm11, %vm835_vm7  ;;  %vm927_vm11 = vcmp.eq.f32.partialorder %v926_v9, 8.507059e+37 }
 0x143   : > { %v1406_v41 = vpop.eup %1405  ;;  %v831_v43 = vsub.f32 1.0, %v830_v35  ;;  %v918_v44 = vmul.f32 %v1754_v37, %v1748_v24  ;;  %v910_v54 = vsel %vm1767_vm8, %v1396_v23, %v906_v42  ;;  %vm923_vm1 = vweird.f32 %v1754_v37 }
 0x144   : > { %1407 = vrcp.f32 %v1756_v39  ;;  %v1761_v46 = vadd.f32 1.0, %v1406_v41  ;;  %v759_v47 = vmul.f32 %v1398_v27, %v758_v38  ;;  %v915_v1 = vsel %vm912_vm14, %v914_v58, %v910_v54  ;;  %vm1798_vm5 = vmor %vm922_vm0, %vm923_vm1 }
 0x145   : > { %v832_v49 = vmul.f32 %v1400_v31, %v831_v43  ;;  %v919_v52 = vsub.f32 1.0, %v918_v44  ;;  %v973_v10 = vmul.f32 %v962_v5, %v915_v1  ;;  %v782_v17 = vand.u32 2147483648, %v1756_v39 }
 0x146   : > { %1409 = vrcp.f32 %v1761_v46  ;;  %v760_v53 = vadd.f32 %v1398_v27, %v759_v47  ;;  %vm776_vm4 = vweird.f32 %v1756_v39  ;;  %v853_v21 = vand.u32 2147483647, %v1761_v46 }
 0x147   : > { %v833_v57 = vadd.f32 %v1400_v31, %v832_v49  ;;  %v920_v2 = vmul.f32 %v1754_v37, %v919_v52  ;;  %v855_v22 = vand.u32 2147483648, %v1761_v46  ;;  %v783_v30 = vor.u32 1.1754944e-38, %v782_v17 }
 0x148   : > { %v764_v60 = vsel %vm763_vm10, %v1398_v27, %v760_v53  ;;  %vm849_vm8 = vweird.f32 %v1761_v46  ;;  %v929_v33 = vor.u32 1.1754944e-38, %v928_v20  ;;  %v965_v42 = vadd.f32 %v1777_v55, %v964_v34 }
 0x149   : > { %v769_v62 = vsel %vm766_vm12, %v768_v56, %v764_v60  ;;  %v837_v63 = vsel %vm836_vm13, %v1400_v31, %v833_v57  ;;  %v921_v16 = vadd.f32 %v1754_v37, %v920_v2  ;;  %v856_v36 = vor.u32 1.1754944e-38, %v855_v22 }
 0x14a   : > { %v1408_v0 = vpop.eup %1407  ;;  %v842_v3 = vsel %vm839_vm15, %v841_v61, %v837_v63  ;;  %v967_v4 = vmul.f32 %v769_v62, %v1627_v13  ;;  %v780_v13 = vand.u32 2147483647, %v1756_v39  ;;  %vm854_vm12 = vcmp.eq.f32.partialorder %v853_v21, 8.507059e+37 }
 0x14b   : > { %v772_v6 = vmul.f32 %v1408_v0, %v1756_v39  ;;  %v969_v7 = vmul.f32 %v842_v3, %v1624_v12  ;;  %vm777_vm3 = vweird.f32 %v1408_v0  ;;  %v925_v31 = vsel %vm1798_vm5, %v1754_v37, %v921_v16  ;;  %v1385_v16 = vld [vmem:[%s1878_s14] ss:$0 sm:$0xff] }
 0x14c   : > { %v1410_v8 = vpop.eup %1409  ;;  %vm778_vm7 = vmor %vm776_vm4, %vm777_vm3  ;;  %vm781_vm9 = vcmp.eq.f32.partialorder %v780_v13, 8.507059e+37  ;;  %v930_v40 = vsel %vm927_vm11, %v929_v33, %v925_v31  ;;  %v1464_v47 = vmov 32.0  }
 0x14d   : > { %v773_v11 = vsub.f32 1.0, %v772_v6  ;;  %v845_v14 = vmul.f32 %v1410_v8, %v1761_v46  ;;  %v971_v15 = vadd.f32 %v969_v7, %v967_v4  ;;  %vm850_vm6 = vweird.f32 %v1410_v8 }
 0x14e   : > { %vm851_vm10 = vmor %vm849_vm8, %vm850_vm6  ;;  %v974_v37 = vmul.f32 %v965_v42, %v930_v40  ;;  %1411 = vrcp.f32 %v1464_v47 }
 0x14f   : > { %v846_v18 = vsub.f32 1.0, %v845_v14  ;;  %v975_v12 = vadd.f32 %v973_v10, %v971_v15  ;;  %v774_v19 = vmul.f32 %v1408_v0, %v773_v11  ;;  %v1384_v10 = vld [vmem:[%s1877_s13] ss:$0 sm:$0xff] }
 0x151   : > { %v979_v25 = vsel %vm639_vm2, %v975_v12, 0.0  ;;  %v775_v26 = vadd.f32 %v1408_v0, %v774_v19  ;;  %v847_v27 = vmul.f32 %v1410_v8, %v846_v18 }
 0x152   : > { %980 = vadd.xlane.f32.xlu0 %v979_v25 }
 0x153   : > { %v779_v32 = vsel %vm778_vm7, %v1408_v0, %v775_v26  ;;  %v848_v24 = vadd.f32 %v1410_v8, %v847_v27 }
 0x154   : > { %v784_v35 = vsel %vm781_vm9, %v783_v30, %v779_v32  ;;  %v1412_v48 = vpop.eup %1411 }
 0x155   : > { %v852_v38 = vsel %vm851_vm10, %v1410_v8, %v848_v24  ;;  %v968_v39 = vmul.f32 %v784_v35, %v1679_v29  ;;  %v986_v49 = vmul.f32 32.0, %v1412_v48  ;;  %vm990_vm13 = vweird.f32 %v1412_v48 }
 0x156   : > { %v857_v41 = vsel %vm854_vm12, %v856_v36, %v852_v38 }
 0x157   : > { %v970_v43 = vmul.f32 %v857_v41, %v1676_v28  ;;  %v987_v50 = vsub.f32 1.0, %v986_v49 }
 0x159   : > { %v972_v44 = vadd.f32 %v970_v43, %v968_v39  ;;  %v988_v51 = vmul.f32 %v1412_v48, %v987_v50 }
 0x15b   : > { %v976_v45 = vadd.f32 %v974_v37, %v972_v44  ;;  %v989_v52 = vadd.f32 %v1412_v48, %v988_v51 }
 0x15d   : > { %v982_v46 = vsel %vm639_vm2, %v976_v45, 0.0  ;;  %v991_v29 = vsel %vm990_vm13, %v1412_v48, %v989_v52 }
 0x15e   : > { %983 = vadd.xlane.f32.xlu0 %v982_v46 }
 0x1c5   : > { %v981_v53 = vpop.xlane.xlu0 %980 }
 0x1c6   : > { %v992_v54 = vmul.f32 %v991_v29, %v981_v53 }
 0x1c8   : > { %v994_v55 = vsub.f32 %v975_v12, %v992_v54 }
 0x1ca   : > { %v996_v56 = vmul.f32 %v994_v55, %v994_v55 }
 0x1cc   : > { %v998_v28 = vsel %vm639_vm2, %v996_v56, 0.0 }
 0x1cd   : > { %999 = vadd.xlane.f32.xlu1 %v998_v28 }
 0x1d1   : > { %v984_v57 = vpop.xlane.xlu0 %983 }
 0x1d2   : > { %v993_v58 = vmul.f32 %v991_v29, %v984_v57 }
 0x1d4   : > { %v995_v59 = vsub.f32 %v976_v45, %v993_v58 }
 0x1d6   : > { %v997_v60 = vmul.f32 %v995_v59, %v995_v59 }
 0x1d8   : > { %v1001_v61 = vsel %vm639_vm2, %v997_v60, 0.0 }
 0x1d9   : > { %1002 = vadd.xlane.f32.xlu1 %v1001_v61 }
 0x240   : > { %v1000_v62 = vpop.xlane.xlu1 %999 }
 0x241   : > { %v1004_v63 = vmul.f32 %v1000_v62, %v991_v29 }
 0x243   : > { %v1006_v0 = vadd.f32 1e-05, %v1004_v63  ;;  %v1386_v63 = vld [vmem:[%s1879_s15] ss:$0 sm:$0xff] }
 0x245   : > { %1413 = vrsqrt.f32 %v1006_v0  ;;  %vm1014_vm15 = vweird.f32 %v1006_v0 }
 0x24b   : > { %v1414_v1 = vpop.eup %1413 }
 0x24c   : > { %v1009_v2 = vmul.f32 %v1414_v1, %v1006_v0  ;;  %v1003_v3 = vpop.xlane.xlu1 %1002  ;;  %vm1015_vm14 = vweird.f32 %v1414_v1 }
 0x24d   : > { %v1005_v4 = vmul.f32 %v1003_v3, %v991_v29  ;;  %vm1016_vm0 = vmor %vm1014_vm15, %vm1015_vm14 }
 0x24e   : > { %v1010_v5 = vmul.f32 %v1414_v1, %v1009_v2 }
 0x24f   : > { %v1007_v6 = vadd.f32 1e-05, %v1005_v4 }
 0x250   : > { %v1011_v7 = vmul.f32 0.5, %v1010_v5 }
 0x251   : > { %1415 = vrsqrt.f32 %v1007_v6  ;;  %vm1024_vm3 = vweird.f32 %v1007_v6 }
 0x252   : > { %v1012_v8 = vsub.f32 1.5, %v1011_v7 }
 0x254   : > { %v1013_v9 = vmul.f32 %v1414_v1, %v1012_v8 }
 0x256   : > { %v1017_v11 = vsel %vm1016_vm0, %v1414_v1, %v1013_v9 }
 0x257   : > { %v1416_v14 = vpop.eup %1415  ;;  %v1028_v15 = vmul.f32 %v1017_v11, %v994_v55 }
 0x258   : > { %v1019_v13 = vmul.f32 %v1416_v14, %v1007_v6  ;;  %vm1025_vm1 = vweird.f32 %v1416_v14 }
 0x259   : > { %v1033_v17 = vmul.f32 %v1384_v10, %v1028_v15  ;;  %vm1026_vm4 = vmor %vm1024_vm3, %vm1025_vm1  ;;  %vm1142_vm1 = vcmask 7168  }
 0x25a   : > { %v1020_v18 = vmul.f32 %v1416_v14, %v1019_v13 }
 0x25b   : > { %v1819_v12 = vadd.f32 %v1385_v16, %v1033_v17 }
 0x25c   : > { %v1021_v19 = vmul.f32 0.5, %v1020_v18  ;;  %v1465_v18 = vmov 0  }
 0x25d   : > { %v1040_v20 = vmul.f32 %v1819_v12, %v1819_v12  ;;  %1378 = vset.pattern.permute.xlu1 %v1465_v18  ;;  %1376 = vset.pattern.permute.xlu2 %v1465_v18 }
 0x25e   : > { %v1022_v21 = vsub.f32 1.5, %v1021_v19  ;;  %1377 = vset.pattern.permute.xlu0 %v1465_v18  ;;  %v1120_v19 = vld [vmem:[#allocation2] sm:$0xff] }
 0x25f   : > { %v1042_v22 = vsel %vm639_vm2, %v1040_v20, 0.0 }
 0x260   : > { %v1023_v23 = vmul.f32 %v1416_v14, %v1022_v21  ;;  %1043 = vadd.xlane.f32.xlu2 %v1042_v22 }
 0x262   : > { %v1027_v25 = vsel %vm1026_vm4, %v1416_v14, %v1023_v23 }
 0x263   : > { %v1029_v26 = vmul.f32 %v1027_v25, %v995_v59 }
 0x265   : > { %v1034_v27 = vmul.f32 %v1384_v10, %v1029_v26 }
 0x267   : > { %v1824_v30 = vadd.f32 %v1385_v16, %v1034_v27 }
 0x269   : > { %v1041_v31 = vmul.f32 %v1824_v30, %v1824_v30 }
 0x26b   : > { %v1045_v32 = vsel %vm639_vm2, %v1041_v31, 0.0 }
 0x26c   : > { %1046 = vadd.xlane.f32.xlu2 %v1045_v32  ;;  %v1136_v32 = vld [vmem:[#allocation3] sm:$0xff] }
 0x2d3   : > { %v1044_v24 = vpop.xlane.xlu2 %1043 }
 0x2d4   : > { %1417 = vrsqrt.f32 %v1044_v24  ;;  %vm1055_vm5 = vcmp.eq.f32.partialorder %v1044_v24, inf  ;;  %v1058_v43 = vand.u32 2147483648, %v1044_v24  ;;  %vm1057_vm6 = vcmp.eq.f32.partialorder %v1044_v24, 0.0 }
 0x2da   : > { %v1418_v33 = vpop.eup %1417 }
 0x2db   : > { %v1049_v34 = vmul.f32 %v1418_v33, %v1044_v24 }
 0x2dd   : > { %v1050_v35 = vmul.f32 %v1418_v33, %v1049_v34 }
 0x2df   : > { %v1051_v36 = vmul.f32 0.5, %v1050_v35  ;;  %v1047_v38 = vpop.xlane.xlu2 %1046 }
 0x2e0   : > { %1419 = vrsqrt.f32 %v1047_v38  ;;  %vm1067_vm7 = vcmp.eq.f32.partialorder %v1047_v38, inf  ;;  %v1070_v29 = vand.u32 2147483648, %v1047_v38  ;;  %vm1069_vm8 = vcmp.eq.f32.partialorder %v1047_v38, 0.0 }
 0x2e1   : > { %v1052_v39 = vsub.f32 1.5, %v1051_v36 }
 0x2e3   : > { %v1053_v40 = vmul.f32 %v1418_v33, %v1052_v39 }
 0x2e5   : > { %v1054_v41 = vmul.f32 %v1053_v40, %v1044_v24 }
 0x2e6   : > { %v1420_v42 = vpop.eup %1419 }
 0x2e7   : > { %v1056_v37 = vsel %vm1055_vm5, %v1044_v24, %v1054_v41  ;;  %v1061_v44 = vmul.f32 %v1420_v42, %v1047_v38 }
 0x2e8   : > { %v1059_v45 = vsel %vm1057_vm6, %v1058_v43, %v1056_v37  ;;  %v1137_v43 = vld [vmem:[#allocation3 + $0x8] sm:$0xff] }
 0x2e9   : > { %v1072_v46 = vadd.f32 1e-08, %v1059_v45  ;;  %v1062_v47 = vmul.f32 %v1420_v42, %v1061_v44 }
 0x2eb   : > { %1421 = vrcp.f32 %v1072_v46  ;;  %v1063_v48 = vmul.f32 0.5, %v1062_v47  ;;  %v1085_v57 = vand.u32 2147483648, %v1072_v46  ;;  %v1083_v59 = vand.u32 2147483647, %v1072_v46  ;;  %v1145_v47 = vld [vmem:[#allocation4] sm:$0xff] }
 0x2ec   : > { %vm1079_vm10 = vweird.f32 %v1072_v46 }
 0x2ed   : > { %v1064_v49 = vsub.f32 1.5, %v1063_v48  ;;  %v1086_v61 = vor.u32 1.1754944e-38, %v1085_v57  ;;  %vm1084_vm12 = vcmp.eq.f32.partialorder %v1083_v59, 8.507059e+37 }
 0x2ef   : > { %v1065_v50 = vmul.f32 %v1420_v42, %v1064_v49 }
 0x2f1   : > { %v1422_v51 = vpop.eup %1421  ;;  %v1066_v52 = vmul.f32 %v1065_v50, %v1047_v38 }
 0x2f2   : > { %v1075_v53 = vmul.f32 %v1422_v51, %v1072_v46  ;;  %vm1080_vm9 = vweird.f32 %v1422_v51 }
 0x2f3   : > { %v1068_v54 = vsel %vm1067_vm7, %v1047_v38, %v1066_v52  ;;  %vm1081_vm11 = vmor %vm1079_vm10, %vm1080_vm9 }
 0x2f4   : > { %v1071_v55 = vsel %vm1069_vm8, %v1070_v29, %v1068_v54  ;;  %v1076_v56 = vsub.f32 1.0, %v1075_v53  ;;  %v1146_v53 = vld [vmem:[#allocation4 + $0x8] sm:$0xff] }
 0x2f5   : > { %v1073_v28 = vadd.f32 1e-08, %v1071_v55 }
 0x2f6   : > { %v1077_v58 = vmul.f32 %v1422_v51, %v1076_v56 }
 0x2f7   : > { %1423 = vrcp.f32 %v1073_v28  ;;  %v1100_v7 = vand.u32 2147483648, %v1073_v28  ;;  %v1098_v9 = vand.u32 2147483647, %v1073_v28  ;;  %vm1094_vm14 = vweird.f32 %v1073_v28 }
 0x2f8   : > { %v1078_v60 = vadd.f32 %v1422_v51, %v1077_v58 }
 0x2f9   : > { %v1101_v11 = vor.u32 1.1754944e-38, %v1100_v7  ;;  %vm1099_vm0 = vcmp.eq.f32.partialorder %v1098_v9, 8.507059e+37 }
 0x2fa   : > { %v1082_v62 = vsel %vm1081_vm11, %v1422_v51, %v1078_v60 }
 0x2fb   : > { %v1087_v0 = vsel %vm1084_vm12, %v1086_v61, %v1082_v62 }
 0x2fc   : > { %v1833_v1 = vmul.f32 %v1087_v0, %v1819_v12  ;;  %v1117_v12 = vstv %s1116_s21 }
 0x2fd   : > { %v1424_v2 = vpop.eup %1423 }
 0x2fe   : > { %v1108_v3 = vmul.f32 %v1386_v63, %v1833_v1  ;;  %v1090_v4 = vmul.f32 %v1424_v2, %v1073_v28  ;;  %vm1095_vm13 = vweird.f32 %v1424_v2 }
 0x2ff   : > { %vm1096_vm15 = vmor %vm1094_vm14, %vm1095_vm13 }
 0x300   : > { %v1110_v5 = vsel %vm639_vm2, %v1108_v3, 0.0  ;;  %v1091_v6 = vsub.f32 1.0, %v1090_v4 }
 0x301   : > { %1111 = vadd.xlane.f32.xlu0 %v1110_v5 }
 0x302   : > { %v1092_v8 = vmul.f32 %v1424_v2, %v1091_v6 }
 0x304   : > { %v1093_v10 = vadd.f32 %v1424_v2, %v1092_v8 }
 0x306   : > { %v1097_v14 = vsel %vm1096_vm15, %v1424_v2, %v1093_v10 }
 0x307   : > { %v1102_v15 = vsel %vm1099_vm0, %v1101_v11, %v1097_v14 }
 0x308   : > { %v1103_v16 = vmul.f32 %v1102_v15, %v1824_v30  ;;  %v1121_v30 = vld [vmem:[#allocation2 + $0x8] sm:$0xff] }
 0x30a   : > { %v1109_v13 = vmul.f32 %v1386_v63, %v1103_v16 }
 0x30c   : > { %v1113_v17 = vsel %vm639_vm2, %v1109_v13, 0.0 }
 0x30d   : > { %1114 = vadd.xlane.f32.xlu1 %v1113_v17 }
 0x374   : > { %v1112_v20 = vpop.xlane.xlu0 %1111 }
 0x375   : > { %v1118_v21 = vadd.f32 %v1117_v12, %v1112_v20 }
 0x377   : > { %v1122_v22 = vmax.f32 %v1120_v19, %v1118_v21 }
 0x379   : > { %v1124_v23 = vsub.f32 %v1120_v19, %v1122_v22  ;;  %v1130_v25 = vsub.f32 %v1118_v21, %v1122_v22  ;;  %1175 = vst.msk [vmem:[#allocation2] sm:$0xff] %vm1142_vm1, %v1122_v22 }
 0x37b   : > { %v1126_v26 = vmul.f32 1.442695, %v1124_v23  ;;  %v1132_v27 = vmul.f32 1.442695, %v1130_v25 }
 0x37d   : > { %1425 = vpow2.f32 %v1126_v26 }
 0x37e   : > { %1427 = vpow2.f32 %v1132_v27 }
 0x380   : > { %v1115_v31 = vpop.xlane.xlu1 %1114 }
 0x381   : > { %v1119_v24 = vadd.f32 %v1117_v12, %v1115_v31 }
 0x383   : > { %v1426_v33 = vpop.eup %1425  ;;  %v1123_v34 = vmax.f32 %v1121_v30, %v1119_v24 }
 0x384   : > { %v1428_v35 = vpop.eup %1427  ;;  %v1138_v36 = vmul.f32 %v1426_v33, %v1136_v32  ;;  %1149 = vperm.xlu2 %1376, %v1426_v33  }
 0x385   : > { %v1125_v38 = vsub.f32 %v1121_v30, %v1123_v34  ;;  %v1131_v39 = vsub.f32 %v1119_v24, %v1123_v34  ;;  %1176 = vst.msk [vmem:[#allocation2 + $0x8] sm:$0xff] %vm1142_vm1, %v1123_v34  ;;  %1161 = vperm.xlu1 %1378, %v1428_v35  }
 0x386   : > { %v1140_v40 = vadd.f32 %v1428_v35, %v1138_v36 }
 0x387   : > { %v1128_v41 = vmul.f32 1.442695, %v1125_v38  ;;  %v1134_v42 = vmul.f32 1.442695, %v1131_v39 }
 0x388   : > { %1143 = vst.msk [vmem:[#allocation3] sm:$0xff] %vm1142_vm1, %v1140_v40 }
 0x389   : > { %1429 = vpow2.f32 %v1128_v41 }
 0x38a   : > { %1431 = vpow2.f32 %v1134_v42 }
 0x38f   : > { %v1430_v37 = vpop.eup %1429 }
 0x390   : > { %v1432_v44 = vpop.eup %1431  ;;  %v1139_v45 = vmul.f32 %v1430_v37, %v1137_v43  ;;  %1154 = vperm.xlu0 %1377, %v1430_v37  }
 0x391   : > { %1166 = vperm.xlu2 %1376, %v1432_v44  }
 0x392   : > { %v1141_v46 = vadd.f32 %v1432_v44, %v1139_v45 }
 0x394   : > { %1144 = vst.msk [vmem:[#allocation3 + $0x8] sm:$0xff] %vm1142_vm1, %v1141_v46 }
 0x3de   : > { %v1150_v48 = vpop.permute.xlu2 %1149 }
 0x3df   : > { %v1157_v50 = vmul.f32 %v1150_v48, %v1145_v47 }
 0x3eb   : > { %v1167_v29 = vpop.permute.xlu2 %1166 }
 0x3ec   : > { %v1170_v55 = vmul.f32 %v1167_v29, %v1103_v16 }
 0x3f7   : > { %v1162_v49 = vpop.permute.xlu1 %1161 }
 0x3f8   : > { %v1169_v51 = vmul.f32 %v1162_v49, %v1833_v1 }
 0x3fa   : > { %v1171_v52 = vadd.f32 %v1169_v51, %v1157_v50 }
 0x3fc   : > { %1173 = vst.msk [vmem:[#allocation4] sm:$0xff] %vm639_vm2, %v1171_v52 }
 0x402   : > { %v1155_v54 = vpop.permute.xlu0 %1154 }
 0x403   : > { %v1158_v56 = vmul.f32 %v1155_v54, %v1146_v53  ;;  %1180 = sbr.rel (%p1340_p6) target bundleno = 1177 (0x499), region = 96 }
 0x405   : > { %v1172_v28 = vadd.f32 %v1170_v55, %v1158_v56 }
 0x407   : > { %1174 = vst.msk [vmem:[#allocation4 + $0x8] sm:$0xff] %vm639_vm2, %v1172_v28 }
 0x408   : > { %v1183_v57 = vld [vmem:[#allocation3] sm:$0xff]  ;;  %v1466_v58 = vmov 0   ;;  %v1184_v59 = vld [vmem:[#allocation3 + $0x8] sm:$0xff]  ;;  %v1181_v6 = vld [vmem:[#allocation4] sm:$0xff] }
 0x409   : > { %1433 = vset.pattern.permute.xlu0 %v1466_v58 }
 0x40a   : > { %1187 = vperm.xlu0 %1433, %v1183_v57  }
 0x40e   : > { %v1182_v18 = vld [vmem:[#allocation4 + $0x8] sm:$0xff] }
 0x412   : > { %1192 = vperm.xlu0 %1433, %v1184_v59  }
 0x47c   : > { %v1188_v60 = vpop.permute.xlu0 %1187 }
 0x47d   : > { %1434 = vrcp.f32 %v1188_v60  ;;  %v1206_v1 = vand.u32 2147483648, %v1188_v60  ;;  %v1204_v3 = vand.u32 2147483647, %v1188_v60  ;;  %vm1200_vm4 = vweird.f32 %v1188_v60 }
 0x47f   : > { %v1207_v7 = vor.u32 1.1754944e-38, %v1206_v1  ;;  %vm1205_vm6 = vcmp.eq.f32.partialorder %v1204_v3, 8.507059e+37 }
 0x483   : > { %v1435_v61 = vpop.eup %1434 }
 0x484   : > { %v1196_v62 = vmul.f32 %v1435_v61, %v1188_v60  ;;  %v1193_v63 = vpop.permute.xlu0 %1192  ;;  %vm1201_vm3 = vweird.f32 %v1435_v61 }
 0x485   : > { %1436 = vrcp.f32 %v1193_v63  ;;  %vm1202_vm5 = vmor %vm1200_vm4, %vm1201_vm3  ;;  %v1221_v15 = vand.u32 2147483648, %v1193_v63  ;;  %v1219_v13 = vand.u32 2147483647, %v1193_v63  ;;  %vm1215_vm8 = vweird.f32 %v1193_v63 }
 0x486   : > { %v1197_v0 = vsub.f32 1.0, %v1196_v62 }
 0x487   : > { %v1222_v12 = vor.u32 1.1754944e-38, %v1221_v15  ;;  %vm1220_vm10 = vcmp.eq.f32.partialorder %v1219_v13, 8.507059e+37 }
 0x488   : > { %v1198_v2 = vmul.f32 %v1435_v61, %v1197_v0 }
 0x48a   : > { %v1199_v4 = vadd.f32 %v1435_v61, %v1198_v2 }
 0x48b   : > { %v1437_v5 = vpop.eup %1436 }
 0x48c   : > { %v1203_v8 = vsel %vm1202_vm5, %v1435_v61, %v1199_v4  ;;  %v1211_v9 = vmul.f32 %v1437_v5, %v1193_v63  ;;  %vm1216_vm7 = vweird.f32 %v1437_v5 }
 0x48d   : > { %v1208_v10 = vsel %vm1205_vm6, %v1207_v7, %v1203_v8  ;;  %vm1217_vm9 = vmor %vm1215_vm8, %vm1216_vm7 }
 0x48e   : > { %v1209_v11 = vmul.f32 %v1208_v10, %v1181_v6  ;;  %v1212_v14 = vsub.f32 1.0, %v1211_v9 }
 0x490   : > { %1225 = vst.msk [vmem:[%s1881_s17] sm:$0xff] %vm639_vm2, %v1209_v11  ;;  %v1213_v16 = vmul.f32 %v1437_v5, %v1212_v14 }
 0x492   : > { %v1214_v17 = vadd.f32 %v1437_v5, %v1213_v16 }
 0x494   : > { %v1218_v19 = vsel %vm1217_vm9, %v1437_v5, %v1214_v17 }
 0x495   : > { %v1223_v20 = vsel %vm1220_vm10, %v1222_v12, %v1218_v19 }
 0x496   : > { %v1224_v21 = vmul.f32 %v1223_v20, %v1182_v18 }
 0x498   : > { %1226 = vst.msk [vmem:[%s1881_s17 + $0x8] sm:$0xff] %vm639_vm2, %v1224_v21 }
 0x499 PF: > { %s28_s28 = sadd.s32 1, %s1460_s28   ;;  %s1890_s26 = smov %s1456_s27 }
 0x49a   : > { %p25_p7 = scmp.ge.s32.totalorder %s28_s28, 5   ;;  %s1891_s27 = smov %s1893_s16 }
 0x49c   :  { %27 = sbr.rel (!%p25_p7) target bundleno = 4 (0x4), region = 129 }

// kernel: cyk_cell_forward.13
= control target key start
LH: loop header
LB: loop body
LE: loop exit
PB: predicated region body
PF: predicated region fallthrough
CT: control target
= control target key end

     0   :  { %s1285_s26 = smov 0   ;;  %s1287_s27 = smov 0   ;;  %s1498_s0 = inlined_call_operand.vmem [shape: f32[5,8,32], index: 0, kind: input, shape index: {}]   ;;  %s1499_s1 = inlined_call_operand.vmem [shape: f32[5,8,32], index: 1, kind: input, shape index: {}]   ;;  %s1500_s2 = inlined_call_operand.vmem [shape: f32[32,64], index: 2, kind: input, shape index: {}]   ;;  %s1501_s3 = inlined_call_operand.vmem [shape: f32[32,64], index: 3, kind: input, shape index: {}]   ;;  %s1502_s4 = inlined_call_operand.vmem [shape: f32[1,64], index: 4, kind: input, shape index: {}]   ;;  %s1503_s5 = inlined_call_operand.vmem [shape: f32[64,32], index: 5, kind: input, shape index: {}]   ;;  %s1504_s6 = inlined_call_operand.vmem [shape: f32[64,32], index: 6, kind: input, shape index: {}]   ;;  %s1505_s7 = inlined_call_operand.vmem [shape: f32[64,32], index: 7, kind: input, shape index: {}]   ;;  %s1506_s8 = inlined_call_operand.vmem [shape: f32[64,32], index: 8, kind: input, shape index: {}]   ;;  %s1507_s9 = inlined_call_operand.vmem [shape: f32[1,32], index: 9, kind: input, shape index: {}]   ;;  %s1508_s10 = inlined_call_operand.vmem [shape: f32[1,32], index: 10, kind: input, shape index: {}]   ;;  %s1509_s11 = inlined_call_operand.vmem [shape: f32[1,32], index: 11, kind: input, shape index: {}]   ;;  %s1510_s12 = inlined_call_operand.vmem [shape: f32[1,32], index: 12, kind: input, shape index: {}]   ;;  %s1511_s13 = inlined_call_operand.vmem [shape: f32[1,32], index: 13, kind: input, shape index: {}]   ;;  %s1512_s14 = inlined_call_operand.vmem [shape: f32[1,32], index: 14, kind: input, shape index: {}]   ;;  %s1513_s15 = inlined_call_operand.vmem [shape: f32[1,32], index: 15, kind: input, shape index: {}]   ;;  %s1514_s16 = inlined_call_operand.<no memory space> [shape: f32[1,1], index: 16, kind: input, shape index: {}]   ;;  %s1515_s17 = inlined_call_operand.vmem [shape: f32[8,32], index: 17, kind: output, shape index: {}]  }
   0x1   :  { %1516 = sst [smem:[#allocation6_spill]] %s1498_s0  ;;  %s1289_s28 = smov 0  }
   0x2   :  { %1517 = sst [smem:[#allocation7_spill]] %s1499_s1 }
   0x3   :  { %22 = sst [smem:[#allocation5]] %s1514_s16 }
   0x4 LB: > { %s37_s16 = sadd.s32 1, %s1181_s27  ;;  %p1080_p0 = scmp.ge.s32.totalorder %s1185_s28, 1  ;;  %s1185_s28 = sphi %s1289_s28, %s28_s28   ;;  %s1181_s27 = sphi %s1287_s27, %s1523_s27   ;;  %s1177_s26 = sphi %s1285_s26, %s1522_s26  }
   0x5   : > { %p38_p1 = scmp.ge.s32.totalorder %s37_s16, 5  ;;  %p518_p2 = scmp.lt.s32.totalorder %s1185_s28, 6 }
   0x7   : > { %s1525_s16 = smov (%p38_p1, %s37_s16), 0  ;;  %p519_p3 = pnand %p1080_p0, %p518_p2 }
   0x8   : > { %p578_p4 = scmp.lt.s32.totalorder (!%p519_p3), %s1177_s26, 4  ;;  %s1518_s19 = sld [smem:[#allocation6_spill]] (!%p519_p3) }
   0x9   : > { %522 = sbr.rel (%p519_p3) target bundleno = 1138 (0x472), region = 88  ;;  %s1519_s22 = sld [smem:[#allocation7_spill]] (!%p519_p3) }
   0xa   : > { %p1083_p5 = scmp.ne.s32.totalorder (!%p519_p3), %s1177_s26, 0 }
   0xe   : > { %s579_s29 = scalar_select %p578_p4, %s1177_s26, 4 }
   0xf   : > { %599 = sbr.rel (%p1083_p5) target bundleno = 24 (0x18), region = 92 }
  0x10   : > { %s1081_s0 = sshll.u32 %s579_s29, 3 }
  0x11   : > { %s1310_s1 = scalar_lea.vmem %s1518_s19, %s1081_s0  ;;  %s591_s23 = scalar_lea.vmem %s1519_s22, %s1081_s0 }
  0x14   : > { %vm600_vm0 = vcmask 7168   ;;  %vm603_vm1 = vcmask 261120   ;;  %v1187_v0 = vmov -inf   ;;  %v1188_v1 = vmov 0.0  }
  0x15   : > { %601 = vst.msk [vmem:[#allocation2] sm:$0xff] %vm600_vm0, %v1187_v0 }
  0x16   : > { %602 = vst.msk [vmem:[#allocation3] sm:$0xff] %vm600_vm0, %v1188_v1 }
  0x17   : > { %604 = vst.msk [vmem:[#allocation4] sm:$0xff] %vm603_vm1, %v1188_v1 }
  0x18 PF: > { %v614_v2 = vld [vmem:[%s1501_s3 + $0x18] sm:$0xff]  ;;  %v613_v4 = vld [vmem:[%s1501_s3 + $0x10] sm:$0xff]  ;;  %v612_v6 = vld [vmem:[%s1501_s3 + $0x8] sm:$0xff]  ;;  %vm615_vm2 = vcmask 261120   ;;  %vm680_vm3 = vcmask 523264   ;;  %s941_s0 = sld [smem:[#allocation5]] }
  0x19   : > { %v610_v3 = vld [vmem:[%s1500_s2 + $0x18] sm:$0xff]  ;;  %631 = vmatpush.msra.mxu0 %v614_v2  ;;  %v609_v5 = vld [vmem:[%s1500_s2 + $0x10] sm:$0xff]  ;;  %v608_v7 = vld [vmem:[%s1500_s2 + $0x8] sm:$0xff]  ;;  %p1093_p6 = scmp.ne.s32.totalorder %s1177_s26, 4 }
  0x1a   : > { %654 = vmatpush.msra.mxu1 %v610_v3  ;;  %v675_v8 = vld [vmem:[%s1503_s5 + $0x38] sm:$0xff]  ;;  %v611_v10 = vld [vmem:[%s1501_s3] sm:$0xff]  ;;  %v674_v12 = vld [vmem:[%s1503_s5 + $0x30] sm:$0xff] }
  0x1b   : > { %632 = vmatpush.msra.mxu0 %v613_v4  ;;  %v730_v9 = vld [vmem:[%s1504_s6 + $0x38] sm:$0xff]  ;;  %v607_v11 = vld [vmem:[%s1500_s2] sm:$0xff]  ;;  %692 = vmatpush.msra.mxu2 %v675_v8  ;;  %v729_v15 = vld [vmem:[%s1504_s6 + $0x30] sm:$0xff] }
  0x1c   : > { %655 = vmatpush.msra.mxu1 %v609_v5  ;;  %743 = vmatpush.msra.mxu3 %v730_v9  ;;  %v1349_v13 = vld [vmem:[%s591_s23] sm:$0xff]  ;;  %v781_v16 = vld [vmem:[%s1505_s7 + $0x38] sm:$0xff]  ;;  %v780_v18 = vld [vmem:[%s1505_s7 + $0x30] sm:$0xff] }
  0x1d   : > { %633 = vmatpush.msra.mxu0 %v612_v6  ;;  %v1352_v14 = vld [vmem:[%s1310_s1] sm:$0xff]  ;;  %v832_v17 = vld [vmem:[%s1506_s8 + $0x38] sm:$0xff]  ;;  %693 = vmatpush.msra.mxu2 %v674_v12  ;;  %v831_v19 = vld [vmem:[%s1506_s8 + $0x30] sm:$0xff] }
  0x1e   : > { %656 = vmatpush.msra.mxu1 %v608_v7  ;;  %744 = vmatpush.msra.mxu3 %v729_v15  ;;  %v673_v20 = vld [vmem:[%s1503_s5 + $0x28] sm:$0xff]  ;;  %v672_v24 = vld [vmem:[%s1503_s5 + $0x20] sm:$0xff]  ;;  %v671_v28 = vld [vmem:[%s1503_s5 + $0x18] sm:$0xff] }
  0x1f   : > { %634 = vmatpush.msra.mxu0 %v611_v10  ;;  %v728_v21 = vld [vmem:[%s1504_s6 + $0x28] sm:$0xff]  ;;  %v727_v25 = vld [vmem:[%s1504_s6 + $0x20] sm:$0xff]  ;;  %694 = vmatpush.msra.mxu2 %v673_v20  ;;  %v726_v29 = vld [vmem:[%s1504_s6 + $0x18] sm:$0xff] }
  0x20   : > { %657 = vmatpush.msra.mxu1 %v607_v11  ;;  %1084 = vmatmul.msk.f32.vlgmr.msra.gmra.mxu0 %vm615_vm2, %v1349_v13  ;;  %v779_v22 = vld [vmem:[%s1505_s7 + $0x28] sm:$0xff]  ;;  %v778_v26 = vld [vmem:[%s1505_s7 + $0x20] sm:$0xff]  ;;  %v777_v30 = vld [vmem:[%s1505_s7 + $0x18] sm:$0xff] }
  0x21   : > { %1085 = vmatmul.msk.f32.vlgmr.msra.gmra.mxu1 %vm615_vm2, %v1352_v14  ;;  %v830_v23 = vld [vmem:[%s1506_s8 + $0x28] sm:$0xff]  ;;  %794 = vmatpush.msrb.mxu0 %v781_v16  ;;  %v829_v27 = vld [vmem:[%s1506_s8 + $0x20] sm:$0xff]  ;;  %v828_v31 = vld [vmem:[%s1506_s8 + $0x18] sm:$0xff] }
  0x22   : > { %845 = vmatpush.msrb.mxu1 %v832_v17  ;;  %745 = vmatpush.msra.mxu3 %v728_v21  ;;  %v670_v32 = vld [vmem:[%s1503_s5 + $0x10] sm:$0xff]  ;;  %v669_v36 = vld [vmem:[%s1503_s5 + $0x8] sm:$0xff]  ;;  %v668_v40 = vld [vmem:[%s1503_s5] sm:$0xff] }
  0x23   : > { %795 = vmatpush.msrb.mxu0 %v780_v18  ;;  %695 = vmatpush.msra.mxu2 %v672_v24  ;;  %v725_v33 = vld [vmem:[%s1504_s6 + $0x10] sm:$0xff]  ;;  %v724_v37 = vld [vmem:[%s1504_s6 + $0x8] sm:$0xff]  ;;  %v723_v41 = vld [vmem:[%s1504_s6] sm:$0xff] }
  0x24   : > { %846 = vmatpush.msrb.mxu1 %v831_v19  ;;  %746 = vmatpush.msra.mxu3 %v727_v25  ;;  %v776_v34 = vld [vmem:[%s1505_s7 + $0x10] sm:$0xff]  ;;  %v775_v38 = vld [vmem:[%s1505_s7 + $0x8] sm:$0xff]  ;;  %v774_v42 = vld [vmem:[%s1505_s7] sm:$0xff] }
  0x25   : > { %796 = vmatpush.msrb.mxu0 %v779_v22  ;;  %696 = vmatpush.msra.mxu2 %v671_v28  ;;  %v827_v35 = vld [vmem:[%s1506_s8 + $0x10] sm:$0xff]  ;;  %v826_v39 = vld [vmem:[%s1506_s8 + $0x8] sm:$0xff]  ;;  %v825_v43 = vld [vmem:[%s1506_s8] sm:$0xff] }
  0x26   : > { %847 = vmatpush.msrb.mxu1 %v830_v23  ;;  %747 = vmatpush.msra.mxu3 %v726_v29  ;;  %v1128_v44 = vld [vmem:[%s1502_s4] ss:$0 sm:$0xff] }
  0x27   : > { %797 = vmatpush.msrb.mxu0 %v778_v26  ;;  %697 = vmatpush.msra.mxu2 %v670_v32  ;;  %v1129_v50 = vld [vmem:[%s1509_s11] ss:$0 sm:$0xff] }
  0x28   : > { %848 = vmatpush.msrb.mxu1 %v829_v27  ;;  %748 = vmatpush.msra.mxu3 %v725_v33  ;;  %v1131_v53 = vld [vmem:[%s1507_s9] ss:$0 sm:$0xff] }
  0x29   : > { %798 = vmatpush.msrb.mxu0 %v777_v30  ;;  %698 = vmatpush.msra.mxu2 %v669_v36  ;;  %v1132_v54 = vld [vmem:[%s1508_s10] ss:$0 sm:$0xff] }
  0x2a   : > { %849 = vmatpush.msrb.mxu1 %v828_v31  ;;  %749 = vmatpush.msra.mxu3 %v724_v37  ;;  %v1130_v28 = vld [vmem:[%s1510_s12] ss:$0 sm:$0xff] }
  0x2b   : > { %799 = vmatpush.msrb.mxu0 %v776_v34  ;;  %699 = vmatpush.msra.mxu2 %v668_v40 }
  0x2c   : > { %850 = vmatpush.msrb.mxu1 %v827_v35  ;;  %750 = vmatpush.msra.mxu3 %v723_v41 }
  0x2d   : > { %800 = vmatpush.msrb.mxu0 %v775_v38 }
  0x2e   : > { %851 = vmatpush.msrb.mxu1 %v826_v39 }
  0x2f   : > { %801 = vmatpush.msrb.mxu0 %v774_v42 }
  0x30   : > { %852 = vmatpush.msrb.mxu1 %v825_v43 }
  0x9d   : > { %v636_v45 = vpop.f32.mrf.mxu0 }
  0x9e   : > { %v659_v46 = vpop.f32.mrf.mxu1 }
  0x9f   : > { %v660_v47 = vadd.f32 %v659_v46, %v636_v45  ;;  %v1189_v46 = vmov 32.0  }
  0xa1   : > { %v666_v48 = vadd.f32 %v1128_v44, %v660_v47 }
  0xa3   : > { %v667_v49 = vmax.f32 %v666_v48, 0.0 }
  0xa5   : > { %1086 = vmatmul.msk.f32.vlgmr.msra.gmra.mxu2 %vm680_vm3, %v667_v49  ;;  %1088 = vmatmul.msk.f32.vlgmr.msra.gmra.mxu3 %vm680_vm3, %v667_v49 }
  0xa6   : > { %1090 = vmatmul.msk.f32.vlgmr.msrb.gmra.mxu0 %vm680_vm3, %v667_v49  ;;  %1092 = vmatmul.msk.f32.vlgmr.msrb.gmra.mxu1 %vm680_vm3, %v667_v49 }
 0x123   : > { %v803_v51 = vpop.f32.mrf.mxu0  ;;  %v854_v32 = vpop.f32.mrf.mxu1 }
 0x124   : > { %v804_v52 = vadd.f32 %v1129_v50, %v803_v51  ;;  %v855_v40 = vadd.f32 %v1130_v28, %v854_v32  ;;  %v1135_v32 = vld [vmem:[%s1513_s15] ss:$0 sm:$0xff] }
 0x126   : > { %v1091_v55 = vmul.f32 -1.442695, %v804_v52 }
 0x128   : > { %1136 = vpow2.f32 %v1091_v55  ;;  %v701_v56 = vpop.f32.mrf.mxu2  ;;  %v752_v57 = vpop.f32.mrf.mxu3 }
 0x129   : > { %v702_v58 = vadd.f32 %v1131_v53, %v701_v56  ;;  %v753_v59 = vadd.f32 %v1132_v54, %v752_v57 }
 0x12b   : > { %v1087_v60 = vmul.f32 -1.442695, %v702_v58  ;;  %v1089_v61 = vmul.f32 -1.442695, %v753_v59 }
 0x12d   : > { %1138 = vpow2.f32 %v1087_v60 }
 0x12e   : > { %v1137_v62 = vpop.eup %1136  ;;  %1140 = vpow2.f32 %v1089_v61 }
 0x12f   : > { %v809_v63 = vadd.f32 1.0, %v1137_v62 }
 0x131   : > { %1142 = vrcp.f32 %v809_v63  ;;  %vm815_vm4 = vweird.f32 %v809_v63  ;;  %v821_v12 = vand.u32 2147483648, %v809_v63  ;;  %v819_v22 = vand.u32 2147483647, %v809_v63 }
 0x133   : > { %v1139_v0 = vpop.eup %1138  ;;  %v822_v31 = vor.u32 1.1754944e-38, %v821_v12  ;;  %vm820_vm14 = vcmp.eq.f32.partialorder %v819_v22, 8.507059e+37 }
 0x134   : > { %v1141_v1 = vpop.eup %1140  ;;  %v707_v2 = vadd.f32 1.0, %v1139_v0 }
 0x135   : > { %v758_v3 = vadd.f32 1.0, %v1141_v1  ;;  %v1133_v1 = vld [vmem:[%s1511_s13] ss:$0 sm:$0xff] }
 0x136   : > { %1144 = vrcp.f32 %v707_v2  ;;  %v719_v18 = vand.u32 2147483648, %v707_v2  ;;  %v717_v20 = vand.u32 2147483647, %v707_v2  ;;  %vm713_vm9 = vweird.f32 %v707_v2 }
 0x137   : > { %v1143_v4 = vpop.eup %1142  ;;  %1146 = vrcp.f32 %v758_v3  ;;  %v770_v21 = vand.u32 2147483648, %v758_v3  ;;  %v768_v24 = vand.u32 2147483647, %v758_v3  ;;  %vm764_vm11 = vweird.f32 %v758_v3 }
 0x138   : > { %v811_v5 = vmul.f32 %v1143_v4, %v809_v63  ;;  %vm816_vm5 = vweird.f32 %v1143_v4  ;;  %v720_v29 = vor.u32 1.1754944e-38, %v719_v18  ;;  %vm718_vm12 = vcmp.eq.f32.partialorder %v717_v20, 8.507059e+37 }
 0x139   : > { %vm1458_vm8 = vmor %vm815_vm4, %vm816_vm5  ;;  %v771_v34 = vor.u32 1.1754944e-38, %v770_v21  ;;  %vm769_vm15 = vcmp.eq.f32.partialorder %v768_v24, 8.507059e+37  ;;  %1148 = vrcp.f32 %v1189_v46 }
 0x13a   : > { %v812_v6 = vsub.f32 1.0, %v811_v5 }
 0x13c   : > { %v1145_v7 = vpop.eup %1144  ;;  %v813_v8 = vmul.f32 %v1143_v4, %v812_v6 }
 0x13d   : > { %v1147_v9 = vpop.eup %1146  ;;  %v709_v10 = vmul.f32 %v1145_v7, %v707_v2  ;;  %vm714_vm6 = vweird.f32 %v1145_v7 }
 0x13e   : > { %v760_v11 = vmul.f32 %v1147_v9, %v758_v3  ;;  %v814_v16 = vadd.f32 %v1143_v4, %v813_v8  ;;  %vm765_vm7 = vweird.f32 %v1147_v9  ;;  %vm715_vm10 = vmor %vm713_vm9, %vm714_vm6 }
 0x13f   : > { %v710_v15 = vsub.f32 1.0, %v709_v10  ;;  %vm766_vm13 = vmor %vm764_vm11, %vm765_vm7  ;;  %v1149_v47 = vpop.eup %1148  ;;  %vm955_vm11 = vcmask 7168  }
 0x140   : > { %v761_v17 = vsub.f32 1.0, %v760_v11  ;;  %v818_v27 = vsel %vm1458_vm8, %v1143_v4, %v814_v16  ;;  %v868_v48 = vmul.f32 32.0, %v1149_v47  ;;  %vm872_vm0 = vweird.f32 %v1149_v47  ;;  %v1134_v4 = vld [vmem:[%s1512_s14] ss:$0 sm:$0xff] }
 0x141   : > { %v711_v19 = vmul.f32 %v1145_v7, %v710_v15  ;;  %v823_v37 = vsel %vm820_vm14, %v822_v31, %v818_v27 }
 0x142   : > { %v762_v23 = vmul.f32 %v1147_v9, %v761_v17  ;;  %v860_v42 = vmul.f32 %v855_v40, %v823_v37  ;;  %v869_v49 = vsub.f32 1.0, %v868_v48  ;;  %v1190_v37 = vmov 0  }
 0x143   : > { %v712_v26 = vadd.f32 %v1145_v7, %v711_v19  ;;  %1126 = vset.pattern.permute.xlu2 %v1190_v37  ;;  %1127 = vset.pattern.permute.xlu0 %v1190_v37 }
 0x144   : > { %v763_v30 = vadd.f32 %v1147_v9, %v762_v23  ;;  %v870_v50 = vmul.f32 %v1149_v47, %v869_v49 }
 0x145   : > { %v716_v33 = vsel %vm715_vm10, %v1145_v7, %v712_v26 }
 0x146   : > { %v721_v35 = vsel %vm718_vm12, %v720_v29, %v716_v33  ;;  %v767_v36 = vsel %vm766_vm13, %v1147_v9, %v763_v30  ;;  %v871_v51 = vadd.f32 %v1149_v47, %v870_v50 }
 0x147   : > { %v772_v38 = vsel %vm769_vm15, %v771_v34, %v767_v36  ;;  %v857_v39 = vmul.f32 %v721_v35, %v1352_v14 }
 0x148   : > { %v858_v41 = vmul.f32 %v772_v38, %v1349_v13  ;;  %v873_v52 = vsel %vm872_vm0, %v1149_v47, %v871_v51  ;;  %v942_v38 = vstv %s941_s0  ;;  %v952_v47 = vld [vmem:[#allocation3] sm:$0xff] }
 0x14a   : > { %v859_v43 = vadd.f32 %v858_v41, %v857_v39  ;;  %v944_v39 = vld [vmem:[#allocation2] sm:$0xff] }
 0x14c   : > { %v861_v44 = vadd.f32 %v860_v42, %v859_v43 }
 0x14e   : > { %v864_v45 = vsel %vm615_vm2, %v861_v44, 0.0 }
 0x14f   : > { %865 = vadd.xlane.f32.xlu0 %v864_v45 }
 0x1c2   : > { %v866_v53 = vpop.xlane.xlu0 %865 }
 0x1c3   : > { %v874_v14 = vmul.f32 %v873_v52, %v866_v53  ;;  %v957_v53 = vld [vmem:[#allocation4] sm:$0xff] }
 0x1c5   : > { %v875_v54 = vsub.f32 %v861_v44, %v874_v14 }
 0x1c7   : > { %v876_v55 = vmul.f32 %v875_v54, %v875_v54 }
 0x1c9   : > { %v877_v13 = vsel %vm615_vm2, %v876_v55, 0.0 }
 0x1ca   : > { %878 = vadd.xlane.f32.xlu0 %v877_v13 }
 0x23d   : > { %v879_v56 = vpop.xlane.xlu0 %878 }
 0x23e   : > { %v880_v57 = vmul.f32 %v879_v56, %v873_v52 }
 0x240   : > { %v881_v58 = vadd.f32 1e-05, %v880_v57 }
 0x242   : > { %1150 = vrsqrt.f32 %v881_v58  ;;  %vm888_vm3 = vweird.f32 %v881_v58 }
 0x248   : > { %v1151_v59 = vpop.eup %1150 }
 0x249   : > { %v883_v60 = vmul.f32 %v1151_v59, %v881_v58  ;;  %vm889_vm1 = vweird.f32 %v1151_v59 }
 0x24a   : > { %vm890_vm4 = vmor %vm888_vm3, %vm889_vm1 }
 0x24b   : > { %v884_v61 = vmul.f32 %v1151_v59, %v883_v60 }
 0x24d   : > { %v885_v62 = vmul.f32 0.5, %v884_v61 }
 0x24f   : > { %v886_v63 = vsub.f32 1.5, %v885_v62 }
 0x251   : > { %v887_v0 = vmul.f32 %v1151_v59, %v886_v63 }
 0x253   : > { %v891_v2 = vsel %vm890_vm4, %v1151_v59, %v887_v0 }
 0x254   : > { %v892_v3 = vmul.f32 %v891_v2, %v875_v54 }
 0x256   : > { %v896_v5 = vmul.f32 %v1133_v1, %v892_v3 }
 0x258   : > { %v900_v6 = vadd.f32 %v1134_v4, %v896_v5 }
 0x25a   : > { %v901_v7 = vmul.f32 %v900_v6, %v900_v6 }
 0x25c   : > { %v902_v8 = vsel %vm615_vm2, %v901_v7, 0.0 }
 0x25d   : > { %903 = vadd.xlane.f32.xlu1 %v902_v8 }
 0x2d0   : > { %v904_v9 = vpop.xlane.xlu1 %903 }
 0x2d1   : > { %1152 = vrsqrt.f32 %v904_v9  ;;  %vm912_vm5 = vcmp.eq.f32.partialorder %v904_v9, inf  ;;  %v915_v19 = vand.u32 2147483648, %v904_v9  ;;  %vm914_vm6 = vcmp.eq.f32.partialorder %v904_v9, 0.0 }
 0x2d7   : > { %v1153_v10 = vpop.eup %1152 }
 0x2d8   : > { %v906_v11 = vmul.f32 %v1153_v10, %v904_v9 }
 0x2da   : > { %v907_v12 = vmul.f32 %v1153_v10, %v906_v11 }
 0x2dc   : > { %v908_v15 = vmul.f32 0.5, %v907_v12 }
 0x2de   : > { %v909_v16 = vsub.f32 1.5, %v908_v15 }
 0x2e0   : > { %v910_v17 = vmul.f32 %v1153_v10, %v909_v16 }
 0x2e2   : > { %v911_v18 = vmul.f32 %v910_v17, %v904_v9 }
 0x2e4   : > { %v913_v20 = vsel %vm912_vm5, %v904_v9, %v911_v18 }
 0x2e5   : > { %v916_v21 = vsel %vm914_vm6, %v915_v19, %v913_v20 }
 0x2e6   : > { %v917_v22 = vadd.f32 1e-08, %v916_v21 }
 0x2e8   : > { %1154 = vrcp.f32 %v917_v22  ;;  %v929_v26 = vand.u32 2147483648, %v917_v22  ;;  %v927_v28 = vand.u32 2147483647, %v917_v22  ;;  %vm923_vm8 = vweird.f32 %v917_v22 }
 0x2ea   : > { %v930_v30 = vor.u32 1.1754944e-38, %v929_v26  ;;  %vm928_vm10 = vcmp.eq.f32.partialorder %v927_v28, 8.507059e+37 }
 0x2ee   : > { %v1155_v23 = vpop.eup %1154 }
 0x2ef   : > { %v919_v24 = vmul.f32 %v1155_v23, %v917_v22  ;;  %vm924_vm7 = vweird.f32 %v1155_v23 }
 0x2f0   : > { %vm925_vm9 = vmor %vm923_vm8, %vm924_vm7 }
 0x2f1   : > { %v920_v25 = vsub.f32 1.0, %v919_v24 }
 0x2f3   : > { %v921_v27 = vmul.f32 %v1155_v23, %v920_v25 }
 0x2f5   : > { %v922_v29 = vadd.f32 %v1155_v23, %v921_v27 }
 0x2f7   : > { %v926_v31 = vsel %vm925_vm9, %v1155_v23, %v922_v29 }
 0x2f8   : > { %v931_v33 = vsel %vm928_vm10, %v930_v30, %v926_v31 }
 0x2f9   : > { %v932_v34 = vmul.f32 %v931_v33, %v900_v6 }
 0x2fb   : > { %v937_v35 = vmul.f32 %v1135_v32, %v932_v34 }
 0x2fd   : > { %v938_v36 = vsel %vm615_vm2, %v937_v35, 0.0 }
 0x2fe   : > { %939 = vadd.xlane.f32.xlu1 %v938_v36 }
 0x371   : > { %v940_v40 = vpop.xlane.xlu1 %939 }
 0x372   : > { %v943_v41 = vadd.f32 %v942_v38, %v940_v40 }
 0x374   : > { %v945_v42 = vmax.f32 %v944_v39, %v943_v41 }
 0x376   : > { %v946_v43 = vsub.f32 %v944_v39, %v945_v42  ;;  %v949_v44 = vsub.f32 %v943_v41, %v945_v42  ;;  %972 = vst.msk [vmem:[#allocation2] sm:$0xff] %vm955_vm11, %v945_v42 }
 0x378   : > { %v947_v45 = vmul.f32 1.442695, %v946_v43  ;;  %v950_v46 = vmul.f32 1.442695, %v949_v44 }
 0x37a   : > { %1156 = vpow2.f32 %v947_v45 }
 0x37b   : > { %1158 = vpow2.f32 %v950_v46 }
 0x380   : > { %v1157_v48 = vpop.eup %1156 }
 0x381   : > { %960 = vperm.xlu2 %1126, %v1157_v48   ;;  %v953_v49 = vmul.f32 %v1157_v48, %v952_v47  ;;  %v1159_v50 = vpop.eup %1158 }
 0x383   : > { %v954_v51 = vadd.f32 %v1159_v50, %v953_v49 }
 0x385   : > { %956 = vst.msk [vmem:[#allocation3] sm:$0xff] %vm955_vm11, %v954_v51 }
 0x389   : > { %966 = vperm.xlu2 %1126, %v1159_v50  }
 0x3db   : > { %v961_v52 = vpop.permute.xlu2 %960 }
 0x3dc   : > { %v963_v54 = vmul.f32 %v961_v52, %v957_v53 }
 0x3e3   : > { %v967_v14 = vpop.permute.xlu2 %966 }
 0x3e4   : > { %v969_v55 = vmul.f32 %v967_v14, %v932_v34  ;;  %976 = sbr.rel (%p1093_p6) target bundleno = 1138 (0x472), region = 96 }
 0x3e6   : > { %v970_v13 = vadd.f32 %v969_v55, %v963_v54 }
 0x3e8   : > { %971 = vst.msk [vmem:[#allocation4] sm:$0xff] %vm615_vm2, %v970_v13 }
 0x3e9   : > { %v978_v56 = vld [vmem:[#allocation3] sm:$0xff]  ;;  %v1191_v57 = vmov 0  }
 0x3ea   : > { %1160 = vset.pattern.permute.xlu0 %v1191_v57 }
 0x3eb   : > { %981 = vperm.xlu0 %1160, %v978_v56  }
 0x3ef   : > { %v977_v2 = vld [vmem:[#allocation4] sm:$0xff] }
 0x45d   : > { %v982_v58 = vpop.permute.xlu0 %981 }
 0x45e   : > { %1161 = vrcp.f32 %v982_v58  ;;  %v995_v62 = vand.u32 2147483648, %v982_v58  ;;  %v993_v0 = vand.u32 2147483647, %v982_v58  ;;  %vm989_vm13 = vweird.f32 %v982_v58 }
 0x460   : > { %v996_v3 = vor.u32 1.1754944e-38, %v995_v62  ;;  %vm994_vm15 = vcmp.eq.f32.partialorder %v993_v0, 8.507059e+37 }
 0x464   : > { %v1162_v59 = vpop.eup %1161 }
 0x465   : > { %v985_v60 = vmul.f32 %v1162_v59, %v982_v58  ;;  %vm990_vm12 = vweird.f32 %v1162_v59 }
 0x466   : > { %vm991_vm14 = vmor %vm989_vm13, %vm990_vm12 }
 0x467   : > { %v986_v61 = vsub.f32 1.0, %v985_v60 }
 0x469   : > { %v987_v63 = vmul.f32 %v1162_v59, %v986_v61 }
 0x46b   : > { %v988_v1 = vadd.f32 %v1162_v59, %v987_v63 }
 0x46d   : > { %v992_v4 = vsel %vm991_vm14, %v1162_v59, %v988_v1 }
 0x46e   : > { %v997_v5 = vsel %vm994_vm15, %v996_v3, %v992_v4 }
 0x46f   : > { %v998_v6 = vmul.f32 %v997_v5, %v977_v2 }
 0x471   : > { %999 = vst.msk [vmem:[%s1515_s17] sm:$0xff] %vm615_vm2, %v998_v6 }
 0x472 PF: > { %s28_s28 = sadd.s32 1, %s1185_s28   ;;  %s1522_s26 = smov %s1181_s27 }
 0x473   : > { %p25_p7 = scmp.ge.s32.totalorder %s28_s28, 7   ;;  %s1523_s27 = smov %s1525_s16 }
 0x475   :  { %27 = sbr.rel (!%p25_p7) target bundleno = 4 (0x4), region = 129 }

// kernel: cyk_cell_forward.14
= control target key start
LH: loop header
LB: loop body
LE: loop exit
PB: predicated region body
PF: predicated region fallthrough
CT: control target
= control target key end

     0   :  { %s1285_s26 = smov 0   ;;  %s1287_s27 = smov 0   ;;  %s1498_s0 = inlined_call_operand.vmem [shape: f32[6,8,32], index: 0, kind: input, shape index: {}]   ;;  %s1499_s1 = inlined_call_operand.vmem [shape: f32[6,8,32], index: 1, kind: input, shape index: {}]   ;;  %s1500_s2 = inlined_call_operand.vmem [shape: f32[32,64], index: 2, kind: input, shape index: {}]   ;;  %s1501_s3 = inlined_call_operand.vmem [shape: f32[32,64], index: 3, kind: input, shape index: {}]   ;;  %s1502_s4 = inlined_call_operand.vmem [shape: f32[1,64], index: 4, kind: input, shape index: {}]   ;;  %s1503_s5 = inlined_call_operand.vmem [shape: f32[64,32], index: 5, kind: input, shape index: {}]   ;;  %s1504_s6 = inlined_call_operand.vmem [shape: f32[64,32], index: 6, kind: input, shape index: {}]   ;;  %s1505_s7 = inlined_call_operand.vmem [shape: f32[64,32], index: 7, kind: input, shape index: {}]   ;;  %s1506_s8 = inlined_call_operand.vmem [shape: f32[64,32], index: 8, kind: input, shape index: {}]   ;;  %s1507_s9 = inlined_call_operand.vmem [shape: f32[1,32], index: 9, kind: input, shape index: {}]   ;;  %s1508_s10 = inlined_call_operand.vmem [shape: f32[1,32], index: 10, kind: input, shape index: {}]   ;;  %s1509_s11 = inlined_call_operand.vmem [shape: f32[1,32], index: 11, kind: input, shape index: {}]   ;;  %s1510_s12 = inlined_call_operand.vmem [shape: f32[1,32], index: 12, kind: input, shape index: {}]   ;;  %s1511_s13 = inlined_call_operand.vmem [shape: f32[1,32], index: 13, kind: input, shape index: {}]   ;;  %s1512_s14 = inlined_call_operand.vmem [shape: f32[1,32], index: 14, kind: input, shape index: {}]   ;;  %s1513_s15 = inlined_call_operand.vmem [shape: f32[1,32], index: 15, kind: input, shape index: {}]   ;;  %s1514_s16 = inlined_call_operand.<no memory space> [shape: f32[1,1], index: 16, kind: input, shape index: {}]   ;;  %s1515_s17 = inlined_call_operand.vmem [shape: f32[8,32], index: 17, kind: output, shape index: {}]  }
   0x1   :  { %1516 = sst [smem:[#allocation6_spill]] %s1498_s0  ;;  %s1289_s28 = smov 0  }
   0x2   :  { %1517 = sst [smem:[#allocation7_spill]] %s1499_s1 }
   0x3   :  { %22 = sst [smem:[#allocation5]] %s1514_s16 }
   0x4 LB: > { %s37_s16 = sadd.s32 1, %s1181_s27  ;;  %p1080_p0 = scmp.ge.s32.totalorder %s1185_s28, 1  ;;  %s1185_s28 = sphi %s1289_s28, %s28_s28   ;;  %s1181_s27 = sphi %s1287_s27, %s1523_s27   ;;  %s1177_s26 = sphi %s1285_s26, %s1522_s26  }
   0x5   : > { %p38_p1 = scmp.ge.s32.totalorder %s37_s16, 6  ;;  %p518_p2 = scmp.lt.s32.totalorder %s1185_s28, 7 }
   0x7   : > { %s1525_s16 = smov (%p38_p1, %s37_s16), 0  ;;  %p519_p3 = pnand %p1080_p0, %p518_p2 }
   0x8   : > { %p578_p4 = scmp.lt.s32.totalorder (!%p519_p3), %s1177_s26, 5  ;;  %s1518_s19 = sld [smem:[#allocation6_spill]] (!%p519_p3) }
   0x9   : > { %522 = sbr.rel (%p519_p3) target bundleno = 1138 (0x472), region = 88  ;;  %s1519_s22 = sld [smem:[#allocation7_spill]] (!%p519_p3) }
   0xa   : > { %p1083_p5 = scmp.ne.s32.totalorder (!%p519_p3), %s1177_s26, 0 }
   0xe   : > { %s579_s29 = scalar_select %p578_p4, %s1177_s26, 5 }
   0xf   : > { %599 = sbr.rel (%p1083_p5) target bundleno = 24 (0x18), region = 92 }
  0x10   : > { %s1081_s0 = sshll.u32 %s579_s29, 3 }
  0x11   : > { %s1310_s1 = scalar_lea.vmem %s1518_s19, %s1081_s0  ;;  %s591_s23 = scalar_lea.vmem %s1519_s22, %s1081_s0 }
  0x14   : > { %vm600_vm0 = vcmask 7168   ;;  %vm603_vm1 = vcmask 261120   ;;  %v1187_v0 = vmov -inf   ;;  %v1188_v1 = vmov 0.0  }
  0x15   : > { %601 = vst.msk [vmem:[#allocation2] sm:$0xff] %vm600_vm0, %v1187_v0 }
  0x16   : > { %602 = vst.msk [vmem:[#allocation3] sm:$0xff] %vm600_vm0, %v1188_v1 }
  0x17   : > { %604 = vst.msk [vmem:[#allocation4] sm:$0xff] %vm603_vm1, %v1188_v1 }
  0x18 PF: > { %v614_v2 = vld [vmem:[%s1501_s3 + $0x18] sm:$0xff]  ;;  %v613_v4 = vld [vmem:[%s1501_s3 + $0x10] sm:$0xff]  ;;  %v612_v6 = vld [vmem:[%s1501_s3 + $0x8] sm:$0xff]  ;;  %vm615_vm2 = vcmask 261120   ;;  %vm680_vm3 = vcmask 523264   ;;  %s941_s0 = sld [smem:[#allocation5]] }
  0x19   : > { %v610_v3 = vld [vmem:[%s1500_s2 + $0x18] sm:$0xff]  ;;  %631 = vmatpush.msra.mxu0 %v614_v2  ;;  %v609_v5 = vld [vmem:[%s1500_s2 + $0x10] sm:$0xff]  ;;  %v608_v7 = vld [vmem:[%s1500_s2 + $0x8] sm:$0xff]  ;;  %p1093_p6 = scmp.ne.s32.totalorder %s1177_s26, 5 }
  0x1a   : > { %654 = vmatpush.msra.mxu1 %v610_v3  ;;  %v675_v8 = vld [vmem:[%s1503_s5 + $0x38] sm:$0xff]  ;;  %v611_v10 = vld [vmem:[%s1501_s3] sm:$0xff]  ;;  %v674_v12 = vld [vmem:[%s1503_s5 + $0x30] sm:$0xff] }
  0x1b   : > { %632 = vmatpush.msra.mxu0 %v613_v4  ;;  %v730_v9 = vld [vmem:[%s1504_s6 + $0x38] sm:$0xff]  ;;  %v607_v11 = vld [vmem:[%s1500_s2] sm:$0xff]  ;;  %692 = vmatpush.msra.mxu2 %v675_v8  ;;  %v729_v15 = vld [vmem:[%s1504_s6 + $0x30] sm:$0xff] }
  0x1c   : > { %655 = vmatpush.msra.mxu1 %v609_v5  ;;  %743 = vmatpush.msra.mxu3 %v730_v9  ;;  %v1349_v13 = vld [vmem:[%s591_s23] sm:$0xff]  ;;  %v781_v16 = vld [vmem:[%s1505_s7 + $0x38] sm:$0xff]  ;;  %v780_v18 = vld [vmem:[%s1505_s7 + $0x30] sm:$0xff] }
  0x1d   : > { %633 = vmatpush.msra.mxu0 %v612_v6  ;;  %v1352_v14 = vld [vmem:[%s1310_s1] sm:$0xff]  ;;  %v832_v17 = vld [vmem:[%s1506_s8 + $0x38] sm:$0xff]  ;;  %693 = vmatpush.msra.mxu2 %v674_v12  ;;  %v831_v19 = vld [vmem:[%s1506_s8 + $0x30] sm:$0xff] }
  0x1e   : > { %656 = vmatpush.msra.mxu1 %v608_v7  ;;  %744 = vmatpush.msra.mxu3 %v729_v15  ;;  %v673_v20 = vld [vmem:[%s1503_s5 + $0x28] sm:$0xff]  ;;  %v672_v24 = vld [vmem:[%s1503_s5 + $0x20] sm:$0xff]  ;;  %v671_v28 = vld [vmem:[%s1503_s5 + $0x18] sm:$0xff] }
  0x1f   : > { %634 = vmatpush.msra.mxu0 %v611_v10  ;;  %v728_v21 = vld [vmem:[%s1504_s6 + $0x28] sm:$0xff]  ;;  %v727_v25 = vld [vmem:[%s1504_s6 + $0x20] sm:$0xff]  ;;  %694 = vmatpush.msra.mxu2 %v673_v20  ;;  %v726_v29 = vld [vmem:[%s1504_s6 + $0x18] sm:$0xff] }
  0x20   : > { %657 = vmatpush.msra.mxu1 %v607_v11  ;;  %1084 = vmatmul.msk.f32.vlgmr.msra.gmra.mxu0 %vm615_vm2, %v1349_v13  ;;  %v779_v22 = vld [vmem:[%s1505_s7 + $0x28] sm:$0xff]  ;;  %v778_v26 = vld [vmem:[%s1505_s7 + $0x20] sm:$0xff]  ;;  %v777_v30 = vld [vmem:[%s1505_s7 + $0x18] sm:$0xff] }
  0x21   : > { %1085 = vmatmul.msk.f32.vlgmr.msra.gmra.mxu1 %vm615_vm2, %v1352_v14  ;;  %v830_v23 = vld [vmem:[%s1506_s8 + $0x28] sm:$0xff]  ;;  %794 = vmatpush.msrb.mxu0 %v781_v16  ;;  %v829_v27 = vld [vmem:[%s1506_s8 + $0x20] sm:$0xff]  ;;  %v828_v31 = vld [vmem:[%s1506_s8 + $0x18] sm:$0xff] }
  0x22   : > { %845 = vmatpush.msrb.mxu1 %v832_v17  ;;  %745 = vmatpush.msra.mxu3 %v728_v21  ;;  %v670_v32 = vld [vmem:[%s1503_s5 + $0x10] sm:$0xff]  ;;  %v669_v36 = vld [vmem:[%s1503_s5 + $0x8] sm:$0xff]  ;;  %v668_v40 = vld [vmem:[%s1503_s5] sm:$0xff] }
  0x23   : > { %795 = vmatpush.msrb.mxu0 %v780_v18  ;;  %695 = vmatpush.msra.mxu2 %v672_v24  ;;  %v725_v33 = vld [vmem:[%s1504_s6 + $0x10] sm:$0xff]  ;;  %v724_v37 = vld [vmem:[%s1504_s6 + $0x8] sm:$0xff]  ;;  %v723_v41 = vld [vmem:[%s1504_s6] sm:$0xff] }
  0x24   : > { %846 = vmatpush.msrb.mxu1 %v831_v19  ;;  %746 = vmatpush.msra.mxu3 %v727_v25  ;;  %v776_v34 = vld [vmem:[%s1505_s7 + $0x10] sm:$0xff]  ;;  %v775_v38 = vld [vmem:[%s1505_s7 + $0x8] sm:$0xff]  ;;  %v774_v42 = vld [vmem:[%s1505_s7] sm:$0xff] }
  0x25   : > { %796 = vmatpush.msrb.mxu0 %v779_v22  ;;  %696 = vmatpush.msra.mxu2 %v671_v28  ;;  %v827_v35 = vld [vmem:[%s1506_s8 + $0x10] sm:$0xff]  ;;  %v826_v39 = vld [vmem:[%s1506_s8 + $0x8] sm:$0xff]  ;;  %v825_v43 = vld [vmem:[%s1506_s8] sm:$0xff] }
  0x26   : > { %847 = vmatpush.msrb.mxu1 %v830_v23  ;;  %747 = vmatpush.msra.mxu3 %v726_v29  ;;  %v1128_v44 = vld [vmem:[%s1502_s4] ss:$0 sm:$0xff] }
  0x27   : > { %797 = vmatpush.msrb.mxu0 %v778_v26  ;;  %697 = vmatpush.msra.mxu2 %v670_v32  ;;  %v1129_v50 = vld [vmem:[%s1509_s11] ss:$0 sm:$0xff] }
  0x28   : > { %848 = vmatpush.msrb.mxu1 %v829_v27  ;;  %748 = vmatpush.msra.mxu3 %v725_v33  ;;  %v1131_v53 = vld [vmem:[%s1507_s9] ss:$0 sm:$0xff] }
  0x29   : > { %798 = vmatpush.msrb.mxu0 %v777_v30  ;;  %698 = vmatpush.msra.mxu2 %v669_v36  ;;  %v1132_v54 = vld [vmem:[%s1508_s10] ss:$0 sm:$0xff] }
  0x2a   : > { %849 = vmatpush.msrb.mxu1 %v828_v31  ;;  %749 = vmatpush.msra.mxu3 %v724_v37  ;;  %v1130_v28 = vld [vmem:[%s1510_s12] ss:$0 sm:$0xff] }
  0x2b   : > { %799 = vmatpush.msrb.mxu0 %v776_v34  ;;  %699 = vmatpush.msra.mxu2 %v668_v40 }
  0x2c   : > { %850 = vmatpush.msrb.mxu1 %v827_v35  ;;  %750 = vmatpush.msra.mxu3 %v723_v41 }
  0x2d   : > { %800 = vmatpush.msrb.mxu0 %v775_v38 }
  0x2e   : > { %851 = vmatpush.msrb.mxu1 %v826_v39 }
  0x2f   : > { %801 = vmatpush.msrb.mxu0 %v774_v42 }
  0x30   : > { %852 = vmatpush.msrb.mxu1 %v825_v43 }
  0x9d   : > { %v636_v45 = vpop.f32.mrf.mxu0 }
  0x9e   : > { %v659_v46 = vpop.f32.mrf.mxu1 }
  0x9f   : > { %v660_v47 = vadd.f32 %v659_v46, %v636_v45  ;;  %v1189_v46 = vmov 32.0  }
  0xa1   : > { %v666_v48 = vadd.f32 %v1128_v44, %v660_v47 }
  0xa3   : > { %v667_v49 = vmax.f32 %v666_v48, 0.0 }
  0xa5   : > { %1086 = vmatmul.msk.f32.vlgmr.msra.gmra.mxu2 %vm680_vm3, %v667_v49  ;;  %1088 = vmatmul.msk.f32.vlgmr.msra.gmra.mxu3 %vm680_vm3, %v667_v49 }
  0xa6   : > { %1090 = vmatmul.msk.f32.vlgmr.msrb.gmra.mxu0 %vm680_vm3, %v667_v49  ;;  %1092 = vmatmul.msk.f32.vlgmr.msrb.gmra.mxu1 %vm680_vm3, %v667_v49 }
 0x123   : > { %v803_v51 = vpop.f32.mrf.mxu0  ;;  %v854_v32 = vpop.f32.mrf.mxu1 }
 0x124   : > { %v804_v52 = vadd.f32 %v1129_v50, %v803_v51  ;;  %v855_v40 = vadd.f32 %v1130_v28, %v854_v32  ;;  %v1135_v32 = vld [vmem:[%s1513_s15] ss:$0 sm:$0xff] }
 0x126   : > { %v1091_v55 = vmul.f32 -1.442695, %v804_v52 }
 0x128   : > { %1136 = vpow2.f32 %v1091_v55  ;;  %v701_v56 = vpop.f32.mrf.mxu2  ;;  %v752_v57 = vpop.f32.mrf.mxu3 }
 0x129   : > { %v702_v58 = vadd.f32 %v1131_v53, %v701_v56  ;;  %v753_v59 = vadd.f32 %v1132_v54, %v752_v57 }
 0x12b   : > { %v1087_v60 = vmul.f32 -1.442695, %v702_v58  ;;  %v1089_v61 = vmul.f32 -1.442695, %v753_v59 }
 0x12d   : > { %1138 = vpow2.f32 %v1087_v60 }
 0x12e   : > { %v1137_v62 = vpop.eup %1136  ;;  %1140 = vpow2.f32 %v1089_v61 }
 0x12f   : > { %v809_v63 = vadd.f32 1.0, %v1137_v62 }
 0x131   : > { %1142 = vrcp.f32 %v809_v63  ;;  %vm815_vm4 = vweird.f32 %v809_v63  ;;  %v821_v12 = vand.u32 2147483648, %v809_v63  ;;  %v819_v22 = vand.u32 2147483647, %v809_v63 }
 0x133   : > { %v1139_v0 = vpop.eup %1138  ;;  %v822_v31 = vor.u32 1.1754944e-38, %v821_v12  ;;  %vm820_vm14 = vcmp.eq.f32.partialorder %v819_v22, 8.507059e+37 }
 0x134   : > { %v1141_v1 = vpop.eup %1140  ;;  %v707_v2 = vadd.f32 1.0, %v1139_v0 }
 0x135   : > { %v758_v3 = vadd.f32 1.0, %v1141_v1  ;;  %v1133_v1 = vld [vmem:[%s1511_s13] ss:$0 sm:$0xff] }
 0x136   : > { %1144 = vrcp.f32 %v707_v2  ;;  %v719_v18 = vand.u32 2147483648, %v707_v2  ;;  %v717_v20 = vand.u32 2147483647, %v707_v2  ;;  %vm713_vm9 = vweird.f32 %v707_v2 }
 0x137   : > { %v1143_v4 = vpop.eup %1142  ;;  %1146 = vrcp.f32 %v758_v3  ;;  %v770_v21 = vand.u32 2147483648, %v758_v3  ;;  %v768_v24 = vand.u32 2147483647, %v758_v3  ;;  %vm764_vm11 = vweird.f32 %v758_v3 }
 0x138   : > { %v811_v5 = vmul.f32 %v1143_v4, %v809_v63  ;;  %vm816_vm5 = vweird.f32 %v1143_v4  ;;  %v720_v29 = vor.u32 1.1754944e-38, %v719_v18  ;;  %vm718_vm12 = vcmp.eq.f32.partialorder %v717_v20, 8.507059e+37 }
 0x139   : > { %vm1458_vm8 = vmor %vm815_vm4, %vm816_vm5  ;;  %v771_v34 = vor.u32 1.1754944e-38, %v770_v21  ;;  %vm769_vm15 = vcmp.eq.f32.partialorder %v768_v24, 8.507059e+37  ;;  %1148 = vrcp.f32 %v1189_v46 }
 0x13a   : > { %v812_v6 = vsub.f32 1.0, %v811_v5 }
 0x13c   : > { %v1145_v7 = vpop.eup %1144  ;;  %v813_v8 = vmul.f32 %v1143_v4, %v812_v6 }
 0x13d   : > { %v1147_v9 = vpop.eup %1146  ;;  %v709_v10 = vmul.f32 %v1145_v7, %v707_v2  ;;  %vm714_vm6 = vweird.f32 %v1145_v7 }
 0x13e   : > { %v760_v11 = vmul.f32 %v1147_v9, %v758_v3  ;;  %v814_v16 = vadd.f32 %v1143_v4, %v813_v8  ;;  %vm765_vm7 = vweird.f32 %v1147_v9  ;;  %vm715_vm10 = vmor %vm713_vm9, %vm714_vm6 }
 0x13f   : > { %v710_v15 = vsub.f32 1.0, %v709_v10  ;;  %vm766_vm13 = vmor %vm764_vm11, %vm765_vm7  ;;  %v1149_v47 = vpop.eup %1148  ;;  %vm955_vm11 = vcmask 7168  }
 0x140   : > { %v761_v17 = vsub.f32 1.0, %v760_v11  ;;  %v818_v27 = vsel %vm1458_vm8, %v1143_v4, %v814_v16  ;;  %v868_v48 = vmul.f32 32.0, %v1149_v47  ;;  %vm872_vm0 = vweird.f32 %v1149_v47  ;;  %v1134_v4 = vld [vmem:[%s1512_s14] ss:$0 sm:$0xff] }
 0x141   : > { %v711_v19 = vmul.f32 %v1145_v7, %v710_v15  ;;  %v823_v37 = vsel %vm820_vm14, %v822_v31, %v818_v27 }
 0x142   : > { %v762_v23 = vmul.f32 %v1147_v9, %v761_v17  ;;  %v860_v42 = vmul.f32 %v855_v40, %v823_v37  ;;  %v869_v49 = vsub.f32 1.0, %v868_v48  ;;  %v1190_v37 = vmov 0  }
 0x143   : > { %v712_v26 = vadd.f32 %v1145_v7, %v711_v19  ;;  %1126 = vset.pattern.permute.xlu2 %v1190_v37  ;;  %1127 = vset.pattern.permute.xlu0 %v1190_v37 }
 0x144   : > { %v763_v30 = vadd.f32 %v1147_v9, %v762_v23  ;;  %v870_v50 = vmul.f32 %v1149_v47, %v869_v49 }
 0x145   : > { %v716_v33 = vsel %vm715_vm10, %v1145_v7, %v712_v26 }
 0x146   : > { %v721_v35 = vsel %vm718_vm12, %v720_v29, %v716_v33  ;;  %v767_v36 = vsel %vm766_vm13, %v1147_v9, %v763_v30  ;;  %v871_v51 = vadd.f32 %v1149_v47, %v870_v50 }
 0x147   : > { %v772_v38 = vsel %vm769_vm15, %v771_v34, %v767_v36  ;;  %v857_v39 = vmul.f32 %v721_v35, %v1352_v14 }
 0x148   : > { %v858_v41 = vmul.f32 %v772_v38, %v1349_v13  ;;  %v873_v52 = vsel %vm872_vm0, %v1149_v47, %v871_v51  ;;  %v942_v38 = vstv %s941_s0  ;;  %v952_v47 = vld [vmem:[#allocation3] sm:$0xff] }
 0x14a   : > { %v859_v43 = vadd.f32 %v858_v41, %v857_v39  ;;  %v944_v39 = vld [vmem:[#allocation2] sm:$0xff] }
 0x14c   : > { %v861_v44 = vadd.f32 %v860_v42, %v859_v43 }
 0x14e   : > { %v864_v45 = vsel %vm615_vm2, %v861_v44, 0.0 }
 0x14f   : > { %865 = vadd.xlane.f32.xlu0 %v864_v45 }
 0x1c2   : > { %v866_v53 = vpop.xlane.xlu0 %865 }
 0x1c3   : > { %v874_v14 = vmul.f32 %v873_v52, %v866_v53  ;;  %v957_v53 = vld [vmem:[#allocation4] sm:$0xff] }
 0x1c5   : > { %v875_v54 = vsub.f32 %v861_v44, %v874_v14 }
 0x1c7   : > { %v876_v55 = vmul.f32 %v875_v54, %v875_v54 }
 0x1c9   : > { %v877_v13 = vsel %vm615_vm2, %v876_v55, 0.0 }
 0x1ca   : > { %878 = vadd.xlane.f32.xlu0 %v877_v13 }
 0x23d   : > { %v879_v56 = vpop.xlane.xlu0 %878 }
 0x23e   : > { %v880_v57 = vmul.f32 %v879_v56, %v873_v52 }
 0x240   : > { %v881_v58 = vadd.f32 1e-05, %v880_v57 }
 0x242   : > { %1150 = vrsqrt.f32 %v881_v58  ;;  %vm888_vm3 = vweird.f32 %v881_v58 }
 0x248   : > { %v1151_v59 = vpop.eup %1150 }
 0x249   : > { %v883_v60 = vmul.f32 %v1151_v59, %v881_v58  ;;  %vm889_vm1 = vweird.f32 %v1151_v59 }
 0x24a   : > { %vm890_vm4 = vmor %vm888_vm3, %vm889_vm1 }
 0x24b   : > { %v884_v61 = vmul.f32 %v1151_v59, %v883_v60 }
 0x24d   : > { %v885_v62 = vmul.f32 0.5, %v884_v61 }
 0x24f   : > { %v886_v63 = vsub.f32 1.5, %v885_v62 }
 0x251   : > { %v887_v0 = vmul.f32 %v1151_v59, %v886_v63 }
 0x253   : > { %v891_v2 = vsel %vm890_vm4, %v1151_v59, %v887_v0 }
 0x254   : > { %v892_v3 = vmul.f32 %v891_v2, %v875_v54 }
 0x256   : > { %v896_v5 = vmul.f32 %v1133_v1, %v892_v3 }
 0x258   : > { %v900_v6 = vadd.f32 %v1134_v4, %v896_v5 }
 0x25a   : > { %v901_v7 = vmul.f32 %v900_v6, %v900_v6 }
 0x25c   : > { %v902_v8 = vsel %vm615_vm2, %v901_v7, 0.0 }
 0x25d   : > { %903 = vadd.xlane.f32.xlu1 %v902_v8 }
 0x2d0   : > { %v904_v9 = vpop.xlane.xlu1 %903 }
 0x2d1   : > { %1152 = vrsqrt.f32 %v904_v9  ;;  %vm912_vm5 = vcmp.eq.f32.partialorder %v904_v9, inf  ;;  %v915_v19 = vand.u32 2147483648, %v904_v9  ;;  %vm914_vm6 = vcmp.eq.f32.partialorder %v904_v9, 0.0 }
 0x2d7   : > { %v1153_v10 = vpop.eup %1152 }
 0x2d8   : > { %v906_v11 = vmul.f32 %v1153_v10, %v904_v9 }
 0x2da   : > { %v907_v12 = vmul.f32 %v1153_v10, %v906_v11 }
 0x2dc   : > { %v908_v15 = vmul.f32 0.5, %v907_v12 }
 0x2de   : > { %v909_v16 = vsub.f32 1.5, %v908_v15 }
 0x2e0   : > { %v910_v17 = vmul.f32 %v1153_v10, %v909_v16 }
 0x2e2   : > { %v911_v18 = vmul.f32 %v910_v17, %v904_v9 }
 0x2e4   : > { %v913_v20 = vsel %vm912_vm5, %v904_v9, %v911_v18 }
 0x2e5   : > { %v916_v21 = vsel %vm914_vm6, %v915_v19, %v913_v20 }
 0x2e6   : > { %v917_v22 = vadd.f32 1e-08, %v916_v21 }
 0x2e8   : > { %1154 = vrcp.f32 %v917_v22  ;;  %v929_v26 = vand.u32 2147483648, %v917_v22  ;;  %v927_v28 = vand.u32 2147483647, %v917_v22  ;;  %vm923_vm8 = vweird.f32 %v917_v22 }
 0x2ea   : > { %v930_v30 = vor.u32 1.1754944e-38, %v929_v26  ;;  %vm928_vm10 = vcmp.eq.f32.partialorder %v927_v28, 8.507059e+37 }
 0x2ee   : > { %v1155_v23 = vpop.eup %1154 }
 0x2ef   : > { %v919_v24 = vmul.f32 %v1155_v23, %v917_v22  ;;  %vm924_vm7 = vweird.f32 %v1155_v23 }
 0x2f0   : > { %vm925_vm9 = vmor %vm923_vm8, %vm924_vm7 }
 0x2f1   : > { %v920_v25 = vsub.f32 1.0, %v919_v24 }
 0x2f3   : > { %v921_v27 = vmul.f32 %v1155_v23, %v920_v25 }
 0x2f5   : > { %v922_v29 = vadd.f32 %v1155_v23, %v921_v27 }
 0x2f7   : > { %v926_v31 = vsel %vm925_vm9, %v1155_v23, %v922_v29 }
 0x2f8   : > { %v931_v33 = vsel %vm928_vm10, %v930_v30, %v926_v31 }
 0x2f9   : > { %v932_v34 = vmul.f32 %v931_v33, %v900_v6 }
 0x2fb   : > { %v937_v35 = vmul.f32 %v1135_v32, %v932_v34 }
 0x2fd   : > { %v938_v36 = vsel %vm615_vm2, %v937_v35, 0.0 }
 0x2fe   : > { %939 = vadd.xlane.f32.xlu1 %v938_v36 }
 0x371   : > { %v940_v40 = vpop.xlane.xlu1 %939 }
 0x372   : > { %v943_v41 = vadd.f32 %v942_v38, %v940_v40 }
 0x374   : > { %v945_v42 = vmax.f32 %v944_v39, %v943_v41 }
 0x376   : > { %v946_v43 = vsub.f32 %v944_v39, %v945_v42  ;;  %v949_v44 = vsub.f32 %v943_v41, %v945_v42  ;;  %972 = vst.msk [vmem:[#allocation2] sm:$0xff] %vm955_vm11, %v945_v42 }
 0x378   : > { %v947_v45 = vmul.f32 1.442695, %v946_v43  ;;  %v950_v46 = vmul.f32 1.442695, %v949_v44 }
 0x37a   : > { %1156 = vpow2.f32 %v947_v45 }
 0x37b   : > { %1158 = vpow2.f32 %v950_v46 }
 0x380   : > { %v1157_v48 = vpop.eup %1156 }
 0x381   : > { %960 = vperm.xlu2 %1126, %v1157_v48   ;;  %v953_v49 = vmul.f32 %v1157_v48, %v952_v47  ;;  %v1159_v50 = vpop.eup %1158 }
 0x383   : > { %v954_v51 = vadd.f32 %v1159_v50, %v953_v49 }
 0x385   : > { %956 = vst.msk [vmem:[#allocation3] sm:$0xff] %vm955_vm11, %v954_v51 }
 0x389   : > { %966 = vperm.xlu2 %1126, %v1159_v50  }
 0x3db   : > { %v961_v52 = vpop.permute.xlu2 %960 }
 0x3dc   : > { %v963_v54 = vmul.f32 %v961_v52, %v957_v53 }
 0x3e3   : > { %v967_v14 = vpop.permute.xlu2 %966 }
 0x3e4   : > { %v969_v55 = vmul.f32 %v967_v14, %v932_v34  ;;  %976 = sbr.rel (%p1093_p6) target bundleno = 1138 (0x472), region = 96 }
 0x3e6   : > { %v970_v13 = vadd.f32 %v969_v55, %v963_v54 }
 0x3e8   : > { %971 = vst.msk [vmem:[#allocation4] sm:$0xff] %vm615_vm2, %v970_v13 }
 0x3e9   : > { %v978_v56 = vld [vmem:[#allocation3] sm:$0xff]  ;;  %v1191_v57 = vmov 0  }
 0x3ea   : > { %1160 = vset.pattern.permute.xlu0 %v1191_v57 }
 0x3eb   : > { %981 = vperm.xlu0 %1160, %v978_v56  }
 0x3ef   : > { %v977_v2 = vld [vmem:[#allocation4] sm:$0xff] }
 0x45d   : > { %v982_v58 = vpop.permute.xlu0 %981 }
 0x45e   : > { %1161 = vrcp.f32 %v982_v58  ;;  %v995_v62 = vand.u32 2147483648, %v982_v58  ;;  %v993_v0 = vand.u32 2147483647, %v982_v58  ;;  %vm989_vm13 = vweird.f32 %v982_v58 }
 0x460   : > { %v996_v3 = vor.u32 1.1754944e-38, %v995_v62  ;;  %vm994_vm15 = vcmp.eq.f32.partialorder %v993_v0, 8.507059e+37 }
 0x464   : > { %v1162_v59 = vpop.eup %1161 }
 0x465   : > { %v985_v60 = vmul.f32 %v1162_v59, %v982_v58  ;;  %vm990_vm12 = vweird.f32 %v1162_v59 }
 0x466   : > { %vm991_vm14 = vmor %vm989_vm13, %vm990_vm12 }
 0x467   : > { %v986_v61 = vsub.f32 1.0, %v985_v60 }
 0x469   : > { %v987_v63 = vmul.f32 %v1162_v59, %v986_v61 }
 0x46b   : > { %v988_v1 = vadd.f32 %v1162_v59, %v987_v63 }
 0x46d   : > { %v992_v4 = vsel %vm991_vm14, %v1162_v59, %v988_v1 }
 0x46e   : > { %v997_v5 = vsel %vm994_vm15, %v996_v3, %v992_v4 }
 0x46f   : > { %v998_v6 = vmul.f32 %v997_v5, %v977_v2 }
 0x471   : > { %999 = vst.msk [vmem:[%s1515_s17] sm:$0xff] %vm615_vm2, %v998_v6 }
 0x472 PF: > { %s28_s28 = sadd.s32 1, %s1185_s28   ;;  %s1522_s26 = smov %s1181_s27 }
 0x473   : > { %p25_p7 = scmp.ge.s32.totalorder %s28_s28, 8   ;;  %s1523_s27 = smov %s1525_s16 }
 0x475   :  { %27 = sbr.rel (!%p25_p7) target bundleno = 4 (0x4), region = 129 }

// kernel: cyk_cell_forward.15
= control target key start
LH: loop header
LB: loop body
LE: loop exit
PB: predicated region body
PF: predicated region fallthrough
CT: control target
= control target key end

     0   :  { %s1285_s26 = smov 0   ;;  %s1287_s27 = smov 0   ;;  %s1498_s0 = inlined_call_operand.vmem [shape: f32[7,8,32], index: 0, kind: input, shape index: {}]   ;;  %s1499_s1 = inlined_call_operand.vmem [shape: f32[7,8,32], index: 1, kind: input, shape index: {}]   ;;  %s1500_s2 = inlined_call_operand.vmem [shape: f32[32,64], index: 2, kind: input, shape index: {}]   ;;  %s1501_s3 = inlined_call_operand.vmem [shape: f32[32,64], index: 3, kind: input, shape index: {}]   ;;  %s1502_s4 = inlined_call_operand.vmem [shape: f32[1,64], index: 4, kind: input, shape index: {}]   ;;  %s1503_s5 = inlined_call_operand.vmem [shape: f32[64,32], index: 5, kind: input, shape index: {}]   ;;  %s1504_s6 = inlined_call_operand.vmem [shape: f32[64,32], index: 6, kind: input, shape index: {}]   ;;  %s1505_s7 = inlined_call_operand.vmem [shape: f32[64,32], index: 7, kind: input, shape index: {}]   ;;  %s1506_s8 = inlined_call_operand.vmem [shape: f32[64,32], index: 8, kind: input, shape index: {}]   ;;  %s1507_s9 = inlined_call_operand.vmem [shape: f32[1,32], index: 9, kind: input, shape index: {}]   ;;  %s1508_s10 = inlined_call_operand.vmem [shape: f32[1,32], index: 10, kind: input, shape index: {}]   ;;  %s1509_s11 = inlined_call_operand.vmem [shape: f32[1,32], index: 11, kind: input, shape index: {}]   ;;  %s1510_s12 = inlined_call_operand.vmem [shape: f32[1,32], index: 12, kind: input, shape index: {}]   ;;  %s1511_s13 = inlined_call_operand.vmem [shape: f32[1,32], index: 13, kind: input, shape index: {}]   ;;  %s1512_s14 = inlined_call_operand.vmem [shape: f32[1,32], index: 14, kind: input, shape index: {}]   ;;  %s1513_s15 = inlined_call_operand.vmem [shape: f32[1,32], index: 15, kind: input, shape index: {}]   ;;  %s1514_s16 = inlined_call_operand.<no memory space> [shape: f32[1,1], index: 16, kind: input, shape index: {}]   ;;  %s1515_s17 = inlined_call_operand.vmem [shape: f32[8,32], index: 17, kind: output, shape index: {}]  }
   0x1   :  { %1516 = sst [smem:[#allocation6_spill]] %s1498_s0  ;;  %s1289_s28 = smov 0  }
   0x2   :  { %1517 = sst [smem:[#allocation7_spill]] %s1499_s1 }
   0x3   :  { %22 = sst [smem:[#allocation5]] %s1514_s16 }
   0x4 LB: > { %s37_s16 = sadd.s32 1, %s1181_s27  ;;  %p1080_p0 = scmp.ge.s32.totalorder %s1185_s28, 1  ;;  %s1185_s28 = sphi %s1289_s28, %s28_s28   ;;  %s1181_s27 = sphi %s1287_s27, %s1523_s27   ;;  %s1177_s26 = sphi %s1285_s26, %s1522_s26  }
   0x5   : > { %p38_p1 = scmp.ge.s32.totalorder %s37_s16, 7  ;;  %p518_p2 = scmp.lt.s32.totalorder %s1185_s28, 8 }
   0x7   : > { %s1525_s16 = smov (%p38_p1, %s37_s16), 0  ;;  %p519_p3 = pnand %p1080_p0, %p518_p2 }
   0x8   : > { %p578_p4 = scmp.lt.s32.totalorder (!%p519_p3), %s1177_s26, 6  ;;  %s1518_s19 = sld [smem:[#allocation6_spill]] (!%p519_p3) }
   0x9   : > { %522 = sbr.rel (%p519_p3) target bundleno = 1138 (0x472), region = 88  ;;  %s1519_s22 = sld [smem:[#allocation7_spill]] (!%p519_p3) }
   0xa   : > { %p1083_p5 = scmp.ne.s32.totalorder (!%p519_p3), %s1177_s26, 0 }
   0xe   : > { %s579_s29 = scalar_select %p578_p4, %s1177_s26, 6 }
   0xf   : > { %599 = sbr.rel (%p1083_p5) target bundleno = 24 (0x18), region = 92 }
  0x10   : > { %s1081_s0 = sshll.u32 %s579_s29, 3 }
  0x11   : > { %s1310_s1 = scalar_lea.vmem %s1518_s19, %s1081_s0  ;;  %s591_s23 = scalar_lea.vmem %s1519_s22, %s1081_s0 }
  0x14   : > { %vm600_vm0 = vcmask 7168   ;;  %vm603_vm1 = vcmask 261120   ;;  %v1187_v0 = vmov -inf   ;;  %v1188_v1 = vmov 0.0  }
  0x15   : > { %601 = vst.msk [vmem:[#allocation2] sm:$0xff] %vm600_vm0, %v1187_v0 }
  0x16   : > { %602 = vst.msk [vmem:[#allocation3] sm:$0xff] %vm600_vm0, %v1188_v1 }
  0x17   : > { %604 = vst.msk [vmem:[#allocation4] sm:$0xff] %vm603_vm1, %v1188_v1 }
  0x18 PF: > { %v614_v2 = vld [vmem:[%s1501_s3 + $0x18] sm:$0xff]  ;;  %v613_v4 = vld [vmem:[%s1501_s3 + $0x10] sm:$0xff]  ;;  %v612_v6 = vld [vmem:[%s1501_s3 + $0x8] sm:$0xff]  ;;  %vm615_vm2 = vcmask 261120   ;;  %vm680_vm3 = vcmask 523264   ;;  %s941_s0 = sld [smem:[#allocation5]] }
  0x19   : > { %v610_v3 = vld [vmem:[%s1500_s2 + $0x18] sm:$0xff]  ;;  %631 = vmatpush.msra.mxu0 %v614_v2  ;;  %v609_v5 = vld [vmem:[%s1500_s2 + $0x10] sm:$0xff]  ;;  %v608_v7 = vld [vmem:[%s1500_s2 + $0x8] sm:$0xff]  ;;  %p1093_p6 = scmp.ne.s32.totalorder %s1177_s26, 6 }
  0x1a   : > { %654 = vmatpush.msra.mxu1 %v610_v3  ;;  %v675_v8 = vld [vmem:[%s1503_s5 + $0x38] sm:$0xff]  ;;  %v611_v10 = vld [vmem:[%s1501_s3] sm:$0xff]  ;;  %v674_v12 = vld [vmem:[%s1503_s5 + $0x30] sm:$0xff] }
  0x1b   : > { %632 = vmatpush.msra.mxu0 %v613_v4  ;;  %v730_v9 = vld [vmem:[%s1504_s6 + $0x38] sm:$0xff]  ;;  %v607_v11 = vld [vmem:[%s1500_s2] sm:$0xff]  ;;  %692 = vmatpush.msra.mxu2 %v675_v8  ;;  %v729_v15 = vld [vmem:[%s1504_s6 + $0x30] sm:$0xff] }
  0x1c   : > { %655 = vmatpush.msra.mxu1 %v609_v5  ;;  %743 = vmatpush.msra.mxu3 %v730_v9  ;;  %v1349_v13 = vld [vmem:[%s591_s23] sm:$0xff]  ;;  %v781_v16 = vld [vmem:[%s1505_s7 + $0x38] sm:$0xff]  ;;  %v780_v18 = vld [vmem:[%s1505_s7 + $0x30] sm:$0xff] }
  0x1d   : > { %633 = vmatpush.msra.mxu0 %v612_v6  ;;  %v1352_v14 = vld [vmem:[%s1310_s1] sm:$0xff]  ;;  %v832_v17 = vld [vmem:[%s1506_s8 + $0x38] sm:$0xff]  ;;  %693 = vmatpush.msra.mxu2 %v674_v12  ;;  %v831_v19 = vld [vmem:[%s1506_s8 + $0x30] sm:$0xff] }
  0x1e   : > { %656 = vmatpush.msra.mxu1 %v608_v7  ;;  %744 = vmatpush.msra.mxu3 %v729_v15  ;;  %v673_v20 = vld [vmem:[%s1503_s5 + $0x28] sm:$0xff]  ;;  %v672_v24 = vld [vmem:[%s1503_s5 + $0x20] sm:$0xff]  ;;  %v671_v28 = vld [vmem:[%s1503_s5 + $0x18] sm:$0xff] }
  0x1f   : > { %634 = vmatpush.msra.mxu0 %v611_v10  ;;  %v728_v21 = vld [vmem:[%s1504_s6 + $0x28] sm:$0xff]  ;;  %v727_v25 = vld [vmem:[%s1504_s6 + $0x20] sm:$0xff]  ;;  %694 = vmatpush.msra.mxu2 %v673_v20  ;;  %v726_v29 = vld [vmem:[%s1504_s6 + $0x18] sm:$0xff] }
  0x20   : > { %657 = vmatpush.msra.mxu1 %v607_v11  ;;  %1084 = vmatmul.msk.f32.vlgmr.msra.gmra.mxu0 %vm615_vm2, %v1349_v13  ;;  %v779_v22 = vld [vmem:[%s1505_s7 + $0x28] sm:$0xff]  ;;  %v778_v26 = vld [vmem:[%s1505_s7 + $0x20] sm:$0xff]  ;;  %v777_v30 = vld [vmem:[%s1505_s7 + $0x18] sm:$0xff] }
  0x21   : > { %1085 = vmatmul.msk.f32.vlgmr.msra.gmra.mxu1 %vm615_vm2, %v1352_v14  ;;  %v830_v23 = vld [vmem:[%s1506_s8 + $0x28] sm:$0xff]  ;;  %794 = vmatpush.msrb.mxu0 %v781_v16  ;;  %v829_v27 = vld [vmem:[%s1506_s8 + $0x20] sm:$0xff]  ;;  %v828_v31 = vld [vmem:[%s1506_s8 + $0x18] sm:$0xff] }
  0x22   : > { %845 = vmatpush.msrb.mxu1 %v832_v17  ;;  %745 = vmatpush.msra.mxu3 %v728_v21  ;;  %v670_v32 = vld [vmem:[%s1503_s5 + $0x10] sm:$0xff]  ;;  %v669_v36 = vld [vmem:[%s1503_s5 + $0x8] sm:$0xff]  ;;  %v668_v40 = vld [vmem:[%s1503_s5] sm:$0xff] }
  0x23   : > { %795 = vmatpush.msrb.mxu0 %v780_v18  ;;  %695 = vmatpush.msra.mxu2 %v672_v24  ;;  %v725_v33 = vld [vmem:[%s1504_s6 + $0x10] sm:$0xff]  ;;  %v724_v37 = vld [vmem:[%s1504_s6 + $0x8] sm:$0xff]  ;;  %v723_v41 = vld [vmem:[%s1504_s6] sm:$0xff] }
  0x24   : > { %846 = vmatpush.msrb.mxu1 %v831_v19  ;;  %746 = vmatpush.msra.mxu3 %v727_v25  ;;  %v776_v34 = vld [vmem:[%s1505_s7 + $0x10] sm:$0xff]  ;;  %v775_v38 = vld [vmem:[%s1505_s7 + $0x8] sm:$0xff]  ;;  %v774_v42 = vld [vmem:[%s1505_s7] sm:$0xff] }
  0x25   : > { %796 = vmatpush.msrb.mxu0 %v779_v22  ;;  %696 = vmatpush.msra.mxu2 %v671_v28  ;;  %v827_v35 = vld [vmem:[%s1506_s8 + $0x10] sm:$0xff]  ;;  %v826_v39 = vld [vmem:[%s1506_s8 + $0x8] sm:$0xff]  ;;  %v825_v43 = vld [vmem:[%s1506_s8] sm:$0xff] }
  0x26   : > { %847 = vmatpush.msrb.mxu1 %v830_v23  ;;  %747 = vmatpush.msra.mxu3 %v726_v29  ;;  %v1128_v44 = vld [vmem:[%s1502_s4] ss:$0 sm:$0xff] }
  0x27   : > { %797 = vmatpush.msrb.mxu0 %v778_v26  ;;  %697 = vmatpush.msra.mxu2 %v670_v32  ;;  %v1129_v50 = vld [vmem:[%s1509_s11] ss:$0 sm:$0xff] }
  0x28   : > { %848 = vmatpush.msrb.mxu1 %v829_v27  ;;  %748 = vmatpush.msra.mxu3 %v725_v33  ;;  %v1131_v53 = vld [vmem:[%s1507_s9] ss:$0 sm:$0xff] }
  0x29   : > { %798 = vmatpush.msrb.mxu0 %v777_v30  ;;  %698 = vmatpush.msra.mxu2 %v669_v36  ;;  %v1132_v54 = vld [vmem:[%s1508_s10] ss:$0 sm:$0xff] }
  0x2a   : > { %849 = vmatpush.msrb.mxu1 %v828_v31  ;;  %749 = vmatpush.msra.mxu3 %v724_v37  ;;  %v1130_v28 = vld [vmem:[%s1510_s12] ss:$0 sm:$0xff] }
  0x2b   : > { %799 = vmatpush.msrb.mxu0 %v776_v34  ;;  %699 = vmatpush.msra.mxu2 %v668_v40 }
  0x2c   : > { %850 = vmatpush.msrb.mxu1 %v827_v35  ;;  %750 = vmatpush.msra.mxu3 %v723_v41 }
  0x2d   : > { %800 = vmatpush.msrb.mxu0 %v775_v38 }
  0x2e   : > { %851 = vmatpush.msrb.mxu1 %v826_v39 }
  0x2f   : > { %801 = vmatpush.msrb.mxu0 %v774_v42 }
  0x30   : > { %852 = vmatpush.msrb.mxu1 %v825_v43 }
  0x9d   : > { %v636_v45 = vpop.f32.mrf.mxu0 }
  0x9e   : > { %v659_v46 = vpop.f32.mrf.mxu1 }
  0x9f   : > { %v660_v47 = vadd.f32 %v659_v46, %v636_v45  ;;  %v1189_v46 = vmov 32.0  }
  0xa1   : > { %v666_v48 = vadd.f32 %v1128_v44, %v660_v47 }
  0xa3   : > { %v667_v49 = vmax.f32 %v666_v48, 0.0 }
  0xa5   : > { %1086 = vmatmul.msk.f32.vlgmr.msra.gmra.mxu2 %vm680_vm3, %v667_v49  ;;  %1088 = vmatmul.msk.f32.vlgmr.msra.gmra.mxu3 %vm680_vm3, %v667_v49 }
  0xa6   : > { %1090 = vmatmul.msk.f32.vlgmr.msrb.gmra.mxu0 %vm680_vm3, %v667_v49  ;;  %1092 = vmatmul.msk.f32.vlgmr.msrb.gmra.mxu1 %vm680_vm3, %v667_v49 }
 0x123   : > { %v803_v51 = vpop.f32.mrf.mxu0  ;;  %v854_v32 = vpop.f32.mrf.mxu1 }
 0x124   : > { %v804_v52 = vadd.f32 %v1129_v50, %v803_v51  ;;  %v855_v40 = vadd.f32 %v1130_v28, %v854_v32  ;;  %v1135_v32 = vld [vmem:[%s1513_s15] ss:$0 sm:$0xff] }
 0x126   : > { %v1091_v55 = vmul.f32 -1.442695, %v804_v52 }
 0x128   : > { %1136 = vpow2.f32 %v1091_v55  ;;  %v701_v56 = vpop.f32.mrf.mxu2  ;;  %v752_v57 = vpop.f32.mrf.mxu3 }
 0x129   : > { %v702_v58 = vadd.f32 %v1131_v53, %v701_v56  ;;  %v753_v59 = vadd.f32 %v1132_v54, %v752_v57 }
 0x12b   : > { %v1087_v60 = vmul.f32 -1.442695, %v702_v58  ;;  %v1089_v61 = vmul.f32 -1.442695, %v753_v59 }
 0x12d   : > { %1138 = vpow2.f32 %v1087_v60 }
 0x12e   : > { %v1137_v62 = vpop.eup %1136  ;;  %1140 = vpow2.f32 %v1089_v61 }
 0x12f   : > { %v809_v63 = vadd.f32 1.0, %v1137_v62 }
 0x131   : > { %1142 = vrcp.f32 %v809_v63  ;;  %vm815_vm4 = vweird.f32 %v809_v63  ;;  %v821_v12 = vand.u32 2147483648, %v809_v63  ;;  %v819_v22 = vand.u32 2147483647, %v809_v63 }
 0x133   : > { %v1139_v0 = vpop.eup %1138  ;;  %v822_v31 = vor.u32 1.1754944e-38, %v821_v12  ;;  %vm820_vm14 = vcmp.eq.f32.partialorder %v819_v22, 8.507059e+37 }
 0x134   : > { %v1141_v1 = vpop.eup %1140  ;;  %v707_v2 = vadd.f32 1.0, %v1139_v0 }
 0x135   : > { %v758_v3 = vadd.f32 1.0, %v1141_v1  ;;  %v1133_v1 = vld [vmem:[%s1511_s13] ss:$0 sm:$0xff] }
 0x136   : > { %1144 = vrcp.f32 %v707_v2  ;;  %v719_v18 = vand.u32 2147483648, %v707_v2  ;;  %v717_v20 = vand.u32 2147483647, %v707_v2  ;;  %vm713_vm9 = vweird.f32 %v707_v2 }
 0x137   : > { %v1143_v4 = vpop.eup %1142  ;;  %1146 = vrcp.f32 %v758_v3  ;;  %v770_v21 = vand.u32 2147483648, %v758_v3  ;;  %v768_v24 = vand.u32 2147483647, %v758_v3  ;;  %vm764_vm11 = vweird.f32 %v758_v3 }
 0x138   : > { %v811_v5 = vmul.f32 %v1143_v4, %v809_v63  ;;  %vm816_vm5 = vweird.f32 %v1143_v4  ;;  %v720_v29 = vor.u32 1.1754944e-38, %v719_v18  ;;  %vm718_vm12 = vcmp.eq.f32.partialorder %v717_v20, 8.507059e+37 }
 0x139   : > { %vm1458_vm8 = vmor %vm815_vm4, %vm816_vm5  ;;  %v771_v34 = vor.u32 1.1754944e-38, %v770_v21  ;;  %vm769_vm15 = vcmp.eq.f32.partialorder %v768_v24, 8.507059e+37  ;;  %1148 = vrcp.f32 %v1189_v46 }
 0x13a   : > { %v812_v6 = vsub.f32 1.0, %v811_v5 }
 0x13c   : > { %v1145_v7 = vpop.eup %1144  ;;  %v813_v8 = vmul.f32 %v1143_v4, %v812_v6 }
 0x13d   : > { %v1147_v9 = vpop.eup %1146  ;;  %v709_v10 = vmul.f32 %v1145_v7, %v707_v2  ;;  %vm714_vm6 = vweird.f32 %v1145_v7 }
 0x13e   : > { %v760_v11 = vmul.f32 %v1147_v9, %v758_v3  ;;  %v814_v16 = vadd.f32 %v1143_v4, %v813_v8  ;;  %vm765_vm7 = vweird.f32 %v1147_v9  ;;  %vm715_vm10 = vmor %vm713_vm9, %vm714_vm6 }
 0x13f   : > { %v710_v15 = vsub.f32 1.0, %v709_v10  ;;  %vm766_vm13 = vmor %vm764_vm11, %vm765_vm7  ;;  %v1149_v47 = vpop.eup %1148  ;;  %vm955_vm11 = vcmask 7168  }
 0x140   : > { %v761_v17 = vsub.f32 1.0, %v760_v11  ;;  %v818_v27 = vsel %vm1458_vm8, %v1143_v4, %v814_v16  ;;  %v868_v48 = vmul.f32 32.0, %v1149_v47  ;;  %vm872_vm0 = vweird.f32 %v1149_v47  ;;  %v1134_v4 = vld [vmem:[%s1512_s14] ss:$0 sm:$0xff] }
 0x141   : > { %v711_v19 = vmul.f32 %v1145_v7, %v710_v15  ;;  %v823_v37 = vsel %vm820_vm14, %v822_v31, %v818_v27 }
 0x142   : > { %v762_v23 = vmul.f32 %v1147_v9, %v761_v17  ;;  %v860_v42 = vmul.f32 %v855_v40, %v823_v37  ;;  %v869_v49 = vsub.f32 1.0, %v868_v48  ;;  %v1190_v37 = vmov 0  }
 0x143   : > { %v712_v26 = vadd.f32 %v1145_v7, %v711_v19  ;;  %1126 = vset.pattern.permute.xlu2 %v1190_v37  ;;  %1127 = vset.pattern.permute.xlu0 %v1190_v37 }
 0x144   : > { %v763_v30 = vadd.f32 %v1147_v9, %v762_v23  ;;  %v870_v50 = vmul.f32 %v1149_v47, %v869_v49 }
 0x145   : > { %v716_v33 = vsel %vm715_vm10, %v1145_v7, %v712_v26 }
 0x146   : > { %v721_v35 = vsel %vm718_vm12, %v720_v29, %v716_v33  ;;  %v767_v36 = vsel %vm766_vm13, %v1147_v9, %v763_v30  ;;  %v871_v51 = vadd.f32 %v1149_v47, %v870_v50 }
 0x147   : > { %v772_v38 = vsel %vm769_vm15, %v771_v34, %v767_v36  ;;  %v857_v39 = vmul.f32 %v721_v35, %v1352_v14 }
 0x148   : > { %v858_v41 = vmul.f32 %v772_v38, %v1349_v13  ;;  %v873_v52 = vsel %vm872_vm0, %v1149_v47, %v871_v51  ;;  %v942_v38 = vstv %s941_s0  ;;  %v952_v47 = vld [vmem:[#allocation3] sm:$0xff] }
 0x14a   : > { %v859_v43 = vadd.f32 %v858_v41, %v857_v39  ;;  %v944_v39 = vld [vmem:[#allocation2] sm:$0xff] }
 0x14c   : > { %v861_v44 = vadd.f32 %v860_v42, %v859_v43 }
 0x14e   : > { %v864_v45 = vsel %vm615_vm2, %v861_v44, 0.0 }
 0x14f   : > { %865 = vadd.xlane.f32.xlu0 %v864_v45 }
 0x1c2   : > { %v866_v53 = vpop.xlane.xlu0 %865 }
 0x1c3   : > { %v874_v14 = vmul.f32 %v873_v52, %v866_v53  ;;  %v957_v53 = vld [vmem:[#allocation4] sm:$0xff] }
 0x1c5   : > { %v875_v54 = vsub.f32 %v861_v44, %v874_v14 }
 0x1c7   : > { %v876_v55 = vmul.f32 %v875_v54, %v875_v54 }
 0x1c9   : > { %v877_v13 = vsel %vm615_vm2, %v876_v55, 0.0 }
 0x1ca   : > { %878 = vadd.xlane.f32.xlu0 %v877_v13 }
 0x23d   : > { %v879_v56 = vpop.xlane.xlu0 %878 }
 0x23e   : > { %v880_v57 = vmul.f32 %v879_v56, %v873_v52 }
 0x240   : > { %v881_v58 = vadd.f32 1e-05, %v880_v57 }
 0x242   : > { %1150 = vrsqrt.f32 %v881_v58  ;;  %vm888_vm3 = vweird.f32 %v881_v58 }
 0x248   : > { %v1151_v59 = vpop.eup %1150 }
 0x249   : > { %v883_v60 = vmul.f32 %v1151_v59, %v881_v58  ;;  %vm889_vm1 = vweird.f32 %v1151_v59 }
 0x24a   : > { %vm890_vm4 = vmor %vm888_vm3, %vm889_vm1 }
 0x24b   : > { %v884_v61 = vmul.f32 %v1151_v59, %v883_v60 }
 0x24d   : > { %v885_v62 = vmul.f32 0.5, %v884_v61 }
 0x24f   : > { %v886_v63 = vsub.f32 1.5, %v885_v62 }
 0x251   : > { %v887_v0 = vmul.f32 %v1151_v59, %v886_v63 }
 0x253   : > { %v891_v2 = vsel %vm890_vm4, %v1151_v59, %v887_v0 }
 0x254   : > { %v892_v3 = vmul.f32 %v891_v2, %v875_v54 }
 0x256   : > { %v896_v5 = vmul.f32 %v1133_v1, %v892_v3 }
 0x258   : > { %v900_v6 = vadd.f32 %v1134_v4, %v896_v5 }
 0x25a   : > { %v901_v7 = vmul.f32 %v900_v6, %v900_v6 }
 0x25c   : > { %v902_v8 = vsel %vm615_vm2, %v901_v7, 0.0 }
 0x25d   : > { %903 = vadd.xlane.f32.xlu1 %v902_v8 }
 0x2d0   : > { %v904_v9 = vpop.xlane.xlu1 %903 }
 0x2d1   : > { %1152 = vrsqrt.f32 %v904_v9  ;;  %vm912_vm5 = vcmp.eq.f32.partialorder %v904_v9, inf  ;;  %v915_v19 = vand.u32 2147483648, %v904_v9  ;;  %vm914_vm6 = vcmp.eq.f32.partialorder %v904_v9, 0.0 }
 0x2d7   : > { %v1153_v10 = vpop.eup %1152 }
 0x2d8   : > { %v906_v11 = vmul.f32 %v1153_v10, %v904_v9 }
 0x2da   : > { %v907_v12 = vmul.f32 %v1153_v10, %v906_v11 }
 0x2dc   : > { %v908_v15 = vmul.f32 0.5, %v907_v12 }
 0x2de   : > { %v909_v16 = vsub.f32 1.5, %v908_v15 }
 0x2e0   : > { %v910_v17 = vmul.f32 %v1153_v10, %v909_v16 }
 0x2e2   : > { %v911_v18 = vmul.f32 %v910_v17, %v904_v9 }
 0x2e4   : > { %v913_v20 = vsel %vm912_vm5, %v904_v9, %v911_v18 }
 0x2e5   : > { %v916_v21 = vsel %vm914_vm6, %v915_v19, %v913_v20 }
 0x2e6   : > { %v917_v22 = vadd.f32 1e-08, %v916_v21 }
 0x2e8   : > { %1154 = vrcp.f32 %v917_v22  ;;  %v929_v26 = vand.u32 2147483648, %v917_v22  ;;  %v927_v28 = vand.u32 2147483647, %v917_v22  ;;  %vm923_vm8 = vweird.f32 %v917_v22 }
 0x2ea   : > { %v930_v30 = vor.u32 1.1754944e-38, %v929_v26  ;;  %vm928_vm10 = vcmp.eq.f32.partialorder %v927_v28, 8.507059e+37 }
 0x2ee   : > { %v1155_v23 = vpop.eup %1154 }
 0x2ef   : > { %v919_v24 = vmul.f32 %v1155_v23, %v917_v22  ;;  %vm924_vm7 = vweird.f32 %v1155_v23 }
 0x2f0   : > { %vm925_vm9 = vmor %vm923_vm8, %vm924_vm7 }
 0x2f1   : > { %v920_v25 = vsub.f32 1.0, %v919_v24 }
 0x2f3   : > { %v921_v27 = vmul.f32 %v1155_v23, %v920_v25 }
 0x2f5   : > { %v922_v29 = vadd.f32 %v1155_v23, %v921_v27 }
 0x2f7   : > { %v926_v31 = vsel %vm925_vm9, %v1155_v23, %v922_v29 }
 0x2f8   : > { %v931_v33 = vsel %vm928_vm10, %v930_v30, %v926_v31 }
 0x2f9   : > { %v932_v34 = vmul.f32 %v931_v33, %v900_v6 }
 0x2fb   : > { %v937_v35 = vmul.f32 %v1135_v32, %v932_v34 }
 0x2fd   : > { %v938_v36 = vsel %vm615_vm2, %v937_v35, 0.0 }
 0x2fe   : > { %939 = vadd.xlane.f32.xlu1 %v938_v36 }
 0x371   : > { %v940_v40 = vpop.xlane.xlu1 %939 }
 0x372   : > { %v943_v41 = vadd.f32 %v942_v38, %v940_v40 }
 0x374   : > { %v945_v42 = vmax.f32 %v944_v39, %v943_v41 }
 0x376   : > { %v946_v43 = vsub.f32 %v944_v39, %v945_v42  ;;  %v949_v44 = vsub.f32 %v943_v41, %v945_v42  ;;  %972 = vst.msk [vmem:[#allocation2] sm:$0xff] %vm955_vm11, %v945_v42 }
 0x378   : > { %v947_v45 = vmul.f32 1.442695, %v946_v43  ;;  %v950_v46 = vmul.f32 1.442695, %v949_v44 }
 0x37a   : > { %1156 = vpow2.f32 %v947_v45 }
 0x37b   : > { %1158 = vpow2.f32 %v950_v46 }
 0x380   : > { %v1157_v48 = vpop.eup %1156 }
 0x381   : > { %960 = vperm.xlu2 %1126, %v1157_v48   ;;  %v953_v49 = vmul.f32 %v1157_v48, %v952_v47  ;;  %v1159_v50 = vpop.eup %1158 }
 0x383   : > { %v954_v51 = vadd.f32 %v1159_v50, %v953_v49 }
 0x385   : > { %956 = vst.msk [vmem:[#allocation3] sm:$0xff] %vm955_vm11, %v954_v51 }
 0x389   : > { %966 = vperm.xlu2 %1126, %v1159_v50  }
 0x3db   : > { %v961_v52 = vpop.permute.xlu2 %960 }
 0x3dc   : > { %v963_v54 = vmul.f32 %v961_v52, %v957_v53 }
 0x3e3   : > { %v967_v14 = vpop.permute.xlu2 %966 }
 0x3e4   : > { %v969_v55 = vmul.f32 %v967_v14, %v932_v34  ;;  %976 = sbr.rel (%p1093_p6) target bundleno = 1138 (0x472), region = 96 }
 0x3e6   : > { %v970_v13 = vadd.f32 %v969_v55, %v963_v54 }
 0x3e8   : > { %971 = vst.msk [vmem:[#allocation4] sm:$0xff] %vm615_vm2, %v970_v13 }
 0x3e9   : > { %v978_v56 = vld [vmem:[#allocation3] sm:$0xff]  ;;  %v1191_v57 = vmov 0  }
 0x3ea   : > { %1160 = vset.pattern.permute.xlu0 %v1191_v57 }
 0x3eb   : > { %981 = vperm.xlu0 %1160, %v978_v56  }
 0x3ef   : > { %v977_v2 = vld [vmem:[#allocation4] sm:$0xff] }
 0x45d   : > { %v982_v58 = vpop.permute.xlu0 %981 }
 0x45e   : > { %1161 = vrcp.f32 %v982_v58  ;;  %v995_v62 = vand.u32 2147483648, %v982_v58  ;;  %v993_v0 = vand.u32 2147483647, %v982_v58  ;;  %vm989_vm13 = vweird.f32 %v982_v58 }
 0x460   : > { %v996_v3 = vor.u32 1.1754944e-38, %v995_v62  ;;  %vm994_vm15 = vcmp.eq.f32.partialorder %v993_v0, 8.507059e+37 }
 0x464   : > { %v1162_v59 = vpop.eup %1161 }
 0x465   : > { %v985_v60 = vmul.f32 %v1162_v59, %v982_v58  ;;  %vm990_vm12 = vweird.f32 %v1162_v59 }
 0x466   : > { %vm991_vm14 = vmor %vm989_vm13, %vm990_vm12 }
 0x467   : > { %v986_v61 = vsub.f32 1.0, %v985_v60 }
 0x469   : > { %v987_v63 = vmul.f32 %v1162_v59, %v986_v61 }
 0x46b   : > { %v988_v1 = vadd.f32 %v1162_v59, %v987_v63 }
 0x46d   : > { %v992_v4 = vsel %vm991_vm14, %v1162_v59, %v988_v1 }
 0x46e   : > { %v997_v5 = vsel %vm994_vm15, %v996_v3, %v992_v4 }
 0x46f   : > { %v998_v6 = vmul.f32 %v997_v5, %v977_v2 }
 0x471   : > { %999 = vst.msk [vmem:[%s1515_s17] sm:$0xff] %vm615_vm2, %v998_v6 }
 0x472 PF: > { %s28_s28 = sadd.s32 1, %s1185_s28   ;;  %s1522_s26 = smov %s1181_s27 }
 0x473   : > { %p25_p7 = scmp.ge.s32.totalorder %s28_s28, 9   ;;  %s1523_s27 = smov %s1525_s16 }
 0x475   :  { %27 = sbr.rel (!%p25_p7) target bundleno = 4 (0x4), region = 129 }

</bundles_post_ra>
